<compile_context>
chip_gen: v7x
topology: tpu7x:2x2x1
jax: 0.10.0
libtpu: 0.0.40
codegen_flags: <defaults>
</compile_context>

<pallas_src>
import functools
import numpy as np
import jax
import jax.numpy as jnp
from jax.experimental import pallas as pl
from jax.experimental.pallas import tpu as pltpu

# ----------------------- configuration (small but faithful to module defaults) -----------------
D = 8                   # depth of pts MLP
W = 128                 # hidden width (module default 256; prefer W=256 on v6e/v7x to fill the 256-deep MXU)
INPUT_CH = 6            # tri-plane channel count (3 planes x 2 channels each)
INPUT_CH_VIEWS = 3
SIZE = 32               # tri-plane spatial resolution (module default 256)
SKIPS = (4,)
NUM_INSTANCE = 2
BOX_WARP = 4
B = 2                   # batch
N = 1024                # sample points per batch element
TN = 512                # point tile (lane axis); re-check VMEM (O(SIZE*TN) temporaries) if SIZE/W scaled up

C_PER_PLANE = INPUT_CH // 3

# plane axes from Triplane.generate_planes(); inverses computed on host (trivial glue).
_PLANE_AXES = np.array(
    [[[1, 0, 0], [0, 1, 0], [0, 0, 1]],
     [[1, 0, 0], [0, 0, 1], [0, 1, 0]],
     [[0, 0, 1], [0, 1, 0], [1, 0, 0]]], dtype=np.float32)
INV_PLANE_AXES = np.linalg.inv(_PLANE_AXES).astype(np.float32)


# ======================= fused kernel: tri-plane sampling + NeRF MLP ============================
def _fused_kernel(planes_ref, aux_ref,
                  a0_ref, b0_ref, a5a_ref, amid_ref, bmid_ref,
                  afa_ref, bfa_ref, avf_ref, avv_ref, bv_ref, argb_ref, brgb_ref,
                  out_ref, *, wp, c_per_plane, skips, depth, hidden):
    f32, bf16 = jnp.float32, jnp.bfloat16
    hp = planes_ref.shape[-1]            # plane height (contracted by the MXU matmul)
    n_planes = planes_ref.shape[1]
    n_views = avv_ref.shape[-1]
    tn = out_ref.shape[-1]

    # Hoisted iotas (identical for all 3 planes; JAX does not CSE broadcast_in_dim).
    iota_w = jax.lax.broadcasted_iota(jnp.int32, (wp, tn), 0).astype(f32)
    iota_h = iota_w if hp == wp else jax.lax.broadcasted_iota(jnp.int32, (hp, tn), 0).astype(f32)

    # ---- tri-plane bilinear grid_sample, transposed (points on lanes) ------------------------
    # Bilinear weights built as tent functions max(0, 1 - |iota - ix|): exact bilinear weights
    # for in-range corners, 0 for out-of-range corners (reproduces padding_mode='zeros').
    # Height axis contracted on the MXU, width axis by a masked multiply + sublane reduction.
    # TODO(synk): at the module default SIZE=256 this one-hot height matmul costs O(SIZE) MACs per
    # point per plane and would dominate; switch to a row-band or DMA-gather path at that scale.
    cols = []                                            # input_ch x (1, TN) sampled features
    for p in range(n_planes):
        gx = aux_ref[0, 2 * p:     2 * p + 1, :]         # (1, TN) normalized width coordinate
        gy = aux_ref[0, 2 * p + 1: 2 * p + 2, :]         # (1, TN) normalized height coordinate
        ix = ((gx + 1.0) * wp - 1.0) * 0.5               # align_corners=False un-normalization
        iy = ((gy + 1.0) * hp - 1.0) * 0.5
        wxm = jnp.maximum(0.0, 1.0 - jnp.abs(iota_w - ix))   # (WP, TN) f32 bilinear tent weights
        wym = jnp.maximum(0.0, 1.0 - jnp.abs(iota_h - iy))   # (HP, TN) f32
        plane_p = planes_ref[0, p]                                               # (C*WP, HP) bf16
        t = jnp.dot(plane_p, wym.astype(bf16), preferred_element_type=f32)       # (C*WP, TN) f32
        for c in range(c_per_plane):
            cols.append(jnp.sum(t[c * wp:(c + 1) * wp, :] * wxm,
                                axis=0, keepdims=True))                          # (1, TN)

    feat = jnp.concatenate(cols, axis=0).astype(bf16)        # (INPUT_CH, TN) tri-plane features
    views = aux_ref[0, 2 * n_planes:2 * n_planes + n_views, :].astype(bf16)      # (n_views, TN)

    # ---- NeRF MLP (transposed: h is (W, TN), weights are (out, in)) --------------------------
    # All contractions on the MXU with bf16 inputs / f32 accumulation; the skinny K=6 / K=3 dots
    # replace the previous rank-1 VPU update loops (VPU was the saturating slot).
    pre = jnp.dot(a0_ref[...], feat, preferred_element_type=f32) + b0_ref[...]
    h = jnp.maximum(pre, 0.0)

    for idx, layer in enumerate(range(1, depth)):
        pre = (jnp.dot(amid_ref[idx], h.astype(bf16), preferred_element_type=f32)
               + bmid_ref[idx])
        if (layer - 1) in skips:                          # this layer consumes cat([feat, h])
            pre = pre + jnp.dot(a5a_ref[...], feat, preferred_element_type=f32)
        h = jnp.maximum(pre, 0.0)

    # fused feature/alpha head: rows [0:W) = feature_linear, row W = alpha_linear
    y = jnp.dot(afa_ref[...], h.astype(bf16), preferred_element_type=f32) + bfa_ref[...]
    feature = y[:hidden, :]                               # (W, TN)
    alpha = y[hidden:hidden + 1, :]                       # (1, TN)

    pre = (jnp.dot(avf_ref[...], feature.astype(bf16), preferred_element_type=f32)
           + jnp.dot(avv_ref[...], views, preferred_element_type=f32)
           + bv_ref[...])
    hv = jnp.maximum(pre, 0.0)

    rgb = jnp.dot(argb_ref[...], hv.astype(bf16), preferred_element_type=f32) + brgb_ref[...]
    out_ref[0] = jnp.concatenate([rgb, alpha], axis=0)    # single lane-dense (4, TN) store


_KPARAM_ORDER = ("A0", "b0", "A5a", "Amid", "bmid", "Afa", "bfa",
                 "Avf", "Avv", "bv", "Argb", "brgb")


def fused_forward_pallas(plane_arr, aux, kparams, *, tile_n=TN):
    """plane_arr: (B, 3, C*SIZE, SIZE) bf16, aux: (B, 9, N) f32  ->  (B, 4, N) f32 [r,g,b,alpha]."""
    B_, n_planes, cw, hp = plane_arr.shape
    _, aux_rows, N_ = aux.shape
    assert N_ % tile_n == 0
    grid = (B_, N_ // tile_n)
    weights = [kparams[n] for n in _KPARAM_ORDER]

    def full_spec(a):
        # TODO(synk): at production sizes add pipeline_mode=pl.Buffered(1) here to drop the
        # redundant second buffer of these constant-index resident weights (v5e VMEM headroom).
        return pl.BlockSpec(a.shape, lambda b, j, _nd=a.ndim: (0,) * _nd)

    in_specs = ([pl.BlockSpec((1, n_planes, cw, hp), lambda b, j: (b, 0, 0, 0)),
                 pl.BlockSpec((1, aux_rows, tile_n), lambda b, j: (b, 0, j))]
                + [full_spec(w) for w in weights])

    kernel = functools.partial(_fused_kernel, wp=SIZE, c_per_plane=C_PER_PLANE,
                               skips=SKIPS, depth=D, hidden=W)
    return pl.pallas_call(
        kernel,
        out_shape=jax.ShapeDtypeStruct((B_, 4, N_), jnp.float32),
        grid=grid,
        in_specs=in_specs,
        out_specs=pl.BlockSpec((1, 4, tile_n), lambda b, j: (b, 0, j)),
        compiler_params=pltpu.CompilerParams(
            # No carried state across either grid axis (disjoint output blocks; features/h are
            # recomputed per step) -> both parallel, so v7x's 2 TCs can split along either axis.
            dimension_semantics=("parallel", "parallel"),
            # Explicit VMEM budget: live usage here is <2 MiB; 32 MiB is safe on all of
            # v5e/v6e/v7x and leaves room if TN/SIZE/W are scaled toward module defaults.
            vmem_limit_bytes=32 * 1024 * 1024),
    )(plane_arr, aux, *weights)


# ======================= XLA-side glue =========================================================
def prepare_kernel_inputs(params, x, label):
    """Label gather, plane projection, and transposed packing for the fused kernel."""
    B_, N_, _ = x.shape
    input_pts = x[..., : x.shape[-1] - INPUT_CH_VIEWS]           # (B, N, 3)
    input_views = x[..., x.shape[-1] - INPUT_CH_VIEWS:]          # (B, N, 3)

    triplane = params["tri_planes"][label]                       # (B, INPUT_CH, S, S)
    p5 = triplane.reshape(B_, 3, C_PER_PLANE, SIZE, SIZE)        # (b, p, c, y, x)
    # kernel wants plane_arr[b, p, c*S + x, y]: (channel, width) on sublanes, height contracted.
    plane_arr = jnp.transpose(p5, (0, 1, 2, 4, 3)).reshape(
        B_, 3, C_PER_PLANE * SIZE, SIZE).astype(jnp.bfloat16)

    coords = (2.0 / BOX_WARP) * input_pts                        # box_warp scaling
    proj = jnp.einsum("bnc,pcd->bpnd", coords,
                      jnp.asarray(INV_PLANE_AXES))[..., :2]      # (B, 3, N, 2)
    proj_t = jnp.transpose(proj, (0, 1, 3, 2)).reshape(B_, 2 * 3, N_)   # row = 2*p + {x, y}
    views_t = jnp.transpose(input_views, (0, 2, 1))              # (B, 3, N)
    aux = jnp.concatenate([proj_t, views_t], axis=1)             # (B, 9, N)
    return plane_arr, aux


@jax.jit
def forward_pallas(params, kparams, x, label):
    plane_arr, aux = prepare_kernel_inputs(params, x, label)
    out_t = fused_forward_pallas(plane_arr, aux, kparams)        # (B, 4, N)
    return jnp.transpose(out_t, (0, 2, 1))                       # (B, N, 4) = [rgb, alpha]


# ======================= parameter init (deterministic, synthetic) =============================
def init_params(key):
    keys = iter(jax.random.split(key, 64))

    def lin_w(fan_in, fan_out):
        return jax.random.normal(next(keys), (fan_in, fan_out), jnp.float32) * jnp.float32(
            np.sqrt(2.0 / fan_in))

    def lin_b(fan_out):
        return 0.01 * jax.random.normal(next(keys), (1, fan_out), jnp.float32)

    params = {}
    params["tri_planes"] = jax.random.normal(
        next(keys), (NUM_INSTANCE, INPUT_CH, SIZE, SIZE), jnp.float32)

    params["W0"] = lin_w(INPUT_CH, W)
    params["b0"] = lin_b(W)

    # TODO(synk): the PyTorch __init__ sizes the skip layer as Linear(W + input_ch//3, W), which is
    # inconsistent with its forward pass (which concatenates the full input_ch tri-plane features);
    # we size it (W + input_ch) so the forward semantics are executable.
    wmid, bmid, w5a = [], [], None
    for layer in range(1, D):
        consumes_skip = (layer - 1) in SKIPS
        fan_in = W + INPUT_CH if consumes_skip else W
        w_full = lin_w(fan_in, W)
        if consumes_skip:
            w5a = w_full[:INPUT_CH]
            wmid.append(w_full[INPUT_CH:])
        else:
            wmid.append(w_full)
        bmid.append(lin_b(W)[0])
    params["W5a"] = w5a
    params["Wmid"] = jnp.stack(wmid, 0)          # (D-1, W, W)  (fan_in, fan_out)
    params["bmid"] = jnp.stack(bmid, 0)          # (D-1, W)

    params["Wf"] = lin_w(W, W); params["bf"] = lin_b(W)
    params["Wa"] = lin_w(W, 1); params["ba"] = lin_b(1)
    wv_full = lin_w(W + INPUT_CH_VIEWS, W)       # views_linears[0] acts on cat([feature, views])
    params["Wvf"] = wv_full[:W]
    params["Wvv"] = wv_full[W:]
    params["bv"] = lin_b(W)
    params["Wrgb"] = lin_w(W, 3); params["brgb"] = lin_b(3)
    return params


def pack_kernel_params(params):
    """Repack f32 masters into the kernel's transposed (out, in) layout; MXU operands in bf16."""
    bf16 = jnp.bfloat16
    return {
        "A0":   params["W0"].T.astype(bf16),                            # (W, 6)   bf16 MXU
        "b0":   params["b0"].T,                                         # (W, 1)   f32
        "A5a":  params["W5a"].T.astype(bf16),                           # (W, 6)   bf16 MXU
        "Amid": jnp.transpose(params["Wmid"], (0, 2, 1)).astype(bf16),  # (D-1, W, W)
        "bmid": params["bmid"][..., None],                              # (D-1, W, 1)
        "Afa":  jnp.concatenate([params["Wf"], params["Wa"]], axis=1).T.astype(bf16),  # (W+1, W)
        "bfa":  jnp.concatenate([params["bf"], params["ba"]], axis=1).T,               # (W+1, 1)
        "Avf":  params["Wvf"].T.astype(bf16),                           # (W, W)
        "Avv":  params["Wvv"].T.astype(bf16),                           # (W, 3)   bf16 MXU
        "bv":   params["bv"].T,                                         # (W, 1)
        "Argb": params["Wrgb"].T.astype(bf16),                          # (3, W)
        "brgb": params["brgb"].T,                                       # (3, 1)
    }


# ----------------------- pure-JAX f32 reference (for correctness check) ------------------------
def grid_sample_ref(planes, grids):
    P, C, H, Wp = planes.shape
    gx, gy = grids[..., 0], grids[..., 1]
    ix = ((gx + 1.0) * Wp - 1.0) * 0.5
    iy = ((gy + 1.0) * H - 1.0) * 0.5
    x0 = jnp.floor(ix); y0 = jnp.floor(iy)
    wx1 = ix - x0; wx0 = 1.0 - wx1
    wy1 = iy - y0; wy0 = 1.0 - wy1

    def corner(xi, yi, w):
        valid = (xi >= 0) & (xi <= Wp - 1) & (yi >= 0) & (yi <= H - 1)
        xc = jnp.clip(xi, 0, Wp - 1).astype(jnp.int32)
        yc = jnp.clip(yi, 0, H - 1).astype(jnp.int32)
        v = jax.vmap(lambda pf, yy, xx: pf[:, yy, xx])(planes, yc, xc)   # (P, C, M)
        v = jnp.transpose(v, (0, 2, 1))                                  # (P, M, C)
        return v * (w * valid.astype(jnp.float32))[..., None]

    return (corner(x0, y0, wx0 * wy0) + corner(x0 + 1, y0, wx1 * wy0)
            + corner(x0, y0 + 1, wx0 * wy1) + corner(x0 + 1, y0 + 1, wx1 * wy1))


def mlp_ref(feat, views, params):
    h = jnp.maximum(feat @ params["W0"] + params["b0"], 0.0)
    for idx, layer in enumerate(range(1, D)):
        if (layer - 1) in SKIPS:
            h = feat @ params["W5a"] + h @ params["Wmid"][idx] + params["bmid"][idx]
        else:
            h = h @ params["Wmid"][idx] + params["bmid"][idx]
        h = jnp.maximum(h, 0.0)
    alpha = h @ params["Wa"] + params["ba"]
    feature = h @ params["Wf"] + params["bf"]
    hv = jnp.maximum(feature @ params["Wvf"] + views @ params["Wvv"] + params["bv"], 0.0)
    rgb = hv @ params["Wrgb"] + params["brgb"]
    return jnp.concatenate([rgb, alpha], axis=-1)


@jax.jit
def forward_ref(params, x, label):
    B_, N_, _ = x.shape
    input_pts = x[..., : x.shape[-1] - INPUT_CH_VIEWS]
    input_views = x[..., x.shape[-1] - INPUT_CH_VIEWS:]
    triplane = params["tri_planes"][label]
    sample_triplane = triplane.reshape(B_, 3, C_PER_PLANE, SIZE, SIZE)
    coords = (2.0 / BOX_WARP) * input_pts
    proj = jnp.einsum("bnc,pcd->bpnd", coords, jnp.asarray(INV_PLANE_AXES))[..., :2]
    planes_flat = sample_triplane.reshape(B_ * 3, C_PER_PLANE, SIZE, SIZE)
    proj_flat = proj.reshape(B_ * 3, N_, 2)
    sampled = grid_sample_ref(planes_flat, proj_flat)              # (B*3, N, C)
    feat = sampled.reshape(B_, 3, N_, C_PER_PLANE).transpose(0, 2, 1, 3).reshape(B_ * N_, INPUT_CH)
    views_flat = input_views.reshape(B_ * N_, INPUT_CH_VIEWS)
    out = mlp_ref(feat, views_flat, params)
    return out.reshape(B_, N_, 4)


# ======================= main ==================================================================
if __name__ == "__main__":
    key = jax.random.PRNGKey(0)
    k_params, k_x = jax.random.split(key)
    params = init_params(k_params)
    kparams = pack_kernel_params(params)

    # x = [3 coords | 3 view dirs]
    x = jax.random.normal(k_x, (B, N, 3 + INPUT_CH_VIEWS), jnp.float32)
    label = jnp.array([0, 1], dtype=jnp.int32)

    out = jax.block_until_ready(forward_pallas(params, kparams, x, label))
    assert out.shape == (B, N, 4) and out.dtype == jnp.float32

    ref = jax.block_until_ready(forward_ref(params, x, label))
    np.testing.assert_allclose(np.asarray(out), np.asarray(ref), rtol=5e-2, atol=5e-2)

    print("KERNEL_OK")
</pallas_src>

<mosaic_0001>
module attributes {stable_mosaic.version = 11 : i64} {
  func.func @_fused_kernel(%arg0: i32, %arg1: i32, %arg2: memref<1x3x64x32xbf16, #tpu.memory_space<vmem>>, %arg3: memref<1x9x512xf32, #tpu.memory_space<vmem>>, %arg4: memref<128x6xbf16, #tpu.memory_space<vmem>>, %arg5: memref<128x1xf32, #tpu.memory_space<vmem>>, %arg6: memref<128x6xbf16, #tpu.memory_space<vmem>>, %arg7: memref<7x128x128xbf16, #tpu.memory_space<vmem>>, %arg8: memref<7x128x1xf32, #tpu.memory_space<vmem>>, %arg9: memref<129x128xbf16, #tpu.memory_space<vmem>>, %arg10: memref<129x1xf32, #tpu.memory_space<vmem>>, %arg11: memref<128x128xbf16, #tpu.memory_space<vmem>>, %arg12: memref<128x3xbf16, #tpu.memory_space<vmem>>, %arg13: memref<128x1xf32, #tpu.memory_space<vmem>>, %arg14: memref<3x128xbf16, #tpu.memory_space<vmem>>, %arg15: memref<3x1xf32, #tpu.memory_space<vmem>>, %arg16: memref<1x4x512xf32, #tpu.memory_space<vmem>>) attributes {dimension_semantics = [#tpu.dimension_semantics<parallel>, #tpu.dimension_semantics<parallel>], iteration_bounds = array<i64: 2, 2>, scalar_prefetch = 0 : i64, scratch_operands = 0 : i64, tpu.core_type = #tpu.core_type<tc>, window_params = [{transform_indices = @transform_0, window_bounds = array<i64: 1, 3, 64, 32>}, {transform_indices = @transform_1, window_bounds = array<i64: 1, 9, 512>}, {pipeline_mode = #tpu.pipeline_mode<synchronous>, transform_indices = @transform_2, window_bounds = array<i64: 128, 6>}, {pipeline_mode = #tpu.pipeline_mode<synchronous>, transform_indices = @transform_3, window_bounds = array<i64: 128, 1>}, {pipeline_mode = #tpu.pipeline_mode<synchronous>, transform_indices = @transform_4, window_bounds = array<i64: 128, 6>}, {pipeline_mode = #tpu.pipeline_mode<synchronous>, transform_indices = @transform_5, window_bounds = array<i64: 7, 128, 128>}, {pipeline_mode = #tpu.pipeline_mode<synchronous>, transform_indices = @transform_6, window_bounds = array<i64: 7, 128, 1>}, {pipeline_mode = #tpu.pipeline_mode<synchronous>, transform_indices = @transform_7, window_bounds = array<i64: 129, 128>}, {pipeline_mode = #tpu.pipeline_mode<synchronous>, transform_indices = @transform_8, window_bounds = array<i64: 129, 1>}, {pipeline_mode = #tpu.pipeline_mode<synchronous>, transform_indices = @transform_9, window_bounds = array<i64: 128, 128>}, {pipeline_mode = #tpu.pipeline_mode<synchronous>, transform_indices = @transform_10, window_bounds = array<i64: 128, 3>}, {pipeline_mode = #tpu.pipeline_mode<synchronous>, transform_indices = @transform_11, window_bounds = array<i64: 128, 1>}, {pipeline_mode = #tpu.pipeline_mode<synchronous>, transform_indices = @transform_12, window_bounds = array<i64: 3, 128>}, {pipeline_mode = #tpu.pipeline_mode<synchronous>, transform_indices = @transform_13, window_bounds = array<i64: 3, 1>}, {transform_indices = @transform_14, window_bounds = array<i64: 1, 4, 512>}]} {
    %0 = tpu.iota {dimensions = array<i32: 0>} : vector<32x512xi32>
    %1 = arith.sitofp %0 : vector<32x512xi32> to vector<32x512xf32>
    %c0 = arith.constant 0 : index
    %c0_0 = arith.constant 0 : index
    %c0_1 = arith.constant 0 : index
    %2 = vector.load %arg3[%c0, %c0_0, %c0_1] : memref<1x9x512xf32, #tpu.memory_space<vmem>>, vector<1x1x512xf32>
    %3 = vector.shape_cast %2 : vector<1x1x512xf32> to vector<1x512xf32>
    %c0_2 = arith.constant 0 : index
    %c1 = arith.constant 1 : index
    %c0_3 = arith.constant 0 : index
    %4 = vector.load %arg3[%c0_2, %c1, %c0_3] : memref<1x9x512xf32, #tpu.memory_space<vmem>>, vector<1x1x512xf32>
    %5 = vector.shape_cast %4 : vector<1x1x512xf32> to vector<1x512xf32>
    %cst = arith.constant 1.000000e+00 : f32
    %6 = vector.broadcast %cst : f32 to vector<1x512xf32>
    %7 = arith.addf %3, %6 : vector<1x512xf32>
    %cst_4 = arith.constant 3.200000e+01 : f32
    %8 = vector.broadcast %cst_4 : f32 to vector<1x512xf32>
    %9 = arith.mulf %7, %8 : vector<1x512xf32>
    %cst_5 = arith.constant 1.000000e+00 : f32
    %10 = vector.broadcast %cst_5 : f32 to vector<1x512xf32>
    %11 = arith.subf %9, %10 : vector<1x512xf32>
    %cst_6 = arith.constant 5.000000e-01 : f32
    %12 = vector.broadcast %cst_6 : f32 to vector<1x512xf32>
    %13 = arith.mulf %11, %12 : vector<1x512xf32>
    %cst_7 = arith.constant 1.000000e+00 : f32
    %14 = vector.broadcast %cst_7 : f32 to vector<1x512xf32>
    %15 = arith.addf %5, %14 : vector<1x512xf32>
    %cst_8 = arith.constant 3.200000e+01 : f32
    %16 = vector.broadcast %cst_8 : f32 to vector<1x512xf32>
    %17 = arith.mulf %15, %16 : vector<1x512xf32>
    %cst_9 = arith.constant 1.000000e+00 : f32
    %18 = vector.broadcast %cst_9 : f32 to vector<1x512xf32>
    %19 = arith.subf %17, %18 : vector<1x512xf32>
    %cst_10 = arith.constant 5.000000e-01 : f32
    %20 = vector.broadcast %cst_10 : f32 to vector<1x512xf32>
    %21 = arith.mulf %19, %20 : vector<1x512xf32>
    %22 = vector.broadcast %13 : vector<1x512xf32> to vector<32x512xf32>
    %23 = arith.subf %1, %22 : vector<32x512xf32>
    %24 = math.absf %23 : vector<32x512xf32>
    %cst_11 = arith.constant 1.000000e+00 : f32
    %25 = vector.broadcast %cst_11 : f32 to vector<32x512xf32>
    %26 = arith.subf %25, %24 : vector<32x512xf32>
    %cst_12 = arith.constant 0.000000e+00 : f32
    %27 = vector.broadcast %cst_12 : f32 to vector<32x512xf32>
    %28 = arith.maximumf %27, %26 : vector<32x512xf32>
    %29 = vector.broadcast %21 : vector<1x512xf32> to vector<32x512xf32>
    %30 = arith.subf %1, %29 : vector<32x512xf32>
    %31 = math.absf %30 : vector<32x512xf32>
    %cst_13 = arith.constant 1.000000e+00 : f32
    %32 = vector.broadcast %cst_13 : f32 to vector<32x512xf32>
    %33 = arith.subf %32, %31 : vector<32x512xf32>
    %cst_14 = arith.constant 0.000000e+00 : f32
    %34 = vector.broadcast %cst_14 : f32 to vector<32x512xf32>
    %35 = arith.maximumf %34, %33 : vector<32x512xf32>
    %c0_15 = arith.constant 0 : index
    %c0_16 = arith.constant 0 : index
    %c0_17 = arith.constant 0 : index
    %c0_18 = arith.constant 0 : index
    %36 = vector.load %arg2[%c0_15, %c0_16, %c0_17, %c0_18] : memref<1x3x64x32xbf16, #tpu.memory_space<vmem>>, vector<1x1x64x32xbf16>
    %37 = vector.shape_cast %36 : vector<1x1x64x32xbf16> to vector<64x32xbf16>
    %38 = arith.truncf %35 : vector<32x512xf32> to vector<32x512xbf16>
    %cst_19 = arith.constant dense<0.000000e+00> : vector<64x512xf32>
    %39 = tpu.matmul %37, %38, %cst_19 {dimension_numbers = #tpu.dot_dimension_numbers<[1], [0], [0], [1], [0, 0, 1, 1], [], []>} : vector<64x32xbf16>, vector<32x512xbf16>, vector<64x512xf32> -> vector<64x512xf32>
    %40 = vector.extract_strided_slice %39 {offsets = [0, 0], sizes = [32, 512], strides = [1, 1]} : vector<64x512xf32> to vector<32x512xf32>
    %41 = arith.mulf %40, %28 : vector<32x512xf32>
    %cst_20 = arith.constant dense<0.000000e+00> : vector<512xf32>
    %42 = vector.multi_reduction <add>, %41, %cst_20 [0] : vector<32x512xf32> to vector<512xf32>
    %43 = vector.shape_cast %42 : vector<512xf32> to vector<1x512xf32>
    %44 = vector.extract_strided_slice %39 {offsets = [32, 0], sizes = [32, 512], strides = [1, 1]} : vector<64x512xf32> to vector<32x512xf32>
    %45 = arith.mulf %44, %28 : vector<32x512xf32>
    %cst_21 = arith.constant dense<0.000000e+00> : vector<512xf32>
    %46 = vector.multi_reduction <add>, %45, %cst_21 [0] : vector<32x512xf32> to vector<512xf32>
    %47 = vector.shape_cast %46 : vector<512xf32> to vector<1x512xf32>
    %c0_22 = arith.constant 0 : index
    %c2 = arith.constant 2 : index
    %c0_23 = arith.constant 0 : index
    %48 = vector.load %arg3[%c0_22, %c2, %c0_23] : memref<1x9x512xf32, #tpu.memory_space<vmem>>, vector<1x1x512xf32>
    %49 = vector.shape_cast %48 : vector<1x1x512xf32> to vector<1x512xf32>
    %c0_24 = arith.constant 0 : index
    %c3 = arith.constant 3 : index
    %c0_25 = arith.constant 0 : index
    %50 = vector.load %arg3[%c0_24, %c3, %c0_25] : memref<1x9x512xf32, #tpu.memory_space<vmem>>, vector<1x1x512xf32>
    %51 = vector.shape_cast %50 : vector<1x1x512xf32> to vector<1x512xf32>
    %cst_26 = arith.constant 1.000000e+00 : f32
    %52 = vector.broadcast %cst_26 : f32 to vector<1x512xf32>
    %53 = arith.addf %49, %52 : vector<1x512xf32>
    %cst_27 = arith.constant 3.200000e+01 : f32
    %54 = vector.broadcast %cst_27 : f32 to vector<1x512xf32>
    %55 = arith.mulf %53, %54 : vector<1x512xf32>
    %cst_28 = arith.constant 1.000000e+00 : f32
    %56 = vector.broadcast %cst_28 : f32 to vector<1x512xf32>
    %57 = arith.subf %55, %56 : vector<1x512xf32>
    %cst_29 = arith.constant 5.000000e-01 : f32
    %58 = vector.broadcast %cst_29 : f32 to vector<1x512xf32>
    %59 = arith.mulf %57, %58 : vector<1x512xf32>
    %cst_30 = arith.constant 1.000000e+00 : f32
    %60 = vector.broadcast %cst_30 : f32 to vector<1x512xf32>
    %61 = arith.addf %51, %60 : vector<1x512xf32>
    %cst_31 = arith.constant 3.200000e+01 : f32
    %62 = vector.broadcast %cst_31 : f32 to vector<1x512xf32>
    %63 = arith.mulf %61, %62 : vector<1x512xf32>
    %cst_32 = arith.constant 1.000000e+00 : f32
    %64 = vector.broadcast %cst_32 : f32 to vector<1x512xf32>
    %65 = arith.subf %63, %64 : vector<1x512xf32>
    %cst_33 = arith.constant 5.000000e-01 : f32
    %66 = vector.broadcast %cst_33 : f32 to vector<1x512xf32>
    %67 = arith.mulf %65, %66 : vector<1x512xf32>
    %68 = vector.broadcast %59 : vector<1x512xf32> to vector<32x512xf32>
    %69 = arith.subf %1, %68 : vector<32x512xf32>
    %70 = math.absf %69 : vector<32x512xf32>
    %cst_34 = arith.constant 1.000000e+00 : f32
    %71 = vector.broadcast %cst_34 : f32 to vector<32x512xf32>
    %72 = arith.subf %71, %70 : vector<32x512xf32>
    %cst_35 = arith.constant 0.000000e+00 : f32
    %73 = vector.broadcast %cst_35 : f32 to vector<32x512xf32>
    %74 = arith.maximumf %73, %72 : vector<32x512xf32>
    %75 = vector.broadcast %67 : vector<1x512xf32> to vector<32x512xf32>
    %76 = arith.subf %1, %75 : vector<32x512xf32>
    %77 = math.absf %76 : vector<32x512xf32>
    %cst_36 = arith.constant 1.000000e+00 : f32
    %78 = vector.broadcast %cst_36 : f32 to vector<32x512xf32>
    %79 = arith.subf %78, %77 : vector<32x512xf32>
    %cst_37 = arith.constant 0.000000e+00 : f32
    %80 = vector.broadcast %cst_37 : f32 to vector<32x512xf32>
    %81 = arith.maximumf %80, %79 : vector<32x512xf32>
    %c0_38 = arith.constant 0 : index
    %c1_39 = arith.constant 1 : index
    %c0_40 = arith.constant 0 : index
    %c0_41 = arith.constant 0 : index
    %82 = vector.load %arg2[%c0_38, %c1_39, %c0_40, %c0_41] : memref<1x3x64x32xbf16, #tpu.memory_space<vmem>>, vector<1x1x64x32xbf16>
    %83 = vector.shape_cast %82 : vector<1x1x64x32xbf16> to vector<64x32xbf16>
    %84 = arith.truncf %81 : vector<32x512xf32> to vector<32x512xbf16>
    %cst_42 = arith.constant dense<0.000000e+00> : vector<64x512xf32>
    %85 = tpu.matmul %83, %84, %cst_42 {dimension_numbers = #tpu.dot_dimension_numbers<[1], [0], [0], [1], [0, 0, 1, 1], [], []>} : vector<64x32xbf16>, vector<32x512xbf16>, vector<64x512xf32> -> vector<64x512xf32>
    %86 = vector.extract_strided_slice %85 {offsets = [0, 0], sizes = [32, 512], strides = [1, 1]} : vector<64x512xf32> to vector<32x512xf32>
    %87 = arith.mulf %86, %74 : vector<32x512xf32>
    %cst_43 = arith.constant dense<0.000000e+00> : vector<512xf32>
    %88 = vector.multi_reduction <add>, %87, %cst_43 [0] : vector<32x512xf32> to vector<512xf32>
    %89 = vector.shape_cast %88 : vector<512xf32> to vector<1x512xf32>
    %90 = vector.extract_strided_slice %85 {offsets = [32, 0], sizes = [32, 512], strides = [1, 1]} : vector<64x512xf32> to vector<32x512xf32>
    %91 = arith.mulf %90, %74 : vector<32x512xf32>
    %cst_44 = arith.constant dense<0.000000e+00> : vector<512xf32>
    %92 = vector.multi_reduction <add>, %91, %cst_44 [0] : vector<32x512xf32> to vector<512xf32>
    %93 = vector.shape_cast %92 : vector<512xf32> to vector<1x512xf32>
    %c0_45 = arith.constant 0 : index
    %c4 = arith.constant 4 : index
    %c0_46 = arith.constant 0 : index
    %94 = vector.load %arg3[%c0_45, %c4, %c0_46] : memref<1x9x512xf32, #tpu.memory_space<vmem>>, vector<1x1x512xf32>
    %95 = vector.shape_cast %94 : vector<1x1x512xf32> to vector<1x512xf32>
    %c0_47 = arith.constant 0 : index
    %c5 = arith.constant 5 : index
    %c0_48 = arith.constant 0 : index
    %96 = vector.load %arg3[%c0_47, %c5, %c0_48] : memref<1x9x512xf32, #tpu.memory_space<vmem>>, vector<1x1x512xf32>
    %97 = vector.shape_cast %96 : vector<1x1x512xf32> to vector<1x512xf32>
    %cst_49 = arith.constant 1.000000e+00 : f32
    %98 = vector.broadcast %cst_49 : f32 to vector<1x512xf32>
    %99 = arith.addf %95, %98 : vector<1x512xf32>
    %cst_50 = arith.constant 3.200000e+01 : f32
    %100 = vector.broadcast %cst_50 : f32 to vector<1x512xf32>
    %101 = arith.mulf %99, %100 : vector<1x512xf32>
    %cst_51 = arith.constant 1.000000e+00 : f32
    %102 = vector.broadcast %cst_51 : f32 to vector<1x512xf32>
    %103 = arith.subf %101, %102 : vector<1x512xf32>
    %cst_52 = arith.constant 5.000000e-01 : f32
    %104 = vector.broadcast %cst_52 : f32 to vector<1x512xf32>
    %105 = arith.mulf %103, %104 : vector<1x512xf32>
    %cst_53 = arith.constant 1.000000e+00 : f32
    %106 = vector.broadcast %cst_53 : f32 to vector<1x512xf32>
    %107 = arith.addf %97, %106 : vector<1x512xf32>
    %cst_54 = arith.constant 3.200000e+01 : f32
    %108 = vector.broadcast %cst_54 : f32 to vector<1x512xf32>
    %109 = arith.mulf %107, %108 : vector<1x512xf32>
    %cst_55 = arith.constant 1.000000e+00 : f32
    %110 = vector.broadcast %cst_55 : f32 to vector<1x512xf32>
    %111 = arith.subf %109, %110 : vector<1x512xf32>
    %cst_56 = arith.constant 5.000000e-01 : f32
    %112 = vector.broadcast %cst_56 : f32 to vector<1x512xf32>
    %113 = arith.mulf %111, %112 : vector<1x512xf32>
    %114 = vector.broadcast %105 : vector<1x512xf32> to vector<32x512xf32>
    %115 = arith.subf %1, %114 : vector<32x512xf32>
    %116 = math.absf %115 : vector<32x512xf32>
    %cst_57 = arith.constant 1.000000e+00 : f32
    %117 = vector.broadcast %cst_57 : f32 to vector<32x512xf32>
    %118 = arith.subf %117, %116 : vector<32x512xf32>
    %cst_58 = arith.constant 0.000000e+00 : f32
    %119 = vector.broadcast %cst_58 : f32 to vector<32x512xf32>
    %120 = arith.maximumf %119, %118 : vector<32x512xf32>
    %121 = vector.broadcast %113 : vector<1x512xf32> to vector<32x512xf32>
    %122 = arith.subf %1, %121 : vector<32x512xf32>
    %123 = math.absf %122 : vector<32x512xf32>
    %cst_59 = arith.constant 1.000000e+00 : f32
    %124 = vector.broadcast %cst_59 : f32 to vector<32x512xf32>
    %125 = arith.subf %124, %123 : vector<32x512xf32>
    %cst_60 = arith.constant 0.000000e+00 : f32
    %126 = vector.broadcast %cst_60 : f32 to vector<32x512xf32>
    %127 = arith.maximumf %126, %125 : vector<32x512xf32>
    %c0_61 = arith.constant 0 : index
    %c2_62 = arith.constant 2 : index
    %c0_63 = arith.constant 0 : index
    %c0_64 = arith.constant 0 : index
    %128 = vector.load %arg2[%c0_61, %c2_62, %c0_63, %c0_64] : memref<1x3x64x32xbf16, #tpu.memory_space<vmem>>, vector<1x1x64x32xbf16>
    %129 = vector.shape_cast %128 : vector<1x1x64x32xbf16> to vector<64x32xbf16>
    %130 = arith.truncf %127 : vector<32x512xf32> to vector<32x512xbf16>
    %cst_65 = arith.constant dense<0.000000e+00> : vector<64x512xf32>
    %131 = tpu.matmul %129, %130, %cst_65 {dimension_numbers = #tpu.dot_dimension_numbers<[1], [0], [0], [1], [0, 0, 1, 1], [], []>} : vector<64x32xbf16>, vector<32x512xbf16>, vector<64x512xf32> -> vector<64x512xf32>
    %132 = vector.extract_strided_slice %131 {offsets = [0, 0], sizes = [32, 512], strides = [1, 1]} : vector<64x512xf32> to vector<32x512xf32>
    %133 = arith.mulf %132, %120 : vector<32x512xf32>
    %cst_66 = arith.constant dense<0.000000e+00> : vector<512xf32>
    %134 = vector.multi_reduction <add>, %133, %cst_66 [0] : vector<32x512xf32> to vector<512xf32>
    %135 = vector.shape_cast %134 : vector<512xf32> to vector<1x512xf32>
    %136 = vector.extract_strided_slice %131 {offsets = [32, 0], sizes = [32, 512], strides = [1, 1]} : vector<64x512xf32> to vector<32x512xf32>
    %137 = arith.mulf %136, %120 : vector<32x512xf32>
    %cst_67 = arith.constant dense<0.000000e+00> : vector<512xf32>
    %138 = vector.multi_reduction <add>, %137, %cst_67 [0] : vector<32x512xf32> to vector<512xf32>
    %139 = vector.shape_cast %138 : vector<512xf32> to vector<1x512xf32>
    %140 = tpu.concatenate %43, %47, %89, %93, %135, %139 in 0 : vector<1x512xf32>, vector<1x512xf32>, vector<1x512xf32>, vector<1x512xf32>, vector<1x512xf32>, vector<1x512xf32> -> vector<6x512xf32>
    %141 = arith.truncf %140 : vector<6x512xf32> to vector<6x512xbf16>
    %c0_68 = arith.constant 0 : index
    %c6 = arith.constant 6 : index
    %c0_69 = arith.constant 0 : index
    %142 = vector.load %arg3[%c0_68, %c6, %c0_69] : memref<1x9x512xf32, #tpu.memory_space<vmem>>, vector<1x3x512xf32>
    %143 = vector.shape_cast %142 : vector<1x3x512xf32> to vector<3x512xf32>
    %144 = arith.truncf %143 : vector<3x512xf32> to vector<3x512xbf16>
    %c0_70 = arith.constant 0 : index
    %c0_71 = arith.constant 0 : index
    %145 = vector.load %arg4[%c0_70, %c0_71] : memref<128x6xbf16, #tpu.memory_space<vmem>>, vector<128x6xbf16>
    %cst_72 = arith.constant dense<0.000000e+00> : vector<128x512xf32>
    %146 = tpu.matmul %145, %141, %cst_72 {dimension_numbers = #tpu.dot_dimension_numbers<[1], [0], [0], [1], [0, 0, 1, 1], [], []>} : vector<128x6xbf16>, vector<6x512xbf16>, vector<128x512xf32> -> vector<128x512xf32>
    %c0_73 = arith.constant 0 : index
    %c0_74 = arith.constant 0 : index
    %147 = vector.load %arg5[%c0_73, %c0_74] : memref<128x1xf32, #tpu.memory_space<vmem>>, vector<128x1xf32>
    %148 = vector.broadcast %147 : vector<128x1xf32> to vector<128x512xf32>
    %149 = arith.addf %146, %148 : vector<128x512xf32>
    %cst_75 = arith.constant 0.000000e+00 : f32
    %150 = vector.broadcast %cst_75 : f32 to vector<128x512xf32>
    %151 = arith.maximumf %149, %150 : vector<128x512xf32>
    %c0_76 = arith.constant 0 : index
    %c0_77 = arith.constant 0 : index
    %c0_78 = arith.constant 0 : index
    %152 = vector.load %arg7[%c0_76, %c0_77, %c0_78] : memref<7x128x128xbf16, #tpu.memory_space<vmem>>, vector<1x128x128xbf16>
    %153 = vector.shape_cast %152 : vector<1x128x128xbf16> to vector<128x128xbf16>
    %154 = arith.truncf %151 : vector<128x512xf32> to vector<128x512xbf16>
    %cst_79 = arith.constant dense<0.000000e+00> : vector<128x512xf32>
    %155 = tpu.matmul %153, %154, %cst_79 {dimension_numbers = #tpu.dot_dimension_numbers<[1], [0], [0], [1], [0, 0, 1, 1], [], []>} : vector<128x128xbf16>, vector<128x512xbf16>, vector<128x512xf32> -> vector<128x512xf32>
    %c0_80 = arith.constant 0 : index
    %c0_81 = arith.constant 0 : index
    %c0_82 = arith.constant 0 : index
    %156 = vector.load %arg8[%c0_80, %c0_81, %c0_82] : memref<7x128x1xf32, #tpu.memory_space<vmem>>, vector<1x128x1xf32>
    %157 = vector.shape_cast %156 : vector<1x128x1xf32> to vector<128x1xf32>
    %158 = vector.broadcast %157 : vector<128x1xf32> to vector<128x512xf32>
    %159 = arith.addf %155, %158 : vector<128x512xf32>
    %cst_83 = arith.constant 0.000000e+00 : f32
    %160 = vector.broadcast %cst_83 : f32 to vector<128x512xf32>
    %161 = arith.maximumf %159, %160 : vector<128x512xf32>
    %c1_84 = arith.constant 1 : index
    %c0_85 = arith.constant 0 : index
    %c0_86 = arith.constant 0 : index
    %162 = vector.load %arg7[%c1_84, %c0_85, %c0_86] : memref<7x128x128xbf16, #tpu.memory_space<vmem>>, vector<1x128x128xbf16>
    %163 = vector.shape_cast %162 : vector<1x128x128xbf16> to vector<128x128xbf16>
    %164 = arith.truncf %161 : vector<128x512xf32> to vector<128x512xbf16>
    %cst_87 = arith.constant dense<0.000000e+00> : vector<128x512xf32>
    %165 = tpu.matmul %163, %164, %cst_87 {dimension_numbers = #tpu.dot_dimension_numbers<[1], [0], [0], [1], [0, 0, 1, 1], [], []>} : vector<128x128xbf16>, vector<128x512xbf16>, vector<128x512xf32> -> vector<128x512xf32>
    %c1_88 = arith.constant 1 : index
    %c0_89 = arith.constant 0 : index
    %c0_90 = arith.constant 0 : index
    %166 = vector.load %arg8[%c1_88, %c0_89, %c0_90] : memref<7x128x1xf32, #tpu.memory_space<vmem>>, vector<1x128x1xf32>
    %167 = vector.shape_cast %166 : vector<1x128x1xf32> to vector<128x1xf32>
    %168 = vector.broadcast %167 : vector<128x1xf32> to vector<128x512xf32>
    %169 = arith.addf %165, %168 : vector<128x512xf32>
    %cst_91 = arith.constant 0.000000e+00 : f32
    %170 = vector.broadcast %cst_91 : f32 to vector<128x512xf32>
    %171 = arith.maximumf %169, %170 : vector<128x512xf32>
    %c2_92 = arith.constant 2 : index
    %c0_93 = arith.constant 0 : index
    %c0_94 = arith.constant 0 : index
    %172 = vector.load %arg7[%c2_92, %c0_93, %c0_94] : memref<7x128x128xbf16, #tpu.memory_space<vmem>>, vector<1x128x128xbf16>
    %173 = vector.shape_cast %172 : vector<1x128x128xbf16> to vector<128x128xbf16>
    %174 = arith.truncf %171 : vector<128x512xf32> to vector<128x512xbf16>
    %cst_95 = arith.constant dense<0.000000e+00> : vector<128x512xf32>
    %175 = tpu.matmul %173, %174, %cst_95 {dimension_numbers = #tpu.dot_dimension_numbers<[1], [0], [0], [1], [0, 0, 1, 1], [], []>} : vector<128x128xbf16>, vector<128x512xbf16>, vector<128x512xf32> -> vector<128x512xf32>
    %c2_96 = arith.constant 2 : index
    %c0_97 = arith.constant 0 : index
    %c0_98 = arith.constant 0 : index
    %176 = vector.load %arg8[%c2_96, %c0_97, %c0_98] : memref<7x128x1xf32, #tpu.memory_space<vmem>>, vector<1x128x1xf32>
    %177 = vector.shape_cast %176 : vector<1x128x1xf32> to vector<128x1xf32>
    %178 = vector.broadcast %177 : vector<128x1xf32> to vector<128x512xf32>
    %179 = arith.addf %175, %178 : vector<128x512xf32>
    %cst_99 = arith.constant 0.000000e+00 : f32
    %180 = vector.broadcast %cst_99 : f32 to vector<128x512xf32>
    %181 = arith.maximumf %179, %180 : vector<128x512xf32>
    %c3_100 = arith.constant 3 : index
    %c0_101 = arith.constant 0 : index
    %c0_102 = arith.constant 0 : index
    %182 = vector.load %arg7[%c3_100, %c0_101, %c0_102] : memref<7x128x128xbf16, #tpu.memory_space<vmem>>, vector<1x128x128xbf16>
    %183 = vector.shape_cast %182 : vector<1x128x128xbf16> to vector<128x128xbf16>
    %184 = arith.truncf %181 : vector<128x512xf32> to vector<128x512xbf16>
    %cst_103 = arith.constant dense<0.000000e+00> : vector<128x512xf32>
    %185 = tpu.matmul %183, %184, %cst_103 {dimension_numbers = #tpu.dot_dimension_numbers<[1], [0], [0], [1], [0, 0, 1, 1], [], []>} : vector<128x128xbf16>, vector<128x512xbf16>, vector<128x512xf32> -> vector<128x512xf32>
    %c3_104 = arith.constant 3 : index
    %c0_105 = arith.constant 0 : index
    %c0_106 = arith.constant 0 : index
    %186 = vector.load %arg8[%c3_104, %c0_105, %c0_106] : memref<7x128x1xf32, #tpu.memory_space<vmem>>, vector<1x128x1xf32>
    %187 = vector.shape_cast %186 : vector<1x128x1xf32> to vector<128x1xf32>
    %188 = vector.broadcast %187 : vector<128x1xf32> to vector<128x512xf32>
    %189 = arith.addf %185, %188 : vector<128x512xf32>
    %cst_107 = arith.constant 0.000000e+00 : f32
    %190 = vector.broadcast %cst_107 : f32 to vector<128x512xf32>
    %191 = arith.maximumf %189, %190 : vector<128x512xf32>
    %c4_108 = arith.constant 4 : index
    %c0_109 = arith.constant 0 : index
    %c0_110 = arith.constant 0 : index
    %192 = vector.load %arg7[%c4_108, %c0_109, %c0_110] : memref<7x128x128xbf16, #tpu.memory_space<vmem>>, vector<1x128x128xbf16>
    %193 = vector.shape_cast %192 : vector<1x128x128xbf16> to vector<128x128xbf16>
    %194 = arith.truncf %191 : vector<128x512xf32> to vector<128x512xbf16>
    %cst_111 = arith.constant dense<0.000000e+00> : vector<128x512xf32>
    %195 = tpu.matmul %193, %194, %cst_111 {dimension_numbers = #tpu.dot_dimension_numbers<[1], [0], [0], [1], [0, 0, 1, 1], [], []>} : vector<128x128xbf16>, vector<128x512xbf16>, vector<128x512xf32> -> vector<128x512xf32>
    %c4_112 = arith.constant 4 : index
    %c0_113 = arith.constant 0 : index
    %c0_114 = arith.constant 0 : index
    %196 = vector.load %arg8[%c4_112, %c0_113, %c0_114] : memref<7x128x1xf32, #tpu.memory_space<vmem>>, vector<1x128x1xf32>
    %197 = vector.shape_cast %196 : vector<1x128x1xf32> to vector<128x1xf32>
    %198 = vector.broadcast %197 : vector<128x1xf32> to vector<128x512xf32>
    %199 = arith.addf %195, %198 : vector<128x512xf32>
    %c0_115 = arith.constant 0 : index
    %c0_116 = arith.constant 0 : index
    %200 = vector.load %arg6[%c0_115, %c0_116] : memref<128x6xbf16, #tpu.memory_space<vmem>>, vector<128x6xbf16>
    %cst_117 = arith.constant dense<0.000000e+00> : vector<128x512xf32>
    %201 = tpu.matmul %200, %141, %cst_117 {dimension_numbers = #tpu.dot_dimension_numbers<[1], [0], [0], [1], [0, 0, 1, 1], [], []>} : vector<128x6xbf16>, vector<6x512xbf16>, vector<128x512xf32> -> vector<128x512xf32>
    %202 = arith.addf %199, %201 : vector<128x512xf32>
    %cst_118 = arith.constant 0.000000e+00 : f32
    %203 = vector.broadcast %cst_118 : f32 to vector<128x512xf32>
    %204 = arith.maximumf %202, %203 : vector<128x512xf32>
    %c5_119 = arith.constant 5 : index
    %c0_120 = arith.constant 0 : index
    %c0_121 = arith.constant 0 : index
    %205 = vector.load %arg7[%c5_119, %c0_120, %c0_121] : memref<7x128x128xbf16, #tpu.memory_space<vmem>>, vector<1x128x128xbf16>
    %206 = vector.shape_cast %205 : vector<1x128x128xbf16> to vector<128x128xbf16>
    %207 = arith.truncf %204 : vector<128x512xf32> to vector<128x512xbf16>
    %cst_122 = arith.constant dense<0.000000e+00> : vector<128x512xf32>
    %208 = tpu.matmul %206, %207, %cst_122 {dimension_numbers = #tpu.dot_dimension_numbers<[1], [0], [0], [1], [0, 0, 1, 1], [], []>} : vector<128x128xbf16>, vector<128x512xbf16>, vector<128x512xf32> -> vector<128x512xf32>
    %c5_123 = arith.constant 5 : index
    %c0_124 = arith.constant 0 : index
    %c0_125 = arith.constant 0 : index
    %209 = vector.load %arg8[%c5_123, %c0_124, %c0_125] : memref<7x128x1xf32, #tpu.memory_space<vmem>>, vector<1x128x1xf32>
    %210 = vector.shape_cast %209 : vector<1x128x1xf32> to vector<128x1xf32>
    %211 = vector.broadcast %210 : vector<128x1xf32> to vector<128x512xf32>
    %212 = arith.addf %208, %211 : vector<128x512xf32>
    %cst_126 = arith.constant 0.000000e+00 : f32
    %213 = vector.broadcast %cst_126 : f32 to vector<128x512xf32>
    %214 = arith.maximumf %212, %213 : vector<128x512xf32>
    %c6_127 = arith.constant 6 : index
    %c0_128 = arith.constant 0 : index
    %c0_129 = arith.constant 0 : index
    %215 = vector.load %arg7[%c6_127, %c0_128, %c0_129] : memref<7x128x128xbf16, #tpu.memory_space<vmem>>, vector<1x128x128xbf16>
    %216 = vector.shape_cast %215 : vector<1x128x128xbf16> to vector<128x128xbf16>
    %217 = arith.truncf %214 : vector<128x512xf32> to vector<128x512xbf16>
    %cst_130 = arith.constant dense<0.000000e+00> : vector<128x512xf32>
    %218 = tpu.matmul %216, %217, %cst_130 {dimension_numbers = #tpu.dot_dimension_numbers<[1], [0], [0], [1], [0, 0, 1, 1], [], []>} : vector<128x128xbf16>, vector<128x512xbf16>, vector<128x512xf32> -> vector<128x512xf32>
    %c6_131 = arith.constant 6 : index
    %c0_132 = arith.constant 0 : index
    %c0_133 = arith.constant 0 : index
    %219 = vector.load %arg8[%c6_131, %c0_132, %c0_133] : memref<7x128x1xf32, #tpu.memory_space<vmem>>, vector<1x128x1xf32>
    %220 = vector.shape_cast %219 : vector<1x128x1xf32> to vector<128x1xf32>
    %221 = vector.broadcast %220 : vector<128x1xf32> to vector<128x512xf32>
    %222 = arith.addf %218, %221 : vector<128x512xf32>
    %cst_134 = arith.constant 0.000000e+00 : f32
    %223 = vector.broadcast %cst_134 : f32 to vector<128x512xf32>
    %224 = arith.maximumf %222, %223 : vector<128x512xf32>
    %c0_135 = arith.constant 0 : index
    %c0_136 = arith.constant 0 : index
    %225 = vector.load %arg9[%c0_135, %c0_136] : memref<129x128xbf16, #tpu.memory_space<vmem>>, vector<129x128xbf16>
    %226 = arith.truncf %224 : vector<128x512xf32> to vector<128x512xbf16>
    %cst_137 = arith.constant dense<0.000000e+00> : vector<129x512xf32>
    %227 = tpu.matmul %225, %226, %cst_137 {dimension_numbers = #tpu.dot_dimension_numbers<[1], [0], [0], [1], [0, 0, 1, 1], [], []>} : vector<129x128xbf16>, vector<128x512xbf16>, vector<129x512xf32> -> vector<129x512xf32>
    %c0_138 = arith.constant 0 : index
    %c0_139 = arith.constant 0 : index
    %228 = vector.load %arg10[%c0_138, %c0_139] : memref<129x1xf32, #tpu.memory_space<vmem>>, vector<129x1xf32>
    %229 = vector.broadcast %228 : vector<129x1xf32> to vector<129x512xf32>
    %230 = arith.addf %227, %229 : vector<129x512xf32>
    %231 = vector.extract_strided_slice %230 {offsets = [0, 0], sizes = [128, 512], strides = [1, 1]} : vector<129x512xf32> to vector<128x512xf32>
    %232 = vector.extract_strided_slice %230 {offsets = [128, 0], sizes = [1, 512], strides = [1, 1]} : vector<129x512xf32> to vector<1x512xf32>
    %c0_140 = arith.constant 0 : index
    %c0_141 = arith.constant 0 : index
    %233 = vector.load %arg11[%c0_140, %c0_141] : memref<128x128xbf16, #tpu.memory_space<vmem>>, vector<128x128xbf16>
    %234 = arith.truncf %231 : vector<128x512xf32> to vector<128x512xbf16>
    %cst_142 = arith.constant dense<0.000000e+00> : vector<128x512xf32>
    %235 = tpu.matmul %233, %234, %cst_142 {dimension_numbers = #tpu.dot_dimension_numbers<[1], [0], [0], [1], [0, 0, 1, 1], [], []>} : vector<128x128xbf16>, vector<128x512xbf16>, vector<128x512xf32> -> vector<128x512xf32>
    %c0_143 = arith.constant 0 : index
    %c0_144 = arith.constant 0 : index
    %236 = vector.load %arg12[%c0_143, %c0_144] : memref<128x3xbf16, #tpu.memory_space<vmem>>, vector<128x3xbf16>
    %cst_145 = arith.constant dense<0.000000e+00> : vector<128x512xf32>
    %237 = tpu.matmul %236, %144, %cst_145 {dimension_numbers = #tpu.dot_dimension_numbers<[1], [0], [0], [1], [0, 0, 1, 1], [], []>} : vector<128x3xbf16>, vector<3x512xbf16>, vector<128x512xf32> -> vector<128x512xf32>
    %238 = arith.addf %235, %237 : vector<128x512xf32>
    %c0_146 = arith.constant 0 : index
    %c0_147 = arith.constant 0 : index
    %239 = vector.load %arg13[%c0_146, %c0_147] : memref<128x1xf32, #tpu.memory_space<vmem>>, vector<128x1xf32>
    %240 = vector.broadcast %239 : vector<128x1xf32> to vector<128x512xf32>
    %241 = arith.addf %238, %240 : vector<128x512xf32>
    %cst_148 = arith.constant 0.000000e+00 : f32
    %242 = vector.broadcast %cst_148 : f32 to vector<128x512xf32>
    %243 = arith.maximumf %241, %242 : vector<128x512xf32>
    %c0_149 = arith.constant 0 : index
    %c0_150 = arith.constant 0 : index
    %244 = vector.load %arg14[%c0_149, %c0_150] : memref<3x128xbf16, #tpu.memory_space<vmem>>, vector<3x128xbf16>
    %245 = arith.truncf %243 : vector<128x512xf32> to vector<128x512xbf16>
    %cst_151 = arith.constant dense<0.000000e+00> : vector<3x512xf32>
    %246 = tpu.matmul %244, %245, %cst_151 {dimension_numbers = #tpu.dot_dimension_numbers<[1], [0], [0], [1], [0, 0, 1, 1], [], []>} : vector<3x128xbf16>, vector<128x512xbf16>, vector<3x512xf32> -> vector<3x512xf32>
    %c0_152 = arith.constant 0 : index
    %c0_153 = arith.constant 0 : index
    %247 = vector.load %arg15[%c0_152, %c0_153] : memref<3x1xf32, #tpu.memory_space<vmem>>, vector<3x1xf32>
    %248 = vector.broadcast %247 : vector<3x1xf32> to vector<3x512xf32>
    %249 = arith.addf %246, %248 : vector<3x512xf32>
    %250 = tpu.concatenate %249, %232 in 0 : vector<3x512xf32>, vector<1x512xf32> -> vector<4x512xf32>
    %c0_154 = arith.constant 0 : index
    %c0_155 = arith.constant 0 : index
    %c0_156 = arith.constant 0 : index
    %251 = vector.load %arg16[%c0_154, %c0_155, %c0_156] : memref<1x4x512xf32, #tpu.memory_space<vmem>>, vector<1x4x512xf32>
    %252 = vector.shape_cast %251 : vector<1x4x512xf32> to vector<4x512xf32>
    %253 = vector.shape_cast %250 : vector<4x512xf32> to vector<1x4x512xf32>
    tpu.vector_store %arg16[%c0_154, %c0_155, %c0_156], %253 {strides = array<i32>} : memref<1x4x512xf32, #tpu.memory_space<vmem>>, vector<1x4x512xf32>,
    return
  }
  func.func @transform_0(%arg0: i32, %arg1: i32) -> (i32, i32, i32, i32) {
    %c0_i32 = arith.constant 0 : i32
    %c0_i32_0 = arith.constant 0 : i32
    %c0_i32_1 = arith.constant 0 : i32
    %c0_i32_2 = arith.constant 0 : i32
    return %arg0, %c0_i32, %c0_i32_0, %c0_i32_1 : i32, i32, i32, i32
  }
  func.func @transform_1(%arg0: i32, %arg1: i32) -> (i32, i32, i32) {
    %c0_i32 = arith.constant 0 : i32
    %c0_i32_0 = arith.constant 0 : i32
    return %arg0, %c0_i32, %arg1 : i32, i32, i32
  }
  func.func @transform_2(%arg0: i32, %arg1: i32) -> (i32, i32) {
    %c0_i32 = arith.constant 0 : i32
    %c0_i32_0 = arith.constant 0 : i32
    %c0_i32_1 = arith.constant 0 : i32
    return %c0_i32, %c0_i32_0 : i32, i32
  }
  func.func @transform_3(%arg0: i32, %arg1: i32) -> (i32, i32) {
    %c0_i32 = arith.constant 0 : i32
    %c0_i32_0 = arith.constant 0 : i32
    %c0_i32_1 = arith.constant 0 : i32
    return %c0_i32, %c0_i32_0 : i32, i32
  }
  func.func @transform_4(%arg0: i32, %arg1: i32) -> (i32, i32) {
    %c0_i32 = arith.constant 0 : i32
    %c0_i32_0 = arith.constant 0 : i32
    %c0_i32_1 = arith.constant 0 : i32
    return %c0_i32, %c0_i32_0 : i32, i32
  }
  func.func @transform_5(%arg0: i32, %arg1: i32) -> (i32, i32, i32) {
    %c0_i32 = arith.constant 0 : i32
    %c0_i32_0 = arith.constant 0 : i32
    %c0_i32_1 = arith.constant 0 : i32
    %c0_i32_2 = arith.constant 0 : i32
    return %c0_i32, %c0_i32_0, %c0_i32_1 : i32, i32, i32
  }
  func.func @transform_6(%arg0: i32, %arg1: i32) -> (i32, i32, i32) {
    %c0_i32 = arith.constant 0 : i32
    %c0_i32_0 = arith.constant 0 : i32
    %c0_i32_1 = arith.constant 0 : i32
    %c0_i32_2 = arith.constant 0 : i32
    return %c0_i32, %c0_i32_0, %c0_i32_1 : i32, i32, i32
  }
  func.func @transform_7(%arg0: i32, %arg1: i32) -> (i32, i32) {
    %c0_i32 = arith.constant 0 : i32
    %c0_i32_0 = arith.constant 0 : i32
    %c0_i32_1 = arith.constant 0 : i32
    return %c0_i32, %c0_i32_0 : i32, i32
  }
  func.func @transform_8(%arg0: i32, %arg1: i32) -> (i32, i32) {
    %c0_i32 = arith.constant 0 : i32
    %c0_i32_0 = arith.constant 0 : i32
    %c0_i32_1 = arith.constant 0 : i32
    return %c0_i32, %c0_i32_0 : i32, i32
  }
  func.func @transform_9(%arg0: i32, %arg1: i32) -> (i32, i32) {
    %c0_i32 = arith.constant 0 : i32
    %c0_i32_0 = arith.constant 0 : i32
    %c0_i32_1 = arith.constant 0 : i32
    return %c0_i32, %c0_i32_0 : i32, i32
  }
  func.func @transform_10(%arg0: i32, %arg1: i32) -> (i32, i32) {
    %c0_i32 = arith.constant 0 : i32
    %c0_i32_0 = arith.constant 0 : i32
    %c0_i32_1 = arith.constant 0 : i32
    return %c0_i32, %c0_i32_0 : i32, i32
  }
  func.func @transform_11(%arg0: i32, %arg1: i32) -> (i32, i32) {
    %c0_i32 = arith.constant 0 : i32
    %c0_i32_0 = arith.constant 0 : i32
    %c0_i32_1 = arith.constant 0 : i32
    return %c0_i32, %c0_i32_0 : i32, i32
  }
  func.func @transform_12(%arg0: i32, %arg1: i32) -> (i32, i32) {
    %c0_i32 = arith.constant 0 : i32
    %c0_i32_0 = arith.constant 0 : i32
    %c0_i32_1 = arith.constant 0 : i32
    return %c0_i32, %c0_i32_0 : i32, i32
  }
  func.func @transform_13(%arg0: i32, %arg1: i32) -> (i32, i32) {
    %c0_i32 = arith.constant 0 : i32
    %c0_i32_0 = arith.constant 0 : i32
    %c0_i32_1 = arith.constant 0 : i32
    return %c0_i32, %c0_i32_0 : i32, i32
  }
  func.func @transform_14(%arg0: i32, %arg1: i32) -> (i32, i32, i32) {
    %c0_i32 = arith.constant 0 : i32
    %c0_i32_0 = arith.constant 0 : i32
    return %arg0, %c0_i32, %arg1 : i32, i32, i32
  }
}

</mosaic_0001>

<bundles_post_ra>
// kernel: forward_pallas.1
= control target key start
LH: loop header
LB: loop body
LE: loop exit
PB: predicated region body
PF: predicated region fallthrough
CT: control target
= control target key end

     0   :  { %s11097_s0 = inlined_call_operand.vmem [shape: bf16[2,3,64,32], index: 0, kind: input, shape index: {}]   ;;  %s11098_s1 = inlined_call_operand.vmem [shape: f32[2,9,1024], index: 1, kind: input, shape index: {}]   ;;  %s11099_s2 = inlined_call_operand.vmem [shape: bf16[128,6], index: 2, kind: input, shape index: {}]   ;;  %s11100_s3 = inlined_call_operand.vmem [shape: f32[128,1], index: 3, kind: input, shape index: {}]   ;;  %s11101_s4 = inlined_call_operand.vmem [shape: bf16[128,6], index: 4, kind: input, shape index: {}]   ;;  %s11102_s5 = inlined_call_operand.vmem [shape: bf16[7,128,128], index: 5, kind: input, shape index: {}]   ;;  %s11103_s6 = inlined_call_operand.vmem [shape: f32[7,128,1], index: 6, kind: input, shape index: {}]   ;;  %s11104_s7 = inlined_call_operand.vmem [shape: bf16[129,128], index: 7, kind: input, shape index: {}]   ;;  %s11105_s8 = inlined_call_operand.vmem [shape: f32[129,1], index: 8, kind: input, shape index: {}]   ;;  %s11106_s9 = inlined_call_operand.vmem [shape: bf16[128,128], index: 9, kind: input, shape index: {}]   ;;  %s11107_s10 = inlined_call_operand.vmem [shape: bf16[128,3], index: 10, kind: input, shape index: {}]   ;;  %s11108_s11 = inlined_call_operand.vmem [shape: f32[128,1], index: 11, kind: input, shape index: {}]   ;;  %s11109_s12 = inlined_call_operand.vmem [shape: bf16[3,128], index: 12, kind: input, shape index: {}]   ;;  %s11110_s13 = inlined_call_operand.vmem [shape: f32[3,1], index: 13, kind: input, shape index: {}]   ;;  %s11111_s14 = inlined_call_operand.hbm [shape: f32[2,4,1024], index: 14, kind: output, shape index: {}]  }
   0x1   :  { %11175 = sst [smem:[#allocation65_spill]] %s11097_s0 }
   0x2   :  { %11176 = sst [smem:[#allocation66_spill]] %s11098_s1 }
   0x3   :  { %11177 = sst [smem:[#allocation67_spill]] %s11109_s12 }
   0x4   :  { %11178 = sst [smem:[#allocation68_spill]] %s11111_s14 }
   0x5   :  { %19 = vsyncpa [#allocation4], 0 }
   0x6   :  { %21 = vsyncpa [#allocation4 + $0x1], 0  ;;  %s8819_s29 = smov 0   ;;  %s8821_s30 = smov 0  }
   0x7   :  { %s8823_s15 = smov 0   ;;  %s8825_s16 = smov 0  }
   0x8   :  { %s8827_s17 = smov 0   ;;  %s8829_s18 = smov 0  }
   0x9   :  { %s8831_s19 = smov 0   ;;  %s8833_s20 = smov 0  }
   0xa LB: > { %11179 = sst [smem:[#allocation6_spill]] %s8711_s29  ;;  %s7846_s21 = sadd.s32 4294967295, %s8739_s20   ;;  %s8739_s20 = sphi %s8833_s20, %s27_s20   ;;  %s8735_s19 = sphi %s8831_s19, %s11319_s19   ;;  %s8731_s18 = sphi %s8829_s18, %s11318_s18   ;;  %s8727_s17 = sphi %s8827_s17, %s11317_s17   ;;  %s8723_s16 = sphi %s8825_s16, %s11316_s16   ;;  %s8719_s15 = sphi %s8823_s15, %s11315_s15   ;;  %s8715_s30 = sphi %s8821_s30, %s11314_s30   ;;  %s8711_s29 = sphi %s8819_s29, %s11313_s29  }
   0xb   : > { %11180 = sst [smem:[#allocation7_spill]] %s8723_s16  ;;  %s7847_s22 = sadd.s32 4294967294, %s8739_s20  }
   0xc   : > { %s36_s23 = sadd.s32 1, %s8731_s18  ;;  %s39_s24 = sadd.s32 1, %s8735_s19 }
   0xd   : > { %p37_p0 = scmp.ge.s32.totalorder %s36_s23, 2  ;;  %p81_p1 = scmp.ne.s32.totalorder %s8719_s15, %s8715_s30 }
   0xe   : > { %p82_p2 = scmp.eq.s32.totalorder %s8739_s20, 0  ;;  %p365_p5 = scmp.eq.s32.totalorder %s7846_s21, 3 }
   0xf   : > { %s11321_s23 = smov (%p37_p0, %s36_s23), 0  ;;  %s11323_s24 = smov (!%p37_p0, %s39_s24), %s8735_s19 }
  0x10   : > { %11181 = sst [smem:[#allocation8_spill]] %s11321_s23  ;;  %s70_s25 = ssub.s32 %s8731_s18, %s11321_s23 }
  0x11   : > { %p8871_p3 = por %p82_p2, %p81_p1  ;;  %p41_p4 = scmp.ge.s32.totalorder %s11323_s24, 2 }
  0x12   : > { %p370_p6 = scmp.ne.s32.totalorder %s8715_s30, %s8711_s29  ;;  %p371_p7 = scmp.eq.s32.totalorder %s7847_s22, 3 }
  0x13   : > { %s11325_s24 = smov (%p41_p4, %s11323_s24), 0  ;;  %p8879_p8 = por %p365_p5, %p81_p1 }
  0x14   : > { %11183 = sst [smem:[#allocation9_spill]] %s11325_s24  ;;  %p8883_p9 = por %p371_p7, %p370_p6 }
  0x15   : > { %s11184_s27 = scalar_select %p8879_p8, 1, 0 }
  0x16   : > { %s11186_s28 = scalar_select %p8883_p9, 1, 0 }
  0x17   : > { %11185 = sst [smem:[#allocation10_spill]] %s11184_s27  ;;  %s69_s23 = ssub.s32 %s8735_s19, %s11325_s24 }
  0x18   : > { %11187 = sst [smem:[#allocation11_spill]] %s11186_s28  ;;  %s71_s14 = sor.u32 %s70_s25, %s69_s23 }
  0x19   : > { %s74_s12 = sadd.s32 1, %s8719_s15  ;;  %p72_p10 = scmp.eq.s32.totalorder %s71_s14, 0 }
  0x1a   : > { %p7849_p11 = scmp.ge.s32.totalorder %s8739_s20, 4 }
  0x1b   : > { %s8891_s16 = scalar_select %p72_p10, %s8719_s15, %s74_s12  }
  0x1c   : > { %423 = sbr.rel (%p7849_p11) target bundleno = 49 (0x31), region = 64 }
  0x23   : > { %434 = sbr.rel (!%p8871_p3) target bundleno = 49 (0x31), region = 72  ;;  %s436_s21 = sand.u32 (%p8871_p3), 1, %s8719_s15  }
  0x24   : > { %s7851_s22 = sshll.u32 (%p8871_p3), %s8731_s18, 2  ;;  %s7850_s29 = sshll.u32 (%p8871_p3), %s436_s21, 6 }
  0x25   : > { %s7852_s27 = sshll.u32 (%p8871_p3), %s8735_s19, 4  ;;  %s11188_s1 = sld [smem:[#allocation66_spill]] (%p8871_p3) }
  0x26   : > { %s441_s28 = sadd.s32 (%p8871_p3), %s7852_s27, %s7851_s22  ;;  %s438_s14 = scalar_lea.vmem (%p8871_p3), [#allocation2], %s7850_s29 }
  0x27   : > { %s7853_s24 = sshll.u32 (%p8871_p3), %s441_s28, 3 }
  0x2b   : > { %s443_s12 = scalar_lea.vmem %s11188_s1, %s7853_s24 }
  0x2c   : > { %v456_v0 = vld [vmem:[%s443_s12] sm:$0xff]  ;;  %v458_v1 = vld [vmem:[%s443_s12 + $0x8] sm:$0xff]  ;;  %v460_v2 = vld [vmem:[%s443_s12 + $0x10] sm:$0xff] }
  0x2d   : > { %457 = vst [vmem:[%s438_s14] sm:$0xff] %v456_v0  ;;  %459 = vst [vmem:[%s438_s14 + $0x8] sm:$0xff] %v458_v1  ;;  %v462_v3 = vld [vmem:[%s443_s12 + $0x18] sm:$0xff]  ;;  %v464_v4 = vld [vmem:[%s443_s12 + $0x40] sm:$0xff] }
  0x2e   : > { %461 = vst [vmem:[%s438_s14 + $0x10] sm:$0xff] %v460_v2  ;;  %v466_v5 = vld [vmem:[%s443_s12 + $0x48] sm:$0xff]  ;;  %463 = vst [vmem:[%s438_s14 + $0x18] sm:$0xff] %v462_v3  ;;  %v468_v6 = vld [vmem:[%s443_s12 + $0x50] sm:$0xff] }
  0x2f   : > { %465 = vst [vmem:[%s438_s14 + $0x20] sm:$0xff] %v464_v4  ;;  %467 = vst [vmem:[%s438_s14 + $0x28] sm:$0xff] %v466_v5  ;;  %v470_v7 = vld [vmem:[%s443_s12 + $0x58] sm:$0xff] }
  0x30   : > { %469 = vst [vmem:[%s438_s14 + $0x30] sm:$0xff] %v468_v6  ;;  %471 = vst [vmem:[%s438_s14 + $0x38] sm:$0xff] %v470_v7 }
  0x31 PF: > { %p7854_p12 = scmp.ge.s32.totalorder %s8739_s20, 1  ;;  %p476_p13 = scmp.lt.s32.totalorder %s8739_s20, 5 }
  0x33   : > { %p477_p0 = pnand %p7854_p12, %p476_p13 }
  0x35   : > { %480 = sbr.rel (%p477_p0) target bundleno = 3531 (0xdcb), region = 95 }
  0x3c   : > { %s8905_s29 = sand.u32 1, %s8715_s30   ;;  %v541_v8 = vlaneseq  ;;  %p533_p1 = scmp.lt.s32.totalorder %s8727_s17, 1  ;;  %v11119_v9 = vmov 0   ;;  %v2049_v10 = vld [vmem:[%s11100_s3] sm:$0xff]  ;;  %v2051_v11 = vld [vmem:[%s11100_s3 + $0x10] sm:$0xff]  ;;  %v2050_v15 = vld [vmem:[%s11100_s3 + $0x8] sm:$0xff] }
  0x3d   : > { %s7855_s24 = sshll.u32 %s8905_s29, 6  ;;  %812 = vmatprep.mubr.bf16.mxu0 %v11119_v9  ;;  %885 = vmatprep.mubr.bf16.mxu1 %v11119_v9  ;;  %v2052_v16 = vld [vmem:[%s11100_s3 + $0x18] sm:$0xff]  ;;  %s11189_s0 = sld [smem:[#allocation65_spill]]  ;;  %v2053_v23 = vld [vmem:[%s11100_s3 + $0x20] sm:$0xff]  ;;  %v2054_v24 = vld [vmem:[%s11100_s3 + $0x28] sm:$0xff]  ;;  %vm767_vm0 = vcmask 261120  }
  0x3e   : > { %v542_v12 = vshrl.u32 %v541_v8, 7  ;;  %8534 = vset.pattern.permute.xlu0 %v11119_v9  ;;  %8535 = vset.pattern.permute.xlu1 %v11119_v9  ;;  %s8919_s22 = scalar_lea.vmem [#allocation2], %s7855_s24  ;;  %v2055_v37 = vld [vmem:[%s11100_s3 + $0x30] sm:$0xff]  ;;  %v2056_v42 = vld [vmem:[%s11100_s3 + $0x38] sm:$0xff]  ;;  %v2057_v50 = vld [vmem:[%s11100_s3 + $0x40] sm:$0xff]  ;;  %vm1992_vm1 = vcmask 1040384  }
  0x3f   : > { %v7858_v13 = vld [vmem:[%s8919_s22 + $0x1] ss:$8 sm:$0xf]  ;;  %s534_s23 = scalar_select %p533_p1, %s8727_s17, 1  ;;  %2067 = vperm.xlu0 %8534, %v2049_v10   ;;  %2077 = vperm.xlu1 %8535, %v2051_v11   ;;  %vm1997_vm2 = vcmask 1041408   ;;  %vm2002_vm3 = vcmask 1042432  }
  0x40   : > { %v7874_v14 = vld [vmem:[%s8919_s22 + $0x3] ss:$8 sm:$0xf]  ;;  %v557_v17 = vadd.f32 1.0, %v7858_v13  ;;  %v543_v18 = vadd.s32 8, %v542_v12  ;;  %v544_v19 = vadd.s32 16, %v542_v12  ;;  %v8950_v32 = vcvt.s32.f32 %v542_v12 }
  0x41   : > { %s8460_s27 = smul.u32 96, %s534_s23  ;;  %v8930_v21 = vsub.s32 1, %v542_v12  ;;  %v1038_v22 = vadd.f32 1.0, %v7874_v14  ;;  %v8943_v25 = vsub.s32 3, %v542_v12  ;;  %v8945_v26 = vsub.s32 0, %v542_v12  ;;  %v2058_v55 = vld [vmem:[%s11100_s3 + $0x48] sm:$0xff] }
  0x42   : > { %v558_v20 = vmul.f32 32.0, %v557_v17  ;;  %v8947_v28 = vsub.s32 2, %v542_v12  ;;  %v7898_v29 = vld [vmem:[%s8919_s22 + $0x5] ss:$8 sm:$0xf]  ;;  %v545_v30 = vadd.s32 24, %v542_v12  ;;  %v8952_v33 = vcvt.s32.f32 %v543_v18 }
  0x43   : > { %s8935_s21 = scalar_lea.vmem %s11189_s0, %s8460_s27  ;;  %2072 = vperm.xlu0 %8534, %v2050_v15   ;;  %2082 = vperm.xlu1 %8535, %v2052_v16   ;;  %v1039_v31 = vmul.f32 32.0, %v1038_v22  ;;  %v8954_v35 = vcvt.s32.f32 %v544_v19  ;;  %v8976_v45 = vadd.f32 1.0, %v7898_v29  ;;  %v2059_v4 = vld [vmem:[%s11100_s3 + $0x50] sm:$0xff]  ;;  %v2060_v10 = vld [vmem:[%s11100_s3 + $0x58] sm:$0xff]  ;;  %vm2007_vm4 = vcmask 1043456   ;;  %s11305_s24 = sld [smem:[#allocation7_spill]] }
  0x44   : > { %v7860_v27 = vadd.f32 -1.0, %v558_v20  ;;  %v8972_v43 = vcvt.s32.f32 %v545_v30  ;;  %vm2012_vm5 = vcmask 1044480   ;;  %vm2185_vm6 = vcmask 48128   ;;  %s11306_s12 = sld [smem:[#allocation67_spill]]  ;;  %s7856_s14 = sshll.u32 %s8905_s29, 4 }
  0x45   : > { %v7876_v36 = vadd.f32 -1.0, %v1039_v31  ;;  %vm6825_vm7 = vcmask 23552   ;;  %s8264_s26 = sshll.u32 %s8727_s17, 3  ;;  %s11308_s25 = sld [smem:[#allocation68_spill]] }
  0x46   : > { %v560_v34 = vmul.f32 0.5, %v7860_v27 }
  0x47   : > { %2087 = vperm.xlu0 %8534, %v2053_v23   ;;  %2092 = vperm.xlu1 %8535, %v2054_v24   ;;  %v8974_v44 = vmul.f32 0.5, %v7876_v36  ;;  %v2061_v24 = vld [vmem:[%s11100_s3 + $0x60] sm:$0xff] }
  0x48   : > { %v654_v38 = vrot.slane %v560_v34, %v8930_v21  ;;  %v8961_v39 = vrot.slane %v560_v34, %v8943_v25  ;;  %v8964_v40 = vrot.slane %v560_v34, %v8945_v26  ;;  %v8967_v41 = vrot.slane %v560_v34, %v8947_v28  ;;  %v2062_v34 = vld [vmem:[%s11100_s3 + $0x68] sm:$0xff] }
  0x4a   : > { %v668_v46 = vsub.f32 %v8950_v32, %v654_v38  ;;  %v672_v47 = vsub.f32 %v8952_v33, %v654_v38  ;;  %v670_v48 = vsub.f32 %v8950_v32, %v8961_v39  ;;  %v674_v49 = vsub.f32 %v8952_v33, %v8961_v39 }
  0x4b   : > { %2097 = vperm.xlu0 %8534, %v2055_v37   ;;  %v667_v51 = vsub.f32 %v8950_v32, %v8964_v40  ;;  %v671_v52 = vsub.f32 %v8952_v33, %v8964_v40  ;;  %v669_v53 = vsub.f32 %v8950_v32, %v8967_v41  ;;  %v673_v54 = vsub.f32 %v8952_v33, %v8967_v41 }
  0x4c   : > { %2102 = vperm.xlu1 %8535, %v2056_v42   ;;  %v684_v56 = vand.u32 2147483647, %v668_v46  ;;  %v688_v57 = vand.u32 2147483647, %v672_v47  ;;  %v686_v58 = vand.u32 2147483647, %v670_v48  ;;  %v676_v59 = vsub.f32 %v8954_v35, %v654_v38 }
  0x4d   : > { %v690_v60 = vand.u32 2147483647, %v674_v49  ;;  %v683_v61 = vand.u32 2147483647, %v667_v51  ;;  %v687_v62 = vand.u32 2147483647, %v671_v52  ;;  %v680_v63 = vsub.f32 %v8972_v43, %v654_v38 }
  0x4e   : > { %v700_v0 = vsub.f32 1.0, %v684_v56  ;;  %v704_v1 = vsub.f32 1.0, %v688_v57  ;;  %v702_v2 = vsub.f32 1.0, %v686_v58  ;;  %v685_v3 = vand.u32 2147483647, %v669_v53 }
  0x4f   : > { %2107 = vperm.xlu0 %8534, %v2057_v50   ;;  %v706_v5 = vsub.f32 1.0, %v690_v60  ;;  %v699_v6 = vsub.f32 1.0, %v683_v61  ;;  %v703_v7 = vsub.f32 1.0, %v687_v62  ;;  %v689_v8 = vand.u32 2147483647, %v673_v54  ;;  %v2064_v61 = vld [vmem:[%s11100_s3 + $0x78] sm:$0xff] }
  0x50   : > { %2112 = vperm.xlu1 %8535, %v2058_v55   ;;  %v716_v11 = vmax.f32 %v700_v0, 0.0  ;;  %v720_v12 = vmax.f32 %v704_v1, 0.0  ;;  %v718_v13 = vmax.f32 %v702_v2, 0.0  ;;  %v701_v14 = vsub.f32 1.0, %v685_v3 }
  0x51   : > { %v722_v15 = vmax.f32 %v706_v5, 0.0  ;;  %v715_v16 = vmax.f32 %v699_v6, 0.0  ;;  %v719_v17 = vmax.f32 %v703_v7, 0.0  ;;  %v705_v18 = vsub.f32 1.0, %v689_v8 }
  0x52   : > { %v740_v19 = vpack.c.bf16 %v720_v12, %v716_v11  ;;  %v717_v20 = vmax.f32 %v701_v14, 0.0  ;;  %v692_v22 = vand.u32 2147483647, %v676_v59  ;;  %v696_v23 = vand.u32 2147483647, %v680_v63 }
  0x53   : > { %2117 = vperm.xlu0 %8534, %v2059_v4   ;;  %v742_v27 = vpack.c.bf16 %v722_v15, %v718_v13  ;;  %v739_v29 = vpack.c.bf16 %v719_v17, %v715_v16  ;;  %v721_v30 = vmax.f32 %v705_v18, 0.0  ;;  %v678_v31 = vsub.f32 %v8954_v35, %v8961_v39  ;;  %v2561_v15 = vld [vmem:[%s11103_s6 + $0x8] sm:$0xff] }
  0x54   : > { %2122 = vperm.xlu1 %8535, %v2060_v10   ;;  %780 = vmatprep.subr.bf16.mxu0 %v740_v19  ;;  %v708_v36 = vsub.f32 1.0, %v692_v22  ;;  %v712_v37 = vsub.f32 1.0, %v696_v23  ;;  %v682_v38 = vsub.f32 %v8972_v43, %v8961_v39  ;;  %v675_v42 = vsub.f32 %v8954_v35, %v8964_v40  ;;  %v2560_v10 = vld [vmem:[%s11103_s6] sm:$0xff] }
  0x55   : > { %853 = vmatprep.subr.bf16.mxu1 %v742_v27  ;;  %781 = vmatpush1.bf16.msra.mxu0 %v739_v29  ;;  %v741_v46 = vpack.c.bf16 %v721_v30, %v717_v20  ;;  %v694_v47 = vand.u32 2147483647, %v678_v31  ;;  %v679_v48 = vsub.f32 %v8972_v43, %v8964_v40  ;;  %v677_v49 = vsub.f32 %v8954_v35, %v8967_v41  ;;  %v2063_v40 = vld [vmem:[%s11100_s3 + $0x70] sm:$0xff]  ;;  %v8536_v20 = vld [vmem:[%s8935_s21] sm:$0xff]  }
  0x56   : > { %v724_v50 = vmax.f32 %v708_v36, 0.0  ;;  %v728_v51 = vmax.f32 %v712_v37, 0.0  ;;  %v698_v52 = vand.u32 2147483647, %v682_v38  ;;  %v691_v53 = vand.u32 2147483647, %v675_v42 }
  0x57   : > { %2127 = vperm.xlu0 %8534, %v2061_v24   ;;  %854 = vmatpush1.bf16.msra.mxu1 %v741_v46  ;;  %v710_v39 = vsub.f32 1.0, %v694_v47  ;;  %v695_v54 = vand.u32 2147483647, %v679_v48  ;;  %v681_v55 = vsub.f32 %v8972_v43, %v8967_v41  ;;  %v693_v56 = vand.u32 2147483647, %v677_v49  ;;  %v2562_v36 = vld [vmem:[%s11103_s6 + $0x10] sm:$0xff] }
  0x58   : > { %2132 = vperm.xlu1 %8535, %v2062_v34   ;;  %v744_v57 = vpack.c.bf16 %v728_v51, %v724_v50  ;;  %v714_v58 = vsub.f32 1.0, %v698_v52  ;;  %v707_v59 = vsub.f32 1.0, %v691_v53  ;;  %v9029_v60 = vrot.slane %v8974_v44, %v8930_v21  ;;  %v2563_v37 = vld [vmem:[%s11103_s6 + $0x18] sm:$0xff] }
  0x59   : > { %v726_v62 = vmax.f32 %v710_v39, 0.0  ;;  %v711_v41 = vsub.f32 1.0, %v695_v54  ;;  %v697_v63 = vand.u32 2147483647, %v681_v55  ;;  %v709_v0 = vsub.f32 1.0, %v693_v56  ;;  %v2564_v54 = vld [vmem:[%s11103_s6 + $0x20] sm:$0xff] }
  0x5a   : > { %782 = vmatprep.subr.bf16.mxu0 %v744_v57  ;;  %v730_v1 = vmax.f32 %v714_v58, 0.0  ;;  %v723_v2 = vmax.f32 %v707_v59, 0.0  ;;  %v1149_v3 = vsub.f32 %v8950_v32, %v9029_v60  ;;  %v1153_v4 = vsub.f32 %v8952_v33, %v9029_v60 }
  0x5b   : > { %2137 = vperm.xlu0 %8534, %v2063_v40   ;;  %v727_v5 = vmax.f32 %v711_v41, 0.0  ;;  %v713_v6 = vsub.f32 1.0, %v697_v63  ;;  %v725_v7 = vmax.f32 %v709_v0, 0.0  ;;  %v9040_v8 = vrot.slane %v8974_v44, %v8943_v25  ;;  %v2565_v41 = vld [vmem:[%s11103_s6 + $0x28] sm:$0xff] }
  0x5c   : > { %2142 = vperm.xlu1 %8535, %v2064_v61   ;;  %v746_v11 = vpack.c.bf16 %v730_v1, %v726_v62  ;;  %v1165_v12 = vand.u32 2147483647, %v1149_v3  ;;  %v1169_v13 = vand.u32 2147483647, %v1153_v4  ;;  %v9047_v14 = vrot.slane %v8974_v44, %v8945_v26  ;;  %v8537_v63 = vld [vmem:[%s8935_s21 + $0x8] sm:$0xff]  }
  0x5d   : > { %v743_v16 = vpack.c.bf16 %v727_v5, %v723_v2  ;;  %v729_v17 = vmax.f32 %v713_v6, 0.0  ;;  %v1151_v18 = vsub.f32 %v8950_v32, %v9040_v8  ;;  %v1155_v19 = vsub.f32 %v8952_v33, %v9040_v8 }
  0x5e   : > { %855 = vmatprep.subr.bf16.mxu1 %v746_v11  ;;  %v1181_v22 = vsub.f32 1.0, %v1165_v12  ;;  %v1185_v23 = vsub.f32 1.0, %v1169_v13  ;;  %v1148_v24 = vsub.f32 %v8950_v32, %v9047_v14  ;;  %v1152_v27 = vsub.f32 %v8952_v33, %v9047_v14 }
  0x5f   : > { %2578 = vperm.xlu0 %8534, %v2560_v10   ;;  %783 = vmatpush1.bf16.msra.mxu0 %v743_v16  ;;  %v745_v29 = vpack.c.bf16 %v729_v17, %v725_v7  ;;  %v1167_v30 = vand.u32 2147483647, %v1151_v18  ;;  %v1171_v31 = vand.u32 2147483647, %v1155_v19  ;;  %v9063_v34 = vrot.slane %v8974_v44, %v8947_v28  ;;  %v2566_v7 = vld [vmem:[%s11103_s6 + $0x30] sm:$0xff] }
  0x60   : > { %2583 = vperm.xlu1 %8535, %v2561_v15   ;;  %v1197_v38 = vmax.f32 %v1181_v22, 0.0  ;;  %v1201_v42 = vmax.f32 %v1185_v23, 0.0  ;;  %v1164_v46 = vand.u32 2147483647, %v1148_v24  ;;  %v1168_v47 = vand.u32 2147483647, %v1152_v27 }
  0x61   : > { %856 = vmatpush1.bf16.msra.mxu1 %v745_v29  ;;  %v1183_v48 = vsub.f32 1.0, %v1167_v30  ;;  %v1187_v49 = vsub.f32 1.0, %v1171_v31  ;;  %v1150_v44 = vsub.f32 %v8950_v32, %v9063_v34  ;;  %v1154_v50 = vsub.f32 %v8952_v33, %v9063_v34  ;;  %v2567_v23 = vld [vmem:[%s11103_s6 + $0x38] sm:$0xff] }
  0x62   : > { %7865 = vmatmul.mubr.msk.bf16.vlgmr.msra.gmra.mrb[0].mxu0 %vm767_vm0, %v8536_v20  ;;  %v1222_v51 = vpack.c.bf16 %v1201_v42, %v1197_v38  ;;  %v1180_v52 = vsub.f32 1.0, %v1164_v46  ;;  %v1184_v53 = vsub.f32 1.0, %v1168_v47  ;;  %v1157_v39 = vsub.f32 %v8954_v35, %v9029_v60  ;;  %v2568_v38 = vld [vmem:[%s11103_s6 + $0x40] sm:$0xff]  ;;  %v8538_v42 = vld [vmem:[%s8935_s21 + $0x10] sm:$0xff]  }
  0x63   : > { %2588 = vperm.xlu0 %8534, %v2562_v36   ;;  %822 = vmatprep.mubr.bf16.mxu0 %v11119_v9  ;;  %v1199_v55 = vmax.f32 %v1183_v48, 0.0  ;;  %v1203_v56 = vmax.f32 %v1187_v49, 0.0  ;;  %v1166_v40 = vand.u32 2147483647, %v1150_v44  ;;  %v1170_v57 = vand.u32 2147483647, %v1154_v50 }
  0x64   : > { %2593 = vperm.xlu1 %8535, %v2563_v37   ;;  %7869 = vmatmul.mubr.msk.bf16.vlgmr.msra.gmra.mrb[0].mxu1 %vm767_vm0, %v8536_v20  ;;  %v1196_v58 = vmax.f32 %v1180_v52, 0.0  ;;  %v1200_v59 = vmax.f32 %v1184_v53, 0.0  ;;  %v1161_v61 = vsub.f32 %v8972_v43, %v9029_v60  ;;  %v1173_v62 = vand.u32 2147483647, %v1157_v39 }
  0x65   : > { %1261 = vmatprep.subr.bf16.mxu0 %v1222_v51  ;;  %895 = vmatprep.mubr.bf16.mxu1 %v11119_v9  ;;  %v1224_v0 = vpack.c.bf16 %v1203_v56, %v1199_v55  ;;  %v1182_v1 = vsub.f32 1.0, %v1166_v40  ;;  %v1186_v2 = vsub.f32 1.0, %v1170_v57  ;;  %v1159_v3 = vsub.f32 %v8954_v35, %v9040_v8  ;;  %v2570_v55 = vld [vmem:[%s11103_s6 + $0x50] sm:$0xff] }
  0x66   : > { %v1221_v4 = vpack.c.bf16 %v1200_v59, %v1196_v58  ;;  %v1177_v5 = vand.u32 2147483647, %v1161_v61  ;;  %v1189_v6 = vsub.f32 1.0, %v1173_v62  ;;  %v1163_v60 = vsub.f32 %v8972_v43, %v9040_v8  ;;  %v2572_v62 = vld [vmem:[%s11103_s6 + $0x60] sm:$0xff] }
  0x67   : > { %2598 = vperm.xlu0 %8534, %v2564_v54   ;;  %1334 = vmatprep.subr.bf16.mxu1 %v1224_v0  ;;  %v1198_v10 = vmax.f32 %v1182_v1, 0.0  ;;  %v1202_v11 = vmax.f32 %v1186_v2, 0.0  ;;  %v1175_v12 = vand.u32 2147483647, %v1159_v3  ;;  %v1156_v13 = vsub.f32 %v8954_v35, %v9047_v14  ;;  %v8539_v3 = vld [vmem:[%s8935_s21 + $0x18] sm:$0xff]  }
  0x68   : > { %2603 = vperm.xlu1 %8535, %v2565_v41   ;;  %1262 = vmatpush1.bf16.msra.mxu0 %v1221_v4  ;;  %v1193_v15 = vsub.f32 1.0, %v1177_v5  ;;  %v1205_v16 = vmax.f32 %v1189_v6, 0.0  ;;  %v1179_v17 = vand.u32 2147483647, %v1163_v60  ;;  %v1160_v8 = vsub.f32 %v8972_v43, %v9047_v14 }
  0x69   : > { %v1223_v18 = vpack.c.bf16 %v1202_v11, %v1198_v10  ;;  %v1191_v19 = vsub.f32 1.0, %v1175_v12  ;;  %v1172_v20 = vand.u32 2147483647, %v1156_v13  ;;  %v1158_v22 = vsub.f32 %v8954_v35, %v9063_v34 }
  0x6a   : > { %7866 = vmatmul.mubr.msk.bf16.gmra.mrb[4].mxu0 %vm767_vm0, %v8537_v63  ;;  %v1209_v24 = vmax.f32 %v1193_v15, 0.0  ;;  %v1195_v27 = vsub.f32 1.0, %v1179_v17  ;;  %v1176_v29 = vand.u32 2147483647, %v1160_v8  ;;  %v1162_v30 = vsub.f32 %v8972_v43, %v9063_v34 }
  0x6b   : > { %2608 = vperm.xlu0 %8534, %v2566_v7   ;;  %832 = vmatprep.mubr.bf16.mxu0 %v11119_v9  ;;  %v1207_v14 = vmax.f32 %v1191_v19, 0.0  ;;  %v1188_v31 = vsub.f32 1.0, %v1172_v20  ;;  %v1174_v36 = vand.u32 2147483647, %v1158_v22  ;;  %v1520_v37 = vmul.f32 32.0, %v8976_v45  ;;  %v2569_v45 = vld [vmem:[%s11103_s6 + $0x48] sm:$0xff] }
  0x6c   : > { %1335 = vmatpush1.bf16.msra.mxu1 %v1223_v18  ;;  %v1226_v46 = vpack.c.bf16 %v1209_v24, %v1205_v16  ;;  %v1211_v47 = vmax.f32 %v1195_v27, 0.0  ;;  %v1192_v48 = vsub.f32 1.0, %v1176_v29  ;;  %v1178_v34 = vand.u32 2147483647, %v1162_v30  ;;  %2613 = vperm.xlu1 %8535, %v2567_v23   ;;  %v2574_v22 = vld [vmem:[%s11103_s6 + $0x70] sm:$0xff]  ;;  %v2573_v30 = vld [vmem:[%s11103_s6 + $0x68] sm:$0xff] }
  0x6d   : > { %7870 = vmatmul.mubr.msk.bf16.gmra.mrb[4].mxu1 %vm767_vm0, %v8537_v63  ;;  %v1204_v49 = vmax.f32 %v1188_v31, 0.0  ;;  %v1190_v44 = vsub.f32 1.0, %v1174_v36  ;;  %v7900_v50 = vadd.f32 -1.0, %v1520_v37  ;;  %v2571_v63 = vld [vmem:[%s11103_s6 + $0x58] sm:$0xff] }
  0x6e   : > { %905 = vmatprep.mubr.bf16.mxu1 %v11119_v9  ;;  %1263 = vmatprep.subr.bf16.mxu0 %v1226_v46  ;;  %v1228_v51 = vpack.c.bf16 %v1211_v47, %v1207_v14  ;;  %v1208_v52 = vmax.f32 %v1192_v48, 0.0  ;;  %v1194_v53 = vsub.f32 1.0, %v1178_v34 }
  0x6f   : > { %2618 = vperm.xlu0 %8534, %v2568_v38   ;;  %v1206_v39 = vmax.f32 %v1190_v44, 0.0  ;;  %v1522_v54 = vmul.f32 0.5, %v7900_v50  ;;  %v7971_v44 = vld [vmem:[%s11103_s6 + $0x80] sm:$0xff]  ;;  %v2575_v50 = vld [vmem:[%s11103_s6 + $0x78] sm:$0xff] }
  0x70   : > { %1336 = vmatprep.subr.bf16.mxu1 %v1228_v51  ;;  %v1225_v56 = vpack.c.bf16 %v1208_v52, %v1204_v49  ;;  %v1210_v40 = vmax.f32 %v1194_v53, 0.0  ;;  %2623 = vperm.xlu1 %8535, %v2569_v45   ;;  %v8540_v45 = vld [vmem:[%s8935_s21 + $0x20] sm:$0xff]  }
  0x71   : > { %v9124_v57 = vrot.slane %v1522_v54, %v8930_v21  ;;  %v9127_v58 = vrot.slane %v1522_v54, %v8943_v25  ;;  %v9130_v59 = vrot.slane %v1522_v54, %v8945_v26  ;;  %v9133_v61 = vrot.slane %v1522_v54, %v8947_v28 }
  0x72   : > { %7867 = vmatmul.mubr.msk.bf16.gmra.mrb[8].mxu0 %vm767_vm0, %v8538_v42  ;;  %v1227_v41 = vpack.c.bf16 %v1210_v40, %v1206_v39 }
  0x73   : > { %2628 = vperm.xlu0 %8534, %v2570_v55   ;;  %842 = vmatprep.mubr.bf16.mxu0 %v11119_v9  ;;  %v1630_v0 = vsub.f32 %v8950_v32, %v9124_v57  ;;  %v1634_v1 = vsub.f32 %v8952_v33, %v9124_v57  ;;  %v1632_v2 = vsub.f32 %v8950_v32, %v9127_v58 }
  0x74   : > { %1264 = vmatpush1.bf16.msra.mxu0 %v1225_v56  ;;  %v1636_v4 = vsub.f32 %v8952_v33, %v9127_v58  ;;  %v1629_v5 = vsub.f32 %v8950_v32, %v9130_v59  ;;  %v1633_v6 = vsub.f32 %v8952_v33, %v9130_v59  ;;  %v1631_v60 = vsub.f32 %v8950_v32, %v9133_v61 }
  0x75   : > { %7871 = vmatmul.mubr.msk.bf16.gmra.mrb[8].mxu1 %vm767_vm0, %v8538_v42  ;;  %v1646_v7 = vand.u32 2147483647, %v1630_v0  ;;  %v1650_v10 = vand.u32 2147483647, %v1634_v1  ;;  %v1648_v11 = vand.u32 2147483647, %v1632_v2  ;;  %v1635_v12 = vsub.f32 %v8952_v33, %v9133_v61  ;;  %2633 = vperm.xlu1 %8535, %v2571_v63  }
  0x76   : > { %915 = vmatprep.mubr.bf16.mxu1 %v11119_v9  ;;  %1337 = vmatpush1.bf16.msra.mxu1 %v1227_v41  ;;  %v1652_v13 = vand.u32 2147483647, %v1636_v4  ;;  %v1645_v15 = vand.u32 2147483647, %v1629_v5  ;;  %v1649_v16 = vand.u32 2147483647, %v1633_v6  ;;  %v1638_v17 = vsub.f32 %v8954_v35, %v9124_v57 }
  0x77   : > { %2638 = vperm.xlu0 %8534, %v2572_v62   ;;  %v1662_v8 = vsub.f32 1.0, %v1646_v7  ;;  %v1666_v18 = vsub.f32 1.0, %v1650_v10  ;;  %v1664_v19 = vsub.f32 1.0, %v1648_v11  ;;  %v1647_v20 = vand.u32 2147483647, %v1631_v60 }
  0x78   : > { %v1668_v23 = vsub.f32 1.0, %v1652_v13  ;;  %v1661_v24 = vsub.f32 1.0, %v1645_v15  ;;  %v1665_v27 = vsub.f32 1.0, %v1649_v16  ;;  %v1651_v29 = vand.u32 2147483647, %v1635_v12 }
  0x79   : > { %v1678_v14 = vmax.f32 %v1662_v8, 0.0  ;;  %v1682_v31 = vmax.f32 %v1666_v18, 0.0  ;;  %v1680_v36 = vmax.f32 %v1664_v19, 0.0  ;;  %v1663_v37 = vsub.f32 1.0, %v1647_v20  ;;  %2643 = vperm.xlu1 %8535, %v2573_v30  }
  0x7a   : > { %7868 = vmatmul.mubr.msk.bf16.gmra.mrb[12].mxu0 %vm767_vm0, %v8539_v3  ;;  %v1684_v38 = vmax.f32 %v1668_v23, 0.0  ;;  %v1677_v42 = vmax.f32 %v1661_v24, 0.0  ;;  %v1681_v46 = vmax.f32 %v1665_v27, 0.0  ;;  %v1667_v47 = vsub.f32 1.0, %v1651_v29  ;;  %v7974_v24 = vld [vmem:[%s11103_s6 + $0x98] sm:$0xff]  ;;  %v8541_v29 = vld [vmem:[%s8935_s21 + $0x28] sm:$0xff]  }
  0x7b   : > { %2648 = vperm.xlu0 %8534, %v2574_v22   ;;  %1293 = vmatprep.mubr.bf16.mxu0 %v11119_v9  ;;  %v1703_v48 = vpack.c.bf16 %v1682_v31, %v1678_v14  ;;  %v1642_v34 = vsub.f32 %v8972_v43, %v9124_v57  ;;  %v1654_v49 = vand.u32 2147483647, %v1638_v17  ;;  %v1679_v52 = vmax.f32 %v1663_v37, 0.0  ;;  %v7973_v57 = vld [vmem:[%s11103_s6 + $0x90] sm:$0xff]  ;;  %v7976_v37 = vld [vmem:[%s11103_s6 + $0xa8] sm:$0xff] }
  0x7c   : > { %v1705_v51 = vpack.c.bf16 %v1684_v38, %v1680_v36  ;;  %v1683_v53 = vmax.f32 %v1667_v47, 0.0  ;;  %v1640_v39 = vsub.f32 %v8954_v35, %v9127_v58  ;;  %v1644_v56 = vsub.f32 %v8972_v43, %v9127_v58  ;;  %v7977_v31 = vld [vmem:[%s11103_s6 + $0xb0] sm:$0xff]  ;;  %v7979_v38 = vld [vmem:[%s11103_s6 + $0xc0] sm:$0xff] }
  0x7d   : > { %7872 = vmatmul.mubr.msk.bf16.gmra.mrb[12].mxu1 %vm767_vm0, %v8539_v3  ;;  %1742 = vmatprep.subr.bf16.mxu0 %v1703_v48  ;;  %v1658_v54 = vand.u32 2147483647, %v1642_v34  ;;  %v1670_v55 = vsub.f32 1.0, %v1654_v49  ;;  %v1637_v40 = vsub.f32 %v8954_v35, %v9130_v59  ;;  %v1702_v62 = vpack.c.bf16 %v1681_v46, %v1677_v42  ;;  %v7978_v42 = vld [vmem:[%s11103_s6 + $0xb8] sm:$0xff]  ;;  %v8542_v46 = vld [vmem:[%s8935_s21 + $0x30] sm:$0xff]   ;;  %v7980_v48 = vld [vmem:[%s11103_s6 + $0xc8] sm:$0xff] }
  0x7e   : > { %1366 = vmatprep.mubr.bf16.mxu1 %v11119_v9  ;;  %1815 = vmatprep.subr.bf16.mxu1 %v1705_v51  ;;  %v1656_v41 = vand.u32 2147483647, %v1640_v39  ;;  %v1641_v63 = vsub.f32 %v8972_v43, %v9130_v59  ;;  %v1639_v0 = vsub.f32 %v8954_v35, %v9133_v61  ;;  %v1660_v58 = vand.u32 2147483647, %v1644_v56  ;;  %v7972_v59 = vld [vmem:[%s11103_s6 + $0x88] sm:$0xff]  ;;  %v7981_v47 = vld [vmem:[%s11103_s6 + $0xd0] sm:$0xff] }
  0x7f   : > { %3062 = vperm.xlu0 %8534, %v7971_v44   ;;  %v1674_v1 = vsub.f32 1.0, %v1658_v54  ;;  %v1686_v2 = vmax.f32 %v1670_v55, 0.0  ;;  %v1653_v3 = vand.u32 2147483647, %v1637_v40  ;;  %2653 = vperm.xlu1 %8535, %v2575_v50   ;;  %v1643_v6 = vsub.f32 %v8972_v43, %v9133_v61  ;;  %v7975_v61 = vld [vmem:[%s11103_s6 + $0xa0] sm:$0xff]  ;;  %v7982_v49 = vld [vmem:[%s11103_s6 + $0xd8] sm:$0xff] }
  0x80   : > { %v1672_v4 = vsub.f32 1.0, %v1656_v41  ;;  %v1657_v5 = vand.u32 2147483647, %v1641_v63  ;;  %v1655_v60 = vand.u32 2147483647, %v1639_v0  ;;  %v1704_v7 = vpack.c.bf16 %v1683_v53, %v1679_v52  ;;  %v7983_v34 = vld [vmem:[%s11103_s6 + $0xe0] sm:$0xff] }
  0x81   : > { %v1690_v10 = vmax.f32 %v1674_v1, 0.0  ;;  %v1676_v11 = vsub.f32 1.0, %v1660_v58  ;;  %v1669_v12 = vsub.f32 1.0, %v1653_v3  ;;  %v1659_v16 = vand.u32 2147483647, %v1643_v6  ;;  %v8543_v44 = vld [vmem:[%s8935_s21 + $0x38] sm:$0xff]  }
  0x82   : > { %7889 = vmatmul.mubr.msk.bf16.vlgmr.msra.gmra.mrb[16].mxu0 %vm767_vm0, %v8540_v45  ;;  %v1688_v13 = vmax.f32 %v1672_v4, 0.0  ;;  %v1673_v15 = vsub.f32 1.0, %v1657_v5  ;;  %v1671_v17 = vsub.f32 1.0, %v1655_v60  ;;  %v7985_v50 = vld [vmem:[%s11103_s6 + $0xf0] sm:$0xff]  ;;  %v8011_v51 = vld [vmem:[%s11103_s6 + $0x100] sm:$0xff]  ;;  %v8545_v53 = vld [vmem:[%s8935_s21 + $0x48] sm:$0xff]  }
  0x83   : > { %3072 = vperm.xlu0 %8534, %v7973_v57   ;;  %1303 = vmatprep.mubr.bf16.mxu0 %v11119_v9  ;;  %v1707_v8 = vpack.c.bf16 %v1690_v10, %v1686_v2  ;;  %v1692_v18 = vmax.f32 %v1676_v11, 0.0  ;;  %v1685_v19 = vmax.f32 %v1669_v12, 0.0  ;;  %v1675_v22 = vsub.f32 1.0, %v1659_v16  ;;  %v8544_v52 = vld [vmem:[%s8935_s21 + $0x40] sm:$0xff]   ;;  %v8546_v39 = vld [vmem:[%s8935_s21 + $0x50] sm:$0xff]   ;;  %v8547_v54 = vld [vmem:[%s8935_s21 + $0x58] sm:$0xff]  }
  0x84   : > { %1743 = vmatpush1.bf16.msra.mxu0 %v1702_v62  ;;  %v1689_v20 = vmax.f32 %v1673_v15, 0.0  ;;  %v1687_v23 = vmax.f32 %v1671_v17, 0.0  ;;  %3067 = vperm.xlu1 %8535, %v7972_v59   ;;  %v7986_v55 = vld [vmem:[%s11103_s6 + $0xf8] sm:$0xff]  ;;  %v8013_v56 = vld [vmem:[%s11103_s6 + $0x110] sm:$0xff]  ;;  %v8012_v40 = vld [vmem:[%s11103_s6 + $0x108] sm:$0xff]  ;;  %s532_s21 = scalar_lea.vmem [#allocation3], %s7856_s14 }
  0x85   : > { %7893 = vmatmul.mubr.msk.bf16.vlgmr.msra.gmra.mrb[16].mxu1 %vm767_vm0, %v8540_v45  ;;  %v1709_v27 = vpack.c.bf16 %v1692_v18, %v1688_v13  ;;  %1744 = vmatprep.subr.bf16.mxu0 %v1707_v8  ;;  %v1691_v14 = vmax.f32 %v1675_v22, 0.0  ;;  %v7984_v45 = vld [vmem:[%s11103_s6 + $0xe8] sm:$0xff]  ;;  %v8015_v57 = vld [vmem:[%s11103_s6 + $0x120] sm:$0xff]  ;;  %v8014_v62 = vld [vmem:[%s11103_s6 + $0x118] sm:$0xff]  ;;  %s7752_s0 = sshll.u32 %s532_s21, 4  ;;  %s7736_s14 = scalar_lea.sflag [#allocation4], %s8905_s29  ;;  %s11045_s0 = int_to_ptr.vmem [resolvable:$true] %s7752_s0 }
  0x86   : > { %1376 = vmatprep.mubr.bf16.mxu1 %v11119_v9  ;;  %1816 = vmatpush1.bf16.msra.mxu1 %v1704_v7  ;;  %v1706_v30 = vpack.c.bf16 %v1689_v20, %v1685_v19  ;;  %v8017_v41 = vld [vmem:[%s11103_s6 + $0x130] sm:$0xff]  ;;  %v8016_v63 = vld [vmem:[%s11103_s6 + $0x128] sm:$0xff]  ;;  %v8019_v0 = vld [vmem:[%s11103_s6 + $0x140] sm:$0xff] }
  0x87   : > { %3082 = vperm.xlu0 %8534, %v7975_v61   ;;  %1817 = vmatprep.subr.bf16.mxu1 %v1709_v27  ;;  %v1708_v36 = vpack.c.bf16 %v1691_v14, %v1687_v23  ;;  %v8018_v1 = vld [vmem:[%s11103_s6 + $0x138] sm:$0xff]  ;;  %v8021_v2 = vld [vmem:[%s11103_s6 + $0x150] sm:$0xff]  ;;  %v8020_v58 = vld [vmem:[%s11103_s6 + $0x148] sm:$0xff] }
  0x88   : > { %1745 = vmatpush1.bf16.msra.mxu0 %v1706_v30  ;;  %3077 = vperm.xlu1 %8535, %v7974_v24   ;;  %v8023_v3 = vld [vmem:[%s11103_s6 + $0x160] sm:$0xff]  ;;  %v8022_v4 = vld [vmem:[%s11103_s6 + $0x158] sm:$0xff]  ;;  %v8025_v5 = vld [vmem:[%s11103_s6 + $0x170] sm:$0xff] }
  0x89   : > { %v8024_v6 = vld [vmem:[%s11103_s6 + $0x168] sm:$0xff]  ;;  %v8051_v7 = vld [vmem:[%s11103_s6 + $0x180] sm:$0xff]  ;;  %v8026_v10 = vld [vmem:[%s11103_s6 + $0x178] sm:$0xff] }
  0x8a   : > { %7890 = vmatmul.mubr.msk.bf16.gmra.mrb[20].mxu0 %vm767_vm0, %v8541_v29  ;;  %1818 = vmatpush1.bf16.msra.mxu1 %v1708_v36  ;;  %v8053_v12 = vld [vmem:[%s11103_s6 + $0x190] sm:$0xff]  ;;  %v8052_v13 = vld [vmem:[%s11103_s6 + $0x188] sm:$0xff]  ;;  %v8055_v16 = vld [vmem:[%s11103_s6 + $0x1a0] sm:$0xff] }
  0x8b   : > { %1313 = vmatprep.mubr.bf16.mxu0 %v11119_v9  ;;  %3092 = vperm.xlu0 %8534, %v7977_v31   ;;  %v8054_v61 = vld [vmem:[%s11103_s6 + $0x198] sm:$0xff]  ;;  %v8057_v8 = vld [vmem:[%s11103_s6 + $0x1b0] sm:$0xff]  ;;  %v8056_v20 = vld [vmem:[%s11103_s6 + $0x1a8] sm:$0xff] }
  0x8c   : > { %3087 = vperm.xlu1 %8535, %v7976_v37   ;;  %v8059_v23 = vld [vmem:[%s11103_s6 + $0x1c0] sm:$0xff]  ;;  %v8058_v27 = vld [vmem:[%s11103_s6 + $0x1b8] sm:$0xff]  ;;  %v8061_v30 = vld [vmem:[%s11103_s6 + $0x1d0] sm:$0xff] }
  0x8d   : > { %7894 = vmatmul.mubr.msk.bf16.gmra.mrb[20].mxu1 %vm767_vm0, %v8541_v29  ;;  %v8060_v31 = vld [vmem:[%s11103_s6 + $0x1c8] sm:$0xff]  ;;  %v8063_v37 = vld [vmem:[%s11103_s6 + $0x1e0] sm:$0xff] }
  0x8e   : > { %1386 = vmatprep.mubr.bf16.mxu1 %v11119_v9 }
  0x8f   : > { %3102 = vperm.xlu0 %8534, %v7979_v38  }
  0x90   : > { %3097 = vperm.xlu1 %8535, %v7978_v42   ;;  %v8062_v42 = vld [vmem:[%s11103_s6 + $0x1d8] sm:$0xff] }
  0x92   : > { %7891 = vmatmul.mubr.msk.bf16.gmra.mrb[24].mxu0 %vm767_vm0, %v8542_v46 }
  0x93   : > { %1323 = vmatprep.mubr.bf16.mxu0 %v11119_v9  ;;  %3112 = vperm.xlu0 %8534, %v7981_v47   ;;  %v550_v47 = vld [vmem:[%s8919_s22] ss:$8 sm:$0xf] }
  0x94   : > { %3107 = vperm.xlu1 %8535, %v7980_v48  }
  0x95   : > { %7895 = vmatmul.mubr.msk.bf16.gmra.mrb[24].mxu1 %vm767_vm0, %v8542_v46  ;;  %v8065_v46 = vld [vmem:[%s11103_s6 + $0x1f0] sm:$0xff] }
  0x96   : > { %1396 = vmatprep.mubr.bf16.mxu1 %v11119_v9 }
  0x97   : > { %3122 = vperm.xlu0 %8534, %v7983_v34  }
  0x98   : > { %3117 = vperm.xlu1 %8535, %v7982_v49   ;;  %v8064_v49 = vld [vmem:[%s11103_s6 + $0x1e8] sm:$0xff] }
  0x9a   : > { %7892 = vmatmul.mubr.msk.bf16.gmra.mrb[28].mxu0 %vm767_vm0, %v8543_v44 }
  0x9b   : > { %1774 = vmatprep.mubr.bf16.mxu0 %v11119_v9  ;;  %3132 = vperm.xlu0 %8534, %v7985_v50   ;;  %v8091_v50 = vld [vmem:[%s11103_s6 + $0x200] sm:$0xff] }
  0x9c   : > { %3127 = vperm.xlu1 %8535, %v7984_v45   ;;  %v8066_v45 = vld [vmem:[%s11103_s6 + $0x1f8] sm:$0xff] }
  0x9d   : > { %7896 = vmatmul.mubr.msk.bf16.gmra.mrb[28].mxu1 %vm767_vm0, %v8543_v44  ;;  %v553_v44 = vadd.f32 1.0, %v550_v47  ;;  %v8103_v47 = vld [vmem:[%s11103_s6 + $0x260] sm:$0xff] }
  0x9e   : > { %1847 = vmatprep.mubr.bf16.mxu1 %v11119_v9 }
  0x9f   : > { %3546 = vperm.xlu0 %8534, %v8011_v51  }
  0xa0   : > { %3137 = vperm.xlu1 %8535, %v7986_v55  }
  0xa2   : > { %7913 = vmatmul.mubr.msk.bf16.vlgmr.msra.gmra.mrb[32].mxu0 %vm767_vm0, %v8544_v52 }
  0xa3   : > { %1784 = vmatprep.mubr.bf16.mxu0 %v11119_v9  ;;  %3556 = vperm.xlu0 %8534, %v8013_v56  }
  0xa4   : > { %3551 = vperm.xlu1 %8535, %v8012_v40  }
  0xa5   : > { %7917 = vmatmul.mubr.msk.bf16.vlgmr.msra.gmra.mrb[32].mxu1 %vm767_vm0, %v8544_v52 }
  0xa6   : > { %1857 = vmatprep.mubr.bf16.mxu1 %v11119_v9 }
  0xa7   : > { %3566 = vperm.xlu0 %8534, %v8015_v57   ;;  %v8095_v57 = vld [vmem:[%s11103_s6 + $0x220] sm:$0xff] }
  0xa8   : > { %3561 = vperm.xlu1 %8535, %v8014_v62   ;;  %v8094_v62 = vld [vmem:[%s11103_s6 + $0x218] sm:$0xff] }
  0xaa   : > { %7914 = vmatmul.mubr.msk.bf16.gmra.mrb[36].mxu0 %vm767_vm0, %v8545_v53 }
  0xab   : > { %1794 = vmatprep.mubr.bf16.mxu0 %v11119_v9  ;;  %3576 = vperm.xlu0 %8534, %v8017_v41  }
  0xac   : > { %3571 = vperm.xlu1 %8535, %v8016_v63   ;;  %v8097_v63 = vld [vmem:[%s11103_s6 + $0x230] sm:$0xff] }
  0xad   : > { %7918 = vmatmul.mubr.msk.bf16.gmra.mrb[36].mxu1 %vm767_vm0, %v8545_v53  ;;  %v554_v53 = vmul.f32 32.0, %v553_v44 }
  0xae   : > { %1867 = vmatprep.mubr.bf16.mxu1 %v11119_v9 }
  0xaf   : > { %3586 = vperm.xlu0 %8534, %v8019_v0   ;;  %v7859_v55 = vadd.f32 -1.0, %v554_v53  ;;  %v8096_v0 = vld [vmem:[%s11103_s6 + $0x228] sm:$0xff] }
  0xb0   : > { %3581 = vperm.xlu1 %8535, %v8018_v1  }
  0xb1   : > { %v556_v41 = vmul.f32 0.5, %v7859_v55 }
  0xb2   : > { %7915 = vmatmul.mubr.msk.bf16.gmra.mrb[40].mxu0 %vm767_vm0, %v8546_v39 }
  0xb3   : > { %1804 = vmatprep.mubr.bf16.mxu0 %v11119_v9  ;;  %3596 = vperm.xlu0 %8534, %v8021_v2  }
  0xb4   : > { %3591 = vperm.xlu1 %8535, %v8020_v58   ;;  %v9440_v58 = vrot.slane %v556_v41, %v8945_v26 }
  0xb5   : > { %7919 = vmatmul.mubr.msk.bf16.gmra.mrb[40].mxu1 %vm767_vm0, %v8546_v39  ;;  %v8093_v39 = vld [vmem:[%s11103_s6 + $0x210] sm:$0xff] }
  0xb6   : > { %1877 = vmatprep.mubr.bf16.mxu1 %v11119_v9 }
  0xb7   : > { %3606 = vperm.xlu0 %8534, %v8023_v3   ;;  %v7873_v3 = vld [vmem:[%s8919_s22 + $0x2] ss:$8 sm:$0xf] }
  0xb8   : > { %3601 = vperm.xlu1 %8535, %v8022_v4   ;;  %v9444_v4 = vrot.slane %v556_v41, %v8947_v28 }
  0xba   : > { %7916 = vmatmul.mubr.msk.bf16.gmra.mrb[44].mxu0 %vm767_vm0, %v8547_v54 }
  0xbb   : > { %2254 = vmatprep.mubr.bf16.mxu0 %v11119_v9  ;;  %3616 = vperm.xlu0 %8534, %v8025_v5   ;;  %v8099_v5 = vld [vmem:[%s11103_s6 + $0x240] sm:$0xff] }
  0xbc   : > { %3611 = vperm.xlu1 %8535, %v8024_v6   ;;  %v8098_v6 = vld [vmem:[%s11103_s6 + $0x238] sm:$0xff] }
  0xbd   : > { %7920 = vmatmul.mubr.msk.bf16.gmra.mrb[44].mxu1 %vm767_vm0, %v8547_v54  ;;  %v8092_v54 = vld [vmem:[%s11103_s6 + $0x208] sm:$0xff] }
  0xbe   : > { %2367 = vmatprep.mubr.bf16.mxu1 %v11119_v9  ;;  %v9324_v60 = vpop.permute.xlu0 %2067  ;;  %v9337_v59 = vpop.permute.xlu1 %2077 }
  0xbf   : > { %11190 = vst [vmem:[#allocation12_spill] sm:$0xff] %v9324_v60  ;;  %4030 = vperm.xlu0 %8534, %v8051_v7   ;;  %11192 = vst [vmem:[#allocation14_spill] sm:$0xff] %v9337_v59  ;;  %v9453_v7 = vrot.slane %v556_v41, %v8930_v21 }
  0xc0   : > { %3621 = vperm.xlu1 %8535, %v8026_v10   ;;  %v9456_v10 = vrot.slane %v556_v41, %v8943_v25  ;;  %v8105_v41 = vld [vmem:[%s11103_s6 + $0x270] sm:$0xff] }
  0xc2   : > { %v9332_v11 = vpop.permute.xlu0 %2072  ;;  %v9347_v17 = vpop.permute.xlu1 %2082 }
  0xc3   : > { %11191 = vst [vmem:[#allocation13_spill] sm:$0xff] %v9332_v11  ;;  %4040 = vperm.xlu0 %8534, %v8053_v12   ;;  %11194 = vst [vmem:[#allocation16_spill] sm:$0xff] %v9347_v17  ;;  %v1034_v12 = vadd.f32 1.0, %v7873_v3  ;;  %v8104_v3 = vld [vmem:[%s11103_s6 + $0x268] sm:$0xff] }
  0xc4   : > { %4035 = vperm.xlu1 %8535, %v8052_v13   ;;  %v582_v13 = vsub.f32 %v8950_v32, %v9440_v58 }
  0xc6   : > { %v9342_v15 = vpop.permute.xlu0 %2087  ;;  %v9357_v19 = vpop.permute.xlu1 %2092 }
  0xc7   : > { %11193 = vst [vmem:[#allocation15_spill] sm:$0xff] %v9342_v15  ;;  %4050 = vperm.xlu0 %8534, %v8055_v16   ;;  %11196 = vst [vmem:[#allocation18_spill] sm:$0xff] %v9357_v19 }
  0xc8   : > { %4045 = vperm.xlu1 %8535, %v8054_v61   ;;  %v584_v61 = vsub.f32 %v8950_v32, %v9444_v4 }
  0xca   : > { %v9355_v18 = vpop.permute.xlu0 %2097 }
  0xcb   : > { %11195 = vst [vmem:[#allocation17_spill] sm:$0xff] %v9355_v18  ;;  %4060 = vperm.xlu0 %8534, %v8057_v8   ;;  %v9367_v24 = vpop.permute.xlu1 %2102 }
  0xcc   : > { %4055 = vperm.xlu1 %8535, %v8056_v20   ;;  %11198 = vst [vmem:[#allocation20_spill] sm:$0xff] %v9367_v24  ;;  %v8101_v20 = vld [vmem:[%s11103_s6 + $0x250] sm:$0xff] }
  0xce   : > { %v9362_v22 = vpop.permute.xlu0 %2107 }
  0xcf   : > { %11197 = vst [vmem:[#allocation19_spill] sm:$0xff] %v9362_v22  ;;  %4070 = vperm.xlu0 %8534, %v8059_v23   ;;  %v9377_v14 = vpop.permute.xlu1 %2112  ;;  %v8100_v23 = vld [vmem:[%s11103_s6 + $0x248] sm:$0xff] }
  0xd0   : > { %4065 = vperm.xlu1 %8535, %v8058_v27   ;;  %11200 = vst [vmem:[#allocation22_spill] sm:$0xff] %v9377_v14  ;;  %v583_v27 = vsub.f32 %v8950_v32, %v9453_v7 }
  0xd2   : > { %v9372_v29 = vpop.permute.xlu0 %2117  ;;  %v599_v44 = vand.u32 2147483647, %v583_v27  ;;  %v590_v27 = vsub.f32 %v8954_v35, %v9440_v58 }
  0xd3   : > { %11199 = vst [vmem:[#allocation21_spill] sm:$0xff] %v9372_v29  ;;  %4080 = vperm.xlu0 %8534, %v8061_v30   ;;  %v9387_v38 = vpop.permute.xlu1 %2122  ;;  %v585_v30 = vsub.f32 %v8950_v32, %v9456_v10 }
  0xd4   : > { %4075 = vperm.xlu1 %8535, %v8060_v31   ;;  %11202 = vst [vmem:[#allocation24_spill] sm:$0xff] %v9387_v38  ;;  %v1035_v31 = vmul.f32 32.0, %v1034_v12  ;;  %v606_v9 = vand.u32 2147483647, %v590_v27 }
  0xd6   : > { %v9382_v36 = vpop.permute.xlu0 %2127  ;;  %v7875_v55 = vadd.f32 -1.0, %v1035_v31 }
  0xd7   : > { %11201 = vst [vmem:[#allocation23_spill] sm:$0xff] %v9382_v36  ;;  %4090 = vperm.xlu0 %8534, %v8063_v37   ;;  %v9398_v34 = vpop.permute.xlu1 %2132  ;;  %v598_v37 = vand.u32 2147483647, %v582_v13 }
  0xd8   : > { %4085 = vperm.xlu1 %8535, %v8062_v42   ;;  %11204 = vst [vmem:[#allocation26_spill] sm:$0xff] %v9398_v34  ;;  %v600_v42 = vand.u32 2147483647, %v584_v61 }
  0xda   : > { %v9396_v48 = vpop.permute.xlu0 %2137 }
  0xdb   : > { %11203 = vst [vmem:[#allocation25_spill] sm:$0xff] %v9396_v48  ;;  %4100 = vperm.xlu0 %8534, %v8065_v46   ;;  %v9411_v52 = vpop.permute.xlu1 %2142  ;;  %v586_v46 = vsub.f32 %v8952_v33, %v9440_v58 }
  0xdc   : > { %4095 = vperm.xlu1 %8535, %v8064_v49   ;;  %11206 = vst [vmem:[#allocation28_spill] sm:$0xff] %v9411_v52  ;;  %v8102_v49 = vld [vmem:[%s11103_s6 + $0x258] sm:$0xff] }
  0xde   : > { %v9409_v51 = vpop.permute.xlu0 %2578 }
  0xdf   : > { %11205 = vst [vmem:[#allocation27_spill] sm:$0xff] %v9409_v51  ;;  %4514 = vperm.xlu0 %8534, %v8091_v50   ;;  %v9421_v40 = vpop.permute.xlu1 %2583  ;;  %v601_v50 = vand.u32 2147483647, %v585_v30  ;;  %v592_v30 = vsub.f32 %v8954_v35, %v9444_v4 }
  0xe0   : > { %4105 = vperm.xlu1 %8535, %v8066_v45   ;;  %11208 = vst [vmem:[#allocation30_spill] sm:$0xff] %v9421_v40  ;;  %v588_v45 = vsub.f32 %v8952_v33, %v9444_v4 }
  0xe2   : > { %v9419_v56 = vpop.permute.xlu0 %2588  ;;  %v604_v12 = vand.u32 2147483647, %v588_v45 }
  0xe3   : > { %4524 = vperm.xlu0 %8534, %v8093_v39   ;;  %11207 = vst [vmem:[#allocation29_spill] sm:$0xff] %v9419_v56  ;;  %v9437_v2 = vpop.permute.xlu1 %2593  ;;  %v587_v39 = vsub.f32 %v8952_v33, %v9453_v7 }
  0xe4   : > { %4519 = vperm.xlu1 %8535, %v8092_v54   ;;  %11210 = vst [vmem:[#allocation32_spill] sm:$0xff] %v9437_v2  ;;  %v589_v54 = vsub.f32 %v8952_v33, %v9456_v10 }
  0xe5   : > { %v603_v13 = vand.u32 2147483647, %v587_v39 }
  0xe6   : > { %v9435_v1 = vpop.permute.xlu0 %2598  ;;  %v605_v61 = vand.u32 2147483647, %v589_v54  ;;  %v620_v54 = vsub.f32 1.0, %v604_v12 }
  0xe7   : > { %4534 = vperm.xlu0 %8534, %v8095_v57   ;;  %11209 = vst [vmem:[#allocation31_spill] sm:$0xff] %v9435_v1  ;;  %v9464_v8 = vpop.permute.xlu1 %2603 }
  0xe8   : > { %4529 = vperm.xlu1 %8535, %v8094_v62   ;;  %11212 = vst [vmem:[#allocation34_spill] sm:$0xff] %v9464_v8  ;;  %v614_v62 = vsub.f32 1.0, %v598_v37  ;;  %v8163_v8 = vld [vmem:[%s11103_s6 + $0x2b0] sm:$0xff] }
  0xea   : > { %v9460_v16 = vpop.permute.xlu0 %2608 }
  0xeb   : > { %4544 = vperm.xlu0 %8534, %v8097_v63   ;;  %11211 = vst [vmem:[#allocation33_spill] sm:$0xff] %v9460_v16  ;;  %v9492_v57 = vpop.permute.xlu1 %2613  ;;  %v616_v63 = vsub.f32 1.0, %v600_v42 }
  0xec   : > { %4539 = vperm.xlu1 %8535, %v8096_v0   ;;  %11214 = vst [vmem:[#allocation36_spill] sm:$0xff] %v9492_v57  ;;  %v602_v0 = vand.u32 2147483647, %v586_v46  ;;  %v591_v46 = vsub.f32 %v8954_v35, %v9453_v7 }
  0xed   : > { %v9508_v37 = vmax.f32 %v616_v63, 0.0  ;;  %v596_v63 = vsub.f32 %v8972_v43, %v9444_v4  ;;  %v8159_v4 = vld [vmem:[%s11103_s6 + $0x290] sm:$0xff] }
  0xee   : > { %v9486_v53 = vpop.permute.xlu0 %2618  ;;  %v618_v42 = vsub.f32 1.0, %v602_v0 }
  0xef   : > { %4554 = vperm.xlu0 %8534, %v8099_v5   ;;  %11213 = vst [vmem:[#allocation35_spill] sm:$0xff] %v9486_v53  ;;  %v615_v5 = vsub.f32 1.0, %v599_v44  ;;  %v8157_v44 = vld [vmem:[%s11103_s6 + $0x280] sm:$0xff] }
  0xf0   : > { %4549 = vperm.xlu1 %8535, %v8098_v6   ;;  %v617_v6 = vsub.f32 1.0, %v601_v50  ;;  %v8106_v50 = vld [vmem:[%s11103_s6 + $0x278] sm:$0xff]  ;;  %v9548_v27 = vmax.f32 %v618_v42, 0.0 }
  0xf1   : > { %v9522_v45 = vmax.f32 %v615_v5, 0.0  ;;  %v608_v5 = vand.u32 2147483647, %v592_v30 }
  0xf2   : > { %v9506_v31 = vpop.permute.xlu0 %2628  ;;  %v9524_v39 = vmax.f32 %v617_v6, 0.0 }
  0xf3   : > { %4564 = vperm.xlu0 %8534, %v8101_v20   ;;  %v1037_v20 = vmul.f32 0.5, %v7875_v55  ;;  %11215 = vst [vmem:[#allocation37_spill] sm:$0xff] %v9506_v31  ;;  %v594_v55 = vsub.f32 %v8972_v43, %v9440_v58  ;;  %v607_v58 = vand.u32 2147483647, %v591_v46  ;;  %v624_v57 = vsub.f32 1.0, %v608_v5 }
  0xf4   : > { %4559 = vperm.xlu1 %8535, %v8100_v23   ;;  %v9500_v23 = vmax.f32 %v614_v62, 0.0  ;;  %v619_v62 = vsub.f32 1.0, %v603_v13  ;;  %v595_v13 = vsub.f32 %v8972_v43, %v9453_v7  ;;  %v9554_v7 = vmax.f32 %v620_v54, 0.0 }
  0xf5   : > { %v9531_v0 = vrot.slane %v1037_v20, %v8945_v26  ;;  %v9535_v6 = vrot.slane %v1037_v20, %v8947_v28  ;;  %v9538_v12 = vrot.slane %v1037_v20, %v8930_v21  ;;  %v610_v30 = vand.u32 2147483647, %v594_v55 }
  0xf6   : > { %v9552_v46 = vpop.permute.xlu0 %2638  ;;  %v9559_v53 = vrot.slane %v1037_v20, %v8943_v25  ;;  %v622_v55 = vsub.f32 1.0, %v606_v9  ;;  %v8160_v20 = vld [vmem:[%s11103_s6 + $0x298] sm:$0xff] }
  0xf7   : > { %4574 = vperm.xlu0 %8534, %v8103_v47   ;;  %v593_v47 = vsub.f32 %v8954_v35, %v9456_v10  ;;  %11217 = vst [vmem:[#allocation39_spill] sm:$0xff] %v9552_v46  ;;  %v9573_v46 = vmax.f32 %v619_v62, 0.0  ;;  %v626_v9 = vsub.f32 1.0, %v610_v30  ;;  %v8162_v62 = vld [vmem:[%s11103_s6 + $0x2a8] sm:$0xff]  ;;  %v1075_v34 = vsub.f32 %v8972_v43, %v9531_v0 }
  0xf8   : > { %4569 = vperm.xlu1 %8535, %v8102_v49   ;;  %v9514_v49 = vpop.permute.xlu1 %2623  ;;  %v9585_v30 = vmax.f32 %v622_v55, 0.0  ;;  %v1076_v38 = vsub.f32 %v8972_v43, %v9538_v12 }
  0xf9   : > { %11216 = vst [vmem:[#allocation38_spill] sm:$0xff] %v9514_v49  ;;  %v1063_v49 = vsub.f32 %v8950_v32, %v9531_v0  ;;  %v9599_v56 = vmax.f32 %v626_v9, 0.0 }
  0xfb   : > { %4584 = vperm.xlu0 %8534, %v8105_v41   ;;  %v621_v41 = vsub.f32 1.0, %v605_v61  ;;  %v8158_v61 = vld [vmem:[%s11103_s6 + $0x288] sm:$0xff] }
  0xfc   : > { %4579 = vperm.xlu1 %8535, %v8104_v3   ;;  %v7897_v3 = vld [vmem:[%s8919_s22 + $0x4] ss:$8 sm:$0xf]  ;;  %v9561_v42 = vpop.permute.xlu1 %2633 }
  0xfd   : > { %v1515_v31 = vadd.f32 1.0, %v7897_v3  ;;  %11218 = vst [vmem:[#allocation40_spill] sm:$0xff] %v9561_v42  ;;  %v1064_v3 = vsub.f32 %v8950_v32, %v9538_v12  ;;  %v9575_v16 = vmax.f32 %v621_v41, 0.0  ;;  %v1067_v41 = vsub.f32 %v8952_v33, %v9531_v0 }
  0xff   : > { %5368 = vperm.xlu0 %8534, %v8157_v44   ;;  %v609_v44 = vand.u32 2147483647, %v593_v47  ;;  %v612_v47 = vand.u32 2147483647, %v596_v63  ;;  %v8161_v63 = vld [vmem:[%s11103_s6 + $0x2a0] sm:$0xff]  ;;  %v1516_v42 = vmul.f32 32.0, %v1515_v31 }
 0x100   : > { %4589 = vperm.xlu1 %8535, %v8106_v50   ;;  %v597_v50 = vsub.f32 %v8972_v43, %v9456_v10  ;;  %v1065_v10 = vsub.f32 %v8950_v32, %v9535_v6  ;;  %v9597_v2 = vpop.permute.xlu1 %2643 }
 0x101   : > { %v625_v54 = vsub.f32 1.0, %v609_v44  ;;  %v1079_v44 = vand.u32 2147483647, %v1063_v49  ;;  %v9591_v49 = vmax.f32 %v624_v57, 0.0  ;;  %11220 = vst [vmem:[#allocation42_spill] sm:$0xff] %v9597_v2  ;;  %v1070_v2 = vsub.f32 %v8952_v33, %v9559_v53 }
 0x102   : > { %v613_v5 = vand.u32 2147483647, %v597_v50  ;;  %v1081_v31 = vand.u32 2147483647, %v1065_v10  ;;  %v1080_v50 = vand.u32 2147483647, %v1064_v3  ;;  %v1069_v10 = vsub.f32 %v8952_v33, %v9535_v6 }
 0x103   : > { %5378 = vperm.xlu0 %8534, %v8159_v4   ;;  %v623_v4 = vsub.f32 1.0, %v607_v58  ;;  %v628_v58 = vsub.f32 1.0, %v612_v47  ;;  %v9589_v47 = vpop.permute.xlu0 %2648  ;;  %v7899_v3 = vadd.f32 -1.0, %v1516_v42  ;;  %v1095_v57 = vsub.f32 1.0, %v1079_v44 }
 0x104   : > { %5373 = vperm.xlu1 %8535, %v8158_v61   ;;  %v611_v61 = vand.u32 2147483647, %v595_v13  ;;  %v1066_v13 = vsub.f32 %v8950_v32, %v9559_v53  ;;  %11219 = vst [vmem:[#allocation41_spill] sm:$0xff] %v9589_v47  ;;  %v629_v55 = vsub.f32 1.0, %v613_v5  ;;  %v1096_v9 = vsub.f32 1.0, %v1080_v50  ;;  %v9633_v36 = vpop.permute.xlu1 %2653 }
 0x105   : > { %v9603_v40 = vmax.f32 %v628_v58, 0.0  ;;  %v1083_v5 = vand.u32 2147483647, %v1067_v41  ;;  %v1071_v58 = vsub.f32 %v8954_v35, %v9531_v0  ;;  %v1073_v44 = vsub.f32 %v8954_v35, %v9535_v6  ;;  %11222 = vst [vmem:[#allocation44_spill] sm:$0xff] %v9633_v36 }
 0x106   : > { %v627_v1 = vsub.f32 1.0, %v611_v61  ;;  %v1082_v47 = vand.u32 2147483647, %v1066_v13  ;;  %v1097_v61 = vsub.f32 1.0, %v1081_v31  ;;  %v1072_v13 = vsub.f32 %v8954_v35, %v9538_v12 }
 0x107   : > { %5388 = vperm.xlu0 %8534, %v8161_v63   ;;  %v9593_v63 = vmax.f32 %v623_v4, 0.0  ;;  %v1068_v4 = vsub.f32 %v8952_v33, %v9538_v12  ;;  %v1085_v31 = vand.u32 2147483647, %v1069_v10  ;;  %v1074_v50 = vsub.f32 %v8954_v35, %v9559_v53  ;;  %v9627_v51 = vpop.permute.xlu0 %3062  ;;  %v8166_v10 = vld [vmem:[%s11103_s6 + $0x2c8] sm:$0xff] }
 0x108   : > { %5383 = vperm.xlu1 %8535, %v8160_v20   ;;  %v9595_v20 = vmax.f32 %v625_v54, 0.0  ;;  %v8165_v54 = vld [vmem:[%s11103_s6 + $0x2c0] sm:$0xff]  ;;  %v9615_v42 = vmax.f32 %v627_v1, 0.0  ;;  %v1518_v41 = vmul.f32 0.5, %v7899_v3  ;;  %11221 = vst [vmem:[#allocation43_spill] sm:$0xff] %v9627_v51  ;;  %v9629_v1 = vmax.f32 %v1095_v57, 0.0 }
 0x109   : > { %v1098_v52 = vsub.f32 1.0, %v1082_v47  ;;  %v1084_v48 = vand.u32 2147483647, %v1068_v4  ;;  %v9641_v3 = vmax.f32 %v1097_v61, 0.0  ;;  %v1099_v57 = vsub.f32 1.0, %v1083_v5 }
 0x10a   : > { %v1086_v47 = vand.u32 2147483647, %v1070_v2  ;;  %v1087_v4 = vand.u32 2147483647, %v1071_v58  ;;  %v1088_v51 = vand.u32 2147483647, %v1072_v13  ;;  %v1077_v36 = vsub.f32 %v8972_v43, %v9535_v6 }
 0x10b   : > { %5398 = vperm.xlu0 %8534, %v8163_v8   ;;  %v8164_v8 = vld [vmem:[%s11103_s6 + $0x2b8] sm:$0xff]  ;;  %v1090_v0 = vand.u32 2147483647, %v1074_v50  ;;  %v9650_v29 = vrot.slane %v1518_v41, %v8945_v26  ;;  %v9652_v61 = vmax.f32 %v1098_v52, 0.0  ;;  %v1091_v5 = vand.u32 2147483647, %v1075_v34  ;;  %v9668_v34 = vpop.permute.xlu0 %3072 }
 0x10c   : > { %5393 = vperm.xlu1 %8535, %v8162_v62   ;;  %v9623_v62 = vmax.f32 %v629_v55, 0.0  ;;  %v8167_v55 = vld [vmem:[%s11103_s6 + $0x2d0] sm:$0xff]  ;;  %v9655_v2 = vrot.slane %v1518_v41, %v8947_v28  ;;  %v8169_v58 = vld [vmem:[%s11103_s6 + $0x2e0] sm:$0xff]  ;;  %v8168_v6 = vld [vmem:[%s11103_s6 + $0x2d8] sm:$0xff]  ;;  %v1100_v12 = vsub.f32 1.0, %v1084_v48  ;;  %v1102_v26 = vsub.f32 1.0, %v1086_v47 }
 0x10d   : > { %v9666_v52 = vrot.slane %v1518_v41, %v8930_v21  ;;  %11223 = vst [vmem:[#allocation45_spill] sm:$0xff] %v9668_v34  ;;  %v1103_v28 = vsub.f32 1.0, %v1087_v4  ;;  %v9671_v50 = vrot.slane %v1518_v41, %v8943_v25  ;;  %v9675_v14 = vand.u32 2147483647, %v1077_v36  ;;  %v8171_v36 = vld [vmem:[%s11103_s6 + $0x2f0] sm:$0xff] }
 0x10e   : > { %v9677_v48 = vand.u32 2147483647, %v1076_v38  ;;  %v9681_v21 = vmax.f32 %v1099_v57, 0.0  ;;  %v1546_v25 = vsub.f32 %v8950_v32, %v9655_v2  ;;  %v8170_v38 = vld [vmem:[%s11103_s6 + $0x2e8] sm:$0xff]  ;;  %v9693_v41 = vmax.f32 %v1100_v12, 0.0 }
 0x10f   : > { %5408 = vperm.xlu0 %8534, %v8165_v54   ;;  %v9643_v54 = vmax.f32 %v1096_v9, 0.0  ;;  %v1101_v9 = vsub.f32 1.0, %v1085_v31  ;;  %v1104_v31 = vsub.f32 1.0, %v1088_v51  ;;  %v1107_v51 = vsub.f32 1.0, %v1091_v5 }
 0x110   : > { %5403 = vperm.xlu1 %8535, %v8164_v8   ;;  %v1089_v8 = vand.u32 2147483647, %v1073_v44  ;;  %v1078_v44 = vsub.f32 %v8972_v43, %v9559_v53  ;;  %v1544_v53 = vsub.f32 %v8950_v32, %v9650_v29  ;;  %v9695_v4 = vmax.f32 %v1102_v26, 0.0 }
 0x111   : > { %v9683_v47 = vmax.f32 %v1101_v9, 0.0  ;;  %v9703_v5 = vmax.f32 %v1104_v31, 0.0  ;;  %v1109_v12 = vsub.f32 1.0, %v9675_v14  ;;  %v1108_v26 = vsub.f32 1.0, %v9677_v48  ;;  %v8172_v14 = vld [vmem:[%s11103_s6 + $0x2f8] sm:$0xff] }
 0x112   : > { %v1105_v13 = vsub.f32 1.0, %v1089_v8  ;;  %v1094_v57 = vand.u32 2147483647, %v1078_v44  ;;  %v1545_v8 = vsub.f32 %v8950_v32, %v9666_v52  ;;  %v1560_v44 = vand.u32 2147483647, %v1544_v53 }
 0x113   : > { %5418 = vperm.xlu0 %8534, %v8167_v55   ;;  %v9673_v55 = vpop.permute.xlu1 %3067  ;;  %11227 = vst [vmem:[#allocation49_spill] sm:$0xff] %v9703_v5  ;;  %v1562_v31 = vand.u32 2147483647, %v1546_v25  ;;  %v1549_v19 = vsub.f32 %v8952_v33, %v9666_v52  ;;  %v1551_v59 = vsub.f32 %v8952_v33, %v9671_v50 }
 0x114   : > { %5413 = vperm.xlu1 %8535, %v8166_v10   ;;  %11224 = vst [vmem:[#allocation46_spill] sm:$0xff] %v9673_v55  ;;  %v1106_v10 = vsub.f32 1.0, %v1090_v0  ;;  %v9699_v0 = vmax.f32 %v1103_v28, 0.0  ;;  %v9701_v9 = vmax.f32 %v1105_v13, 0.0  ;;  %v9711_v55 = vpop.permute.xlu0 %3082  ;;  %v9713_v13 = vmax.f32 %v1107_v51, 0.0 }
 0x115   : > { %11229 = vst [vmem:[#allocation51_spill] sm:$0xff] %v9711_v55  ;;  %v1110_v53 = vsub.f32 1.0, %v1094_v57  ;;  %v1561_v55 = vand.u32 2147483647, %v1545_v8  ;;  %v1550_v51 = vsub.f32 %v8952_v33, %v9655_v2  ;;  %v1576_v17 = vsub.f32 1.0, %v1560_v44 }
 0x116   : > { %11225 = vst [vmem:[#allocation47_spill] sm:$0xff] %v9699_v0  ;;  %11226 = vst [vmem:[#allocation48_spill] sm:$0xff] %v9701_v9  ;;  %v9707_v34 = vmax.f32 %v1106_v10, 0.0  ;;  %v1578_v60 = vsub.f32 1.0, %v1562_v31 }
 0x117   : > { %5428 = vperm.xlu0 %8534, %v8169_v58   ;;  %v1547_v58 = vsub.f32 %v8950_v32, %v9671_v50  ;;  %11230 = vst [vmem:[#allocation52_spill] sm:$0xff] %v9713_v13  ;;  %v9715_v22 = vpop.permute.xlu1 %3077  ;;  %v8197_v32 = vld [vmem:[%s11103_s6 + $0x300] sm:$0xff]  ;;  %v1577_v31 = vsub.f32 1.0, %v1561_v55  ;;  %v9751_v13 = vmax.f32 %v1110_v53, 0.0  ;;  %v1566_v5 = vand.u32 2147483647, %v1550_v51 }
 0x118   : > { %5423 = vperm.xlu1 %8535, %v8168_v6   ;;  %11228 = vst [vmem:[#allocation50_spill] sm:$0xff] %v9707_v34  ;;  %11231 = vst [vmem:[#allocation53_spill] sm:$0xff] %v9715_v22  ;;  %v9754_v0 = vpop.permute.xlu0 %3092  ;;  %v8201_v55 = vld [vmem:[%s11103_s6 + $0x320] sm:$0xff] }
 0x119   : > { %v9729_v18 = vand.u32 2147483647, %v1547_v58  ;;  %11232 = vst [vmem:[#allocation54_spill] sm:$0xff] %v9754_v0 }
 0x11b   : > { %5438 = vperm.xlu0 %8534, %v8171_v36   ;;  %v1548_v36 = vsub.f32 %v8952_v33, %v9650_v29  ;;  %v1579_v9 = vsub.f32 1.0, %v9729_v18  ;;  %v8200_v18 = vld [vmem:[%s11103_s6 + $0x318] sm:$0xff] }
 0x11c   : > { %5433 = vperm.xlu1 %8535, %v8170_v38  }
 0x11f   : > { %5852 = vperm.xlu0 %8534, %v8197_v32  }
 0x120   : > { %5443 = vperm.xlu1 %8535, %v8172_v14   ;;  %v1564_v14 = vand.u32 2147483647, %v1548_v36  ;;  %v9757_v36 = vmax.f32 %v1576_v17, 0.0  ;;  %v9770_v17 = vand.u32 2147483647, %v1551_v59 }
 0x135   : > { %v814_v6 = vpop.f32.mrb[0].mxu0 }
 0x136   : > { %v816_v28 = vpop.f32.mrb[1].mxu0  ;;  %v926_v25 = vmul.f32 %v814_v6, %v9500_v23 }
 0x137   : > { %v887_v10 = vpop.f32.mrb[0].mxu1  ;;  %v818_v48 = vpop.f32.mrb[2].mxu0  ;;  %v927_v57 = vmul.f32 %v816_v28, %v9522_v45  ;;  %v8199_v28 = vld [vmem:[%s11103_s6 + $0x310] sm:$0xff] }
 0x138   : > { %v889_v38 = vpop.f32.mrb[1].mxu1  ;;  %v930_v22 = vmul.f32 %v818_v48, %v9548_v27  ;;  %v820_v24 = vpop.f32.mrb[3].mxu0  ;;  %v928_v6 = vmul.f32 %v887_v10, %v9508_v37  ;;  %5862 = vperm.xlu0 %8534, %v8199_v28  }
 0x139   : > { %v891_v8 = vpop.f32.mrb[2].mxu1  ;;  %v931_v15 = vmul.f32 %v820_v24, %v9573_v46  ;;  %v8198_v24 = vld [vmem:[%s11103_s6 + $0x308] sm:$0xff]  ;;  %v929_v44 = vmul.f32 %v889_v38, %v9524_v39 }
 0x13a   : > { %v942_v48 = vadd.f32 %v930_v22, %v926_v25  ;;  %v932_v58 = vmul.f32 %v891_v8, %v9554_v7  ;;  %v893_v11 = vpop.f32.mrb[3].mxu1  ;;  %v9747_v22 = vmax.f32 %v1109_v12, 0.0  ;;  %v9749_v25 = vmax.f32 %v1108_v26, 0.0  ;;  %5857 = vperm.xlu1 %8535, %v8198_v24   ;;  %v9759_v26 = vpop.permute.xlu1 %3087 }
 0x13b   : > { %v951_v33 = vadd.f32 %v931_v15, %v927_v57  ;;  %v933_v32 = vmul.f32 %v893_v11, %v9575_v16  ;;  %v1565_v12 = vand.u32 2147483647, %v1549_v19  ;;  %11233 = vst [vmem:[#allocation55_spill] sm:$0xff] %v9759_v26  ;;  %v9768_v57 = vmax.f32 %v1578_v60, 0.0 }
 0x13c   : > { %v960_v10 = vadd.f32 %v932_v58, %v928_v6  ;;  %v1582_v60 = vsub.f32 1.0, %v1566_v5  ;;  %5872 = vperm.xlu0 %8534, %v8201_v55   ;;  %v9786_v55 = vmax.f32 %v1579_v9, 0.0 }
 0x13d   : > { %v969_v8 = vadd.f32 %v933_v32, %v929_v44  ;;  %v824_v34 = vpop.f32.mrb[4].mxu0  ;;  %11234 = vst [vmem:[#allocation56_spill] sm:$0xff] %v9768_v57  ;;  %v9774_v44 = vmax.f32 %v1577_v31, 0.0  ;;  %v8203_v31 = vld [vmem:[%s11103_s6 + $0x330] sm:$0xff] }
 0x13e   : > { %v934_v11 = vmul.f32 %v824_v34, %v9585_v30  ;;  %v826_v15 = vpop.f32.mrb[5].mxu0  ;;  %v1580_v34 = vsub.f32 1.0, %v1564_v14  ;;  %5867 = vperm.xlu1 %8535, %v8200_v18   ;;  %11235 = vst [vmem:[#allocation57_spill] sm:$0xff] %v9786_v55 }
 0x13f   : > { %v935_v51 = vmul.f32 %v826_v15, %v9593_v63  ;;  %v828_v38 = vpop.f32.mrb[6].mxu0 }
 0x140   : > { %v897_v53 = vpop.f32.mrb[4].mxu1  ;;  %v943_v19 = vadd.f32 %v942_v48, %v934_v11  ;;  %v938_v28 = vmul.f32 %v828_v38, %v9599_v56  ;;  %v830_v24 = vpop.f32.mrb[7].mxu0  ;;  %5882 = vperm.xlu0 %8534, %v8203_v31  }
 0x141   : > { %v936_v6 = vmul.f32 %v897_v53, %v9591_v49  ;;  %v899_v58 = vpop.f32.mrb[5].mxu1  ;;  %v952_v32 = vadd.f32 %v951_v33, %v935_v51  ;;  %v939_v15 = vmul.f32 %v830_v24, %v9615_v42  ;;  %v1581_v53 = vsub.f32 1.0, %v1565_v12  ;;  %v8202_v33 = vld [vmem:[%s11103_s6 + $0x328] sm:$0xff] }
 0x142   : > { %v937_v0 = vmul.f32 %v899_v58, %v9595_v20  ;;  %v901_v26 = vpop.f32.mrb[6].mxu1  ;;  %v944_v14 = vadd.f32 %v943_v19, %v938_v28  ;;  %v9788_v19 = vmax.f32 %v1580_v34, 0.0  ;;  %v1552_v12 = vsub.f32 %v8954_v35, %v9650_v29  ;;  %5877 = vperm.xlu1 %8535, %v8202_v33  }
 0x143   : > { %v961_v59 = vadd.f32 %v960_v10, %v936_v6  ;;  %v940_v48 = vmul.f32 %v901_v26, %v9603_v40  ;;  %v903_v11 = vpop.f32.mrb[7].mxu1  ;;  %v953_v38 = vadd.f32 %v952_v32, %v939_v15  ;;  %v1583_v28 = vsub.f32 1.0, %v9770_v17  ;;  %v9801_v15 = vpop.permute.xlu1 %3097  ;;  %v8204_v17 = vld [vmem:[%s11103_s6 + $0x338] sm:$0xff] }
 0x144   : > { %v970_v51 = vadd.f32 %v969_v8, %v937_v0  ;;  %v941_v5 = vmul.f32 %v903_v11, %v9623_v62  ;;  %v945_v10 = vrot.slane %v944_v14, 4  ;;  %11236 = vst [vmem:[#allocation58_spill] sm:$0xff] %v9788_v19  ;;  %v1554_v0 = vsub.f32 %v8954_v35, %v9655_v2  ;;  %v9795_v8 = vpop.permute.xlu0 %3102  ;;  %11240 = vst [vmem:[#allocation62_spill] sm:$0xff] %v9801_v15 }
 0x145   : > { %v962_v18 = vadd.f32 %v961_v59, %v940_v48  ;;  %v954_v26 = vrot.slane %v953_v38, 4  ;;  %v834_v58 = vpop.f32.mrb[8].mxu0  ;;  %11237 = vst [vmem:[#allocation59_spill] sm:$0xff] %v9795_v8  ;;  %v9797_v32 = vmax.f32 %v1582_v60, 0.0  ;;  %v9799_v34 = vmax.f32 %v1581_v53, 0.0  ;;  %v8205_v59 = vld [vmem:[%s11103_s6 + $0x340] sm:$0xff] }
 0x146   : > { %v971_v6 = vadd.f32 %v970_v51, %v941_v5  ;;  %v836_v24 = vpop.f32.mrb[9].mxu0  ;;  %v946_v48 = vadd.f32 %v945_v10, %v944_v14  ;;  %v1553_v60 = vsub.f32 %v8954_v35, %v9666_v52  ;;  %v1555_v53 = vsub.f32 %v8954_v35, %v9671_v50  ;;  %5892 = vperm.xlu0 %8534, %v8205_v59  }
 0x147   : > { %v963_v9 = vrot.slane %v962_v18, 4  ;;  %11238 = vst [vmem:[#allocation60_spill] sm:$0xff] %v9797_v32  ;;  %11239 = vst [vmem:[#allocation61_spill] sm:$0xff] %v9799_v34  ;;  %v838_v33 = vpop.f32.mrb[10].mxu0  ;;  %v955_v51 = vadd.f32 %v954_v26, %v953_v38  ;;  %v978_v5 = vmul.f32 %v834_v58, %v9500_v23  ;;  %v9815_v34 = vand.u32 2147483647, %v1552_v12  ;;  %5887 = vperm.xlu1 %8535, %v8204_v17  }
 0x148   : > { %v972_v11 = vrot.slane %v971_v6, 4  ;;  %v907_v31 = vpop.f32.mrb[8].mxu1  ;;  %v982_v15 = vmul.f32 %v838_v33, %v9548_v27  ;;  %v840_v32 = vpop.f32.mrb[11].mxu0  ;;  %v979_v14 = vmul.f32 %v836_v24, %v9522_v45  ;;  %v9819_v57 = vand.u32 2147483647, %v1554_v0  ;;  %v8206_v45 = vld [vmem:[%s11103_s6 + $0x348] sm:$0xff] }
 0x149   : > { %v909_v8 = vpop.f32.mrb[9].mxu1  ;;  %v964_v55 = vadd.f32 %v963_v9, %v962_v18  ;;  %v983_v19 = vmul.f32 %v840_v32, %v9573_v46  ;;  %v980_v38 = vmul.f32 %v907_v31, %v9508_v37  ;;  %v8207_v18 = vld [vmem:[%s11103_s6 + $0x350] sm:$0xff]  ;;  %v947_v46 = vrot.slane %v946_v48, 2  ;;  %v8209_v31 = vld [vmem:[%s11103_s6 + $0x360] sm:$0xff] }
 0x14a   : > { %v911_v10 = vpop.f32.mrb[10].mxu1  ;;  %v973_v35 = vadd.f32 %v972_v11, %v971_v6  ;;  %v994_v23 = vadd.f32 %v982_v15, %v978_v5  ;;  %v981_v12 = vmul.f32 %v909_v8, %v9524_v39  ;;  %v956_v0 = vrot.slane %v955_v51, 2  ;;  %v9839_v11 = vpop.permute.xlu0 %3112  ;;  %5902 = vperm.xlu0 %8534, %v8207_v18  }
 0x14b   : > { %v984_v26 = vmul.f32 %v911_v10, %v9554_v7  ;;  %v913_v27 = vpop.f32.mrb[11].mxu1  ;;  %v1003_v58 = vadd.f32 %v983_v19, %v979_v14  ;;  %v9831_v9 = vmax.f32 %v1583_v28, 0.0  ;;  %v1556_v7 = vsub.f32 %v8972_v43, %v9650_v29  ;;  %5897 = vperm.xlu1 %8535, %v8206_v45   ;;  %v9846_v8 = vpop.permute.xlu1 %3107  ;;  %v8208_v10 = vld [vmem:[%s11103_s6 + $0x358] sm:$0xff] }
 0x14c   : > { %v985_v6 = vmul.f32 %v913_v27, %v9575_v16  ;;  %v965_v24 = vrot.slane %v964_v55, 2  ;;  %v9835_v59 = vand.u32 2147483647, %v1553_v60  ;;  %v9837_v17 = vand.u32 2147483647, %v1555_v53 }
 0x14d   : > { %v1012_v37 = vadd.f32 %v984_v26, %v980_v38  ;;  %v844_v15 = vpop.f32.mrb[12].mxu0  ;;  %v974_v39 = vrot.slane %v973_v35, 2  ;;  %v9851_v33 = vadd.f32 %v947_v46, %v946_v48  ;;  %v9859_v38 = vadd.f32 %v956_v0, %v955_v51 }
 0x14e   : > { %v1021_v32 = vadd.f32 %v985_v6, %v981_v12  ;;  %v986_v16 = vmul.f32 %v844_v15, %v9585_v30  ;;  %v846_v19 = vpop.f32.mrb[13].mxu0  ;;  %v9863_v46 = vadd.f32 %v965_v24, %v964_v55  ;;  %5912 = vperm.xlu0 %8534, %v8209_v31   ;;  %v9874_v24 = vand.u32 2147483647, %v1556_v7  ;;  %v9884_v7 = vpop.permute.xlu0 %3122 }
 0x14f   : > { %v987_v53 = vmul.f32 %v846_v19, %v9593_v63  ;;  %v848_v5 = vpop.f32.mrb[14].mxu0  ;;  %v9867_v19 = vadd.f32 %v974_v39, %v973_v35  ;;  %5907 = vperm.xlu1 %8535, %v8208_v10   ;;  %11241 = vst [vmem:[#allocation63_spill] sm:$0xff] %v9884_v7 }
 0x150   : > { %v917_v60 = vpop.f32.mrb[12].mxu1  ;;  %v995_v26 = vadd.f32 %v994_v23, %v986_v16  ;;  %v990_v48 = vmul.f32 %v848_v5, %v9599_v56  ;;  %v850_v45 = vpop.f32.mrb[15].mxu0  ;;  %v8211_v56 = vld [vmem:[%s11103_s6 + $0x370] sm:$0xff]  ;;  %v949_v16 = vrot.slane %v9851_v33, 1 }
 0x151   : > { %v988_v27 = vmul.f32 %v917_v60, %v9591_v49  ;;  %v919_v18 = vpop.f32.mrb[13].mxu1  ;;  %v1004_v63 = vadd.f32 %v1003_v58, %v987_v53  ;;  %v991_v15 = vmul.f32 %v850_v45, %v9615_v42  ;;  %v8210_v42 = vld [vmem:[%s11103_s6 + $0x368] sm:$0xff]  ;;  %v967_v53 = vrot.slane %v9863_v46, 1 }
 0x152   : > { %v989_v12 = vmul.f32 %v919_v18, %v9595_v20  ;;  %v921_v6 = vpop.f32.mrb[14].mxu1  ;;  %v996_v0 = vadd.f32 %v995_v26, %v990_v48  ;;  %5922 = vperm.xlu0 %8534, %v8211_v56   ;;  %v976_v5 = vrot.slane %v9867_v19, 1  ;;  %v9888_v18 = vpop.permute.xlu1 %3117  ;;  %v6317_v48 = vld [vmem:[%s11105_s8] sm:$0xff] }
 0x153   : > { %v1013_v51 = vadd.f32 %v1012_v37, %v988_v27  ;;  %v992_v23 = vmul.f32 %v921_v6, %v9603_v40  ;;  %v923_v49 = vpop.f32.mrb[15].mxu1  ;;  %v1005_v58 = vadd.f32 %v1004_v63, %v991_v15  ;;  %5917 = vperm.xlu1 %8535, %v8210_v42  }
 0x154   : > { %v1022_v55 = vadd.f32 %v1021_v32, %v989_v12  ;;  %v993_v20 = vmul.f32 %v923_v49, %v9623_v62  ;;  %v997_v35 = vrot.slane %v996_v0, 4  ;;  %v958_v32 = vrot.slane %v9859_v38, 1 }
 0x155   : > { %v1014_v37 = vadd.f32 %v1013_v51, %v992_v23  ;;  %v1006_v31 = vrot.slane %v1005_v58, 4  ;;  %v1295_v62 = vpop.f32.mrb[16].mxu0 }
 0x156   : > { %v1023_v60 = vadd.f32 %v1022_v55, %v993_v20  ;;  %v998_v10 = vadd.f32 %v997_v35, %v996_v0  ;;  %v1297_v27 = vpop.f32.mrb[17].mxu0  ;;  %v1407_v12 = vmul.f32 %v1295_v62, %v9629_v1  ;;  %v8212_v0 = vld [vmem:[%s11103_s6 + $0x378] sm:$0xff]  ;;  %6336 = vperm.xlu0 %8534, %v6317_v48   ;;  %v6318_v48 = vld [vmem:[%s11105_s8 + $0x8] sm:$0xff] }
 0x157   : > { %v1015_v26 = vrot.slane %v1014_v37, 4  ;;  %v1007_v45 = vadd.f32 %v1006_v31, %v1005_v58  ;;  %v1408_v15 = vmul.f32 %v1297_v27, %v9643_v54  ;;  %v1299_v51 = vpop.f32.mrb[18].mxu0  ;;  %5927 = vperm.xlu1 %8535, %v8212_v0   ;;  %v959_v0 = vadd.f32 %v958_v32, %v9859_v38 }
 0x158   : > { %v1024_v63 = vrot.slane %v1023_v60, 4  ;;  %v1368_v6 = vpop.f32.mrb[16].mxu1  ;;  %v999_v23 = vrot.slane %v998_v10, 2  ;;  %v1411_v20 = vmul.f32 %v1299_v51, %v9681_v21  ;;  %v1301_v42 = vpop.f32.mrb[19].mxu0 }
 0x159   : > { %v1016_v49 = vadd.f32 %v1015_v26, %v1014_v37  ;;  %v1409_v56 = vmul.f32 %v1368_v6, %v9641_v3  ;;  %v1370_v55 = vpop.f32.mrb[17].mxu1  ;;  %v1008_v58 = vrot.slane %v1007_v45, 2  ;;  %v1412_v27 = vmul.f32 %v1301_v42, %v9693_v41  ;;  %v6319_v26 = vld [vmem:[%s11105_s8 + $0x10] sm:$0xff] }
 0x15a   : > { %v1025_v35 = vadd.f32 %v1024_v63, %v1023_v60  ;;  %v1410_v31 = vmul.f32 %v1370_v55, %v9652_v61  ;;  %v1372_v62 = vpop.f32.mrb[18].mxu1  ;;  %v1000_v40 = vadd.f32 %v999_v23, %v998_v10  ;;  %v1423_v14 = vadd.f32 %v1411_v20, %v1407_v12  ;;  %6346 = vperm.xlu0 %8534, %v6319_v26  }
 0x15b   : > { %v1017_v39 = vrot.slane %v1016_v49, 2  ;;  %v1413_v30 = vmul.f32 %v1372_v62, %v9683_v47  ;;  %v1374_v37 = vpop.f32.mrb[19].mxu1  ;;  %v1009_v6 = vadd.f32 %v1008_v58, %v1007_v45  ;;  %v1432_v60 = vadd.f32 %v1412_v27, %v1408_v15  ;;  %v9912_v45 = vpop.permute.xlu0 %3132  ;;  %6341 = vperm.xlu1 %8535, %v6318_v48  }
 0x15c   : > { %v1026_v51 = vrot.slane %v1025_v35, 2  ;;  %v1414_v63 = vmul.f32 %v1374_v37, %v9695_v4  ;;  %v950_v10 = vadd.f32 %v949_v16, %v9851_v33  ;;  %v1001_v12 = vrot.slane %v1000_v40, 1  ;;  %11242 = vst [vmem:[#allocation64_spill] sm:$0xff] %v9912_v45  ;;  %v11243_v37 = vld [vmem:[#allocation47_spill] sm:$0xff]  ;;  %v9917_v16 = vpop.permute.xlu1 %3127 }
 0x15d   : > { %v1018_v23 = vadd.f32 %v1017_v39, %v1016_v49  ;;  %v1441_v55 = vadd.f32 %v1413_v30, %v1409_v56  ;;  %v1010_v20 = vrot.slane %v1009_v6, 1  ;;  %v1305_v29 = vpop.f32.mrb[20].mxu0  ;;  %v968_v15 = vadd.f32 %v967_v53, %v9863_v46  ;;  %11244 = vst [vmem:[#allocation47_spill] sm:$0xff] %v9917_v16  ;;  %v6321_v30 = vld [vmem:[%s11105_s8 + $0x20] sm:$0xff]  ;;  %v11245_v56 = vld [vmem:[#allocation49_spill] sm:$0xff] }
 0x15e   : > { %v1027_v42 = vadd.f32 %v1026_v51, %v1025_v35  ;;  %v1450_v62 = vadd.f32 %v1414_v63, %v1410_v31  ;;  %v977_v58 = vadd.f32 %v976_v5, %v9867_v19  ;;  %v1415_v28 = vmul.f32 %v1305_v29, %v11243_v37  ;;  %v1307_v33 = vpop.f32.mrb[21].mxu0  ;;  %v6320_v19 = vld [vmem:[%s11105_s8 + $0x18] sm:$0xff]  ;;  %v11246_v5 = vld [vmem:[#allocation48_spill] sm:$0xff]  ;;  %6356 = vperm.xlu0 %8534, %v6321_v30  }
 0x15f   : > { %v1019_v27 = vrot.slane %v1018_v23, 1  ;;  %v1002_v38 = vadd.f32 %v1001_v12, %v1000_v40  ;;  %v1011_v39 = vadd.f32 %v1010_v20, %v1009_v6  ;;  %v1416_v35 = vmul.f32 %v1307_v33, %v11245_v56  ;;  %v1309_v46 = vpop.f32.mrb[22].mxu0  ;;  %v11247_v51 = vld [vmem:[#allocation52_spill] sm:$0xff]  ;;  %v11248_v20 = vld [vmem:[#allocation50_spill] sm:$0xff]  ;;  %6351 = vperm.xlu1 %8535, %v6320_v19  }
 0x160   : > { %v1028_v32 = vrot.slane %v1027_v42, 1  ;;  %v1378_v49 = vpop.f32.mrb[20].mxu1  ;;  %v1424_v53 = vadd.f32 %v1423_v14, %v1415_v28  ;;  %v1419_v63 = vmul.f32 %v1309_v46, %v11247_v51  ;;  %v1311_v48 = vpop.f32.mrb[23].mxu0 }
 0x161   : > { %v1020_v29 = vadd.f32 %v1019_v27, %v1018_v23  ;;  %v1417_v31 = vmul.f32 %v1378_v49, %v11246_v5  ;;  %v1380_v26 = vpop.f32.mrb[21].mxu1  ;;  %v9929_v40 = vsel %vm1992_vm1, %v959_v0, %v1011_v39  ;;  %v1433_v12 = vadd.f32 %v1432_v60, %v1416_v35  ;;  %v6323_v27 = vld [vmem:[%s11105_s8 + $0x30] sm:$0xff] }
 0x162   : > { %v1029_v6 = vadd.f32 %v1028_v32, %v1027_v42  ;;  %v1418_v33 = vmul.f32 %v1380_v26, %v11248_v20  ;;  %v1382_v45 = vpop.f32.mrb[22].mxu1  ;;  %v1425_v7 = vadd.f32 %v1424_v53, %v1419_v63  ;;  %v1420_v28 = vmul.f32 %v1311_v48, %v9749_v25  ;;  %v9961_v53 = vpop.permute.xlu0 %3546  ;;  %6366 = vperm.xlu0 %8534, %v6323_v27  }
 0x163   : > { %v1442_v16 = vadd.f32 %v1441_v55, %v1417_v31  ;;  %v1421_v23 = vmul.f32 %v1382_v45, %v9747_v22  ;;  %v1384_v14 = vpop.f32.mrb[23].mxu1  ;;  %v9942_v30 = vsel %vm1992_vm1, %v950_v10, %v1002_v38  ;;  %v6322_v55 = vld [vmem:[%s11105_s8 + $0x28] sm:$0xff]  ;;  %v9948_v49 = vsel %vm1992_vm1, %v968_v15, %v1020_v29  ;;  %v9967_v48 = vpop.permute.xlu1 %3137 }
 0x164   : > { %v9938_v0 = vsel %vm1992_vm1, %v977_v58, %v1029_v6  ;;  %v1451_v60 = vadd.f32 %v1450_v62, %v1418_v33  ;;  %v1422_v42 = vmul.f32 %v1384_v14, %v9751_v13  ;;  %v1426_v45 = vrot.slane %v1425_v7, 4  ;;  %6361 = vperm.xlu1 %8535, %v6322_v55  }
 0x165   : > { %v1443_v39 = vadd.f32 %v1442_v16, %v1421_v23  ;;  %v1434_v32 = vadd.f32 %v1433_v12, %v1420_v28  ;;  %v1315_v46 = vpop.f32.mrb[24].mxu0  ;;  %v1587_v58 = vsub.f32 1.0, %v9837_v17  ;;  %v11249_v62 = vsub.f32 %v8972_v43, %v9655_v2  ;;  %v6325_v2 = vld [vmem:[%s11105_s8 + $0x40] sm:$0xff] }
 0x166   : > { %v1452_v35 = vadd.f32 %v1451_v60, %v1422_v42  ;;  %v11250_v10 = vsub.f32 %v8972_v43, %v9666_v52  ;;  %v1427_v16 = vadd.f32 %v1426_v45, %v1425_v7  ;;  %v1317_v31 = vpop.f32.mrb[25].mxu0  ;;  %v11251_v26 = vsub.f32 1.0, %v9815_v34  ;;  %v6324_v34 = vld [vmem:[%s11105_s8 + $0x38] sm:$0xff]  ;;  %6376 = vperm.xlu0 %8534, %v6325_v2  }
 0x167   : > { %v9954_v19 = vand.u32 2147483647, %v11249_v62  ;;  %v1444_v15 = vrot.slane %v1443_v39, 4  ;;  %v1435_v29 = vrot.slane %v1434_v32, 4  ;;  %v1459_v6 = vmul.f32 %v1315_v46, %v9629_v1  ;;  %v1319_v33 = vpop.f32.mrb[26].mxu0 }
 0x168   : > { %v9959_v38 = vand.u32 2147483647, %v11250_v10  ;;  %v9965_v63 = vmax.f32 %v11251_v26, 0.0  ;;  %v1453_v52 = vrot.slane %v1452_v35, 4  ;;  %v1388_v12 = vpop.f32.mrb[24].mxu1  ;;  %v1460_v7 = vmul.f32 %v1317_v31, %v9643_v54  ;;  %v1321_v1 = vpop.f32.mrb[27].mxu0  ;;  %6371 = vperm.xlu1 %8535, %v6324_v34  }
 0x169   : > { %v11252_v23 = vsub.f32 1.0, %v9819_v57  ;;  %v1428_v14 = vrot.slane %v1427_v16, 2  ;;  %v1445_v27 = vadd.f32 %v1444_v15, %v1443_v39  ;;  %v1436_v60 = vadd.f32 %v1435_v29, %v1434_v32  ;;  %v1390_v55 = vpop.f32.mrb[25].mxu1 }
 0x16a   : > { %v1461_v42 = vmul.f32 %v1388_v12, %v9641_v3  ;;  %v1454_v45 = vadd.f32 %v1453_v52, %v1452_v35  ;;  %v1462_v54 = vmul.f32 %v1390_v55, %v9652_v61  ;;  %v1463_v46 = vmul.f32 %v1319_v33, %v9681_v21  ;;  %v1392_v57 = vpop.f32.mrb[26].mxu1  ;;  %v6327_v3 = vld [vmem:[%s11105_s8 + $0x50] sm:$0xff] }
 0x16b   : > { %v9976_v28 = vmax.f32 %v11252_v23, 0.0  ;;  %v1464_v62 = vmul.f32 %v1321_v1, %v9693_v41  ;;  %v1429_v10 = vadd.f32 %v1428_v14, %v1427_v16  ;;  %v1446_v31 = vrot.slane %v1445_v27, 2  ;;  %v1394_v39 = vpop.f32.mrb[27].mxu1  ;;  %v6326_v41 = vld [vmem:[%s11105_s8 + $0x48] sm:$0xff]  ;;  %6386 = vperm.xlu0 %8534, %v6327_v3   ;;  %v10006_v1 = vpop.permute.xlu1 %3551 }
 0x16c   : > { %v1437_v26 = vrot.slane %v1436_v60, 2  ;;  %v1465_v23 = vmul.f32 %v1392_v57, %v9683_v47  ;;  %v1455_v32 = vrot.slane %v1454_v45, 2  ;;  %v1475_v35 = vadd.f32 %v1463_v46, %v1459_v6  ;;  %6381 = vperm.xlu1 %8535, %v6326_v41  }
 0x16d   : > { %v1484_v61 = vadd.f32 %v1464_v62, %v1460_v7  ;;  %v1466_v21 = vmul.f32 %v1394_v39, %v9695_v4  ;;  %v1430_v16 = vrot.slane %v1429_v10, 1  ;;  %v1447_v15 = vadd.f32 %v1446_v31, %v1445_v27  ;;  %v1325_v12 = vpop.f32.mrb[28].mxu0  ;;  %v9999_v7 = vpop.permute.xlu0 %3556 }
 0x16e   : > { %v1438_v29 = vadd.f32 %v1437_v26, %v1436_v60  ;;  %v1493_v2 = vadd.f32 %v1465_v23, %v1461_v42  ;;  %v1456_v47 = vadd.f32 %v1455_v32, %v1454_v45  ;;  %v1588_v33 = vsub.f32 1.0, %v9874_v24  ;;  %v1327_v27 = vpop.f32.mrb[29].mxu0 }
 0x16f   : > { %v1502_v52 = vadd.f32 %v1466_v21, %v1462_v54  ;;  %v11253_v34 = vsub.f32 %v8972_v43, %v9671_v50  ;;  %v1448_v4 = vrot.slane %v1447_v15, 1  ;;  %v1467_v55 = vmul.f32 %v1325_v12, %v11243_v37  ;;  %v6329_v43 = vld [vmem:[%s11105_s8 + $0x60] sm:$0xff]  ;;  %v1329_v46 = vpop.f32.mrb[30].mxu0 }
 0x170   : > { %v1439_v14 = vrot.slane %v1438_v29, 1  ;;  %v11254_v60 = vsub.f32 1.0, %v9835_v59  ;;  %v1431_v50 = vadd.f32 %v1430_v16, %v1429_v10  ;;  %v1457_v24 = vrot.slane %v1456_v47, 1  ;;  %v1398_v45 = vpop.f32.mrb[28].mxu1  ;;  %v6328_v59 = vld [vmem:[%s11105_s8 + $0x58] sm:$0xff]  ;;  %v1331_v10 = vpop.f32.mrb[31].mxu0  ;;  %6396 = vperm.xlu0 %8534, %v6329_v43  }
 0x171   : > { %v9997_v6 = vand.u32 2147483647, %v11253_v34  ;;  %v1468_v54 = vmul.f32 %v1327_v27, %v11245_v56  ;;  %v10014_v37 = vmax.f32 %v1587_v58, 0.0  ;;  %v1449_v57 = vadd.f32 %v1448_v4, %v1447_v15  ;;  %v1400_v23 = vpop.f32.mrb[29].mxu1  ;;  %6391 = vperm.xlu1 %8535, %v6328_v59   ;;  %v10049_v34 = vpop.permute.xlu0 %3566 }
 0x172   : > { %v10004_v42 = vmax.f32 %v11254_v60, 0.0  ;;  %v1440_v62 = vadd.f32 %v1439_v14, %v1438_v29  ;;  %v1476_v31 = vadd.f32 %v1475_v35, %v1467_v55  ;;  %v1469_v26 = vmul.f32 %v1398_v45, %v11246_v5  ;;  %v1402_v17 = vpop.f32.mrb[30].mxu1  ;;  %v6331_v5 = vld [vmem:[%s11105_s8 + $0x70] sm:$0xff]  ;;  %v10054_v60 = vpop.permute.xlu1 %3561 }
 0x173   : > { %v1458_v39 = vadd.f32 %v1457_v24, %v1456_v47  ;;  %v1485_v3 = vadd.f32 %v1484_v61, %v1468_v54  ;;  %v1470_v56 = vmul.f32 %v1400_v23, %v11248_v20  ;;  %v1471_v32 = vmul.f32 %v1329_v46, %v11247_v51  ;;  %v1404_v16 = vpop.f32.mrb[31].mxu1  ;;  %v11255_v46 = vld [vmem:[#allocation56_spill] sm:$0xff] }
 0x174   : > { %v1494_v58 = vadd.f32 %v1493_v2, %v1469_v26  ;;  %v1473_v21 = vmul.f32 %v1402_v17, %v9747_v22  ;;  %v1472_v41 = vmul.f32 %v1331_v10, %v9749_v25  ;;  %v10026_v35 = vsel %vm1997_vm2, %v9929_v40, %v1440_v62  ;;  %v6330_v22 = vld [vmem:[%s11105_s8 + $0x68] sm:$0xff]  ;;  %6406 = vperm.xlu0 %8534, %v6331_v5   ;;  %v11256_v62 = vld [vmem:[#allocation58_spill] sm:$0xff] }
 0x175   : > { %v1503_v20 = vadd.f32 %v1502_v52, %v1470_v56  ;;  %v1477_v61 = vadd.f32 %v1476_v31, %v1471_v32  ;;  %v1474_v51 = vmul.f32 %v1404_v16, %v9751_v13  ;;  %v10034_v15 = vsel %vm1997_vm2, %v9938_v0, %v1458_v39  ;;  %v1776_v52 = vpop.f32.mrb[32].mxu0  ;;  %6401 = vperm.xlu1 %8535, %v6330_v22   ;;  %v11257_v39 = vld [vmem:[#allocation57_spill] sm:$0xff]  ;;  %v11259_v16 = vld [vmem:[#allocation60_spill] sm:$0xff] }
 0x176   : > { %v1495_v25 = vadd.f32 %v1494_v58, %v1473_v21  ;;  %v1486_v40 = vadd.f32 %v1485_v3, %v1472_v41  ;;  %v10041_v29 = vsel %vm1997_vm2, %v9942_v30, %v1431_v50  ;;  %v10045_v2 = vsel %vm1997_vm2, %v9948_v49, %v1449_v57  ;;  %v1778_v55 = vpop.f32.mrb[33].mxu0  ;;  %v7364_v49 = vld [vmem:[%s11108_s11] sm:$0xff]  ;;  %v11258_v32 = vld [vmem:[#allocation61_spill] sm:$0xff] }
 0x177   : > { %v1478_v47 = vrot.slane %v1477_v61, 4  ;;  %v1504_v13 = vadd.f32 %v1503_v20, %v1474_v51  ;;  %v1590_v0 = vsub.f32 1.0, %v9954_v19  ;;  %v1589_v12 = vsub.f32 1.0, %v9959_v38  ;;  %v1780_v45 = vpop.f32.mrb[34].mxu0 }
 0x178   : > { %v1496_v4 = vrot.slane %v1495_v25, 4  ;;  %v1487_v14 = vrot.slane %v1486_v40, 4  ;;  %v10051_v27 = vmax.f32 %v1588_v33, 0.0  ;;  %v1591_v30 = vsub.f32 1.0, %v9997_v6  ;;  %v1849_v50 = vpop.f32.mrb[32].mxu1  ;;  %v6332_v33 = vld [vmem:[%s11105_s8 + $0x78] sm:$0xff]  ;;  %7382 = vperm.xlu0 %8534, %v7364_v49  }
 0x179   : > { %v1479_v19 = vadd.f32 %v1478_v47, %v1477_v61  ;;  %v1505_v43 = vrot.slane %v1504_v13, 4  ;;  %v1888_v38 = vmul.f32 %v1776_v52, %v9757_v36  ;;  %v1889_v24 = vmul.f32 %v1778_v55, %v9774_v44  ;;  %v1851_v57 = vpop.f32.mrb[33].mxu1  ;;  %v1782_v26 = vpop.f32.mrb[35].mxu0  ;;  %6411 = vperm.xlu1 %8535, %v6332_v33   ;;  %v7366_v61 = vld [vmem:[%s11108_s11 + $0x10] sm:$0xff]  ;;  %v7365_v47 = vld [vmem:[%s11108_s11 + $0x8] sm:$0xff] }
 0x17a   : > { %v1497_v6 = vadd.f32 %v1496_v4, %v1495_v25  ;;  %v1488_v54 = vadd.f32 %v1487_v14, %v1486_v40  ;;  %v1890_v59 = vmul.f32 %v1849_v50, %v11255_v46  ;;  %v1892_v31 = vmul.f32 %v1780_v45, %v11256_v62  ;;  %v1853_v56 = vpop.f32.mrb[34].mxu1 }
 0x17b   : > { %v1480_v23 = vrot.slane %v1479_v19, 2  ;;  %v1506_v10 = vadd.f32 %v1505_v43, %v1504_v13  ;;  %v1891_v3 = vmul.f32 %v1851_v57, %v11257_v39  ;;  %v1893_v17 = vmul.f32 %v1782_v26, %v11258_v32  ;;  %v1855_v20 = vpop.f32.mrb[35].mxu1 }
 0x17c   : > { %v1498_v58 = vrot.slane %v1497_v6, 2  ;;  %v1489_v21 = vrot.slane %v1488_v54, 2  ;;  %v1904_v41 = vadd.f32 %v1892_v31, %v1888_v38  ;;  %v1894_v5 = vmul.f32 %v1853_v56, %v11259_v16  ;;  %7392 = vperm.xlu0 %8534, %v7366_v61  }
 0x17d   : > { %v1481_v51 = vadd.f32 %v1480_v23, %v1479_v19  ;;  %v1507_v22 = vrot.slane %v1506_v10, 2  ;;  %v1913_v25 = vadd.f32 %v1893_v17, %v1889_v24  ;;  %v1895_v40 = vmul.f32 %v1855_v20, %v9831_v9  ;;  %v1786_v38 = vpop.f32.mrb[36].mxu0  ;;  %v10080_v19 = vpop.permute.xlu0 %3576  ;;  %7387 = vperm.xlu1 %8535, %v7365_v47  }
 0x17e   : > { %v1499_v13 = vadd.f32 %v1498_v58, %v1497_v6  ;;  %v1490_v52 = vadd.f32 %v1489_v21, %v1488_v54  ;;  %v1922_v4 = vadd.f32 %v1894_v5, %v1890_v59  ;;  %v10076_v14 = vmax.f32 %v1590_v0, 0.0  ;;  %v1788_v57 = vpop.f32.mrb[37].mxu0  ;;  %v10083_v6 = vpop.permute.xlu1 %3571  ;;  %v7368_v0 = vld [vmem:[%s11108_s11 + $0x20] sm:$0xff] }
 0x17f   : > { %v1482_v55 = vrot.slane %v1481_v51, 1  ;;  %v1508_v49 = vadd.f32 %v1507_v22, %v1506_v10  ;;  %v1931_v43 = vadd.f32 %v1895_v40, %v1891_v3  ;;  %v10078_v50 = vmax.f32 %v1589_v12, 0.0  ;;  %v1790_v26 = vpop.f32.mrb[38].mxu0  ;;  %v7367_v10 = vld [vmem:[%s11108_s11 + $0x18] sm:$0xff] }
 0x180   : > { %v1500_v24 = vrot.slane %v1499_v13, 1  ;;  %v1491_v45 = vrot.slane %v1490_v52, 1  ;;  %v1896_v33 = vmul.f32 %v1786_v38, %v9965_v63  ;;  %v1859_v12 = vpop.f32.mrb[36].mxu1  ;;  %v1897_v31 = vmul.f32 %v1788_v57, %v10004_v42  ;;  %v1792_v5 = vpop.f32.mrb[39].mxu0  ;;  %7402 = vperm.xlu0 %8534, %v7368_v0  }
 0x181   : > { %v1483_v54 = vadd.f32 %v1482_v55, %v1481_v51  ;;  %v1509_v59 = vrot.slane %v1508_v49, 1  ;;  %v10089_v23 = vmax.f32 %v1591_v30, 0.0  ;;  %v1898_v58 = vmul.f32 %v1859_v12, %v9976_v28  ;;  %v1861_v21 = vpop.f32.mrb[37].mxu1  ;;  %7397 = vperm.xlu1 %8535, %v7367_v10   ;;  %v10122_v12 = vpop.permute.xlu0 %3586 }
 0x182   : > { %v1501_v3 = vadd.f32 %v1500_v24, %v1499_v13  ;;  %v1492_v56 = vadd.f32 %v1491_v45, %v1490_v52  ;;  %v1905_v17 = vadd.f32 %v1904_v41, %v1896_v33  ;;  %v1914_v61 = vadd.f32 %v1913_v25, %v1897_v31  ;;  %v1863_v40 = vpop.f32.mrb[38].mxu1  ;;  %v7370_v25 = vld [vmem:[%s11108_s11 + $0x30] sm:$0xff]  ;;  %v7369_v24 = vld [vmem:[%s11108_s11 + $0x28] sm:$0xff]  ;;  %v10124_v10 = vpop.permute.xlu1 %3581 }
 0x183   : > { %v1510_v20 = vadd.f32 %v1509_v59, %v1508_v49  ;;  %v1899_v51 = vmul.f32 %v1861_v21, %v10014_v37  ;;  %v1900_v22 = vmul.f32 %v1790_v26, %v10051_v27  ;;  %v1923_v30 = vadd.f32 %v1922_v4, %v1898_v58  ;;  %v1865_v13 = vpop.f32.mrb[39].mxu1  ;;  %v7371_v21 = vld [vmem:[%s11108_s11 + $0x38] sm:$0xff] }
 0x184   : > { %v1902_v47 = vmul.f32 %v1863_v40, %v10076_v14  ;;  %v1901_v55 = vmul.f32 %v1792_v5, %v10078_v50  ;;  %v10101_v41 = vsel %vm2002_vm3, %v10026_v35, %v1492_v56  ;;  %v1903_v38 = vmul.f32 %v1865_v13, %v10089_v23  ;;  %7412 = vperm.xlu0 %8534, %v7370_v25  }
 0x185   : > { %v1932_v52 = vadd.f32 %v1931_v43, %v1899_v51  ;;  %v1906_v49 = vadd.f32 %v1905_v17, %v1900_v22  ;;  %v10109_v4 = vsel %vm2002_vm3, %v10034_v15, %v1510_v20  ;;  %v10116_v33 = vsel %vm2002_vm3, %v10041_v29, %v1483_v54  ;;  %v1796_v59 = vpop.f32.mrb[40].mxu0  ;;  %7407 = vperm.xlu1 %8535, %v7369_v24   ;;  %v7372_v29 = vld [vmem:[%s11108_s11 + $0x40] sm:$0xff] }
 0x186   : > { %v1924_v45 = vadd.f32 %v1923_v30, %v1902_v47  ;;  %v1915_v35 = vadd.f32 %v1914_v61, %v1901_v55  ;;  %v10120_v43 = vsel %vm2002_vm3, %v10045_v2, %v1501_v3  ;;  %v1798_v26 = vpop.f32.mrb[41].mxu0  ;;  %v1940_v2 = vmul.f32 %v1796_v59, %v9757_v36  ;;  %v10146_v59 = vpop.permute.xlu1 %3591 }
 0x187   : > { %v1907_v57 = vrot.slane %v1906_v49, 4  ;;  %v1933_v0 = vadd.f32 %v1932_v52, %v1903_v38  ;;  %v1941_v17 = vmul.f32 %v1798_v26, %v9774_v44  ;;  %v1800_v58 = vpop.f32.mrb[42].mxu0 }
 0x188   : > { %v1925_v15 = vrot.slane %v1924_v45, 4  ;;  %v1916_v31 = vrot.slane %v1915_v35, 4  ;;  %v1869_v3 = vpop.f32.mrb[40].mxu1  ;;  %v1944_v22 = vmul.f32 %v1800_v58, %v11256_v62  ;;  %v1802_v40 = vpop.f32.mrb[43].mxu0  ;;  %7422 = vperm.xlu0 %8534, %v7372_v29  }
 0x189   : > { %v1908_v54 = vadd.f32 %v1907_v57, %v1906_v49  ;;  %v1934_v56 = vrot.slane %v1933_v0, 4  ;;  %v1942_v61 = vmul.f32 %v1869_v3, %v11255_v46  ;;  %v1871_v51 = vpop.f32.mrb[41].mxu1  ;;  %v1945_v44 = vmul.f32 %v1802_v40, %v11258_v32  ;;  %7417 = vperm.xlu1 %8535, %v7371_v21   ;;  %v7374_v46 = vld [vmem:[%s11108_s11 + $0x50] sm:$0xff]  ;;  %v7373_v32 = vld [vmem:[%s11108_s11 + $0x48] sm:$0xff]  ;;  %v10148_v29 = vpop.permute.xlu0 %3596  ;;  %v7376_v3 = vld [vmem:[%s11108_s11 + $0x60] sm:$0xff] }
 0x18a   : > { %v1926_v5 = vadd.f32 %v1925_v15, %v1924_v45  ;;  %v1917_v20 = vadd.f32 %v1916_v31, %v1915_v35  ;;  %v1943_v36 = vmul.f32 %v1871_v51, %v11257_v39  ;;  %v1873_v55 = vpop.f32.mrb[42].mxu1  ;;  %v1956_v52 = vadd.f32 %v1944_v22, %v1940_v2 }
 0x18b   : > { %v1909_v30 = vrot.slane %v1908_v54, 2  ;;  %v1935_v47 = vadd.f32 %v1934_v56, %v1933_v0  ;;  %v1946_v49 = vmul.f32 %v1873_v55, %v11259_v16  ;;  %v1875_v38 = vpop.f32.mrb[43].mxu1  ;;  %v1965_v45 = vadd.f32 %v1945_v44, %v1941_v17 }
 0x18c   : > { %v1927_v13 = vrot.slane %v1926_v5, 2  ;;  %v1918_v25 = vrot.slane %v1917_v20, 2  ;;  %v1947_v39 = vmul.f32 %v1875_v38, %v9831_v9  ;;  %7432 = vperm.xlu0 %8534, %v7374_v46  }
 0x18d   : > { %v1910_v62 = vadd.f32 %v1909_v30, %v1908_v54  ;;  %v1936_v24 = vrot.slane %v1935_v47, 2  ;;  %v1974_v0 = vadd.f32 %v1946_v49, %v1942_v61  ;;  %v1806_v26 = vpop.f32.mrb[44].mxu0  ;;  %7427 = vperm.xlu1 %8535, %v7373_v32   ;;  %v7375_v61 = vld [vmem:[%s11108_s11 + $0x58] sm:$0xff] }
 0x18e   : > { %v1928_v35 = vadd.f32 %v1927_v13, %v1926_v5  ;;  %v1919_v57 = vadd.f32 %v1918_v25, %v1917_v20  ;;  %v1983_v31 = vadd.f32 %v1947_v39, %v1943_v36  ;;  %v1948_v9 = vmul.f32 %v1806_v26, %v9965_v63  ;;  %v1808_v2 = vpop.f32.mrb[45].mxu0  ;;  %v7379_v26 = vld [vmem:[%s11108_s11 + $0x78] sm:$0xff] }
 0x18f   : > { %v1911_v16 = vrot.slane %v1910_v62, 1  ;;  %v1937_v15 = vadd.f32 %v1936_v24, %v1935_v47  ;;  %v1949_v5 = vmul.f32 %v1808_v2, %v10004_v42  ;;  %v1810_v20 = vpop.f32.mrb[46].mxu0 }
 0x190   : > { %v1929_v54 = vrot.slane %v1928_v35, 1  ;;  %v1920_v56 = vrot.slane %v1919_v57, 1  ;;  %v1879_v21 = vpop.f32.mrb[44].mxu1  ;;  %v1957_v63 = vadd.f32 %v1956_v52, %v1948_v9  ;;  %v1812_v47 = vpop.f32.mrb[47].mxu0  ;;  %v1952_v13 = vmul.f32 %v1810_v20, %v10051_v27  ;;  %7442 = vperm.xlu0 %8534, %v7376_v3  }
 0x191   : > { %v1912_v17 = vadd.f32 %v1911_v16, %v1910_v62  ;;  %v1938_v58 = vrot.slane %v1937_v15, 1  ;;  %v1950_v40 = vmul.f32 %v1879_v21, %v9976_v28  ;;  %v1881_v30 = vpop.f32.mrb[45].mxu1  ;;  %v1966_v55 = vadd.f32 %v1965_v45, %v1949_v5  ;;  %v10165_v28 = vpop.permute.xlu1 %3601  ;;  %7437 = vperm.xlu1 %8535, %v7375_v61   ;;  %v7621_v5 = vld [vmem:[%s11110_s13] sm:$0x7] }
 0x192   : > { %v1930_v51 = vadd.f32 %v1929_v54, %v1928_v35  ;;  %v1921_v22 = vadd.f32 %v1920_v56, %v1919_v57  ;;  %v1951_v44 = vmul.f32 %v1881_v30, %v10014_v37  ;;  %v1883_v42 = vpop.f32.mrb[46].mxu1  ;;  %v1953_v38 = vmul.f32 %v1812_v47, %v10078_v50  ;;  %v7378_v37 = vld [vmem:[%s11108_s11 + $0x70] sm:$0xff]  ;;  %v10173_v45 = vpop.permute.xlu0 %3606  ;;  %v7377_v50 = vld [vmem:[%s11108_s11 + $0x68] sm:$0xff] }
 0x193   : > { %v1939_v36 = vadd.f32 %v1938_v58, %v1937_v15  ;;  %v1975_v25 = vadd.f32 %v1974_v0, %v1950_v40  ;;  %v1954_v49 = vmul.f32 %v1883_v42, %v10076_v14  ;;  %v1885_v46 = vpop.f32.mrb[47].mxu1  ;;  %v1958_v27 = vadd.f32 %v1957_v63, %v1952_v13 }
 0x194   : > { %v2009_v52 = vsel %vm2007_vm4, %v10101_v41, %v1921_v22  ;;  %v1984_v62 = vadd.f32 %v1983_v31, %v1951_v44  ;;  %v1955_v24 = vmul.f32 %v1885_v46, %v10089_v23  ;;  %v1967_v39 = vadd.f32 %v1966_v55, %v1953_v38  ;;  %7452 = vperm.xlu0 %8534, %v7378_v37  }
 0x195   : > { %v2011_v14 = vsel %vm2007_vm4, %v10109_v4, %v1939_v36  ;;  %v1976_v41 = vadd.f32 %v1975_v25, %v1954_v49  ;;  %v2008_v32 = vsel %vm2007_vm4, %v10116_v33, %v1912_v17  ;;  %v2010_v35 = vsel %vm2007_vm4, %v10120_v43, %v1930_v51  ;;  %7447 = vperm.xlu1 %8535, %v7377_v50   ;;  %v6333_v4 = vld [vmem:[%s11105_s8 + $0x80] sm:$0x1]  ;;  %v10188_v56 = vpop.permute.xlu1 %3611 }
 0x196   : > { %v1959_v57 = vrot.slane %v1958_v27, 4  ;;  %v1985_v0 = vadd.f32 %v1984_v62, %v1955_v24  ;;  %v1968_v16 = vrot.slane %v1967_v39, 4  ;;  %v10190_v2 = vpop.permute.xlu0 %3616 }
 0x197   : > { %v1977_v23 = vrot.slane %v1976_v41, 4 }
 0x198   : > { %v1960_v15 = vadd.f32 %v1959_v57, %v1958_v27  ;;  %v1986_v31 = vrot.slane %v1985_v0, 4  ;;  %v1969_v54 = vadd.f32 %v1968_v16, %v1967_v39  ;;  %6416 = vperm.xlu0 %8534, %v6333_v4   ;;  %v8550_v39 = vld [vmem:[%s11099_s2 + $0x10] sm:$0xff]   ;;  %v8553_v57 = vld [vmem:[%s11099_s2 + $0x28] sm:$0xff]   ;;  %v11261_v4 = vld [vmem:[#allocation12_spill] sm:$0xff] }
 0x199   : > { %v1978_v33 = vadd.f32 %v1977_v23, %v1976_v41  ;;  %7457 = vperm.xlu1 %8535, %v7379_v26   ;;  %v10195_v30 = vpop.permute.xlu1 %3621  ;;  %v8549_v41 = vld [vmem:[%s11099_s2 + $0x8] sm:$0xff]   ;;  %v8555_v23 = vld [vmem:[%s11099_s2 + $0x38] sm:$0xff]  }
 0x19a   : > { %v1961_v43 = vrot.slane %v1960_v15, 2  ;;  %v1987_v9 = vadd.f32 %v1986_v31, %v1985_v0  ;;  %v1970_v17 = vrot.slane %v1969_v54, 2  ;;  %v8554_v0 = vld [vmem:[%s11099_s2 + $0x30] sm:$0xff]  }
 0x19b   : > { %v1979_v3 = vrot.slane %v1978_v33, 2 }
 0x19c   : > { %v1962_v58 = vadd.f32 %v1961_v43, %v1960_v15  ;;  %v1988_v21 = vrot.slane %v1987_v9, 2  ;;  %v1971_v61 = vadd.f32 %v1970_v17, %v1969_v54  ;;  %v11262_v17 = vld [vmem:[#allocation13_spill] sm:$0xff] }
 0x19d   : > { %v1980_v20 = vadd.f32 %v1979_v3, %v1978_v33  ;;  %7624 = vperm.xlu1 %8535, %v7621_v5  }
 0x19e   : > { %v1963_v51 = vrot.slane %v1962_v58, 1  ;;  %v1989_v22 = vadd.f32 %v1988_v21, %v1987_v9  ;;  %v1972_v40 = vrot.slane %v1971_v61, 1 }
 0x19f   : > { %v1981_v63 = vrot.slane %v1980_v20, 1 }
 0x1a0   : > { %v1990_v47 = vrot.slane %v1989_v22, 1  ;;  %v1964_v36 = vadd.f32 %v1963_v51, %v1962_v58  ;;  %v1973_v55 = vadd.f32 %v1972_v40, %v1971_v61 }
 0x1a1   : > { %v1982_v44 = vadd.f32 %v1981_v63, %v1980_v20 }
 0x1a2   : > { %v1991_v13 = vadd.f32 %v1990_v47, %v1989_v22  ;;  %v2013_v42 = vsel %vm2012_vm5, %v2008_v32, %v1964_v36  ;;  %v2014_v25 = vsel %vm2012_vm5, %v2009_v52, %v1973_v55  ;;  %v8548_v52 = vld [vmem:[%s11099_s2] sm:$0xff]   ;;  %v8551_v32 = vld [vmem:[%s11099_s2 + $0x18] sm:$0xff]  }
 0x1a3   : > { %v2017_v49 = vpack.c.bf16 %v2013_v42, %v2013_v42  ;;  %v2015_v38 = vsel %vm2012_vm5, %v2010_v35, %v1982_v44  ;;  %v10197_v46 = vpack.c.bf16 %v2014_v25, %v2014_v25  ;;  %v8552_v35 = vld [vmem:[%s11099_s2 + $0x20] sm:$0xff]  }
 0x1a4   : > { %v2016_v37 = vsel %vm2012_vm5, %v2011_v14, %v1991_v13  ;;  %v2019_v62 = vpack.c.bf16 %v2015_v38, %v2015_v38  ;;  %v11260_v14 = vmov 0  }
 0x1a5   : > { %v10199_v27 = vpack.c.bf16 %v2016_v37, %v2016_v37  ;;  %v10202_v24 = vsel %vm2002_vm3, %v2017_v49, 0  ;;  %7929 = vmatprep.subr.msk.bf16.mxu0 %vm2002_vm3, %v10197_v46 }
 0x1a6   : > { %v10207_v50 = vsel %vm2002_vm3, %v2019_v62, 0  ;;  %2223 = vmatpush1.bf16.msra.mxu0 %v10202_v24  ;;  %v11263_v62 = vld [vmem:[#allocation14_spill] sm:$0xff] }
 0x1a7   : > { %7938 = vmatprep.subr.msk.bf16.mxu1 %vm2002_vm3, %v10199_v27 }
 0x1a8   : > { %2336 = vmatpush1.bf16.msra.mxu1 %v10207_v50 }
 0x1a9   : > { %7930 = vmatmul.mubr.msk.bf16.vlgmr.msra.gmra.mrb[48].mxu0 %vm2185_vm6, %v8548_v52 }
 0x1aa   : > { %2264 = vmatprep.mubr.bf16.mxu0 %v11260_v14 }
 0x1ab   : > { %7939 = vmatmul.mubr.msk.bf16.vlgmr.msra.gmra.mrb[48].mxu1 %vm2185_vm6, %v8548_v52 }
 0x1ac   : > { %2377 = vmatprep.mubr.bf16.mxu1 %v11260_v14 }
 0x1b1   : > { %7931 = vmatmul.mubr.msk.bf16.gmra.mrb[52].mxu0 %vm2185_vm6, %v8549_v41 }
 0x1b2   : > { %2274 = vmatprep.mubr.bf16.mxu0 %v11260_v14 }
 0x1b3   : > { %7940 = vmatmul.mubr.msk.bf16.gmra.mrb[52].mxu1 %vm2185_vm6, %v8549_v41 }
 0x1b4   : > { %2387 = vmatprep.mubr.bf16.mxu1 %v11260_v14 }
 0x1b9   : > { %7932 = vmatmul.mubr.msk.bf16.gmra.mrb[56].mxu0 %vm2185_vm6, %v8550_v39 }
 0x1ba   : > { %2284 = vmatprep.mubr.bf16.mxu0 %v11260_v14 }
 0x1bb   : > { %7941 = vmatmul.mubr.msk.bf16.gmra.mrb[56].mxu1 %vm2185_vm6, %v8550_v39 }
 0x1bc   : > { %2397 = vmatprep.mubr.bf16.mxu1 %v11260_v14 }
 0x1c1   : > { %7933 = vmatmul.mubr.msk.bf16.gmra.mrb[60].mxu0 %vm2185_vm6, %v8551_v32 }
 0x1c2   : > { %2294 = vmatprep.mubr.bf16.mxu0 %v11260_v14 }
 0x1c3   : > { %7942 = vmatmul.mubr.msk.bf16.gmra.mrb[60].mxu1 %vm2185_vm6, %v8551_v32 }
 0x1c4   : > { %2407 = vmatprep.mubr.bf16.mxu1 %v11260_v14 }
 0x1c9   : > { %7934 = vmatmul.mubr.msk.bf16.gmra.mrb[64].mxu0 %vm2185_vm6, %v8552_v35 }
 0x1ca   : > { %2304 = vmatprep.mubr.bf16.mxu0 %v11260_v14 }
 0x1cb   : > { %7943 = vmatmul.mubr.msk.bf16.gmra.mrb[64].mxu1 %vm2185_vm6, %v8552_v35 }
 0x1cc   : > { %2417 = vmatprep.mubr.bf16.mxu1 %v11260_v14 }
 0x1d1   : > { %7935 = vmatmul.mubr.msk.bf16.gmra.mrb[68].mxu0 %vm2185_vm6, %v8553_v57 }
 0x1d2   : > { %2314 = vmatprep.mubr.bf16.mxu0 %v11260_v14 }
 0x1d3   : > { %7944 = vmatmul.mubr.msk.bf16.gmra.mrb[68].mxu1 %vm2185_vm6, %v8553_v57 }
 0x1d4   : > { %2427 = vmatprep.mubr.bf16.mxu1 %v11260_v14 }
 0x1d9   : > { %7936 = vmatmul.mubr.msk.bf16.gmra.mrb[72].mxu0 %vm2185_vm6, %v8554_v0 }
 0x1da   : > { %2324 = vmatprep.mubr.bf16.mxu0 %v11260_v14 }
 0x1db   : > { %7945 = vmatmul.mubr.msk.bf16.gmra.mrb[72].mxu1 %vm2185_vm6, %v8554_v0 }
 0x1dc   : > { %2437 = vmatprep.mubr.bf16.mxu1 %v11260_v14 }
 0x1e1   : > { %7937 = vmatmul.mubr.msk.bf16.gmra.mrb[76].mxu0 %vm2185_vm6, %v8555_v23 }
 0x1e2   : > { %2736 = vmatprep.mubr.bf16.mxu0 %v11260_v14 }
 0x1e3   : > { %7946 = vmatmul.mubr.msk.bf16.gmra.mrb[76].mxu1 %vm2185_vm6, %v8555_v23 }
 0x1e4   : > { %2849 = vmatprep.mubr.bf16.mxu1 %v11260_v14 }
 0x27c   : > { %v2256_v16 = vpop.f32.mrb[48].mxu0 }
 0x27d   : > { %v2257_v15 = vadd.f32 %v2256_v16, %v11261_v4  ;;  %v2258_v26 = vpop.f32.mrb[49].mxu0 }
 0x27e   : > { %v2369_v31 = vpop.f32.mrb[48].mxu1  ;;  %v2259_v54 = vadd.f32 %v2258_v26, %v11261_v4  ;;  %v2260_v9 = vpop.f32.mrb[50].mxu0 }
 0x27f   : > { %v2370_v33 = vadd.f32 %v2369_v31, %v11261_v4  ;;  %v2371_v43 = vpop.f32.mrb[49].mxu1  ;;  %v2261_v58 = vadd.f32 %v2260_v9, %v11262_v17  ;;  %v2262_v5 = vpop.f32.mrb[51].mxu0  ;;  %v2448_v22 = vmax.f32 %v2257_v15, 0.0 }
 0x280   : > { %v2372_v3 = vadd.f32 %v2371_v43, %v11261_v4  ;;  %v2373_v21 = vpop.f32.mrb[50].mxu1  ;;  %v2263_v61 = vadd.f32 %v2262_v5, %v11262_v17  ;;  %v2449_v36 = vmax.f32 %v2259_v54, 0.0  ;;  %v11264_v4 = vld [vmem:[#allocation16_spill] sm:$0xff] }
 0x281   : > { %v2374_v20 = vadd.f32 %v2373_v21, %v11262_v17  ;;  %v2375_v51 = vpop.f32.mrb[51].mxu1  ;;  %v2452_v63 = vmax.f32 %v2261_v58, 0.0  ;;  %v2450_v47 = vmax.f32 %v2370_v33, 0.0 }
 0x282   : > { %v2376_v40 = vadd.f32 %v2375_v51, %v11262_v17  ;;  %v2453_v44 = vmax.f32 %v2263_v61, 0.0  ;;  %v2451_v13 = vmax.f32 %v2372_v3, 0.0 }
 0x283   : > { %v2454_v55 = vmax.f32 %v2374_v20, 0.0  ;;  %v2528_v42 = vpack.c.bf16 %v2452_v63, %v2448_v22 }
 0x284   : > { %v2455_v25 = vmax.f32 %v2376_v40, 0.0  ;;  %v2266_v38 = vpop.f32.mrb[52].mxu0  ;;  %v2529_v37 = vpack.c.bf16 %v2453_v44, %v2449_v36  ;;  %v11265_v36 = vld [vmem:[#allocation15_spill] sm:$0xff] }
 0x285   : > { %v2530_v49 = vpack.c.bf16 %v2454_v55, %v2450_v47  ;;  %v2267_v52 = vadd.f32 %v2266_v38, %v11263_v62  ;;  %v2268_v39 = vpop.f32.mrb[53].mxu0 }
 0x286   : > { %v2379_v41 = vpop.f32.mrb[52].mxu1  ;;  %v2531_v32 = vpack.c.bf16 %v2455_v25, %v2451_v13  ;;  %v2269_v57 = vadd.f32 %v2268_v39, %v11263_v62  ;;  %v2270_v23 = vpop.f32.mrb[54].mxu0  ;;  %2704 = vmatprep.subr.bf16.mxu0 %v2529_v37 }
 0x287   : > { %v2380_v35 = vadd.f32 %v2379_v41, %v11263_v62  ;;  %v2381_v0 = vpop.f32.mrb[53].mxu1  ;;  %v2271_v15 = vadd.f32 %v2270_v23, %v11264_v4  ;;  %v2272_v26 = vpop.f32.mrb[55].mxu0  ;;  %2705 = vmatpush1.bf16.msra.mxu0 %v2528_v42  ;;  %v2456_v9 = vmax.f32 %v2267_v52, 0.0  ;;  %v11266_v52 = vld [vmem:[#allocation18_spill] sm:$0xff] }
 0x288   : > { %v2382_v16 = vadd.f32 %v2381_v0, %v11263_v62  ;;  %v2383_v31 = vpop.f32.mrb[54].mxu1  ;;  %2817 = vmatprep.subr.bf16.mxu1 %v2531_v32  ;;  %v2273_v54 = vadd.f32 %v2272_v26, %v11264_v4  ;;  %v2457_v21 = vmax.f32 %v2269_v57, 0.0 }
 0x289   : > { %v2384_v33 = vadd.f32 %v2383_v31, %v11264_v4  ;;  %v2385_v43 = vpop.f32.mrb[55].mxu1  ;;  %2818 = vmatpush1.bf16.msra.mxu1 %v2530_v49  ;;  %v2460_v3 = vmax.f32 %v2271_v15, 0.0  ;;  %v2458_v58 = vmax.f32 %v2380_v35, 0.0 }
 0x28a   : > { %v2386_v17 = vadd.f32 %v2385_v43, %v11264_v4  ;;  %v2461_v20 = vmax.f32 %v2273_v54, 0.0  ;;  %v2459_v61 = vmax.f32 %v2382_v16, 0.0 }
 0x28b   : > { %v2462_v5 = vmax.f32 %v2384_v33, 0.0  ;;  %v2532_v51 = vpack.c.bf16 %v2460_v3, %v2456_v9 }
 0x28c   : > { %v2463_v22 = vmax.f32 %v2386_v17, 0.0  ;;  %v2276_v40 = vpop.f32.mrb[56].mxu0  ;;  %v2533_v47 = vpack.c.bf16 %v2461_v20, %v2457_v21  ;;  %v11267_v21 = vld [vmem:[#allocation17_spill] sm:$0xff] }
 0x28d   : > { %v2534_v63 = vpack.c.bf16 %v2462_v5, %v2458_v58  ;;  %v2277_v55 = vadd.f32 %v2276_v40, %v11265_v36  ;;  %v2278_v13 = vpop.f32.mrb[57].mxu0 }
 0x28e   : > { %v2389_v44 = vpop.f32.mrb[56].mxu1  ;;  %v2535_v42 = vpack.c.bf16 %v2463_v22, %v2459_v61  ;;  %v2279_v49 = vadd.f32 %v2278_v13, %v11265_v36  ;;  %v2280_v37 = vpop.f32.mrb[58].mxu0  ;;  %2706 = vmatprep.subr.bf16.mxu0 %v2533_v47 }
 0x28f   : > { %v2390_v25 = vadd.f32 %v2389_v44, %v11265_v36  ;;  %v2391_v38 = vpop.f32.mrb[57].mxu1  ;;  %v2281_v41 = vadd.f32 %v2280_v37, %v11266_v52  ;;  %v2282_v32 = vpop.f32.mrb[59].mxu0  ;;  %2707 = vmatpush1.bf16.msra.mxu0 %v2532_v51  ;;  %v2464_v23 = vmax.f32 %v2277_v55, 0.0  ;;  %v11268_v55 = vld [vmem:[#allocation20_spill] sm:$0xff] }
 0x290   : > { %v2392_v62 = vadd.f32 %v2391_v38, %v11265_v36  ;;  %v2393_v39 = vpop.f32.mrb[58].mxu1  ;;  %2819 = vmatprep.subr.bf16.mxu1 %v2535_v42  ;;  %v2283_v57 = vadd.f32 %v2282_v32, %v11266_v52  ;;  %v2465_v31 = vmax.f32 %v2279_v49, 0.0 }
 0x291   : > { %v2394_v35 = vadd.f32 %v2393_v39, %v11266_v52  ;;  %v2395_v0 = vpop.f32.mrb[59].mxu1  ;;  %2820 = vmatpush1.bf16.msra.mxu1 %v2534_v63  ;;  %v2468_v16 = vmax.f32 %v2281_v41, 0.0  ;;  %v2466_v15 = vmax.f32 %v2390_v25, 0.0 }
 0x292   : > { %v2396_v4 = vadd.f32 %v2395_v0, %v11266_v52  ;;  %v2469_v33 = vmax.f32 %v2283_v57, 0.0  ;;  %v2467_v54 = vmax.f32 %v2392_v62, 0.0 }
 0x293   : > { %v2470_v26 = vmax.f32 %v2394_v35, 0.0  ;;  %v2536_v43 = vpack.c.bf16 %v2468_v16, %v2464_v23 }
 0x294   : > { %v2471_v9 = vmax.f32 %v2396_v4, 0.0  ;;  %v2286_v17 = vpop.f32.mrb[60].mxu0  ;;  %v2537_v58 = vpack.c.bf16 %v2469_v33, %v2465_v31  ;;  %v11269_v31 = vld [vmem:[#allocation19_spill] sm:$0xff] }
 0x295   : > { %v2538_v3 = vpack.c.bf16 %v2470_v26, %v2466_v15  ;;  %v2287_v5 = vadd.f32 %v2286_v17, %v11267_v21  ;;  %v2288_v61 = vpop.f32.mrb[61].mxu0 }
 0x296   : > { %v2399_v20 = vpop.f32.mrb[60].mxu1  ;;  %v2539_v51 = vpack.c.bf16 %v2471_v9, %v2467_v54  ;;  %v2289_v63 = vadd.f32 %v2288_v61, %v11267_v21  ;;  %v2290_v47 = vpop.f32.mrb[62].mxu0  ;;  %2708 = vmatprep.subr.bf16.mxu0 %v2537_v58 }
 0x297   : > { %v2400_v22 = vadd.f32 %v2399_v20, %v11267_v21  ;;  %v2401_v40 = vpop.f32.mrb[61].mxu1  ;;  %v2291_v44 = vadd.f32 %v2290_v47, %v11268_v55  ;;  %v2292_v42 = vpop.f32.mrb[63].mxu0  ;;  %2709 = vmatpush1.bf16.msra.mxu0 %v2536_v43  ;;  %v2472_v37 = vmax.f32 %v2287_v5, 0.0  ;;  %v11270_v5 = vld [vmem:[#allocation22_spill] sm:$0xff] }
 0x298   : > { %v2402_v36 = vadd.f32 %v2401_v40, %v11267_v21  ;;  %v2403_v13 = vpop.f32.mrb[62].mxu1  ;;  %2821 = vmatprep.subr.bf16.mxu1 %v2539_v51  ;;  %v2293_v49 = vadd.f32 %v2292_v42, %v11268_v55  ;;  %v2473_v39 = vmax.f32 %v2289_v63, 0.0 }
 0x299   : > { %v2404_v25 = vadd.f32 %v2403_v13, %v11268_v55  ;;  %v2405_v38 = vpop.f32.mrb[63].mxu1  ;;  %2822 = vmatpush1.bf16.msra.mxu1 %v2538_v3  ;;  %v2476_v62 = vmax.f32 %v2291_v44, 0.0  ;;  %v2474_v41 = vmax.f32 %v2400_v22, 0.0 }
 0x29a   : > { %v2406_v52 = vadd.f32 %v2405_v38, %v11268_v55  ;;  %v2477_v35 = vmax.f32 %v2293_v49, 0.0  ;;  %v2475_v57 = vmax.f32 %v2402_v36, 0.0 }
 0x29b   : > { %v2478_v32 = vmax.f32 %v2404_v25, 0.0  ;;  %v2540_v0 = vpack.c.bf16 %v2476_v62, %v2472_v37 }
 0x29c   : > { %v2479_v23 = vmax.f32 %v2406_v52, 0.0  ;;  %v2296_v4 = vpop.f32.mrb[64].mxu0  ;;  %v2541_v15 = vpack.c.bf16 %v2477_v35, %v2473_v39  ;;  %v11271_v39 = vld [vmem:[#allocation21_spill] sm:$0xff] }
 0x29d   : > { %v2542_v16 = vpack.c.bf16 %v2478_v32, %v2474_v41  ;;  %v2297_v26 = vadd.f32 %v2296_v4, %v11269_v31  ;;  %v2298_v54 = vpop.f32.mrb[65].mxu0 }
 0x29e   : > { %v2409_v33 = vpop.f32.mrb[64].mxu1  ;;  %v2543_v43 = vpack.c.bf16 %v2479_v23, %v2475_v57  ;;  %v2299_v3 = vadd.f32 %v2298_v54, %v11269_v31  ;;  %v2300_v58 = vpop.f32.mrb[66].mxu0  ;;  %2710 = vmatprep.subr.bf16.mxu0 %v2541_v15 }
 0x29f   : > { %v2410_v9 = vadd.f32 %v2409_v33, %v11269_v31  ;;  %v2411_v17 = vpop.f32.mrb[65].mxu1  ;;  %v2301_v20 = vadd.f32 %v2300_v58, %v11270_v5  ;;  %v2302_v51 = vpop.f32.mrb[67].mxu0  ;;  %2711 = vmatpush1.bf16.msra.mxu0 %v2540_v0  ;;  %v2480_v47 = vmax.f32 %v2297_v26, 0.0  ;;  %v11272_v26 = vld [vmem:[#allocation24_spill] sm:$0xff] }
 0x2a0   : > { %v2412_v21 = vadd.f32 %v2411_v17, %v11269_v31  ;;  %v2413_v61 = vpop.f32.mrb[66].mxu1  ;;  %2823 = vmatprep.subr.bf16.mxu1 %v2543_v43  ;;  %v2303_v63 = vadd.f32 %v2302_v51, %v11270_v5  ;;  %v2481_v13 = vmax.f32 %v2299_v3, 0.0 }
 0x2a1   : > { %v2414_v22 = vadd.f32 %v2413_v61, %v11270_v5  ;;  %v2415_v40 = vpop.f32.mrb[67].mxu1  ;;  %2824 = vmatpush1.bf16.msra.mxu1 %v2542_v16  ;;  %v2484_v36 = vmax.f32 %v2301_v20, 0.0  ;;  %v2482_v44 = vmax.f32 %v2410_v9, 0.0 }
 0x2a2   : > { %v2416_v55 = vadd.f32 %v2415_v40, %v11270_v5  ;;  %v2485_v25 = vmax.f32 %v2303_v63, 0.0  ;;  %v2483_v49 = vmax.f32 %v2412_v21, 0.0 }
 0x2a3   : > { %v2486_v42 = vmax.f32 %v2414_v22, 0.0  ;;  %v2544_v38 = vpack.c.bf16 %v2484_v36, %v2480_v47 }
 0x2a4   : > { %v2487_v37 = vmax.f32 %v2416_v55, 0.0  ;;  %v2306_v52 = vpop.f32.mrb[68].mxu0  ;;  %v2545_v41 = vpack.c.bf16 %v2485_v25, %v2481_v13  ;;  %v11273_v13 = vld [vmem:[#allocation23_spill] sm:$0xff] }
 0x2a5   : > { %v2546_v62 = vpack.c.bf16 %v2486_v42, %v2482_v44  ;;  %v2307_v32 = vadd.f32 %v2306_v52, %v11271_v39  ;;  %v2308_v57 = vpop.f32.mrb[69].mxu0 }
 0x2a6   : > { %v2419_v35 = vpop.f32.mrb[68].mxu1  ;;  %v2547_v0 = vpack.c.bf16 %v2487_v37, %v2483_v49  ;;  %v2309_v16 = vadd.f32 %v2308_v57, %v11271_v39  ;;  %v2310_v15 = vpop.f32.mrb[70].mxu0  ;;  %2712 = vmatprep.subr.bf16.mxu0 %v2545_v41 }
 0x2a7   : > { %v2420_v23 = vadd.f32 %v2419_v35, %v11271_v39  ;;  %v2421_v4 = vpop.f32.mrb[69].mxu1  ;;  %v2311_v33 = vadd.f32 %v2310_v15, %v11272_v26  ;;  %v2312_v43 = vpop.f32.mrb[71].mxu0  ;;  %2713 = vmatpush1.bf16.msra.mxu0 %v2544_v38  ;;  %v2488_v58 = vmax.f32 %v2307_v32, 0.0  ;;  %v11274_v32 = vld [vmem:[#allocation26_spill] sm:$0xff] }
 0x2a8   : > { %v2422_v31 = vadd.f32 %v2421_v4, %v11271_v39  ;;  %v2423_v54 = vpop.f32.mrb[70].mxu1  ;;  %2825 = vmatprep.subr.bf16.mxu1 %v2547_v0  ;;  %v2313_v3 = vadd.f32 %v2312_v43, %v11272_v26  ;;  %v2489_v61 = vmax.f32 %v2309_v16, 0.0 }
 0x2a9   : > { %v2424_v9 = vadd.f32 %v2423_v54, %v11272_v26  ;;  %v2425_v17 = vpop.f32.mrb[71].mxu1  ;;  %2826 = vmatpush1.bf16.msra.mxu1 %v2546_v62  ;;  %v2492_v21 = vmax.f32 %v2311_v33, 0.0  ;;  %v2490_v20 = vmax.f32 %v2420_v23, 0.0 }
 0x2aa   : > { %v2426_v5 = vadd.f32 %v2425_v17, %v11272_v26  ;;  %v2493_v22 = vmax.f32 %v2313_v3, 0.0  ;;  %v2491_v63 = vmax.f32 %v2422_v31, 0.0 }
 0x2ab   : > { %v2494_v51 = vmax.f32 %v2424_v9, 0.0  ;;  %v2548_v40 = vpack.c.bf16 %v2492_v21, %v2488_v58 }
 0x2ac   : > { %v2495_v47 = vmax.f32 %v2426_v5, 0.0  ;;  %v2316_v55 = vpop.f32.mrb[72].mxu0  ;;  %v2549_v44 = vpack.c.bf16 %v2493_v22, %v2489_v61  ;;  %v11275_v61 = vld [vmem:[#allocation25_spill] sm:$0xff] }
 0x2ad   : > { %v2550_v36 = vpack.c.bf16 %v2494_v51, %v2490_v20  ;;  %v2317_v42 = vadd.f32 %v2316_v55, %v11273_v13  ;;  %v2318_v49 = vpop.f32.mrb[73].mxu0 }
 0x2ae   : > { %v2429_v25 = vpop.f32.mrb[72].mxu1  ;;  %v2551_v38 = vpack.c.bf16 %v2495_v47, %v2491_v63  ;;  %v2319_v62 = vadd.f32 %v2318_v49, %v11273_v13  ;;  %v2320_v41 = vpop.f32.mrb[74].mxu0  ;;  %2714 = vmatprep.subr.bf16.mxu0 %v2549_v44 }
 0x2af   : > { %v2430_v37 = vadd.f32 %v2429_v25, %v11273_v13  ;;  %v2431_v52 = vpop.f32.mrb[73].mxu1  ;;  %v2321_v35 = vadd.f32 %v2320_v41, %v11274_v32  ;;  %v2322_v0 = vpop.f32.mrb[75].mxu0  ;;  %2715 = vmatpush1.bf16.msra.mxu0 %v2548_v40  ;;  %v2496_v15 = vmax.f32 %v2317_v42, 0.0  ;;  %v11276_v42 = vld [vmem:[#allocation28_spill] sm:$0xff] }
 0x2b0   : > { %v2432_v39 = vadd.f32 %v2431_v52, %v11273_v13  ;;  %v2433_v57 = vpop.f32.mrb[74].mxu1  ;;  %2827 = vmatprep.subr.bf16.mxu1 %v2551_v38  ;;  %v2323_v16 = vadd.f32 %v2322_v0, %v11274_v32  ;;  %v2497_v54 = vmax.f32 %v2319_v62, 0.0 }
 0x2b1   : > { %v2434_v23 = vadd.f32 %v2433_v57, %v11274_v32  ;;  %v2435_v4 = vpop.f32.mrb[75].mxu1  ;;  %2828 = vmatpush1.bf16.msra.mxu1 %v2550_v36  ;;  %v2500_v31 = vmax.f32 %v2321_v35, 0.0  ;;  %v2498_v33 = vmax.f32 %v2430_v37, 0.0 }
 0x2b2   : > { %v2436_v26 = vadd.f32 %v2435_v4, %v11274_v32  ;;  %v2501_v9 = vmax.f32 %v2323_v16, 0.0  ;;  %v2499_v3 = vmax.f32 %v2432_v39, 0.0 }
 0x2b3   : > { %v2502_v43 = vmax.f32 %v2434_v23, 0.0  ;;  %v2552_v17 = vpack.c.bf16 %v2500_v31, %v2496_v15 }
 0x2b4   : > { %v2503_v58 = vmax.f32 %v2436_v26, 0.0  ;;  %v2326_v5 = vpop.f32.mrb[76].mxu0  ;;  %v2553_v20 = vpack.c.bf16 %v2501_v9, %v2497_v54  ;;  %v8556_v54 = vld [vmem:[%s11102_s5] sm:$0xff]   ;;  %v8558_v9 = vld [vmem:[%s11102_s5 + $0x10] sm:$0xff]  }
 0x2b5   : > { %v2554_v21 = vpack.c.bf16 %v2502_v43, %v2498_v33  ;;  %v2327_v51 = vadd.f32 %v2326_v5, %v11275_v61  ;;  %v2328_v63 = vpop.f32.mrb[77].mxu0  ;;  %v8557_v43 = vld [vmem:[%s11102_s5 + $0x8] sm:$0xff]   ;;  %v8563_v5 = vld [vmem:[%s11102_s5 + $0x38] sm:$0xff]  }
 0x2b6   : > { %v2439_v22 = vpop.f32.mrb[76].mxu1  ;;  %v2555_v40 = vpack.c.bf16 %v2503_v58, %v2499_v3  ;;  %v2329_v36 = vadd.f32 %v2328_v63, %v11275_v61  ;;  %v2330_v44 = vpop.f32.mrb[78].mxu0  ;;  %2716 = vmatprep.subr.bf16.mxu0 %v2553_v20  ;;  %v8559_v3 = vld [vmem:[%s11102_s5 + $0x18] sm:$0xff]   ;;  %v8561_v58 = vld [vmem:[%s11102_s5 + $0x28] sm:$0xff]  }
 0x2b7   : > { %v2440_v47 = vadd.f32 %v2439_v22, %v11275_v61  ;;  %v2441_v55 = vpop.f32.mrb[77].mxu1  ;;  %v2331_v25 = vadd.f32 %v2330_v44, %v11276_v42  ;;  %v2332_v38 = vpop.f32.mrb[79].mxu0  ;;  %2717 = vmatpush1.bf16.msra.mxu0 %v2552_v17  ;;  %v2504_v41 = vmax.f32 %v2327_v51, 0.0  ;;  %v8560_v17 = vld [vmem:[%s11102_s5 + $0x20] sm:$0xff]  }
 0x2b8   : > { %v2442_v13 = vadd.f32 %v2441_v55, %v11275_v61  ;;  %v2443_v49 = vpop.f32.mrb[78].mxu1  ;;  %2829 = vmatprep.subr.bf16.mxu1 %v2555_v40  ;;  %v2333_v62 = vadd.f32 %v2332_v38, %v11276_v42  ;;  %v2505_v57 = vmax.f32 %v2329_v36, 0.0  ;;  %v11277_v61 = vld [vmem:[#allocation27_spill] sm:$0xff] }
 0x2b9   : > { %v2444_v37 = vadd.f32 %v2443_v49, %v11276_v42  ;;  %v2445_v52 = vpop.f32.mrb[79].mxu1  ;;  %2830 = vmatpush1.bf16.msra.mxu1 %v2554_v21  ;;  %v2508_v39 = vmax.f32 %v2331_v25, 0.0  ;;  %v2506_v35 = vmax.f32 %v2440_v47, 0.0  ;;  %v8562_v21 = vld [vmem:[%s11102_s5 + $0x30] sm:$0xff]  }
 0x2ba   : > { %v2446_v32 = vadd.f32 %v2445_v52, %v11276_v42  ;;  %v2509_v23 = vmax.f32 %v2333_v62, 0.0  ;;  %v2507_v16 = vmax.f32 %v2442_v13, 0.0  ;;  %v11278_v13 = vld [vmem:[#allocation30_spill] sm:$0xff] }
 0x2bb   : > { %v2510_v0 = vmax.f32 %v2444_v37, 0.0  ;;  %v2556_v4 = vpack.c.bf16 %v2508_v39, %v2504_v41 }
 0x2bc   : > { %v2511_v15 = vmax.f32 %v2446_v32, 0.0  ;;  %v2557_v26 = vpack.c.bf16 %v2509_v23, %v2505_v57 }
 0x2bd   : > { %v2558_v31 = vpack.c.bf16 %v2510_v0, %v2506_v35 }
 0x2be   : > { %v2559_v33 = vpack.c.bf16 %v2511_v15, %v2507_v16  ;;  %2718 = vmatprep.subr.bf16.mxu0 %v2557_v26 }
 0x2bf   : > { %2719 = vmatpush1.bf16.msra.mxu0 %v2556_v4 }
 0x2c0   : > { %2831 = vmatprep.subr.bf16.mxu1 %v2559_v33  ;;  %v11279_v33 = vld [vmem:[#allocation29_spill] sm:$0xff] }
 0x2c1   : > { %2832 = vmatpush1.bf16.msra.mxu1 %v2558_v31 }
 0x2c2   : > { %2737 = vmatmul.mubr.bf16.vlgmr.msra.gmra.mrb[80].mxu0 %v8556_v54 }
 0x2c3   : > { %2746 = vmatprep.mubr.bf16.mxu0 %v11260_v14 }
 0x2c4   : > { %2850 = vmatmul.mubr.bf16.vlgmr.msra.gmra.mrb[80].mxu1 %v8556_v54 }
 0x2c5   : > { %2859 = vmatprep.mubr.bf16.mxu1 %v11260_v14 }
 0x2ca   : > { %2747 = vmatmul.mubr.bf16.gmra.mrb[84].mxu0 %v8557_v43 }
 0x2cb   : > { %2756 = vmatprep.mubr.bf16.mxu0 %v11260_v14 }
 0x2cc   : > { %2860 = vmatmul.mubr.bf16.gmra.mrb[84].mxu1 %v8557_v43 }
 0x2cd   : > { %2869 = vmatprep.mubr.bf16.mxu1 %v11260_v14 }
 0x2d2   : > { %2757 = vmatmul.mubr.bf16.gmra.mrb[88].mxu0 %v8558_v9 }
 0x2d3   : > { %2766 = vmatprep.mubr.bf16.mxu0 %v11260_v14 }
 0x2d4   : > { %2870 = vmatmul.mubr.bf16.gmra.mrb[88].mxu1 %v8558_v9 }
 0x2d5   : > { %2879 = vmatprep.mubr.bf16.mxu1 %v11260_v14 }
 0x2da   : > { %2767 = vmatmul.mubr.bf16.gmra.mrb[92].mxu0 %v8559_v3 }
 0x2db   : > { %2776 = vmatprep.mubr.bf16.mxu0 %v11260_v14 }
 0x2dc   : > { %2880 = vmatmul.mubr.bf16.gmra.mrb[92].mxu1 %v8559_v3 }
 0x2dd   : > { %2889 = vmatprep.mubr.bf16.mxu1 %v11260_v14 }
 0x2e2   : > { %2777 = vmatmul.mubr.bf16.gmra.mrb[96].mxu0 %v8560_v17 }
 0x2e3   : > { %2786 = vmatprep.mubr.bf16.mxu0 %v11260_v14 }
 0x2e4   : > { %2890 = vmatmul.mubr.bf16.gmra.mrb[96].mxu1 %v8560_v17 }
 0x2e5   : > { %2899 = vmatprep.mubr.bf16.mxu1 %v11260_v14 }
 0x2ea   : > { %2787 = vmatmul.mubr.bf16.gmra.mrb[100].mxu0 %v8561_v58 }
 0x2eb   : > { %2796 = vmatprep.mubr.bf16.mxu0 %v11260_v14 }
 0x2ec   : > { %2900 = vmatmul.mubr.bf16.gmra.mrb[100].mxu1 %v8561_v58 }
 0x2ed   : > { %2909 = vmatprep.mubr.bf16.mxu1 %v11260_v14 }
 0x2f2   : > { %2797 = vmatmul.mubr.bf16.gmra.mrb[104].mxu0 %v8562_v21 }
 0x2f3   : > { %2806 = vmatprep.mubr.bf16.mxu0 %v11260_v14 }
 0x2f4   : > { %2910 = vmatmul.mubr.bf16.gmra.mrb[104].mxu1 %v8562_v21 }
 0x2f5   : > { %2919 = vmatprep.mubr.bf16.mxu1 %v11260_v14 }
 0x2fa   : > { %2807 = vmatmul.mubr.bf16.gmra.mrb[108].mxu0 %v8563_v5 }
 0x2fb   : > { %3220 = vmatprep.mubr.bf16.mxu0 %v11260_v14 }
 0x2fc   : > { %2920 = vmatmul.mubr.bf16.gmra.mrb[108].mxu1 %v8563_v5 }
 0x2fd   : > { %3333 = vmatprep.mubr.bf16.mxu1 %v11260_v14 }
 0x395   : > { %v2738_v20 = vpop.f32.mrb[80].mxu0 }
 0x396   : > { %v2739_v51 = vadd.f32 %v2738_v20, %v11277_v61  ;;  %v2740_v63 = vpop.f32.mrb[81].mxu0 }
 0x397   : > { %v2851_v22 = vpop.f32.mrb[80].mxu1  ;;  %v2741_v47 = vadd.f32 %v2740_v63, %v11277_v61  ;;  %v2742_v55 = vpop.f32.mrb[82].mxu0 }
 0x398   : > { %v2852_v40 = vadd.f32 %v2851_v22, %v11277_v61  ;;  %v2853_v36 = vpop.f32.mrb[81].mxu1  ;;  %v2743_v42 = vadd.f32 %v2742_v55, %v11278_v13  ;;  %v2744_v49 = vpop.f32.mrb[83].mxu0  ;;  %v2930_v52 = vmax.f32 %v2739_v51, 0.0 }
 0x399   : > { %v2854_v44 = vadd.f32 %v2853_v36, %v11277_v61  ;;  %v2855_v25 = vpop.f32.mrb[82].mxu1  ;;  %v2745_v37 = vadd.f32 %v2744_v49, %v11278_v13  ;;  %v2931_v35 = vmax.f32 %v2741_v47, 0.0  ;;  %v11280_v61 = vld [vmem:[#allocation32_spill] sm:$0xff] }
 0x39a   : > { %v2856_v38 = vadd.f32 %v2855_v25, %v11278_v13  ;;  %v2857_v62 = vpop.f32.mrb[83].mxu1  ;;  %v2934_v41 = vmax.f32 %v2743_v42, 0.0  ;;  %v2932_v32 = vmax.f32 %v2852_v40, 0.0 }
 0x39b   : > { %v2858_v39 = vadd.f32 %v2857_v62, %v11278_v13  ;;  %v2935_v0 = vmax.f32 %v2745_v37, 0.0  ;;  %v2933_v23 = vmax.f32 %v2854_v44, 0.0 }
 0x39c   : > { %v2936_v57 = vmax.f32 %v2856_v38, 0.0  ;;  %v3011_v16 = vpack.c.bf16 %v2934_v41, %v2930_v52 }
 0x39d   : > { %v2937_v4 = vmax.f32 %v2858_v39, 0.0  ;;  %v2748_v31 = vpop.f32.mrb[84].mxu0  ;;  %v3012_v26 = vpack.c.bf16 %v2935_v0, %v2931_v35  ;;  %v11281_v35 = vld [vmem:[#allocation31_spill] sm:$0xff] }
 0x39e   : > { %v3013_v15 = vpack.c.bf16 %v2936_v57, %v2932_v32  ;;  %v2749_v54 = vadd.f32 %v2748_v31, %v11279_v33  ;;  %v2750_v9 = vpop.f32.mrb[85].mxu0 }
 0x39f   : > { %v2861_v43 = vpop.f32.mrb[84].mxu1  ;;  %v3014_v3 = vpack.c.bf16 %v2937_v4, %v2933_v23  ;;  %v2751_v58 = vadd.f32 %v2750_v9, %v11279_v33  ;;  %v2752_v5 = vpop.f32.mrb[86].mxu0  ;;  %3188 = vmatprep.subr.bf16.mxu0 %v3012_v26 }
 0x3a0   : > { %v2862_v17 = vadd.f32 %v2861_v43, %v11279_v33  ;;  %v2863_v21 = vpop.f32.mrb[85].mxu1  ;;  %v2753_v51 = vadd.f32 %v2752_v5, %v11280_v61  ;;  %v2754_v63 = vpop.f32.mrb[87].mxu0  ;;  %3189 = vmatpush1.bf16.msra.mxu0 %v3011_v16  ;;  %v2938_v55 = vmax.f32 %v2749_v54, 0.0  ;;  %v11282_v54 = vld [vmem:[#allocation34_spill] sm:$0xff] }
 0x3a1   : > { %v2864_v20 = vadd.f32 %v2863_v21, %v11279_v33  ;;  %v2865_v22 = vpop.f32.mrb[86].mxu1  ;;  %3301 = vmatprep.subr.bf16.mxu1 %v3014_v3  ;;  %v2755_v47 = vadd.f32 %v2754_v63, %v11280_v61  ;;  %v2939_v49 = vmax.f32 %v2751_v58, 0.0 }
 0x3a2   : > { %v2866_v40 = vadd.f32 %v2865_v22, %v11280_v61  ;;  %v2867_v36 = vpop.f32.mrb[87].mxu1  ;;  %3302 = vmatpush1.bf16.msra.mxu1 %v3013_v15  ;;  %v2942_v44 = vmax.f32 %v2753_v51, 0.0  ;;  %v2940_v42 = vmax.f32 %v2862_v17, 0.0 }
 0x3a3   : > { %v2868_v13 = vadd.f32 %v2867_v36, %v11280_v61  ;;  %v2943_v38 = vmax.f32 %v2755_v47, 0.0  ;;  %v2941_v37 = vmax.f32 %v2864_v20, 0.0 }
 0x3a4   : > { %v2944_v25 = vmax.f32 %v2866_v40, 0.0  ;;  %v3015_v52 = vpack.c.bf16 %v2942_v44, %v2938_v55 }
 0x3a5   : > { %v2945_v62 = vmax.f32 %v2868_v13, 0.0  ;;  %v2758_v41 = vpop.f32.mrb[88].mxu0  ;;  %v3016_v39 = vpack.c.bf16 %v2943_v38, %v2939_v49 }
 0x3a6   : > { %v3017_v32 = vpack.c.bf16 %v2944_v25, %v2940_v42  ;;  %v2759_v57 = vadd.f32 %v2758_v41, %v11281_v35  ;;  %v2760_v23 = vpop.f32.mrb[89].mxu0  ;;  %v11283_v25 = vld [vmem:[#allocation33_spill] sm:$0xff] }
 0x3a7   : > { %v2871_v0 = vpop.f32.mrb[88].mxu1  ;;  %v3018_v16 = vpack.c.bf16 %v2945_v62, %v2941_v37  ;;  %v2761_v15 = vadd.f32 %v2760_v23, %v11281_v35  ;;  %v2762_v26 = vpop.f32.mrb[90].mxu0  ;;  %3190 = vmatprep.subr.bf16.mxu0 %v3016_v39 }
 0x3a8   : > { %v2872_v4 = vadd.f32 %v2871_v0, %v11281_v35  ;;  %v2873_v31 = vpop.f32.mrb[89].mxu1  ;;  %v2763_v43 = vadd.f32 %v2762_v26, %v11282_v54  ;;  %v2764_v3 = vpop.f32.mrb[91].mxu0  ;;  %3191 = vmatpush1.bf16.msra.mxu0 %v3015_v52  ;;  %v2946_v5 = vmax.f32 %v2759_v57, 0.0  ;;  %v11284_v57 = vld [vmem:[#allocation36_spill] sm:$0xff] }
 0x3a9   : > { %v2874_v33 = vadd.f32 %v2873_v31, %v11281_v35  ;;  %v2875_v9 = vpop.f32.mrb[90].mxu1  ;;  %3303 = vmatprep.subr.bf16.mxu1 %v3018_v16  ;;  %v2765_v58 = vadd.f32 %v2764_v3, %v11282_v54  ;;  %v2947_v63 = vmax.f32 %v2761_v15, 0.0 }
 0x3aa   : > { %v2876_v17 = vadd.f32 %v2875_v9, %v11282_v54  ;;  %v2877_v21 = vpop.f32.mrb[91].mxu1  ;;  %3304 = vmatpush1.bf16.msra.mxu1 %v3017_v32  ;;  %v2950_v20 = vmax.f32 %v2763_v43, 0.0  ;;  %v2948_v51 = vmax.f32 %v2872_v4, 0.0 }
 0x3ab   : > { %v2878_v61 = vadd.f32 %v2877_v21, %v11282_v54  ;;  %v2951_v40 = vmax.f32 %v2765_v58, 0.0  ;;  %v2949_v47 = vmax.f32 %v2874_v33, 0.0 }
 0x3ac   : > { %v2952_v22 = vmax.f32 %v2876_v17, 0.0  ;;  %v3019_v55 = vpack.c.bf16 %v2950_v20, %v2946_v5 }
 0x3ad   : > { %v2953_v36 = vmax.f32 %v2878_v61, 0.0  ;;  %v2768_v44 = vpop.f32.mrb[92].mxu0  ;;  %v3020_v13 = vpack.c.bf16 %v2951_v40, %v2947_v63 }
 0x3ae   : > { %v3021_v42 = vpack.c.bf16 %v2952_v22, %v2948_v51  ;;  %v2769_v49 = vadd.f32 %v2768_v44, %v11283_v25  ;;  %v2770_v37 = vpop.f32.mrb[93].mxu0  ;;  %v11285_v22 = vld [vmem:[#allocation35_spill] sm:$0xff] }
 0x3af   : > { %v2881_v38 = vpop.f32.mrb[92].mxu1  ;;  %v3022_v62 = vpack.c.bf16 %v2953_v36, %v2949_v47  ;;  %v2771_v41 = vadd.f32 %v2770_v37, %v11283_v25  ;;  %v2772_v32 = vpop.f32.mrb[94].mxu0  ;;  %3192 = vmatprep.subr.bf16.mxu0 %v3020_v13 }
 0x3b0   : > { %v2882_v52 = vadd.f32 %v2881_v38, %v11283_v25  ;;  %v2883_v39 = vpop.f32.mrb[93].mxu1  ;;  %v2773_v0 = vadd.f32 %v2772_v32, %v11284_v57  ;;  %v2774_v16 = vpop.f32.mrb[95].mxu0  ;;  %3193 = vmatpush1.bf16.msra.mxu0 %v3019_v55  ;;  %v2954_v26 = vmax.f32 %v2769_v49, 0.0  ;;  %v11286_v49 = vld [vmem:[#allocation38_spill] sm:$0xff] }
 0x3b1   : > { %v2884_v35 = vadd.f32 %v2883_v39, %v11283_v25  ;;  %v2885_v23 = vpop.f32.mrb[94].mxu1  ;;  %3305 = vmatprep.subr.bf16.mxu1 %v3022_v62  ;;  %v2775_v15 = vadd.f32 %v2774_v16, %v11284_v57  ;;  %v2955_v3 = vmax.f32 %v2771_v41, 0.0 }
 0x3b2   : > { %v2886_v4 = vadd.f32 %v2885_v23, %v11284_v57  ;;  %v2887_v31 = vpop.f32.mrb[95].mxu1  ;;  %3306 = vmatpush1.bf16.msra.mxu1 %v3021_v42  ;;  %v2958_v33 = vmax.f32 %v2773_v0, 0.0  ;;  %v2956_v43 = vmax.f32 %v2882_v52, 0.0 }
 0x3b3   : > { %v2888_v54 = vadd.f32 %v2887_v31, %v11284_v57  ;;  %v2959_v17 = vmax.f32 %v2775_v15, 0.0  ;;  %v2957_v58 = vmax.f32 %v2884_v35, 0.0 }
 0x3b4   : > { %v2960_v9 = vmax.f32 %v2886_v4, 0.0  ;;  %v3023_v5 = vpack.c.bf16 %v2958_v33, %v2954_v26 }
 0x3b5   : > { %v2961_v21 = vmax.f32 %v2888_v54, 0.0  ;;  %v2778_v20 = vpop.f32.mrb[96].mxu0  ;;  %v3024_v61 = vpack.c.bf16 %v2959_v17, %v2955_v3 }
 0x3b6   : > { %v3025_v51 = vpack.c.bf16 %v2960_v9, %v2956_v43  ;;  %v2779_v63 = vadd.f32 %v2778_v20, %v11285_v22  ;;  %v2780_v47 = vpop.f32.mrb[97].mxu0  ;;  %v11287_v9 = vld [vmem:[#allocation37_spill] sm:$0xff] }
 0x3b7   : > { %v2891_v40 = vpop.f32.mrb[96].mxu1  ;;  %v3026_v36 = vpack.c.bf16 %v2961_v21, %v2957_v58  ;;  %v2781_v44 = vadd.f32 %v2780_v47, %v11285_v22  ;;  %v2782_v42 = vpop.f32.mrb[98].mxu0  ;;  %3194 = vmatprep.subr.bf16.mxu0 %v3024_v61 }
 0x3b8   : > { %v2892_v55 = vadd.f32 %v2891_v40, %v11285_v22  ;;  %v2893_v13 = vpop.f32.mrb[97].mxu1  ;;  %v2783_v38 = vadd.f32 %v2782_v42, %v11286_v49  ;;  %v2784_v62 = vpop.f32.mrb[99].mxu0  ;;  %3195 = vmatpush1.bf16.msra.mxu0 %v3023_v5  ;;  %v2962_v32 = vmax.f32 %v2779_v63, 0.0  ;;  %v11288_v63 = vld [vmem:[#allocation40_spill] sm:$0xff] }
 0x3b9   : > { %v2894_v25 = vadd.f32 %v2893_v13, %v11285_v22  ;;  %v2895_v37 = vpop.f32.mrb[98].mxu1  ;;  %3307 = vmatprep.subr.bf16.mxu1 %v3026_v36  ;;  %v2785_v41 = vadd.f32 %v2784_v62, %v11286_v49  ;;  %v2963_v16 = vmax.f32 %v2781_v44, 0.0 }
 0x3ba   : > { %v2896_v52 = vadd.f32 %v2895_v37, %v11286_v49  ;;  %v2897_v39 = vpop.f32.mrb[99].mxu1  ;;  %3308 = vmatpush1.bf16.msra.mxu1 %v3025_v51  ;;  %v2966_v35 = vmax.f32 %v2783_v38, 0.0  ;;  %v2964_v0 = vmax.f32 %v2892_v55, 0.0 }
 0x3bb   : > { %v2898_v57 = vadd.f32 %v2897_v39, %v11286_v49  ;;  %v2967_v4 = vmax.f32 %v2785_v41, 0.0  ;;  %v2965_v15 = vmax.f32 %v2894_v25, 0.0 }
 0x3bc   : > { %v2968_v23 = vmax.f32 %v2896_v52, 0.0  ;;  %v3027_v26 = vpack.c.bf16 %v2966_v35, %v2962_v32 }
 0x3bd   : > { %v2969_v31 = vmax.f32 %v2898_v57, 0.0  ;;  %v2788_v33 = vpop.f32.mrb[100].mxu0  ;;  %v3028_v54 = vpack.c.bf16 %v2967_v4, %v2963_v16 }
 0x3be   : > { %v3029_v43 = vpack.c.bf16 %v2968_v23, %v2964_v0  ;;  %v2789_v3 = vadd.f32 %v2788_v33, %v11287_v9  ;;  %v2790_v58 = vpop.f32.mrb[101].mxu0  ;;  %v11289_v23 = vld [vmem:[#allocation39_spill] sm:$0xff] }
 0x3bf   : > { %v2901_v17 = vpop.f32.mrb[100].mxu1  ;;  %v3030_v21 = vpack.c.bf16 %v2969_v31, %v2965_v15  ;;  %v2791_v20 = vadd.f32 %v2790_v58, %v11287_v9  ;;  %v2792_v51 = vpop.f32.mrb[102].mxu0  ;;  %3196 = vmatprep.subr.bf16.mxu0 %v3028_v54 }
 0x3c0   : > { %v2902_v5 = vadd.f32 %v2901_v17, %v11287_v9  ;;  %v2903_v61 = vpop.f32.mrb[101].mxu1  ;;  %v2793_v40 = vadd.f32 %v2792_v51, %v11288_v63  ;;  %v2794_v36 = vpop.f32.mrb[103].mxu0  ;;  %3197 = vmatpush1.bf16.msra.mxu0 %v3027_v26  ;;  %v2970_v42 = vmax.f32 %v2789_v3, 0.0  ;;  %v11290_v3 = vld [vmem:[#allocation42_spill] sm:$0xff] }
 0x3c1   : > { %v2904_v22 = vadd.f32 %v2903_v61, %v11287_v9  ;;  %v2905_v47 = vpop.f32.mrb[102].mxu1  ;;  %3309 = vmatprep.subr.bf16.mxu1 %v3030_v21  ;;  %v2795_v44 = vadd.f32 %v2794_v36, %v11288_v63  ;;  %v2971_v62 = vmax.f32 %v2791_v20, 0.0 }
 0x3c2   : > { %v2906_v55 = vadd.f32 %v2905_v47, %v11288_v63  ;;  %v2907_v13 = vpop.f32.mrb[103].mxu1  ;;  %3310 = vmatpush1.bf16.msra.mxu1 %v3029_v43  ;;  %v2974_v25 = vmax.f32 %v2793_v40, 0.0  ;;  %v2972_v38 = vmax.f32 %v2902_v5, 0.0 }
 0x3c3   : > { %v2908_v49 = vadd.f32 %v2907_v13, %v11288_v63  ;;  %v2975_v52 = vmax.f32 %v2795_v44, 0.0  ;;  %v2973_v41 = vmax.f32 %v2904_v22, 0.0 }
 0x3c4   : > { %v2976_v37 = vmax.f32 %v2906_v55, 0.0  ;;  %v3031_v32 = vpack.c.bf16 %v2974_v25, %v2970_v42 }
 0x3c5   : > { %v2977_v39 = vmax.f32 %v2908_v49, 0.0  ;;  %v2798_v35 = vpop.f32.mrb[104].mxu0  ;;  %v3032_v57 = vpack.c.bf16 %v2975_v52, %v2971_v62 }
 0x3c6   : > { %v3033_v0 = vpack.c.bf16 %v2976_v37, %v2972_v38  ;;  %v2799_v16 = vadd.f32 %v2798_v35, %v11289_v23  ;;  %v2800_v15 = vpop.f32.mrb[105].mxu0  ;;  %v11291_v37 = vld [vmem:[#allocation41_spill] sm:$0xff] }
 0x3c7   : > { %v2911_v4 = vpop.f32.mrb[104].mxu1  ;;  %v3034_v31 = vpack.c.bf16 %v2977_v39, %v2973_v41  ;;  %v2801_v33 = vadd.f32 %v2800_v15, %v11289_v23  ;;  %v2802_v43 = vpop.f32.mrb[106].mxu0  ;;  %3198 = vmatprep.subr.bf16.mxu0 %v3032_v57 }
 0x3c8   : > { %v2912_v26 = vadd.f32 %v2911_v4, %v11289_v23  ;;  %v2913_v54 = vpop.f32.mrb[105].mxu1  ;;  %v2803_v17 = vadd.f32 %v2802_v43, %v11290_v3  ;;  %v2804_v21 = vpop.f32.mrb[107].mxu0  ;;  %3199 = vmatpush1.bf16.msra.mxu0 %v3031_v32  ;;  %v2978_v51 = vmax.f32 %v2799_v16, 0.0  ;;  %v11292_v16 = vld [vmem:[#allocation44_spill] sm:$0xff] }
 0x3c9   : > { %v2914_v9 = vadd.f32 %v2913_v54, %v11289_v23  ;;  %v2915_v58 = vpop.f32.mrb[106].mxu1  ;;  %3311 = vmatprep.subr.bf16.mxu1 %v3034_v31  ;;  %v2805_v20 = vadd.f32 %v2804_v21, %v11290_v3  ;;  %v2979_v36 = vmax.f32 %v2801_v33, 0.0 }
 0x3ca   : > { %v2916_v5 = vadd.f32 %v2915_v58, %v11290_v3  ;;  %v2917_v61 = vpop.f32.mrb[107].mxu1  ;;  %3312 = vmatpush1.bf16.msra.mxu1 %v3033_v0  ;;  %v2982_v22 = vmax.f32 %v2803_v17, 0.0  ;;  %v2980_v40 = vmax.f32 %v2912_v26, 0.0 }
 0x3cb   : > { %v2918_v63 = vadd.f32 %v2917_v61, %v11290_v3  ;;  %v2983_v55 = vmax.f32 %v2805_v20, 0.0  ;;  %v2981_v44 = vmax.f32 %v2914_v9, 0.0 }
 0x3cc   : > { %v2984_v47 = vmax.f32 %v2916_v5, 0.0  ;;  %v3035_v42 = vpack.c.bf16 %v2982_v22, %v2978_v51 }
 0x3cd   : > { %v2985_v13 = vmax.f32 %v2918_v63, 0.0  ;;  %v2808_v25 = vpop.f32.mrb[108].mxu0  ;;  %v3036_v49 = vpack.c.bf16 %v2983_v55, %v2979_v36  ;;  %v8565_v36 = vld [vmem:[%s11102_s5 + $0x48] sm:$0xff]   ;;  %v8566_v55 = vld [vmem:[%s11102_s5 + $0x50] sm:$0xff]  }
 0x3ce   : > { %v3037_v38 = vpack.c.bf16 %v2984_v47, %v2980_v40  ;;  %v2809_v62 = vadd.f32 %v2808_v25, %v11291_v37  ;;  %v2810_v41 = vpop.f32.mrb[109].mxu0  ;;  %v8564_v47 = vld [vmem:[%s11102_s5 + $0x40] sm:$0xff]   ;;  %v8570_v25 = vld [vmem:[%s11102_s5 + $0x70] sm:$0xff]  }
 0x3cf   : > { %v2921_v52 = vpop.f32.mrb[108].mxu1  ;;  %v3038_v39 = vpack.c.bf16 %v2985_v13, %v2981_v44  ;;  %v2811_v35 = vadd.f32 %v2810_v41, %v11291_v37  ;;  %v2812_v0 = vpop.f32.mrb[110].mxu0  ;;  %3200 = vmatprep.subr.bf16.mxu0 %v3036_v49  ;;  %v8567_v44 = vld [vmem:[%s11102_s5 + $0x58] sm:$0xff]   ;;  %v8568_v13 = vld [vmem:[%s11102_s5 + $0x60] sm:$0xff]  }
 0x3d0   : > { %v2922_v32 = vadd.f32 %v2921_v52, %v11291_v37  ;;  %v2923_v57 = vpop.f32.mrb[109].mxu1  ;;  %v2813_v4 = vadd.f32 %v2812_v0, %v11292_v16  ;;  %v2814_v31 = vpop.f32.mrb[111].mxu0  ;;  %3201 = vmatpush1.bf16.msra.mxu0 %v3035_v42  ;;  %v2986_v43 = vmax.f32 %v2809_v62, 0.0  ;;  %v8569_v42 = vld [vmem:[%s11102_s5 + $0x68] sm:$0xff]   ;;  %v8571_v49 = vld [vmem:[%s11102_s5 + $0x78] sm:$0xff]  }
 0x3d1   : > { %v2924_v23 = vadd.f32 %v2923_v57, %v11291_v37  ;;  %v2925_v15 = vpop.f32.mrb[110].mxu1  ;;  %3313 = vmatprep.subr.bf16.mxu1 %v3038_v39  ;;  %v2815_v33 = vadd.f32 %v2814_v31, %v11292_v16  ;;  %v2987_v21 = vmax.f32 %v2811_v35, 0.0  ;;  %v11293_v37 = vld [vmem:[#allocation43_spill] sm:$0xff] }
 0x3d2   : > { %v2926_v26 = vadd.f32 %v2925_v15, %v11292_v16  ;;  %v2927_v54 = vpop.f32.mrb[111].mxu1  ;;  %3314 = vmatpush1.bf16.msra.mxu1 %v3037_v38  ;;  %v2990_v9 = vmax.f32 %v2813_v4, 0.0  ;;  %v2988_v17 = vmax.f32 %v2922_v32, 0.0 }
 0x3d3   : > { %v2928_v3 = vadd.f32 %v2927_v54, %v11292_v16  ;;  %v2991_v5 = vmax.f32 %v2815_v33, 0.0  ;;  %v2989_v20 = vmax.f32 %v2924_v23, 0.0  ;;  %v11294_v23 = vld [vmem:[#allocation46_spill] sm:$0xff] }
 0x3d4   : > { %v2992_v58 = vmax.f32 %v2926_v26, 0.0  ;;  %v3039_v51 = vpack.c.bf16 %v2990_v9, %v2986_v43 }
 0x3d5   : > { %v2993_v61 = vmax.f32 %v2928_v3, 0.0  ;;  %v3040_v22 = vpack.c.bf16 %v2991_v5, %v2987_v21 }
 0x3d6   : > { %v3041_v63 = vpack.c.bf16 %v2992_v58, %v2988_v17 }
 0x3d7   : > { %v3042_v40 = vpack.c.bf16 %v2993_v61, %v2989_v20  ;;  %3202 = vmatprep.subr.bf16.mxu0 %v3040_v22 }
 0x3d8   : > { %3203 = vmatpush1.bf16.msra.mxu0 %v3039_v51 }
 0x3d9   : > { %3315 = vmatprep.subr.bf16.mxu1 %v3042_v40  ;;  %v11295_v40 = vld [vmem:[#allocation45_spill] sm:$0xff] }
 0x3da   : > { %3316 = vmatpush1.bf16.msra.mxu1 %v3041_v63 }
 0x3db   : > { %3221 = vmatmul.mubr.bf16.vlgmr.msra.gmra.mrb[112].mxu0 %v8564_v47 }
 0x3dc   : > { %3230 = vmatprep.mubr.bf16.mxu0 %v11260_v14 }
 0x3dd   : > { %3334 = vmatmul.mubr.bf16.vlgmr.msra.gmra.mrb[112].mxu1 %v8564_v47 }
 0x3de   : > { %3343 = vmatprep.mubr.bf16.mxu1 %v11260_v14 }
 0x3e3   : > { %3231 = vmatmul.mubr.bf16.gmra.mrb[116].mxu0 %v8565_v36 }
 0x3e4   : > { %3240 = vmatprep.mubr.bf16.mxu0 %v11260_v14 }
 0x3e5   : > { %3344 = vmatmul.mubr.bf16.gmra.mrb[116].mxu1 %v8565_v36 }
 0x3e6   : > { %3353 = vmatprep.mubr.bf16.mxu1 %v11260_v14 }
 0x3eb   : > { %3241 = vmatmul.mubr.bf16.gmra.mrb[120].mxu0 %v8566_v55 }
 0x3ec   : > { %3250 = vmatprep.mubr.bf16.mxu0 %v11260_v14 }
 0x3ed   : > { %3354 = vmatmul.mubr.bf16.gmra.mrb[120].mxu1 %v8566_v55 }
 0x3ee   : > { %3363 = vmatprep.mubr.bf16.mxu1 %v11260_v14 }
 0x3f3   : > { %3251 = vmatmul.mubr.bf16.gmra.mrb[124].mxu0 %v8567_v44 }
 0x3f4   : > { %3260 = vmatprep.mubr.bf16.mxu0 %v11260_v14 }
 0x3f5   : > { %3364 = vmatmul.mubr.bf16.gmra.mrb[124].mxu1 %v8567_v44 }
 0x3f6   : > { %3373 = vmatprep.mubr.bf16.mxu1 %v11260_v14 }
 0x3fb   : > { %3261 = vmatmul.mubr.bf16.gmra.mrb[128].mxu0 %v8568_v13 }
 0x3fc   : > { %3270 = vmatprep.mubr.bf16.mxu0 %v11260_v14 }
 0x3fd   : > { %3374 = vmatmul.mubr.bf16.gmra.mrb[128].mxu1 %v8568_v13 }
 0x3fe   : > { %3383 = vmatprep.mubr.bf16.mxu1 %v11260_v14 }
 0x403   : > { %3271 = vmatmul.mubr.bf16.gmra.mrb[132].mxu0 %v8569_v42 }
 0x404   : > { %3280 = vmatprep.mubr.bf16.mxu0 %v11260_v14 }
 0x405   : > { %3384 = vmatmul.mubr.bf16.gmra.mrb[132].mxu1 %v8569_v42 }
 0x406   : > { %3393 = vmatprep.mubr.bf16.mxu1 %v11260_v14 }
 0x40b   : > { %3281 = vmatmul.mubr.bf16.gmra.mrb[136].mxu0 %v8570_v25 }
 0x40c   : > { %3290 = vmatprep.mubr.bf16.mxu0 %v11260_v14 }
 0x40d   : > { %3394 = vmatmul.mubr.bf16.gmra.mrb[136].mxu1 %v8570_v25 }
 0x40e   : > { %3403 = vmatprep.mubr.bf16.mxu1 %v11260_v14 }
 0x413   : > { %3291 = vmatmul.mubr.bf16.gmra.mrb[140].mxu0 %v8571_v49 }
 0x414   : > { %3704 = vmatprep.mubr.bf16.mxu0 %v11260_v14 }
 0x415   : > { %3404 = vmatmul.mubr.bf16.gmra.mrb[140].mxu1 %v8571_v49 }
 0x416   : > { %3817 = vmatprep.mubr.bf16.mxu1 %v11260_v14 }
 0x4ae   : > { %v3222_v38 = vpop.f32.mrb[112].mxu0 }
 0x4af   : > { %v3223_v62 = vadd.f32 %v3222_v38, %v11293_v37  ;;  %v3224_v41 = vpop.f32.mrb[113].mxu0 }
 0x4b0   : > { %v3335_v52 = vpop.f32.mrb[112].mxu1  ;;  %v3225_v32 = vadd.f32 %v3224_v41, %v11293_v37  ;;  %v3226_v57 = vpop.f32.mrb[114].mxu0 }
 0x4b1   : > { %v3336_v39 = vadd.f32 %v3335_v52, %v11293_v37  ;;  %v3337_v35 = vpop.f32.mrb[113].mxu1  ;;  %v3227_v16 = vadd.f32 %v3226_v57, %v11294_v23  ;;  %v3228_v15 = vpop.f32.mrb[115].mxu0  ;;  %v3414_v54 = vmax.f32 %v3223_v62, 0.0 }
 0x4b2   : > { %v3338_v0 = vadd.f32 %v3337_v35, %v11293_v37  ;;  %v3339_v4 = vpop.f32.mrb[114].mxu1  ;;  %v3229_v26 = vadd.f32 %v3228_v15, %v11294_v23  ;;  %v3415_v58 = vmax.f32 %v3225_v32, 0.0  ;;  %v11296_v37 = vld [vmem:[#allocation53_spill] sm:$0xff] }
 0x4b3   : > { %v3340_v31 = vadd.f32 %v3339_v4, %v11294_v23  ;;  %v3341_v33 = vpop.f32.mrb[115].mxu1  ;;  %v3418_v43 = vmax.f32 %v3227_v16, 0.0  ;;  %v3416_v3 = vmax.f32 %v3336_v39, 0.0 }
 0x4b4   : > { %v3342_v9 = vadd.f32 %v3341_v33, %v11294_v23  ;;  %v3419_v21 = vmax.f32 %v3229_v26, 0.0  ;;  %v3417_v5 = vmax.f32 %v3338_v0, 0.0 }
 0x4b5   : > { %v3420_v17 = vmax.f32 %v3340_v31, 0.0  ;;  %v3495_v61 = vpack.c.bf16 %v3418_v43, %v3414_v54 }
 0x4b6   : > { %v3421_v20 = vmax.f32 %v3342_v9, 0.0  ;;  %v3232_v51 = vpop.f32.mrb[116].mxu0  ;;  %v3496_v22 = vpack.c.bf16 %v3419_v21, %v3415_v58 }
 0x4b7   : > { %v3497_v63 = vpack.c.bf16 %v3420_v17, %v3416_v3  ;;  %v3233_v47 = vadd.f32 %v3232_v51, %v11295_v40  ;;  %v3234_v55 = vpop.f32.mrb[117].mxu0  ;;  %v11297_v17 = vld [vmem:[#allocation51_spill] sm:$0xff] }
 0x4b8   : > { %v3345_v36 = vpop.f32.mrb[116].mxu1  ;;  %v3498_v44 = vpack.c.bf16 %v3421_v20, %v3417_v5  ;;  %v3235_v42 = vadd.f32 %v3234_v55, %v11295_v40  ;;  %v3236_v49 = vpop.f32.mrb[118].mxu0  ;;  %3672 = vmatprep.subr.bf16.mxu0 %v3496_v22 }
 0x4b9   : > { %v3346_v13 = vadd.f32 %v3345_v36, %v11295_v40  ;;  %v3347_v25 = vpop.f32.mrb[117].mxu1  ;;  %v3237_v62 = vadd.f32 %v3236_v49, %v11296_v37  ;;  %v3238_v41 = vpop.f32.mrb[119].mxu0  ;;  %3673 = vmatpush1.bf16.msra.mxu0 %v3495_v61  ;;  %v3422_v57 = vmax.f32 %v3233_v47, 0.0  ;;  %v11298_v47 = vld [vmem:[#allocation55_spill] sm:$0xff] }
 0x4ba   : > { %v3348_v38 = vadd.f32 %v3347_v25, %v11295_v40  ;;  %v3349_v52 = vpop.f32.mrb[118].mxu1  ;;  %3785 = vmatprep.subr.bf16.mxu1 %v3498_v44  ;;  %v3239_v32 = vadd.f32 %v3238_v41, %v11296_v37  ;;  %v3423_v4 = vmax.f32 %v3235_v42, 0.0 }
 0x4bb   : > { %v3350_v39 = vadd.f32 %v3349_v52, %v11296_v37  ;;  %v3351_v35 = vpop.f32.mrb[119].mxu1  ;;  %3786 = vmatpush1.bf16.msra.mxu1 %v3497_v63  ;;  %v3426_v0 = vmax.f32 %v3237_v62, 0.0  ;;  %v3424_v16 = vmax.f32 %v3346_v13, 0.0 }
 0x4bc   : > { %v3352_v23 = vadd.f32 %v3351_v35, %v11296_v37  ;;  %v3427_v31 = vmax.f32 %v3239_v32, 0.0  ;;  %v3425_v26 = vmax.f32 %v3348_v38, 0.0 }
 0x4bd   : > { %v3428_v15 = vmax.f32 %v3350_v39, 0.0  ;;  %v3499_v33 = vpack.c.bf16 %v3426_v0, %v3422_v57 }
 0x4be   : > { %v3429_v54 = vmax.f32 %v3352_v23, 0.0  ;;  %v3242_v9 = vpop.f32.mrb[120].mxu0  ;;  %v3500_v3 = vpack.c.bf16 %v3427_v31, %v3423_v4 }
 0x4bf   : > { %v3501_v43 = vpack.c.bf16 %v3428_v15, %v3424_v16  ;;  %v3243_v58 = vadd.f32 %v3242_v9, %v11297_v17  ;;  %v3244_v5 = vpop.f32.mrb[121].mxu0  ;;  %v11299_v15 = vld [vmem:[#allocation54_spill] sm:$0xff] }
 0x4c0   : > { %v3355_v21 = vpop.f32.mrb[120].mxu1  ;;  %v3502_v20 = vpack.c.bf16 %v3429_v54, %v3425_v26  ;;  %v3245_v51 = vadd.f32 %v3244_v5, %v11297_v17  ;;  %v3246_v63 = vpop.f32.mrb[122].mxu0  ;;  %3674 = vmatprep.subr.bf16.mxu0 %v3500_v3 }
 0x4c1   : > { %v3356_v61 = vadd.f32 %v3355_v21, %v11297_v17  ;;  %v3357_v22 = vpop.f32.mrb[121].mxu1  ;;  %v3247_v36 = vadd.f32 %v3246_v63, %v11298_v47  ;;  %v3248_v44 = vpop.f32.mrb[123].mxu0  ;;  %3675 = vmatpush1.bf16.msra.mxu0 %v3499_v33  ;;  %v3430_v49 = vmax.f32 %v3243_v58, 0.0  ;;  %v11300_v58 = vld [vmem:[#allocation62_spill] sm:$0xff] }
 0x4c2   : > { %v3358_v40 = vadd.f32 %v3357_v22, %v11297_v17  ;;  %v3359_v55 = vpop.f32.mrb[122].mxu1  ;;  %3787 = vmatprep.subr.bf16.mxu1 %v3502_v20  ;;  %v3249_v42 = vadd.f32 %v3248_v44, %v11298_v47  ;;  %v3431_v52 = vmax.f32 %v3245_v51, 0.0 }
 0x4c3   : > { %v3360_v13 = vadd.f32 %v3359_v55, %v11298_v47  ;;  %v3361_v25 = vpop.f32.mrb[123].mxu1  ;;  %3788 = vmatpush1.bf16.msra.mxu1 %v3501_v43  ;;  %v3434_v38 = vmax.f32 %v3247_v36, 0.0  ;;  %v3432_v62 = vmax.f32 %v3356_v61, 0.0 }
 0x4c4   : > { %v3362_v37 = vadd.f32 %v3361_v25, %v11298_v47  ;;  %v3435_v39 = vmax.f32 %v3249_v42, 0.0  ;;  %v3433_v32 = vmax.f32 %v3358_v40, 0.0 }
 0x4c5   : > { %v3436_v41 = vmax.f32 %v3360_v13, 0.0  ;;  %v3503_v35 = vpack.c.bf16 %v3434_v38, %v3430_v49 }
 0x4c6   : > { %v3437_v57 = vmax.f32 %v3362_v37, 0.0  ;;  %v3504_v23 = vpack.c.bf16 %v3435_v39, %v3431_v52  ;;  %v3252_v16 = vpop.f32.mrb[124].mxu0 }
 0x4c7   : > { %v3505_v0 = vpack.c.bf16 %v3436_v41, %v3432_v62  ;;  %v3253_v31 = vadd.f32 %v3252_v16, %v11299_v15  ;;  %v3254_v33 = vpop.f32.mrb[125].mxu0  ;;  %v11301_v41 = vld [vmem:[#allocation59_spill] sm:$0xff] }
 0x4c8   : > { %v3506_v4 = vpack.c.bf16 %v3437_v57, %v3433_v32  ;;  %v3365_v26 = vpop.f32.mrb[124].mxu1  ;;  %v3255_v43 = vadd.f32 %v3254_v33, %v11299_v15  ;;  %v3256_v3 = vpop.f32.mrb[126].mxu0  ;;  %3676 = vmatprep.subr.bf16.mxu0 %v3504_v23 }
 0x4c9   : > { %v3366_v54 = vadd.f32 %v3365_v26, %v11299_v15  ;;  %v3367_v9 = vpop.f32.mrb[125].mxu1  ;;  %v3257_v21 = vadd.f32 %v3256_v3, %v11300_v58  ;;  %v3258_v20 = vpop.f32.mrb[127].mxu0  ;;  %3677 = vmatpush1.bf16.msra.mxu0 %v3503_v35  ;;  %v3438_v63 = vmax.f32 %v3253_v31, 0.0 }
 0x4ca   : > { %v3368_v17 = vadd.f32 %v3367_v9, %v11299_v15  ;;  %v3369_v5 = vpop.f32.mrb[126].mxu1  ;;  %3789 = vmatprep.subr.bf16.mxu1 %v3506_v4  ;;  %v3259_v51 = vadd.f32 %v3258_v20, %v11300_v58  ;;  %v3439_v55 = vmax.f32 %v3255_v43, 0.0 }
 0x4cb   : > { %v3370_v61 = vadd.f32 %v3369_v5, %v11300_v58  ;;  %v3371_v22 = vpop.f32.mrb[127].mxu1  ;;  %3790 = vmatpush1.bf16.msra.mxu1 %v3505_v0  ;;  %v3442_v40 = vmax.f32 %v3257_v21, 0.0  ;;  %v3440_v36 = vmax.f32 %v3366_v54, 0.0 }
 0x4cc   : > { %v3372_v47 = vadd.f32 %v3371_v22, %v11300_v58  ;;  %v3443_v13 = vmax.f32 %v3259_v51, 0.0  ;;  %v3441_v42 = vmax.f32 %v3368_v17, 0.0 }
 0x4cd   : > { %v3444_v44 = vmax.f32 %v3370_v61, 0.0  ;;  %v3507_v25 = vpack.c.bf16 %v3442_v40, %v3438_v63 }
 0x4ce   : > { %v3445_v49 = vmax.f32 %v3372_v47, 0.0  ;;  %v3508_v37 = vpack.c.bf16 %v3443_v13, %v3439_v55  ;;  %v3262_v62 = vpop.f32.mrb[128].mxu0 }
 0x4cf   : > { %v3509_v38 = vpack.c.bf16 %v3444_v44, %v3440_v36  ;;  %v3263_v39 = vadd.f32 %v3262_v62, %v11301_v41  ;;  %v3264_v35 = vpop.f32.mrb[129].mxu0 }
 0x4d0   : > { %v3510_v52 = vpack.c.bf16 %v3445_v49, %v3441_v42  ;;  %v3375_v32 = vpop.f32.mrb[128].mxu1  ;;  %v3265_v0 = vadd.f32 %v3264_v35, %v11301_v41  ;;  %v3266_v16 = vpop.f32.mrb[130].mxu0  ;;  %3678 = vmatprep.subr.bf16.mxu0 %v3508_v37 }
 0x4d1   : > { %v3376_v57 = vadd.f32 %v3375_v32, %v11301_v41  ;;  %v3377_v23 = vpop.f32.mrb[129].mxu1  ;;  %v3267_v15 = vadd.f32 %v3266_v16, %v9846_v8  ;;  %v3268_v26 = vpop.f32.mrb[131].mxu0  ;;  %3679 = vmatpush1.bf16.msra.mxu0 %v3507_v25  ;;  %v3446_v9 = vmax.f32 %v3263_v39, 0.0 }
 0x4d2   : > { %v3378_v4 = vadd.f32 %v3377_v23, %v11301_v41  ;;  %v3379_v31 = vpop.f32.mrb[130].mxu1  ;;  %3791 = vmatprep.subr.bf16.mxu1 %v3510_v52  ;;  %v3269_v54 = vadd.f32 %v3268_v26, %v9846_v8  ;;  %v3447_v21 = vmax.f32 %v3265_v0, 0.0 }
 0x4d3   : > { %v3380_v33 = vadd.f32 %v3379_v31, %v9846_v8  ;;  %v3381_v43 = vpop.f32.mrb[131].mxu1  ;;  %3792 = vmatpush1.bf16.msra.mxu1 %v3509_v38  ;;  %v3450_v3 = vmax.f32 %v3267_v15, 0.0  ;;  %v3448_v58 = vmax.f32 %v3376_v57, 0.0 }
 0x4d4   : > { %v3382_v17 = vadd.f32 %v3381_v43, %v9846_v8  ;;  %v3451_v20 = vmax.f32 %v3269_v54, 0.0  ;;  %v3449_v61 = vmax.f32 %v3378_v4, 0.0 }
 0x4d5   : > { %v3452_v5 = vmax.f32 %v3380_v33, 0.0  ;;  %v3511_v51 = vpack.c.bf16 %v3450_v3, %v3446_v9  ;;  %v11302_v3 = vld [vmem:[#allocation63_spill] sm:$0xff] }
 0x4d6   : > { %v3453_v22 = vmax.f32 %v3382_v17, 0.0  ;;  %v3512_v40 = vpack.c.bf16 %v3451_v20, %v3447_v21  ;;  %v3272_v47 = vpop.f32.mrb[132].mxu0 }
 0x4d7   : > { %v3513_v63 = vpack.c.bf16 %v3452_v5, %v3448_v58  ;;  %v3273_v55 = vadd.f32 %v3272_v47, %v9839_v11  ;;  %v3274_v13 = vpop.f32.mrb[133].mxu0 }
 0x4d8   : > { %v3514_v36 = vpack.c.bf16 %v3453_v22, %v3449_v61  ;;  %v3385_v44 = vpop.f32.mrb[132].mxu1  ;;  %v3275_v25 = vadd.f32 %v3274_v13, %v9839_v11  ;;  %v3276_v49 = vpop.f32.mrb[134].mxu0  ;;  %3680 = vmatprep.subr.bf16.mxu0 %v3512_v40  ;;  %v11303_v22 = vld [vmem:[#allocation47_spill] sm:$0xff] }
 0x4d9   : > { %v3386_v42 = vadd.f32 %v3385_v44, %v9839_v11  ;;  %v3387_v8 = vpop.f32.mrb[133].mxu1  ;;  %v3277_v37 = vadd.f32 %v3276_v49, %v9888_v18  ;;  %v3278_v52 = vpop.f32.mrb[135].mxu0  ;;  %3681 = vmatpush1.bf16.msra.mxu0 %v3511_v51  ;;  %v3454_v35 = vmax.f32 %v3273_v55, 0.0 }
 0x4da   : > { %v3388_v38 = vadd.f32 %v3387_v8, %v9839_v11  ;;  %v3389_v62 = vpop.f32.mrb[134].mxu1  ;;  %3793 = vmatprep.subr.bf16.mxu1 %v3514_v36  ;;  %v3279_v39 = vadd.f32 %v3278_v52, %v9888_v18  ;;  %v3455_v16 = vmax.f32 %v3275_v25, 0.0 }
 0x4db   : > { %v3390_v41 = vadd.f32 %v3389_v62, %v9888_v18  ;;  %v3391_v32 = vpop.f32.mrb[135].mxu1  ;;  %3794 = vmatpush1.bf16.msra.mxu1 %v3513_v63  ;;  %v3458_v57 = vmax.f32 %v3277_v37, 0.0  ;;  %v3456_v23 = vmax.f32 %v3386_v42, 0.0 }
 0x4dc   : > { %v3392_v0 = vadd.f32 %v3391_v32, %v9888_v18  ;;  %v3459_v11 = vmax.f32 %v3279_v39, 0.0  ;;  %v3457_v15 = vmax.f32 %v3388_v38, 0.0 }
 0x4dd   : > { %v3460_v4 = vmax.f32 %v3390_v41, 0.0  ;;  %v3515_v31 = vpack.c.bf16 %v3458_v57, %v3454_v35 }
 0x4de   : > { %v3461_v26 = vmax.f32 %v3392_v0, 0.0  ;;  %v3516_v54 = vpack.c.bf16 %v3459_v11, %v3455_v16  ;;  %v3282_v43 = vpop.f32.mrb[136].mxu0  ;;  %v11304_v0 = vld [vmem:[#allocation64_spill] sm:$0xff] }
 0x4df   : > { %v3517_v33 = vpack.c.bf16 %v3460_v4, %v3456_v23  ;;  %v3283_v17 = vadd.f32 %v3282_v43, %v11302_v3  ;;  %v3284_v21 = vpop.f32.mrb[137].mxu0 }
 0x4e0   : > { %v3518_v9 = vpack.c.bf16 %v3461_v26, %v3457_v15  ;;  %v3395_v58 = vpop.f32.mrb[136].mxu1  ;;  %v3285_v20 = vadd.f32 %v3284_v21, %v11302_v3  ;;  %v3286_v61 = vpop.f32.mrb[138].mxu0  ;;  %3682 = vmatprep.subr.bf16.mxu0 %v3516_v54 }
 0x4e1   : > { %v3396_v5 = vadd.f32 %v3395_v58, %v11302_v3  ;;  %v3397_v18 = vpop.f32.mrb[137].mxu1  ;;  %v3287_v63 = vadd.f32 %v3286_v61, %v11303_v22  ;;  %v3288_v47 = vpop.f32.mrb[139].mxu0  ;;  %3683 = vmatpush1.bf16.msra.mxu0 %v3515_v31  ;;  %v3462_v13 = vmax.f32 %v3283_v17, 0.0 }
 0x4e2   : > { %v3398_v51 = vadd.f32 %v3397_v18, %v11302_v3  ;;  %v3399_v40 = vpop.f32.mrb[138].mxu1  ;;  %3795 = vmatprep.subr.bf16.mxu1 %v3518_v9  ;;  %v3289_v55 = vadd.f32 %v3288_v47, %v11303_v22  ;;  %v3463_v49 = vmax.f32 %v3285_v20, 0.0 }
 0x4e3   : > { %v3400_v36 = vadd.f32 %v3399_v40, %v11303_v22  ;;  %v3401_v44 = vpop.f32.mrb[139].mxu1  ;;  %3796 = vmatpush1.bf16.msra.mxu1 %v3517_v33  ;;  %v3466_v42 = vmax.f32 %v3287_v63, 0.0  ;;  %v3464_v8 = vmax.f32 %v3396_v5, 0.0 }
 0x4e4   : > { %v3402_v25 = vadd.f32 %v3401_v44, %v11303_v22  ;;  %v3467_v37 = vmax.f32 %v3289_v55, 0.0  ;;  %v3465_v62 = vmax.f32 %v3398_v51, 0.0 }
 0x4e5   : > { %v3468_v38 = vmax.f32 %v3400_v36, 0.0  ;;  %v3519_v52 = vpack.c.bf16 %v3466_v42, %v3462_v13  ;;  %v8572_v13 = vld [vmem:[%s11102_s5 + $0x80] sm:$0xff]   ;;  %v8574_v42 = vld [vmem:[%s11102_s5 + $0x90] sm:$0xff]  }
 0x4e6   : > { %v3469_v41 = vmax.f32 %v3402_v25, 0.0  ;;  %v3520_v32 = vpack.c.bf16 %v3467_v37, %v3463_v49  ;;  %v3292_v35 = vpop.f32.mrb[140].mxu0  ;;  %v8575_v25 = vld [vmem:[%s11102_s5 + $0x98] sm:$0xff]   ;;  %v8577_v49 = vld [vmem:[%s11102_s5 + $0xa8] sm:$0xff]  }
 0x4e7   : > { %v3521_v39 = vpack.c.bf16 %v3468_v38, %v3464_v8  ;;  %v3293_v23 = vadd.f32 %v3292_v35, %v11304_v0  ;;  %v3294_v4 = vpop.f32.mrb[141].mxu0  ;;  %v8576_v8 = vld [vmem:[%s11102_s5 + $0xa0] sm:$0xff]   ;;  %v8578_v38 = vld [vmem:[%s11102_s5 + $0xb0] sm:$0xff]   ;;  %v8579_v37 = vld [vmem:[%s11102_s5 + $0xb8] sm:$0xff]  }
 0x4e8   : > { %v3522_v57 = vpack.c.bf16 %v3469_v41, %v3465_v62  ;;  %v3405_v16 = vpop.f32.mrb[140].mxu1  ;;  %v3295_v15 = vadd.f32 %v3294_v4, %v11304_v0  ;;  %v3296_v26 = vpop.f32.mrb[142].mxu0  ;;  %3684 = vmatprep.subr.bf16.mxu0 %v3520_v32 }
 0x4e9   : > { %v3406_v11 = vadd.f32 %v3405_v16, %v11304_v0  ;;  %v3407_v31 = vpop.f32.mrb[141].mxu1  ;;  %v3297_v54 = vadd.f32 %v3296_v26, %v9967_v48  ;;  %v3298_v9 = vpop.f32.mrb[143].mxu0  ;;  %3685 = vmatpush1.bf16.msra.mxu0 %v3519_v52  ;;  %v3470_v21 = vmax.f32 %v3293_v23, 0.0 }
 0x4ea   : > { %v3408_v33 = vadd.f32 %v3407_v31, %v11304_v0  ;;  %v3409_v43 = vpop.f32.mrb[142].mxu1  ;;  %3797 = vmatprep.subr.bf16.mxu1 %v3522_v57  ;;  %v3299_v17 = vadd.f32 %v3298_v9, %v9967_v48  ;;  %v3471_v61 = vmax.f32 %v3295_v15, 0.0 }
 0x4eb   : > { %v3410_v3 = vadd.f32 %v3409_v43, %v9967_v48  ;;  %v3411_v58 = vpop.f32.mrb[143].mxu1  ;;  %3798 = vmatpush1.bf16.msra.mxu1 %v3521_v39  ;;  %v3474_v5 = vmax.f32 %v3297_v54, 0.0  ;;  %v3472_v18 = vmax.f32 %v3406_v11, 0.0 }
 0x4ec   : > { %v3412_v20 = vadd.f32 %v3411_v58, %v9967_v48  ;;  %v3475_v22 = vmax.f32 %v3299_v17, 0.0  ;;  %v3473_v63 = vmax.f32 %v3408_v33, 0.0  ;;  %v8573_v48 = vld [vmem:[%s11102_s5 + $0x88] sm:$0xff]  }
 0x4ed   : > { %v3476_v51 = vmax.f32 %v3410_v3, 0.0  ;;  %v3523_v40 = vpack.c.bf16 %v3474_v5, %v3470_v21 }
 0x4ee   : > { %v3477_v47 = vmax.f32 %v3412_v20, 0.0  ;;  %v3524_v55 = vpack.c.bf16 %v3475_v22, %v3471_v61 }
 0x4ef   : > { %v3525_v36 = vpack.c.bf16 %v3476_v51, %v3472_v18 }
 0x4f0   : > { %v3526_v44 = vpack.c.bf16 %v3477_v47, %v3473_v63  ;;  %3686 = vmatprep.subr.bf16.mxu0 %v3524_v55 }
 0x4f1   : > { %3687 = vmatpush1.bf16.msra.mxu0 %v3523_v40 }
 0x4f2   : > { %3799 = vmatprep.subr.bf16.mxu1 %v3526_v44 }
 0x4f3   : > { %3800 = vmatpush1.bf16.msra.mxu1 %v3525_v36 }
 0x4f4   : > { %3705 = vmatmul.mubr.bf16.vlgmr.msra.gmra.mrb[144].mxu0 %v8572_v13 }
 0x4f5   : > { %3714 = vmatprep.mubr.bf16.mxu0 %v11260_v14 }
 0x4f6   : > { %3818 = vmatmul.mubr.bf16.vlgmr.msra.gmra.mrb[144].mxu1 %v8572_v13 }
 0x4f7   : > { %3827 = vmatprep.mubr.bf16.mxu1 %v11260_v14 }
 0x4fc   : > { %3715 = vmatmul.mubr.bf16.gmra.mrb[148].mxu0 %v8573_v48 }
 0x4fd   : > { %3724 = vmatprep.mubr.bf16.mxu0 %v11260_v14 }
 0x4fe   : > { %3828 = vmatmul.mubr.bf16.gmra.mrb[148].mxu1 %v8573_v48 }
 0x4ff   : > { %3837 = vmatprep.mubr.bf16.mxu1 %v11260_v14 }
 0x504   : > { %3725 = vmatmul.mubr.bf16.gmra.mrb[152].mxu0 %v8574_v42 }
 0x505   : > { %3734 = vmatprep.mubr.bf16.mxu0 %v11260_v14 }
 0x506   : > { %3838 = vmatmul.mubr.bf16.gmra.mrb[152].mxu1 %v8574_v42 }
 0x507   : > { %3847 = vmatprep.mubr.bf16.mxu1 %v11260_v14 }
 0x50c   : > { %3735 = vmatmul.mubr.bf16.gmra.mrb[156].mxu0 %v8575_v25 }
 0x50d   : > { %3744 = vmatprep.mubr.bf16.mxu0 %v11260_v14 }
 0x50e   : > { %3848 = vmatmul.mubr.bf16.gmra.mrb[156].mxu1 %v8575_v25 }
 0x50f   : > { %3857 = vmatprep.mubr.bf16.mxu1 %v11260_v14 }
 0x514   : > { %3745 = vmatmul.mubr.bf16.gmra.mrb[160].mxu0 %v8576_v8 }
 0x515   : > { %3754 = vmatprep.mubr.bf16.mxu0 %v11260_v14 }
 0x516   : > { %3858 = vmatmul.mubr.bf16.gmra.mrb[160].mxu1 %v8576_v8 }
 0x517   : > { %3867 = vmatprep.mubr.bf16.mxu1 %v11260_v14 }
 0x51c   : > { %3755 = vmatmul.mubr.bf16.gmra.mrb[164].mxu0 %v8577_v49 }
 0x51d   : > { %3764 = vmatprep.mubr.bf16.mxu0 %v11260_v14 }
 0x51e   : > { %3868 = vmatmul.mubr.bf16.gmra.mrb[164].mxu1 %v8577_v49 }
 0x51f   : > { %3877 = vmatprep.mubr.bf16.mxu1 %v11260_v14 }
 0x524   : > { %3765 = vmatmul.mubr.bf16.gmra.mrb[168].mxu0 %v8578_v38 }
 0x525   : > { %3774 = vmatprep.mubr.bf16.mxu0 %v11260_v14 }
 0x526   : > { %3878 = vmatmul.mubr.bf16.gmra.mrb[168].mxu1 %v8578_v38 }
 0x527   : > { %3887 = vmatprep.mubr.bf16.mxu1 %v11260_v14 }
 0x52c   : > { %3775 = vmatmul.mubr.bf16.gmra.mrb[172].mxu0 %v8579_v37 }
 0x52d   : > { %4188 = vmatprep.mubr.bf16.mxu0 %v11260_v14 }
 0x52e   : > { %3888 = vmatmul.mubr.bf16.gmra.mrb[172].mxu1 %v8579_v37 }
 0x52f   : > { %4301 = vmatprep.mubr.bf16.mxu1 %v11260_v14 }
 0x5c7   : > { %v3706_v62 = vpop.f32.mrb[144].mxu0 }
 0x5c8   : > { %v3707_v52 = vadd.f32 %v3706_v62, %v9961_v53  ;;  %v3708_v39 = vpop.f32.mrb[145].mxu0 }
 0x5c9   : > { %v3819_v41 = vpop.f32.mrb[144].mxu1  ;;  %v3709_v35 = vadd.f32 %v3708_v39, %v9961_v53  ;;  %v3710_v0 = vpop.f32.mrb[146].mxu0 }
 0x5ca   : > { %v3820_v32 = vadd.f32 %v3819_v41, %v9961_v53  ;;  %v3821_v57 = vpop.f32.mrb[145].mxu1  ;;  %v3711_v16 = vadd.f32 %v3710_v0, %v10006_v1  ;;  %v3712_v11 = vpop.f32.mrb[147].mxu0  ;;  %v3898_v33 = vmax.f32 %v3707_v52, 0.0 }
 0x5cb   : > { %v3822_v23 = vadd.f32 %v3821_v57, %v9961_v53  ;;  %v3823_v4 = vpop.f32.mrb[146].mxu1  ;;  %v3713_v31 = vadd.f32 %v3712_v11, %v10006_v1  ;;  %v3899_v3 = vmax.f32 %v3709_v35, 0.0 }
 0x5cc   : > { %v3824_v15 = vadd.f32 %v3823_v4, %v10006_v1  ;;  %v3825_v26 = vpop.f32.mrb[147].mxu1  ;;  %v3902_v54 = vmax.f32 %v3711_v16, 0.0  ;;  %v3900_v9 = vmax.f32 %v3820_v32, 0.0 }
 0x5cd   : > { %v3826_v43 = vadd.f32 %v3825_v26, %v10006_v1  ;;  %v3903_v58 = vmax.f32 %v3713_v31, 0.0  ;;  %v3901_v21 = vmax.f32 %v3822_v23, 0.0 }
 0x5ce   : > { %v3904_v17 = vmax.f32 %v3824_v15, 0.0  ;;  %v3979_v5 = vpack.c.bf16 %v3902_v54, %v3898_v33 }
 0x5cf   : > { %v3905_v53 = vmax.f32 %v3826_v43, 0.0  ;;  %v3980_v18 = vpack.c.bf16 %v3903_v58, %v3899_v3  ;;  %v3716_v61 = vpop.f32.mrb[148].mxu0 }
 0x5d0   : > { %v3981_v20 = vpack.c.bf16 %v3904_v17, %v3900_v9  ;;  %v3717_v22 = vadd.f32 %v3716_v61, %v9999_v7  ;;  %v3718_v40 = vpop.f32.mrb[149].mxu0 }
 0x5d1   : > { %v3982_v51 = vpack.c.bf16 %v3905_v53, %v3901_v21  ;;  %v3829_v63 = vpop.f32.mrb[148].mxu1  ;;  %v3719_v36 = vadd.f32 %v3718_v40, %v9999_v7  ;;  %v3720_v55 = vpop.f32.mrb[150].mxu0  ;;  %4156 = vmatprep.subr.bf16.mxu0 %v3980_v18 }
 0x5d2   : > { %v3830_v47 = vadd.f32 %v3829_v63, %v9999_v7  ;;  %v3831_v1 = vpop.f32.mrb[149].mxu1  ;;  %v3721_v13 = vadd.f32 %v3720_v55, %v10054_v60  ;;  %v3722_v42 = vpop.f32.mrb[151].mxu0  ;;  %4157 = vmatpush1.bf16.msra.mxu0 %v3979_v5  ;;  %v3906_v38 = vmax.f32 %v3717_v22, 0.0 }
 0x5d3   : > { %v3832_v44 = vadd.f32 %v3831_v1, %v9999_v7  ;;  %v3833_v48 = vpop.f32.mrb[150].mxu1  ;;  %4269 = vmatprep.subr.bf16.mxu1 %v3982_v51  ;;  %v3723_v8 = vadd.f32 %v3722_v42, %v10054_v60  ;;  %v3907_v41 = vmax.f32 %v3719_v36, 0.0 }
 0x5d4   : > { %v3834_v25 = vadd.f32 %v3833_v48, %v10054_v60  ;;  %v3835_v49 = vpop.f32.mrb[151].mxu1  ;;  %4270 = vmatpush1.bf16.msra.mxu1 %v3981_v20  ;;  %v3910_v37 = vmax.f32 %v3721_v13, 0.0  ;;  %v3908_v52 = vmax.f32 %v3830_v47, 0.0 }
 0x5d5   : > { %v3836_v62 = vadd.f32 %v3835_v49, %v10054_v60  ;;  %v3911_v7 = vmax.f32 %v3723_v8, 0.0  ;;  %v3909_v32 = vmax.f32 %v3832_v44, 0.0 }
 0x5d6   : > { %v3912_v39 = vmax.f32 %v3834_v25, 0.0  ;;  %v3983_v35 = vpack.c.bf16 %v3910_v37, %v3906_v38 }
 0x5d7   : > { %v3913_v57 = vmax.f32 %v3836_v62, 0.0  ;;  %v3984_v23 = vpack.c.bf16 %v3911_v7, %v3907_v41  ;;  %v3726_v16 = vpop.f32.mrb[152].mxu0 }
 0x5d8   : > { %v3985_v0 = vpack.c.bf16 %v3912_v39, %v3908_v52  ;;  %v3727_v11 = vadd.f32 %v3726_v16, %v10049_v34  ;;  %v3728_v31 = vpop.f32.mrb[153].mxu0 }
 0x5d9   : > { %v3986_v4 = vpack.c.bf16 %v3913_v57, %v3909_v32  ;;  %v3839_v15 = vpop.f32.mrb[152].mxu1  ;;  %v3729_v33 = vadd.f32 %v3728_v31, %v10049_v34  ;;  %v3730_v54 = vpop.f32.mrb[154].mxu0  ;;  %4158 = vmatprep.subr.bf16.mxu0 %v3984_v23 }
 0x5da   : > { %v3840_v26 = vadd.f32 %v3839_v15, %v10049_v34  ;;  %v3841_v60 = vpop.f32.mrb[153].mxu1  ;;  %v3731_v9 = vadd.f32 %v3730_v54, %v10083_v6  ;;  %v3732_v17 = vpop.f32.mrb[155].mxu0  ;;  %4159 = vmatpush1.bf16.msra.mxu0 %v3983_v35  ;;  %v3914_v53 = vmax.f32 %v3727_v11, 0.0 }
 0x5db   : > { %v3842_v43 = vadd.f32 %v3841_v60, %v10049_v34  ;;  %v3843_v3 = vpop.f32.mrb[154].mxu1  ;;  %4271 = vmatprep.subr.bf16.mxu1 %v3986_v4  ;;  %v3733_v21 = vadd.f32 %v3732_v17, %v10083_v6  ;;  %v3915_v51 = vmax.f32 %v3729_v33, 0.0 }
 0x5dc   : > { %v3844_v58 = vadd.f32 %v3843_v3, %v10083_v6  ;;  %v3845_v5 = vpop.f32.mrb[155].mxu1  ;;  %4272 = vmatpush1.bf16.msra.mxu1 %v3985_v0  ;;  %v3918_v20 = vmax.f32 %v3731_v9, 0.0  ;;  %v3916_v61 = vmax.f32 %v3840_v26, 0.0 }
 0x5dd   : > { %v3846_v18 = vadd.f32 %v3845_v5, %v10083_v6  ;;  %v3919_v34 = vmax.f32 %v3733_v21, 0.0  ;;  %v3917_v63 = vmax.f32 %v3842_v43, 0.0 }
 0x5de   : > { %v3920_v22 = vmax.f32 %v3844_v58, 0.0  ;;  %v3987_v40 = vpack.c.bf16 %v3918_v20, %v3914_v53 }
 0x5df   : > { %v3921_v47 = vmax.f32 %v3846_v18, 0.0  ;;  %v3988_v1 = vpack.c.bf16 %v3919_v34, %v3915_v51  ;;  %v3736_v55 = vpop.f32.mrb[156].mxu0 }
 0x5e0   : > { %v3989_v36 = vpack.c.bf16 %v3920_v22, %v3916_v61  ;;  %v3737_v13 = vadd.f32 %v3736_v55, %v10080_v19  ;;  %v3738_v42 = vpop.f32.mrb[157].mxu0 }
 0x5e1   : > { %v3990_v44 = vpack.c.bf16 %v3921_v47, %v3917_v63  ;;  %v3849_v48 = vpop.f32.mrb[156].mxu1  ;;  %v3739_v8 = vadd.f32 %v3738_v42, %v10080_v19  ;;  %v3740_v49 = vpop.f32.mrb[158].mxu0  ;;  %4160 = vmatprep.subr.bf16.mxu0 %v3988_v1 }
 0x5e2   : > { %v3850_v25 = vadd.f32 %v3849_v48, %v10080_v19  ;;  %v3851_v6 = vpop.f32.mrb[157].mxu1  ;;  %v3741_v37 = vadd.f32 %v3740_v49, %v10124_v10  ;;  %v3742_v52 = vpop.f32.mrb[159].mxu0  ;;  %4161 = vmatpush1.bf16.msra.mxu0 %v3987_v40  ;;  %v3922_v32 = vmax.f32 %v3737_v13, 0.0 }
 0x5e3   : > { %v3852_v38 = vadd.f32 %v3851_v6, %v10080_v19  ;;  %v3853_v62 = vpop.f32.mrb[158].mxu1  ;;  %4273 = vmatprep.subr.bf16.mxu1 %v3990_v44  ;;  %v3743_v39 = vadd.f32 %v3742_v52, %v10124_v10  ;;  %v3923_v23 = vmax.f32 %v3739_v8, 0.0 }
 0x5e4   : > { %v3854_v41 = vadd.f32 %v3853_v62, %v10124_v10  ;;  %v3855_v7 = vpop.f32.mrb[159].mxu1  ;;  %4274 = vmatpush1.bf16.msra.mxu1 %v3989_v36  ;;  %v3926_v35 = vmax.f32 %v3741_v37, 0.0  ;;  %v3924_v0 = vmax.f32 %v3850_v25, 0.0 }
 0x5e5   : > { %v3856_v57 = vadd.f32 %v3855_v7, %v10124_v10  ;;  %v3927_v19 = vmax.f32 %v3743_v39, 0.0  ;;  %v3925_v4 = vmax.f32 %v3852_v38, 0.0 }
 0x5e6   : > { %v3928_v16 = vmax.f32 %v3854_v41, 0.0  ;;  %v3991_v11 = vpack.c.bf16 %v3926_v35, %v3922_v32 }
 0x5e7   : > { %v3929_v15 = vmax.f32 %v3856_v57, 0.0  ;;  %v3992_v26 = vpack.c.bf16 %v3927_v19, %v3923_v23  ;;  %v3746_v33 = vpop.f32.mrb[160].mxu0 }
 0x5e8   : > { %v3993_v31 = vpack.c.bf16 %v3928_v16, %v3924_v0  ;;  %v3747_v54 = vadd.f32 %v3746_v33, %v10122_v12  ;;  %v3748_v9 = vpop.f32.mrb[161].mxu0 }
 0x5e9   : > { %v3994_v60 = vpack.c.bf16 %v3929_v15, %v3925_v4  ;;  %v3859_v43 = vpop.f32.mrb[160].mxu1  ;;  %v3749_v17 = vadd.f32 %v3748_v9, %v10122_v12  ;;  %v3750_v58 = vpop.f32.mrb[162].mxu0  ;;  %4162 = vmatprep.subr.bf16.mxu0 %v3992_v26 }
 0x5ea   : > { %v3860_v3 = vadd.f32 %v3859_v43, %v10122_v12  ;;  %v3861_v10 = vpop.f32.mrb[161].mxu1  ;;  %v3751_v5 = vadd.f32 %v3750_v58, %v10146_v59  ;;  %v3752_v20 = vpop.f32.mrb[163].mxu0  ;;  %4163 = vmatpush1.bf16.msra.mxu0 %v3991_v11  ;;  %v3930_v22 = vmax.f32 %v3747_v54, 0.0 }
 0x5eb   : > { %v3862_v21 = vadd.f32 %v3861_v10, %v10122_v12  ;;  %v3863_v53 = vpop.f32.mrb[162].mxu1  ;;  %4275 = vmatprep.subr.bf16.mxu1 %v3994_v60  ;;  %v3753_v61 = vadd.f32 %v3752_v20, %v10146_v59  ;;  %v3931_v47 = vmax.f32 %v3749_v17, 0.0 }
 0x5ec   : > { %v3864_v18 = vadd.f32 %v3863_v53, %v10146_v59  ;;  %v3865_v51 = vpop.f32.mrb[163].mxu1  ;;  %4276 = vmatpush1.bf16.msra.mxu1 %v3993_v31  ;;  %v3934_v34 = vmax.f32 %v3751_v5, 0.0  ;;  %v3932_v40 = vmax.f32 %v3860_v3, 0.0 }
 0x5ed   : > { %v3866_v63 = vadd.f32 %v3865_v51, %v10146_v59  ;;  %v3935_v12 = vmax.f32 %v3753_v61, 0.0  ;;  %v3933_v1 = vmax.f32 %v3862_v21, 0.0 }
 0x5ee   : > { %v3936_v36 = vmax.f32 %v3864_v18, 0.0  ;;  %v3995_v55 = vpack.c.bf16 %v3934_v34, %v3930_v22 }
 0x5ef   : > { %v3937_v44 = vmax.f32 %v3866_v63, 0.0  ;;  %v3996_v48 = vpack.c.bf16 %v3935_v12, %v3931_v47  ;;  %v3756_v42 = vpop.f32.mrb[164].mxu0 }
 0x5f0   : > { %v3997_v13 = vpack.c.bf16 %v3936_v36, %v3932_v40  ;;  %v3757_v8 = vadd.f32 %v3756_v42, %v10148_v29  ;;  %v3758_v49 = vpop.f32.mrb[165].mxu0 }
 0x5f1   : > { %v3998_v25 = vpack.c.bf16 %v3937_v44, %v3933_v1  ;;  %v3869_v6 = vpop.f32.mrb[164].mxu1  ;;  %v3759_v37 = vadd.f32 %v3758_v49, %v10148_v29  ;;  %v3760_v62 = vpop.f32.mrb[166].mxu0  ;;  %4164 = vmatprep.subr.bf16.mxu0 %v3996_v48 }
 0x5f2   : > { %v3870_v38 = vadd.f32 %v3869_v6, %v10148_v29  ;;  %v3871_v59 = vpop.f32.mrb[165].mxu1  ;;  %v3761_v41 = vadd.f32 %v3760_v62, %v10165_v28  ;;  %v3762_v7 = vpop.f32.mrb[167].mxu0  ;;  %4165 = vmatpush1.bf16.msra.mxu0 %v3995_v55  ;;  %v3938_v0 = vmax.f32 %v3757_v8, 0.0 }
 0x5f3   : > { %v3872_v52 = vadd.f32 %v3871_v59, %v10148_v29  ;;  %v3873_v39 = vpop.f32.mrb[166].mxu1  ;;  %4277 = vmatprep.subr.bf16.mxu1 %v3998_v25  ;;  %v3763_v35 = vadd.f32 %v3762_v7, %v10165_v28  ;;  %v3939_v4 = vmax.f32 %v3759_v37, 0.0 }
 0x5f4   : > { %v3874_v32 = vadd.f32 %v3873_v39, %v10165_v28  ;;  %v3875_v57 = vpop.f32.mrb[167].mxu1  ;;  %4278 = vmatpush1.bf16.msra.mxu1 %v3997_v13  ;;  %v3942_v23 = vmax.f32 %v3761_v41, 0.0  ;;  %v3940_v19 = vmax.f32 %v3870_v38, 0.0 }
 0x5f5   : > { %v3876_v16 = vadd.f32 %v3875_v57, %v10165_v28  ;;  %v3943_v29 = vmax.f32 %v3763_v35, 0.0  ;;  %v3941_v15 = vmax.f32 %v3872_v52, 0.0 }
 0x5f6   : > { %v3944_v11 = vmax.f32 %v3874_v32, 0.0  ;;  %v3999_v31 = vpack.c.bf16 %v3942_v23, %v3938_v0 }
 0x5f7   : > { %v3945_v26 = vmax.f32 %v3876_v16, 0.0  ;;  %v4000_v60 = vpack.c.bf16 %v3943_v29, %v3939_v4  ;;  %v3766_v54 = vpop.f32.mrb[168].mxu0 }
 0x5f8   : > { %v4001_v33 = vpack.c.bf16 %v3944_v11, %v3940_v19  ;;  %v3767_v9 = vadd.f32 %v3766_v54, %v10173_v45  ;;  %v3768_v17 = vpop.f32.mrb[169].mxu0  ;;  %v8582_v54 = vld [vmem:[%s11102_s5 + $0xd0] sm:$0xff]  }
 0x5f9   : > { %v4002_v43 = vpack.c.bf16 %v3945_v26, %v3941_v15  ;;  %v3879_v3 = vpop.f32.mrb[168].mxu1  ;;  %v3769_v58 = vadd.f32 %v3768_v17, %v10173_v45  ;;  %v3770_v21 = vpop.f32.mrb[170].mxu0  ;;  %4166 = vmatprep.subr.bf16.mxu0 %v4000_v60  ;;  %v8580_v60 = vld [vmem:[%s11102_s5 + $0xc0] sm:$0xff]   ;;  %v8586_v17 = vld [vmem:[%s11102_s5 + $0xf0] sm:$0xff]  }
 0x5fa   : > { %v3880_v10 = vadd.f32 %v3879_v3, %v10173_v45  ;;  %v3881_v28 = vpop.f32.mrb[169].mxu1  ;;  %v3771_v53 = vadd.f32 %v3770_v21, %v10188_v56  ;;  %v3772_v18 = vpop.f32.mrb[171].mxu0  ;;  %4167 = vmatpush1.bf16.msra.mxu0 %v3999_v31  ;;  %v3946_v34 = vmax.f32 %v3767_v9, 0.0  ;;  %v8584_v9 = vld [vmem:[%s11102_s5 + $0xe0] sm:$0xff]   ;;  %v8585_v3 = vld [vmem:[%s11102_s5 + $0xe8] sm:$0xff]  }
 0x5fb   : > { %v3882_v5 = vadd.f32 %v3881_v28, %v10173_v45  ;;  %v3883_v20 = vpop.f32.mrb[170].mxu1  ;;  %4279 = vmatprep.subr.bf16.mxu1 %v4002_v43  ;;  %v3773_v51 = vadd.f32 %v3772_v18, %v10188_v56  ;;  %v3947_v36 = vmax.f32 %v3769_v58, 0.0  ;;  %v8583_v43 = vld [vmem:[%s11102_s5 + $0xd8] sm:$0xff]   ;;  %v4031_v58 = vpop.permute.xlu0 %4030 }
 0x5fc   : > { %v3884_v61 = vadd.f32 %v3883_v20, %v10188_v56  ;;  %v3885_v22 = vpop.f32.mrb[171].mxu1  ;;  %4280 = vmatpush1.bf16.msra.mxu1 %v4001_v33  ;;  %v3950_v63 = vmax.f32 %v3771_v53, 0.0  ;;  %v3948_v47 = vmax.f32 %v3880_v10, 0.0  ;;  %v8587_v10 = vld [vmem:[%s11102_s5 + $0xf8] sm:$0xff]   ;;  %v4036_v28 = vpop.permute.xlu1 %4035 }
 0x5fd   : > { %v3886_v40 = vadd.f32 %v3885_v22, %v10188_v56  ;;  %v3951_v45 = vmax.f32 %v3773_v51, 0.0  ;;  %v3949_v1 = vmax.f32 %v3882_v5, 0.0 }
 0x5fe   : > { %v3952_v12 = vmax.f32 %v3884_v61, 0.0  ;;  %v4003_v55 = vpack.c.bf16 %v3950_v63, %v3946_v34 }
 0x5ff   : > { %v3953_v44 = vmax.f32 %v3886_v40, 0.0  ;;  %v4004_v48 = vpack.c.bf16 %v3951_v45, %v3947_v36  ;;  %v3776_v42 = vpop.f32.mrb[172].mxu0 }
 0x600   : > { %v4005_v13 = vpack.c.bf16 %v3952_v12, %v3948_v47  ;;  %v3777_v8 = vadd.f32 %v3776_v42, %v10190_v2  ;;  %v3778_v49 = vpop.f32.mrb[173].mxu0 }
 0x601   : > { %v4006_v25 = vpack.c.bf16 %v3953_v44, %v3949_v1  ;;  %v3889_v6 = vpop.f32.mrb[172].mxu1  ;;  %v3779_v37 = vadd.f32 %v3778_v49, %v10190_v2  ;;  %v3780_v59 = vpop.f32.mrb[174].mxu0  ;;  %4168 = vmatprep.subr.bf16.mxu0 %v4004_v48 }
 0x602   : > { %v3890_v38 = vadd.f32 %v3889_v6, %v10190_v2  ;;  %v3891_v56 = vpop.f32.mrb[173].mxu1  ;;  %v3781_v52 = vadd.f32 %v3780_v59, %v10195_v30  ;;  %v3782_v39 = vpop.f32.mrb[175].mxu0  ;;  %4169 = vmatpush1.bf16.msra.mxu0 %v4003_v55  ;;  %v3954_v57 = vmax.f32 %v3777_v8, 0.0 }
 0x603   : > { %v3892_v62 = vadd.f32 %v3891_v56, %v10190_v2  ;;  %v3893_v41 = vpop.f32.mrb[174].mxu1  ;;  %4281 = vmatprep.subr.bf16.mxu1 %v4006_v25  ;;  %v3783_v32 = vadd.f32 %v3782_v39, %v10195_v30  ;;  %v3955_v19 = vmax.f32 %v3779_v37, 0.0  ;;  %v4041_v8 = vpop.permute.xlu0 %4040 }
 0x604   : > { %v3894_v7 = vadd.f32 %v3893_v41, %v10195_v30  ;;  %v3895_v35 = vpop.f32.mrb[175].mxu1  ;;  %4282 = vmatpush1.bf16.msra.mxu1 %v4005_v13  ;;  %v3958_v0 = vmax.f32 %v3781_v52, 0.0  ;;  %v3956_v16 = vmax.f32 %v3890_v38, 0.0  ;;  %v4046_v37 = vpop.permute.xlu1 %4045 }
 0x605   : > { %v3896_v23 = vadd.f32 %v3895_v35, %v10195_v30  ;;  %v3959_v2 = vmax.f32 %v3783_v32, 0.0  ;;  %v3957_v11 = vmax.f32 %v3892_v62, 0.0  ;;  %v8581_v30 = vld [vmem:[%s11102_s5 + $0xc8] sm:$0xff]  }
 0x606   : > { %v3960_v4 = vmax.f32 %v3894_v7, 0.0  ;;  %v4007_v29 = vpack.c.bf16 %v3958_v0, %v3954_v57 }
 0x607   : > { %v3961_v15 = vmax.f32 %v3896_v23, 0.0  ;;  %v4008_v26 = vpack.c.bf16 %v3959_v2, %v3955_v19 }
 0x608   : > { %v4009_v31 = vpack.c.bf16 %v3960_v4, %v3956_v16 }
 0x609   : > { %v4010_v33 = vpack.c.bf16 %v3961_v15, %v3957_v11  ;;  %4170 = vmatprep.subr.bf16.mxu0 %v4008_v26 }
 0x60a   : > { %4171 = vmatpush1.bf16.msra.mxu0 %v4007_v29 }
 0x60b   : > { %4283 = vmatprep.subr.bf16.mxu1 %v4010_v33 }
 0x60c   : > { %4284 = vmatpush1.bf16.msra.mxu1 %v4009_v31 }
 0x60d   : > { %4189 = vmatmul.mubr.bf16.vlgmr.msra.gmra.mrb[176].mxu0 %v8580_v60 }
 0x60e   : > { %4198 = vmatprep.mubr.bf16.mxu0 %v11260_v14 }
 0x60f   : > { %4302 = vmatmul.mubr.bf16.vlgmr.msra.gmra.mrb[176].mxu1 %v8580_v60 }
 0x610   : > { %4311 = vmatprep.mubr.bf16.mxu1 %v11260_v14 }
 0x615   : > { %4199 = vmatmul.mubr.bf16.gmra.mrb[180].mxu0 %v8581_v30 }
 0x616   : > { %4208 = vmatprep.mubr.bf16.mxu0 %v11260_v14 }
 0x617   : > { %4312 = vmatmul.mubr.bf16.gmra.mrb[180].mxu1 %v8581_v30 }
 0x618   : > { %4321 = vmatprep.mubr.bf16.mxu1 %v11260_v14 }
 0x61d   : > { %4209 = vmatmul.mubr.bf16.gmra.mrb[184].mxu0 %v8582_v54 }
 0x61e   : > { %4218 = vmatprep.mubr.bf16.mxu0 %v11260_v14 }
 0x61f   : > { %4322 = vmatmul.mubr.bf16.gmra.mrb[184].mxu1 %v8582_v54 }
 0x620   : > { %4331 = vmatprep.mubr.bf16.mxu1 %v11260_v14 }
 0x625   : > { %4219 = vmatmul.mubr.bf16.gmra.mrb[188].mxu0 %v8583_v43 }
 0x626   : > { %4228 = vmatprep.mubr.bf16.mxu0 %v11260_v14 }
 0x627   : > { %4332 = vmatmul.mubr.bf16.gmra.mrb[188].mxu1 %v8583_v43  ;;  %v4051_v43 = vpop.permute.xlu0 %4050 }
 0x628   : > { %4341 = vmatprep.mubr.bf16.mxu1 %v11260_v14 }
 0x62d   : > { %4229 = vmatmul.mubr.bf16.gmra.mrb[192].mxu0 %v8584_v9 }
 0x62e   : > { %4238 = vmatprep.mubr.bf16.mxu0 %v11260_v14 }
 0x62f   : > { %4342 = vmatmul.mubr.bf16.gmra.mrb[192].mxu1 %v8584_v9 }
 0x630   : > { %4351 = vmatprep.mubr.bf16.mxu1 %v11260_v14 }
 0x635   : > { %4239 = vmatmul.mubr.bf16.gmra.mrb[196].mxu0 %v8585_v3 }
 0x636   : > { %4248 = vmatprep.mubr.bf16.mxu0 %v11260_v14 }
 0x637   : > { %4352 = vmatmul.mubr.bf16.gmra.mrb[196].mxu1 %v8585_v3 }
 0x638   : > { %4361 = vmatprep.mubr.bf16.mxu1 %v11260_v14 }
 0x63d   : > { %4249 = vmatmul.mubr.bf16.gmra.mrb[200].mxu0 %v8586_v17 }
 0x63e   : > { %4258 = vmatprep.mubr.bf16.mxu0 %v11260_v14 }
 0x63f   : > { %4362 = vmatmul.mubr.bf16.gmra.mrb[200].mxu1 %v8586_v17 }
 0x640   : > { %4371 = vmatprep.mubr.bf16.mxu1 %v11260_v14 }
 0x645   : > { %4259 = vmatmul.mubr.bf16.gmra.mrb[204].mxu0 %v8587_v10 }
 0x646   : > { %4672 = vmatprep.mubr.bf16.mxu0 %v11260_v14 }
 0x647   : > { %4372 = vmatmul.mubr.bf16.gmra.mrb[204].mxu1 %v8587_v10  ;;  %v4056_v10 = vpop.permute.xlu1 %4055 }
 0x648   : > { %4785 = vmatprep.mubr.bf16.mxu1 %v11260_v14 }
 0x6e0   : > { %v4190_v21 = vpop.f32.mrb[176].mxu0 }
 0x6e1   : > { %v4191_v5 = vadd.f32 %v4190_v21, %v4031_v58  ;;  %v4192_v20 = vpop.f32.mrb[177].mxu0 }
 0x6e2   : > { %v4303_v53 = vpop.f32.mrb[176].mxu1  ;;  %v4193_v61 = vadd.f32 %v4192_v20, %v4031_v58  ;;  %v4194_v22 = vpop.f32.mrb[178].mxu0 }
 0x6e3   : > { %v4304_v18 = vadd.f32 %v4303_v53, %v4031_v58  ;;  %v4305_v51 = vpop.f32.mrb[177].mxu1  ;;  %v4195_v63 = vadd.f32 %v4194_v22, %v4036_v28  ;;  %v4196_v47 = vpop.f32.mrb[179].mxu0  ;;  %v4382_v1 = vmax.f32 %v4191_v5, 0.0 }
 0x6e4   : > { %v4306_v34 = vadd.f32 %v4305_v51, %v4031_v58  ;;  %v4307_v40 = vpop.f32.mrb[178].mxu1  ;;  %v4197_v12 = vadd.f32 %v4196_v47, %v4036_v28  ;;  %v4383_v48 = vmax.f32 %v4193_v61, 0.0 }
 0x6e5   : > { %v4308_v36 = vadd.f32 %v4307_v40, %v4036_v28  ;;  %v4309_v45 = vpop.f32.mrb[179].mxu1  ;;  %v4386_v55 = vmax.f32 %v4195_v63, 0.0  ;;  %v4384_v13 = vmax.f32 %v4304_v18, 0.0 }
 0x6e6   : > { %v4310_v44 = vadd.f32 %v4309_v45, %v4036_v28  ;;  %v4387_v25 = vmax.f32 %v4197_v12, 0.0  ;;  %v4385_v6 = vmax.f32 %v4306_v34, 0.0 }
 0x6e7   : > { %v4388_v42 = vmax.f32 %v4308_v36, 0.0  ;;  %v4463_v49 = vpack.c.bf16 %v4386_v55, %v4382_v1 }
 0x6e8   : > { %v4389_v38 = vmax.f32 %v4310_v44, 0.0  ;;  %v4464_v59 = vpack.c.bf16 %v4387_v25, %v4383_v48  ;;  %v4200_v62 = vpop.f32.mrb[180].mxu0 }
 0x6e9   : > { %v4465_v56 = vpack.c.bf16 %v4388_v42, %v4384_v13  ;;  %v4201_v41 = vadd.f32 %v4200_v62, %v4041_v8  ;;  %v4202_v7 = vpop.f32.mrb[181].mxu0 }
 0x6ea   : > { %v4466_v52 = vpack.c.bf16 %v4389_v38, %v4385_v6  ;;  %v4313_v39 = vpop.f32.mrb[180].mxu1  ;;  %v4203_v35 = vadd.f32 %v4202_v7, %v4041_v8  ;;  %v4204_v0 = vpop.f32.mrb[182].mxu0  ;;  %4640 = vmatprep.subr.bf16.mxu0 %v4464_v59 }
 0x6eb   : > { %v4314_v32 = vadd.f32 %v4313_v39, %v4041_v8  ;;  %v4315_v57 = vpop.f32.mrb[181].mxu1  ;;  %v4205_v16 = vadd.f32 %v4204_v0, %v4046_v37  ;;  %v4206_v4 = vpop.f32.mrb[183].mxu0  ;;  %4641 = vmatpush1.bf16.msra.mxu0 %v4463_v49  ;;  %v4390_v15 = vmax.f32 %v4201_v41, 0.0 }
 0x6ec   : > { %v4316_v23 = vadd.f32 %v4315_v57, %v4041_v8  ;;  %v4317_v19 = vpop.f32.mrb[182].mxu1  ;;  %4753 = vmatprep.subr.bf16.mxu1 %v4466_v52  ;;  %v4207_v11 = vadd.f32 %v4206_v4, %v4046_v37  ;;  %v4391_v60 = vmax.f32 %v4203_v35, 0.0  ;;  %v4061_v6 = vpop.permute.xlu0 %4060 }
 0x6ed   : > { %v4318_v2 = vadd.f32 %v4317_v19, %v4046_v37  ;;  %v4319_v29 = vpop.f32.mrb[183].mxu1  ;;  %4754 = vmatpush1.bf16.msra.mxu1 %v4465_v56  ;;  %v4394_v31 = vmax.f32 %v4205_v16, 0.0  ;;  %v4392_v33 = vmax.f32 %v4314_v32, 0.0  ;;  %v4066_v56 = vpop.permute.xlu1 %4065 }
 0x6ee   : > { %v4320_v26 = vadd.f32 %v4319_v29, %v4046_v37  ;;  %v4395_v54 = vmax.f32 %v4207_v11, 0.0  ;;  %v4393_v9 = vmax.f32 %v4316_v23, 0.0 }
 0x6ef   : > { %v4396_v30 = vmax.f32 %v4318_v2, 0.0  ;;  %v4467_v3 = vpack.c.bf16 %v4394_v31, %v4390_v15 }
 0x6f0   : > { %v4397_v17 = vmax.f32 %v4320_v26, 0.0  ;;  %v4468_v28 = vpack.c.bf16 %v4395_v54, %v4391_v60  ;;  %v4210_v21 = vpop.f32.mrb[184].mxu0 }
 0x6f1   : > { %v4469_v58 = vpack.c.bf16 %v4396_v30, %v4392_v33  ;;  %v4211_v53 = vadd.f32 %v4210_v21, %v4051_v43  ;;  %v4212_v18 = vpop.f32.mrb[185].mxu0 }
 0x6f2   : > { %v4470_v5 = vpack.c.bf16 %v4397_v17, %v4393_v9  ;;  %v4323_v20 = vpop.f32.mrb[184].mxu1  ;;  %v4213_v51 = vadd.f32 %v4212_v18, %v4051_v43  ;;  %v4214_v34 = vpop.f32.mrb[186].mxu0  ;;  %4642 = vmatprep.subr.bf16.mxu0 %v4468_v28 }
 0x6f3   : > { %v4324_v61 = vadd.f32 %v4323_v20, %v4051_v43  ;;  %v4325_v22 = vpop.f32.mrb[185].mxu1  ;;  %v4215_v40 = vadd.f32 %v4214_v34, %v4056_v10  ;;  %v4216_v36 = vpop.f32.mrb[187].mxu0  ;;  %4643 = vmatpush1.bf16.msra.mxu0 %v4467_v3  ;;  %v4398_v55 = vmax.f32 %v4211_v53, 0.0 }
 0x6f4   : > { %v4326_v63 = vadd.f32 %v4325_v22, %v4051_v43  ;;  %v4327_v47 = vpop.f32.mrb[186].mxu1  ;;  %4755 = vmatprep.subr.bf16.mxu1 %v4470_v5  ;;  %v4217_v45 = vadd.f32 %v4216_v36, %v4056_v10  ;;  %v4399_v42 = vmax.f32 %v4213_v51, 0.0  ;;  %v4071_v9 = vpop.permute.xlu0 %4070 }
 0x6f5   : > { %v4328_v12 = vadd.f32 %v4327_v47, %v4056_v10  ;;  %v4329_v1 = vpop.f32.mrb[187].mxu1  ;;  %4756 = vmatpush1.bf16.msra.mxu1 %v4469_v58  ;;  %v4402_v44 = vmax.f32 %v4215_v40, 0.0  ;;  %v4400_v48 = vmax.f32 %v4324_v61, 0.0  ;;  %v4076_v58 = vpop.permute.xlu1 %4075 }
 0x6f6   : > { %v4330_v13 = vadd.f32 %v4329_v1, %v4056_v10  ;;  %v4403_v8 = vmax.f32 %v4217_v45, 0.0  ;;  %v4401_v49 = vmax.f32 %v4326_v63, 0.0 }
 0x6f7   : > { %v4404_v25 = vmax.f32 %v4328_v12, 0.0  ;;  %v4471_v38 = vpack.c.bf16 %v4402_v44, %v4398_v55 }
 0x6f8   : > { %v4405_v37 = vmax.f32 %v4330_v13, 0.0  ;;  %v4472_v62 = vpack.c.bf16 %v4403_v8, %v4399_v42  ;;  %v4220_v52 = vpop.f32.mrb[188].mxu0 }
 0x6f9   : > { %v4473_v59 = vpack.c.bf16 %v4404_v25, %v4400_v48  ;;  %v4221_v39 = vadd.f32 %v4220_v52, %v4061_v6  ;;  %v4222_v32 = vpop.f32.mrb[189].mxu0 }
 0x6fa   : > { %v4474_v41 = vpack.c.bf16 %v4405_v37, %v4401_v49  ;;  %v4333_v7 = vpop.f32.mrb[188].mxu1  ;;  %v4223_v57 = vadd.f32 %v4222_v32, %v4061_v6  ;;  %v4224_v23 = vpop.f32.mrb[190].mxu0  ;;  %4644 = vmatprep.subr.bf16.mxu0 %v4472_v62 }
 0x6fb   : > { %v4334_v35 = vadd.f32 %v4333_v7, %v4061_v6  ;;  %v4335_v0 = vpop.f32.mrb[189].mxu1  ;;  %v4225_v19 = vadd.f32 %v4224_v23, %v4066_v56  ;;  %v4226_v2 = vpop.f32.mrb[191].mxu0  ;;  %4645 = vmatpush1.bf16.msra.mxu0 %v4471_v38  ;;  %v4406_v31 = vmax.f32 %v4221_v39, 0.0 }
 0x6fc   : > { %v4336_v16 = vadd.f32 %v4335_v0, %v4061_v6  ;;  %v4337_v4 = vpop.f32.mrb[190].mxu1  ;;  %4757 = vmatprep.subr.bf16.mxu1 %v4474_v41  ;;  %v4227_v29 = vadd.f32 %v4226_v2, %v4066_v56  ;;  %v4407_v30 = vmax.f32 %v4223_v57, 0.0  ;;  %v4081_v49 = vpop.permute.xlu0 %4080 }
 0x6fd   : > { %v4338_v11 = vadd.f32 %v4337_v4, %v4066_v56  ;;  %v4339_v15 = vpop.f32.mrb[191].mxu1  ;;  %4758 = vmatpush1.bf16.msra.mxu1 %v4473_v59  ;;  %v4410_v26 = vmax.f32 %v4225_v19, 0.0  ;;  %v4408_v60 = vmax.f32 %v4334_v35, 0.0  ;;  %v4086_v59 = vpop.permute.xlu1 %4085 }
 0x6fe   : > { %v4340_v33 = vadd.f32 %v4339_v15, %v4066_v56  ;;  %v4411_v43 = vmax.f32 %v4227_v29, 0.0  ;;  %v4409_v3 = vmax.f32 %v4336_v16, 0.0 }
 0x6ff   : > { %v4412_v54 = vmax.f32 %v4338_v11, 0.0  ;;  %v4475_v17 = vpack.c.bf16 %v4410_v26, %v4406_v31 }
 0x700   : > { %v4413_v10 = vmax.f32 %v4340_v33, 0.0  ;;  %v4476_v21 = vpack.c.bf16 %v4411_v43, %v4407_v30  ;;  %v4230_v5 = vpop.f32.mrb[192].mxu0 }
 0x701   : > { %v4477_v28 = vpack.c.bf16 %v4412_v54, %v4408_v60  ;;  %v4231_v20 = vadd.f32 %v4230_v5, %v4071_v9  ;;  %v4232_v61 = vpop.f32.mrb[193].mxu0 }
 0x702   : > { %v4478_v53 = vpack.c.bf16 %v4413_v10, %v4409_v3  ;;  %v4343_v18 = vpop.f32.mrb[192].mxu1  ;;  %v4233_v22 = vadd.f32 %v4232_v61, %v4071_v9  ;;  %v4234_v63 = vpop.f32.mrb[194].mxu0  ;;  %4646 = vmatprep.subr.bf16.mxu0 %v4476_v21 }
 0x703   : > { %v4344_v51 = vadd.f32 %v4343_v18, %v4071_v9  ;;  %v4345_v34 = vpop.f32.mrb[193].mxu1  ;;  %v4235_v47 = vadd.f32 %v4234_v63, %v4076_v58  ;;  %v4236_v12 = vpop.f32.mrb[195].mxu0  ;;  %4647 = vmatpush1.bf16.msra.mxu0 %v4475_v17  ;;  %v4414_v44 = vmax.f32 %v4231_v20, 0.0 }
 0x704   : > { %v4346_v40 = vadd.f32 %v4345_v34, %v4071_v9  ;;  %v4347_v36 = vpop.f32.mrb[194].mxu1  ;;  %4759 = vmatprep.subr.bf16.mxu1 %v4478_v53  ;;  %v4237_v1 = vadd.f32 %v4236_v12, %v4076_v58  ;;  %v4415_v25 = vmax.f32 %v4233_v22, 0.0  ;;  %v4091_v3 = vpop.permute.xlu0 %4090 }
 0x705   : > { %v4348_v45 = vadd.f32 %v4347_v36, %v4076_v58  ;;  %v4349_v55 = vpop.f32.mrb[195].mxu1  ;;  %4760 = vmatpush1.bf16.msra.mxu1 %v4477_v28  ;;  %v4418_v13 = vmax.f32 %v4235_v47, 0.0  ;;  %v4416_v42 = vmax.f32 %v4344_v51, 0.0  ;;  %v4096_v28 = vpop.permute.xlu1 %4095 }
 0x706   : > { %v4350_v48 = vadd.f32 %v4349_v55, %v4076_v58  ;;  %v4419_v6 = vmax.f32 %v4237_v1, 0.0  ;;  %v4417_v38 = vmax.f32 %v4346_v40, 0.0 }
 0x707   : > { %v4420_v8 = vmax.f32 %v4348_v45, 0.0  ;;  %v4479_v37 = vpack.c.bf16 %v4418_v13, %v4414_v44 }
 0x708   : > { %v4421_v56 = vmax.f32 %v4350_v48, 0.0  ;;  %v4480_v52 = vpack.c.bf16 %v4419_v6, %v4415_v25  ;;  %v4240_v41 = vpop.f32.mrb[196].mxu0 }
 0x709   : > { %v4481_v62 = vpack.c.bf16 %v4420_v8, %v4416_v42  ;;  %v4241_v7 = vadd.f32 %v4240_v41, %v4081_v49  ;;  %v4242_v35 = vpop.f32.mrb[197].mxu0 }
 0x70a   : > { %v4482_v39 = vpack.c.bf16 %v4421_v56, %v4417_v38  ;;  %v4353_v32 = vpop.f32.mrb[196].mxu1  ;;  %v4243_v0 = vadd.f32 %v4242_v35, %v4081_v49  ;;  %v4244_v16 = vpop.f32.mrb[198].mxu0  ;;  %4648 = vmatprep.subr.bf16.mxu0 %v4480_v52 }
 0x70b   : > { %v4354_v57 = vadd.f32 %v4353_v32, %v4081_v49  ;;  %v4355_v23 = vpop.f32.mrb[197].mxu1  ;;  %v4245_v4 = vadd.f32 %v4244_v16, %v4086_v59  ;;  %v4246_v11 = vpop.f32.mrb[199].mxu0  ;;  %4649 = vmatpush1.bf16.msra.mxu0 %v4479_v37  ;;  %v4422_v26 = vmax.f32 %v4241_v7, 0.0 }
 0x70c   : > { %v4356_v19 = vadd.f32 %v4355_v23, %v4081_v49  ;;  %v4357_v2 = vpop.f32.mrb[198].mxu1  ;;  %4761 = vmatprep.subr.bf16.mxu1 %v4482_v39  ;;  %v4247_v15 = vadd.f32 %v4246_v11, %v4086_v59  ;;  %v4423_v54 = vmax.f32 %v4243_v0, 0.0  ;;  %v4101_v38 = vpop.permute.xlu0 %4100 }
 0x70d   : > { %v4358_v29 = vadd.f32 %v4357_v2, %v4086_v59  ;;  %v4359_v31 = vpop.f32.mrb[199].mxu1  ;;  %4762 = vmatpush1.bf16.msra.mxu1 %v4481_v62  ;;  %v4426_v33 = vmax.f32 %v4245_v4, 0.0  ;;  %v4424_v30 = vmax.f32 %v4354_v57, 0.0  ;;  %v4106_v62 = vpop.permute.xlu1 %4105 }
 0x70e   : > { %v4360_v60 = vadd.f32 %v4359_v31, %v4086_v59  ;;  %v4427_v9 = vmax.f32 %v4247_v15, 0.0  ;;  %v4425_v17 = vmax.f32 %v4356_v19, 0.0 }
 0x70f   : > { %v4428_v43 = vmax.f32 %v4358_v29, 0.0  ;;  %v4483_v10 = vpack.c.bf16 %v4426_v33, %v4422_v26 }
 0x710   : > { %v4429_v58 = vmax.f32 %v4360_v60, 0.0  ;;  %v4484_v5 = vpack.c.bf16 %v4427_v9, %v4423_v54  ;;  %v4250_v53 = vpop.f32.mrb[200].mxu0 }
 0x711   : > { %v4485_v21 = vpack.c.bf16 %v4428_v43, %v4424_v30  ;;  %v4251_v18 = vadd.f32 %v4250_v53, %v4091_v3  ;;  %v4252_v51 = vpop.f32.mrb[201].mxu0  ;;  %v8588_v53 = vld [vmem:[%s11102_s5 + $0x100] sm:$0xff]  }
 0x712   : > { %v4486_v20 = vpack.c.bf16 %v4429_v58, %v4425_v17  ;;  %v4363_v61 = vpop.f32.mrb[200].mxu1  ;;  %v4253_v34 = vadd.f32 %v4252_v51, %v4091_v3  ;;  %v4254_v40 = vpop.f32.mrb[202].mxu0  ;;  %4650 = vmatprep.subr.bf16.mxu0 %v4484_v5  ;;  %v8596_v51 = vld [vmem:[%s11101_s4] sm:$0xff]  }
 0x713   : > { %v4364_v22 = vadd.f32 %v4363_v61, %v4091_v3  ;;  %v4365_v63 = vpop.f32.mrb[201].mxu1  ;;  %v4255_v36 = vadd.f32 %v4254_v40, %v4096_v28  ;;  %v4256_v45 = vpop.f32.mrb[203].mxu0  ;;  %4651 = vmatpush1.bf16.msra.mxu0 %v4483_v10  ;;  %v4430_v13 = vmax.f32 %v4251_v18, 0.0  ;;  %v8594_v18 = vld [vmem:[%s11102_s5 + $0x130] sm:$0xff]   ;;  %v8595_v61 = vld [vmem:[%s11102_s5 + $0x138] sm:$0xff]   ;;  %v8600_v40 = vld [vmem:[%s11101_s4 + $0x20] sm:$0xff]  }
 0x714   : > { %v4366_v47 = vadd.f32 %v4365_v63, %v4091_v3  ;;  %v4367_v12 = vpop.f32.mrb[202].mxu1  ;;  %4763 = vmatprep.subr.bf16.mxu1 %v4486_v20  ;;  %v4257_v55 = vadd.f32 %v4256_v45, %v4096_v28  ;;  %v4431_v8 = vmax.f32 %v4253_v34, 0.0  ;;  %v8589_v20 = vld [vmem:[%s11102_s5 + $0x108] sm:$0xff]   ;;  %v8598_v34 = vld [vmem:[%s11101_s4 + $0x10] sm:$0xff]   ;;  %v8599_v63 = vld [vmem:[%s11101_s4 + $0x18] sm:$0xff]   ;;  %v4515_v45 = vpop.permute.xlu0 %4514 }
 0x715   : > { %v4368_v1 = vadd.f32 %v4367_v12, %v4096_v28  ;;  %v4369_v44 = vpop.f32.mrb[203].mxu1  ;;  %4764 = vmatpush1.bf16.msra.mxu1 %v4485_v21  ;;  %v4434_v48 = vmax.f32 %v4255_v36, 0.0  ;;  %v4432_v25 = vmax.f32 %v4364_v22, 0.0  ;;  %v8597_v22 = vld [vmem:[%s11101_s4 + $0x8] sm:$0xff]   ;;  %v8602_v36 = vld [vmem:[%s11101_s4 + $0x30] sm:$0xff]   ;;  %v8603_v12 = vld [vmem:[%s11101_s4 + $0x38] sm:$0xff]  }
 0x716   : > { %v4370_v42 = vadd.f32 %v4369_v44, %v4096_v28  ;;  %v4435_v49 = vmax.f32 %v4257_v55, 0.0  ;;  %v4433_v37 = vmax.f32 %v4366_v47, 0.0  ;;  %v8601_v47 = vld [vmem:[%s11101_s4 + $0x28] sm:$0xff]  }
 0x717   : > { %v4436_v6 = vmax.f32 %v4368_v1, 0.0  ;;  %v4487_v56 = vpack.c.bf16 %v4434_v48, %v4430_v13  ;;  %v4520_v1 = vpop.permute.xlu1 %4519 }
 0x718   : > { %v4437_v59 = vmax.f32 %v4370_v42, 0.0  ;;  %v4488_v41 = vpack.c.bf16 %v4435_v49, %v4431_v8  ;;  %v4260_v39 = vpop.f32.mrb[204].mxu0 }
 0x719   : > { %v4489_v52 = vpack.c.bf16 %v4436_v6, %v4432_v25  ;;  %v4261_v32 = vadd.f32 %v4260_v39, %v4101_v38  ;;  %v4262_v57 = vpop.f32.mrb[205].mxu0 }
 0x71a   : > { %v4490_v7 = vpack.c.bf16 %v4437_v59, %v4433_v37  ;;  %v4373_v35 = vpop.f32.mrb[204].mxu1  ;;  %v4263_v23 = vadd.f32 %v4262_v57, %v4101_v38  ;;  %v4264_v19 = vpop.f32.mrb[206].mxu0  ;;  %4652 = vmatprep.subr.bf16.mxu0 %v4488_v41 }
 0x71b   : > { %v4374_v0 = vadd.f32 %v4373_v35, %v4101_v38  ;;  %v4375_v16 = vpop.f32.mrb[205].mxu1  ;;  %v4265_v2 = vadd.f32 %v4264_v19, %v4106_v62  ;;  %v4266_v29 = vpop.f32.mrb[207].mxu0  ;;  %4653 = vmatpush1.bf16.msra.mxu0 %v4487_v56  ;;  %v4438_v33 = vmax.f32 %v4261_v32, 0.0 }
 0x71c   : > { %v4376_v4 = vadd.f32 %v4375_v16, %v4101_v38  ;;  %v4377_v11 = vpop.f32.mrb[206].mxu1  ;;  %4765 = vmatprep.subr.bf16.mxu1 %v4490_v7  ;;  %v4267_v31 = vadd.f32 %v4266_v29, %v4106_v62  ;;  %v4439_v43 = vmax.f32 %v4263_v23, 0.0  ;;  %v4525_v23 = vpop.permute.xlu0 %4524 }
 0x71d   : > { %v4378_v15 = vadd.f32 %v4377_v11, %v4106_v62  ;;  %v4379_v26 = vpop.f32.mrb[207].mxu1  ;;  %4766 = vmatpush1.bf16.msra.mxu1 %v4489_v52  ;;  %v4442_v60 = vmax.f32 %v4265_v2, 0.0  ;;  %v4440_v54 = vmax.f32 %v4374_v0, 0.0  ;;  %v4530_v2 = vpop.permute.xlu1 %4529 }
 0x71e   : > { %v4380_v30 = vadd.f32 %v4379_v26, %v4106_v62  ;;  %v4443_v3 = vmax.f32 %v4267_v31, 0.0  ;;  %v4441_v17 = vmax.f32 %v4376_v4, 0.0 }
 0x71f   : > { %v4444_v9 = vmax.f32 %v4378_v15, 0.0  ;;  %v4491_v10 = vpack.c.bf16 %v4442_v60, %v4438_v33 }
 0x720   : > { %v4445_v58 = vmax.f32 %v4380_v30, 0.0  ;;  %v4492_v21 = vpack.c.bf16 %v4443_v3, %v4439_v43 }
 0x721   : > { %v4493_v28 = vpack.c.bf16 %v4444_v9, %v4440_v54 }
 0x722   : > { %v4494_v5 = vpack.c.bf16 %v4445_v58, %v4441_v17  ;;  %4654 = vmatprep.subr.bf16.mxu0 %v4492_v21 }
 0x723   : > { %4655 = vmatpush1.bf16.msra.mxu0 %v4491_v10 }
 0x724   : > { %4767 = vmatprep.subr.bf16.mxu1 %v4494_v5  ;;  %8123 = vmatprep.subr.msk.bf16.mxu0 %vm2002_vm3, %v10197_v46  ;;  %v8590_v46 = vld [vmem:[%s11102_s5 + $0x110] sm:$0xff]  }
 0x725   : > { %4768 = vmatpush1.bf16.msra.mxu1 %v4493_v28 }
 0x726   : > { %8132 = vmatprep.subr.msk.bf16.mxu1 %vm2002_vm3, %v10199_v27  ;;  %4673 = vmatmul.mubr.bf16.vlgmr.msra.gmra.mrb[208].mxu0 %v8588_v53  ;;  %v8591_v27 = vld [vmem:[%s11102_s5 + $0x118] sm:$0xff]  }
 0x727   : > { %4947 = vmatpush1.bf16.msra.mxu0 %v10202_v24  ;;  %4682 = vmatprep.mubr.bf16.mxu0 %v11260_v14  ;;  %v8592_v24 = vld [vmem:[%s11102_s5 + $0x120] sm:$0xff]  }
 0x728   : > { %4786 = vmatmul.mubr.bf16.vlgmr.msra.gmra.mrb[208].mxu1 %v8588_v53 }
 0x729   : > { %5060 = vmatpush1.bf16.msra.mxu1 %v10207_v50  ;;  %4795 = vmatprep.mubr.bf16.mxu1 %v11260_v14  ;;  %v8593_v50 = vld [vmem:[%s11102_s5 + $0x128] sm:$0xff]  }
 0x72e   : > { %4683 = vmatmul.mubr.bf16.gmra.mrb[212].mxu0 %v8589_v20 }
 0x72f   : > { %4692 = vmatprep.mubr.bf16.mxu0 %v11260_v14 }
 0x730   : > { %4796 = vmatmul.mubr.bf16.gmra.mrb[212].mxu1 %v8589_v20 }
 0x731   : > { %4805 = vmatprep.mubr.bf16.mxu1 %v11260_v14 }
 0x736   : > { %4693 = vmatmul.mubr.bf16.gmra.mrb[216].mxu0 %v8590_v46 }
 0x737   : > { %4702 = vmatprep.mubr.bf16.mxu0 %v11260_v14 }
 0x738   : > { %4806 = vmatmul.mubr.bf16.gmra.mrb[216].mxu1 %v8590_v46 }
 0x739   : > { %4815 = vmatprep.mubr.bf16.mxu1 %v11260_v14 }
 0x73e   : > { %4703 = vmatmul.mubr.bf16.gmra.mrb[220].mxu0 %v8591_v27 }
 0x73f   : > { %4712 = vmatprep.mubr.bf16.mxu0 %v11260_v14 }
 0x740   : > { %4816 = vmatmul.mubr.bf16.gmra.mrb[220].mxu1 %v8591_v27 }
 0x741   : > { %4825 = vmatprep.mubr.bf16.mxu1 %v11260_v14 }
 0x746   : > { %4713 = vmatmul.mubr.bf16.gmra.mrb[224].mxu0 %v8592_v24 }
 0x747   : > { %4722 = vmatprep.mubr.bf16.mxu0 %v11260_v14 }
 0x748   : > { %4826 = vmatmul.mubr.bf16.gmra.mrb[224].mxu1 %v8592_v24 }
 0x749   : > { %4835 = vmatprep.mubr.bf16.mxu1 %v11260_v14 }
 0x74e   : > { %4723 = vmatmul.mubr.bf16.gmra.mrb[228].mxu0 %v8593_v50 }
 0x74f   : > { %4732 = vmatprep.mubr.bf16.mxu0 %v11260_v14 }
 0x750   : > { %4836 = vmatmul.mubr.bf16.gmra.mrb[228].mxu1 %v8593_v50 }
 0x751   : > { %4845 = vmatprep.mubr.bf16.mxu1 %v11260_v14 }
 0x756   : > { %4733 = vmatmul.mubr.bf16.gmra.mrb[232].mxu0 %v8594_v18 }
 0x757   : > { %4742 = vmatprep.mubr.bf16.mxu0 %v11260_v14 }
 0x758   : > { %4846 = vmatmul.mubr.bf16.gmra.mrb[232].mxu1 %v8594_v18 }
 0x759   : > { %4855 = vmatprep.mubr.bf16.mxu1 %v11260_v14 }
 0x75e   : > { %4743 = vmatmul.mubr.bf16.gmra.mrb[236].mxu0 %v8595_v61 }
 0x75f   : > { %4978 = vmatprep.mubr.bf16.mxu0 %v11260_v14 }
 0x760   : > { %4856 = vmatmul.mubr.bf16.gmra.mrb[236].mxu1 %v8595_v61  ;;  %v4535_v61 = vpop.permute.xlu0 %4534 }
 0x761   : > { %5091 = vmatprep.mubr.bf16.mxu1 %v11260_v14 }
 0x766   : > { %8124 = vmatmul.mubr.msk.bf16.vlgmr.msra.gmra.mrb[208].mxu0 %vm2185_vm6, %v8596_v51 }
 0x767   : > { %4988 = vmatprep.mubr.bf16.mxu0 %v11260_v14 }
 0x768   : > { %8133 = vmatmul.mubr.msk.bf16.vlgmr.msra.gmra.mrb[208].mxu1 %vm2185_vm6, %v8596_v51 }
 0x769   : > { %5101 = vmatprep.mubr.bf16.mxu1 %v11260_v14 }
 0x76e   : > { %8125 = vmatmul.mubr.msk.bf16.gmra.mrb[212].mxu0 %vm2185_vm6, %v8597_v22 }
 0x76f   : > { %4998 = vmatprep.mubr.bf16.mxu0 %v11260_v14 }
 0x770   : > { %8134 = vmatmul.mubr.msk.bf16.gmra.mrb[212].mxu1 %vm2185_vm6, %v8597_v22 }
 0x771   : > { %5111 = vmatprep.mubr.bf16.mxu1 %v11260_v14 }
 0x776   : > { %8126 = vmatmul.mubr.msk.bf16.gmra.mrb[216].mxu0 %vm2185_vm6, %v8598_v34 }
 0x777   : > { %5008 = vmatprep.mubr.bf16.mxu0 %v11260_v14 }
 0x778   : > { %8135 = vmatmul.mubr.msk.bf16.gmra.mrb[216].mxu1 %vm2185_vm6, %v8598_v34 }
 0x779   : > { %5121 = vmatprep.mubr.bf16.mxu1 %v11260_v14 }
 0x77e   : > { %8127 = vmatmul.mubr.msk.bf16.gmra.mrb[220].mxu0 %vm2185_vm6, %v8599_v63 }
 0x77f   : > { %5018 = vmatprep.mubr.bf16.mxu0 %v11260_v14 }
 0x780   : > { %8136 = vmatmul.mubr.msk.bf16.gmra.mrb[220].mxu1 %vm2185_vm6, %v8599_v63  ;;  %v4540_v63 = vpop.permute.xlu1 %4539 }
 0x781   : > { %5131 = vmatprep.mubr.bf16.mxu1 %v11260_v14 }
 0x786   : > { %8128 = vmatmul.mubr.msk.bf16.gmra.mrb[224].mxu0 %vm2185_vm6, %v8600_v40 }
 0x787   : > { %5028 = vmatprep.mubr.bf16.mxu0 %v11260_v14 }
 0x788   : > { %8137 = vmatmul.mubr.msk.bf16.gmra.mrb[224].mxu1 %vm2185_vm6, %v8600_v40 }
 0x789   : > { %5141 = vmatprep.mubr.bf16.mxu1 %v11260_v14 }
 0x78e   : > { %8129 = vmatmul.mubr.msk.bf16.gmra.mrb[228].mxu0 %vm2185_vm6, %v8601_v47 }
 0x78f   : > { %5038 = vmatprep.mubr.bf16.mxu0 %v11260_v14 }
 0x790   : > { %8138 = vmatmul.mubr.msk.bf16.gmra.mrb[228].mxu1 %vm2185_vm6, %v8601_v47 }
 0x791   : > { %5151 = vmatprep.mubr.bf16.mxu1 %v11260_v14 }
 0x796   : > { %8130 = vmatmul.mubr.msk.bf16.gmra.mrb[232].mxu0 %vm2185_vm6, %v8602_v36 }
 0x797   : > { %5048 = vmatprep.mubr.bf16.mxu0 %v11260_v14 }
 0x798   : > { %8139 = vmatmul.mubr.msk.bf16.gmra.mrb[232].mxu1 %vm2185_vm6, %v8602_v36 }
 0x799   : > { %5161 = vmatprep.mubr.bf16.mxu1 %v11260_v14 }
 0x79e   : > { %8131 = vmatmul.mubr.msk.bf16.gmra.mrb[236].mxu0 %vm2185_vm6, %v8603_v12 }
 0x79f   : > { %5526 = vmatprep.mubr.bf16.mxu0 %v11260_v14 }
 0x7a0   : > { %8140 = vmatmul.mubr.msk.bf16.gmra.mrb[236].mxu1 %vm2185_vm6, %v8603_v12 }
 0x7a1   : > { %5639 = vmatprep.mubr.bf16.mxu1 %v11260_v14 }
 0x839   : > { %v4980_v55 = vpop.f32.mrb[208].mxu0 }
 0x83a   : > { %v8268_v44 = vadd.f32 %v4980_v55, %v4515_v45  ;;  %v4982_v48 = vpop.f32.mrb[209].mxu0 }
 0x83b   : > { %v5093_v13 = vpop.f32.mrb[208].mxu1  ;;  %v8269_v25 = vadd.f32 %v4982_v48, %v4515_v45  ;;  %v4984_v6 = vpop.f32.mrb[210].mxu0 }
 0x83c   : > { %v8300_v42 = vadd.f32 %v5093_v13, %v4515_v45  ;;  %v5095_v8 = vpop.f32.mrb[209].mxu1  ;;  %v8270_v38 = vadd.f32 %v4984_v6, %v4520_v1  ;;  %v4986_v56 = vpop.f32.mrb[211].mxu0  ;;  %v5236_v41 = vmax.f32 %v8268_v44, 0.0 }
 0x83d   : > { %v8301_v49 = vadd.f32 %v5095_v8, %v4515_v45  ;;  %v5097_v37 = vpop.f32.mrb[210].mxu1  ;;  %v8271_v62 = vadd.f32 %v4986_v56, %v4520_v1  ;;  %v5237_v35 = vmax.f32 %v8269_v25, 0.0 }
 0x83e   : > { %v8302_v59 = vadd.f32 %v5097_v37, %v4520_v1  ;;  %v5099_v52 = vpop.f32.mrb[211].mxu1  ;;  %v5240_v39 = vmax.f32 %v8270_v38, 0.0  ;;  %v5238_v32 = vmax.f32 %v8300_v42, 0.0 }
 0x83f   : > { %v8303_v7 = vadd.f32 %v5099_v52, %v4520_v1  ;;  %v5241_v0 = vmax.f32 %v8271_v62, 0.0  ;;  %v5239_v16 = vmax.f32 %v8301_v49, 0.0 }
 0x840   : > { %v5242_v57 = vmax.f32 %v8302_v59, 0.0  ;;  %v5317_v19 = vpack.c.bf16 %v5240_v39, %v5236_v41 }
 0x841   : > { %v5243_v4 = vmax.f32 %v8303_v7, 0.0  ;;  %v5318_v29 = vpack.c.bf16 %v5241_v0, %v5237_v35  ;;  %v4990_v15 = vpop.f32.mrb[212].mxu0  ;;  %v4545_v35 = vpop.permute.xlu0 %4544 }
 0x842   : > { %v5319_v11 = vpack.c.bf16 %v5242_v57, %v5238_v32  ;;  %v8272_v26 = vadd.f32 %v4990_v15, %v4525_v23  ;;  %v4992_v60 = vpop.f32.mrb[213].mxu0 }
 0x843   : > { %v5320_v31 = vpack.c.bf16 %v5243_v4, %v5239_v16  ;;  %v5103_v33 = vpop.f32.mrb[212].mxu1  ;;  %v8273_v54 = vadd.f32 %v4992_v60, %v4525_v23  ;;  %v4994_v9 = vpop.f32.mrb[214].mxu0  ;;  %5494 = vmatprep.subr.bf16.mxu0 %v5318_v29 }
 0x844   : > { %v8304_v30 = vadd.f32 %v5103_v33, %v4525_v23  ;;  %v5105_v43 = vpop.f32.mrb[213].mxu1  ;;  %v8274_v17 = vadd.f32 %v4994_v9, %v4530_v2  ;;  %v4996_v58 = vpop.f32.mrb[215].mxu0  ;;  %5495 = vmatpush1.bf16.msra.mxu0 %v5317_v19  ;;  %v5244_v53 = vmax.f32 %v8272_v26, 0.0 }
 0x845   : > { %v8305_v3 = vadd.f32 %v5105_v43, %v4525_v23  ;;  %v5107_v10 = vpop.f32.mrb[214].mxu1  ;;  %5607 = vmatprep.subr.bf16.mxu1 %v5320_v31  ;;  %v8275_v21 = vadd.f32 %v4996_v58, %v4530_v2  ;;  %v5245_v24 = vmax.f32 %v8273_v54, 0.0  ;;  %v4550_v16 = vpop.permute.xlu1 %4549 }
 0x846   : > { %v8306_v28 = vadd.f32 %v5107_v10, %v4530_v2  ;;  %v5109_v5 = vpop.f32.mrb[215].mxu1  ;;  %5608 = vmatpush1.bf16.msra.mxu1 %v5319_v11  ;;  %v5248_v20 = vmax.f32 %v8274_v17, 0.0  ;;  %v5246_v27 = vmax.f32 %v8304_v30, 0.0 }
 0x847   : > { %v8307_v46 = vadd.f32 %v5109_v5, %v4530_v2  ;;  %v5249_v18 = vmax.f32 %v8275_v21, 0.0  ;;  %v5247_v51 = vmax.f32 %v8305_v3, 0.0 }
 0x848   : > { %v5250_v50 = vmax.f32 %v8306_v28, 0.0  ;;  %v5321_v22 = vpack.c.bf16 %v5248_v20, %v5244_v53 }
 0x849   : > { %v5251_v34 = vmax.f32 %v8307_v46, 0.0  ;;  %v5322_v47 = vpack.c.bf16 %v5249_v18, %v5245_v24  ;;  %v5000_v36 = vpop.f32.mrb[216].mxu0  ;;  %v4555_v24 = vpop.permute.xlu0 %4554 }
 0x84a   : > { %v5323_v40 = vpack.c.bf16 %v5250_v50, %v5246_v27  ;;  %v8276_v45 = vadd.f32 %v5000_v36, %v4535_v61  ;;  %v5002_v55 = vpop.f32.mrb[217].mxu0 }
 0x84b   : > { %v5324_v12 = vpack.c.bf16 %v5251_v34, %v5247_v51  ;;  %v5113_v1 = vpop.f32.mrb[216].mxu1  ;;  %v8277_v13 = vadd.f32 %v5002_v55, %v4535_v61  ;;  %v5004_v42 = vpop.f32.mrb[218].mxu0  ;;  %5496 = vmatprep.subr.bf16.mxu0 %v5322_v47 }
 0x84c   : > { %v8308_v44 = vadd.f32 %v5113_v1, %v4535_v61  ;;  %v5115_v48 = vpop.f32.mrb[217].mxu1  ;;  %v8278_v8 = vadd.f32 %v5004_v42, %v4540_v63  ;;  %v5006_v49 = vpop.f32.mrb[219].mxu0  ;;  %5497 = vmatpush1.bf16.msra.mxu0 %v5321_v22  ;;  %v5252_v59 = vmax.f32 %v8276_v45, 0.0 }
 0x84d   : > { %v8309_v25 = vadd.f32 %v5115_v48, %v4535_v61  ;;  %v5117_v6 = vpop.f32.mrb[218].mxu1  ;;  %5609 = vmatprep.subr.bf16.mxu1 %v5324_v12  ;;  %v8279_v37 = vadd.f32 %v5006_v49, %v4540_v63  ;;  %v5253_v39 = vmax.f32 %v8277_v13, 0.0  ;;  %v4560_v51 = vpop.permute.xlu1 %4559 }
 0x84e   : > { %v8310_v38 = vadd.f32 %v5117_v6, %v4540_v63  ;;  %v5119_v56 = vpop.f32.mrb[219].mxu1  ;;  %5610 = vmatpush1.bf16.msra.mxu1 %v5323_v40  ;;  %v5256_v62 = vmax.f32 %v8278_v8, 0.0  ;;  %v5254_v41 = vmax.f32 %v8308_v44, 0.0 }
 0x84f   : > { %v8311_v52 = vadd.f32 %v5119_v56, %v4540_v63  ;;  %v5257_v32 = vmax.f32 %v8279_v37, 0.0  ;;  %v5255_v57 = vmax.f32 %v8309_v25, 0.0 }
 0x850   : > { %v5258_v7 = vmax.f32 %v8310_v38, 0.0  ;;  %v5325_v0 = vpack.c.bf16 %v5256_v62, %v5252_v59 }
 0x851   : > { %v5259_v23 = vmax.f32 %v8311_v52, 0.0  ;;  %v5326_v4 = vpack.c.bf16 %v5257_v32, %v5253_v39  ;;  %v5010_v2 = vpop.f32.mrb[220].mxu0  ;;  %v4565_v39 = vpop.permute.xlu0 %4564 }
 0x852   : > { %v5327_v19 = vpack.c.bf16 %v5258_v7, %v5254_v41  ;;  %v8280_v29 = vadd.f32 %v5010_v2, %v4545_v35  ;;  %v5012_v31 = vpop.f32.mrb[221].mxu0 }
 0x853   : > { %v5328_v11 = vpack.c.bf16 %v5259_v23, %v5255_v57  ;;  %v5123_v15 = vpop.f32.mrb[220].mxu1  ;;  %v8281_v33 = vadd.f32 %v5012_v31, %v4545_v35  ;;  %v5014_v30 = vpop.f32.mrb[222].mxu0  ;;  %5498 = vmatprep.subr.bf16.mxu0 %v5326_v4 }
 0x854   : > { %v8312_v26 = vadd.f32 %v5123_v15, %v4545_v35  ;;  %v5125_v60 = vpop.f32.mrb[221].mxu1  ;;  %v8282_v43 = vadd.f32 %v5014_v30, %v4550_v16  ;;  %v5016_v3 = vpop.f32.mrb[223].mxu0  ;;  %5499 = vmatpush1.bf16.msra.mxu0 %v5325_v0  ;;  %v5260_v28 = vmax.f32 %v8280_v29, 0.0 }
 0x855   : > { %v8313_v54 = vadd.f32 %v5125_v60, %v4545_v35  ;;  %v5127_v9 = vpop.f32.mrb[222].mxu1  ;;  %5611 = vmatprep.subr.bf16.mxu1 %v5328_v11  ;;  %v8283_v10 = vadd.f32 %v5016_v3, %v4550_v16  ;;  %v5261_v20 = vmax.f32 %v8281_v33, 0.0  ;;  %v4570_v57 = vpop.permute.xlu1 %4569 }
 0x856   : > { %v8314_v17 = vadd.f32 %v5127_v9, %v4550_v16  ;;  %v5129_v58 = vpop.f32.mrb[223].mxu1  ;;  %5612 = vmatpush1.bf16.msra.mxu1 %v5327_v19  ;;  %v5264_v21 = vmax.f32 %v8282_v43, 0.0  ;;  %v5262_v53 = vmax.f32 %v8312_v26, 0.0 }
 0x857   : > { %v8315_v5 = vadd.f32 %v5129_v58, %v4550_v16  ;;  %v5265_v27 = vmax.f32 %v8283_v10, 0.0  ;;  %v5263_v50 = vmax.f32 %v8313_v54, 0.0 }
 0x858   : > { %v5266_v46 = vmax.f32 %v8314_v17, 0.0  ;;  %v5329_v18 = vpack.c.bf16 %v5264_v21, %v5260_v28 }
 0x859   : > { %v5267_v61 = vmax.f32 %v8315_v5, 0.0  ;;  %v5330_v34 = vpack.c.bf16 %v5265_v27, %v5261_v20  ;;  %v5020_v63 = vpop.f32.mrb[224].mxu0  ;;  %v4575_v20 = vpop.permute.xlu0 %4574 }
 0x85a   : > { %v5331_v22 = vpack.c.bf16 %v5266_v46, %v5262_v53  ;;  %v8284_v47 = vadd.f32 %v5020_v63, %v4555_v24  ;;  %v5022_v12 = vpop.f32.mrb[225].mxu0 }
 0x85b   : > { %v5332_v40 = vpack.c.bf16 %v5267_v61, %v5263_v50  ;;  %v5133_v36 = vpop.f32.mrb[224].mxu1  ;;  %v8285_v1 = vadd.f32 %v5022_v12, %v4555_v24  ;;  %v5024_v44 = vpop.f32.mrb[226].mxu0  ;;  %5500 = vmatprep.subr.bf16.mxu0 %v5330_v34 }
 0x85c   : > { %v8316_v45 = vadd.f32 %v5133_v36, %v4555_v24  ;;  %v5135_v55 = vpop.f32.mrb[225].mxu1  ;;  %v8286_v48 = vadd.f32 %v5024_v44, %v4560_v51  ;;  %v5026_v25 = vpop.f32.mrb[227].mxu0  ;;  %5501 = vmatpush1.bf16.msra.mxu0 %v5329_v18  ;;  %v5268_v38 = vmax.f32 %v8284_v47, 0.0 }
 0x85d   : > { %v8317_v13 = vadd.f32 %v5135_v55, %v4555_v24  ;;  %v5137_v42 = vpop.f32.mrb[226].mxu1  ;;  %5613 = vmatprep.subr.bf16.mxu1 %v5332_v40  ;;  %v8287_v6 = vadd.f32 %v5026_v25, %v4560_v51  ;;  %v5269_v62 = vmax.f32 %v8285_v1, 0.0  ;;  %v4580_v50 = vpop.permute.xlu1 %4579 }
 0x85e   : > { %v8318_v8 = vadd.f32 %v5137_v42, %v4560_v51  ;;  %v5139_v49 = vpop.f32.mrb[227].mxu1  ;;  %5614 = vmatpush1.bf16.msra.mxu1 %v5331_v22  ;;  %v5272_v37 = vmax.f32 %v8286_v48, 0.0  ;;  %v5270_v59 = vmax.f32 %v8316_v45, 0.0 }
 0x85f   : > { %v8319_v56 = vadd.f32 %v5139_v49, %v4560_v51  ;;  %v5273_v41 = vmax.f32 %v8287_v6, 0.0  ;;  %v5271_v7 = vmax.f32 %v8317_v13, 0.0 }
 0x860   : > { %v5274_v52 = vmax.f32 %v8318_v8, 0.0  ;;  %v5333_v32 = vpack.c.bf16 %v5272_v37, %v5268_v38 }
 0x861   : > { %v5275_v35 = vmax.f32 %v8319_v56, 0.0  ;;  %v5334_v23 = vpack.c.bf16 %v5273_v41, %v5269_v62  ;;  %v5030_v16 = vpop.f32.mrb[228].mxu0  ;;  %v4585_v62 = vpop.permute.xlu0 %4584 }
 0x862   : > { %v5335_v0 = vpack.c.bf16 %v5274_v52, %v5270_v59  ;;  %v8288_v4 = vadd.f32 %v5030_v16, %v4565_v39  ;;  %v5032_v11 = vpop.f32.mrb[229].mxu0 }
 0x863   : > { %v5336_v19 = vpack.c.bf16 %v5275_v35, %v5271_v7  ;;  %v5143_v2 = vpop.f32.mrb[228].mxu1  ;;  %v8289_v15 = vadd.f32 %v5032_v11, %v4565_v39  ;;  %v5034_v26 = vpop.f32.mrb[230].mxu0  ;;  %5502 = vmatprep.subr.bf16.mxu0 %v5334_v23 }
 0x864   : > { %v8320_v29 = vadd.f32 %v5143_v2, %v4565_v39  ;;  %v5145_v31 = vpop.f32.mrb[229].mxu1  ;;  %v8290_v60 = vadd.f32 %v5034_v26, %v4570_v57  ;;  %v5036_v54 = vpop.f32.mrb[231].mxu0  ;;  %5503 = vmatpush1.bf16.msra.mxu0 %v5333_v32  ;;  %v5276_v17 = vmax.f32 %v8288_v4, 0.0 }
 0x865   : > { %v8321_v33 = vadd.f32 %v5145_v31, %v4565_v39  ;;  %v5147_v30 = vpop.f32.mrb[230].mxu1  ;;  %5615 = vmatprep.subr.bf16.mxu1 %v5336_v19  ;;  %v8291_v9 = vadd.f32 %v5036_v54, %v4570_v57  ;;  %v5277_v21 = vmax.f32 %v8289_v15, 0.0  ;;  %v4590_v7 = vpop.permute.xlu1 %4589 }
 0x866   : > { %v8322_v43 = vadd.f32 %v5147_v30, %v4570_v57  ;;  %v5149_v3 = vpop.f32.mrb[231].mxu1  ;;  %5616 = vmatpush1.bf16.msra.mxu1 %v5335_v0  ;;  %v5280_v10 = vmax.f32 %v8290_v60, 0.0  ;;  %v5278_v28 = vmax.f32 %v8320_v29, 0.0 }
 0x867   : > { %v8323_v58 = vadd.f32 %v5149_v3, %v4570_v57  ;;  %v5281_v53 = vmax.f32 %v8291_v9, 0.0  ;;  %v5279_v46 = vmax.f32 %v8321_v33, 0.0 }
 0x868   : > { %v5282_v5 = vmax.f32 %v8322_v43, 0.0  ;;  %v5337_v27 = vpack.c.bf16 %v5280_v10, %v5276_v17 }
 0x869   : > { %v5283_v24 = vmax.f32 %v8323_v58, 0.0  ;;  %v5338_v61 = vpack.c.bf16 %v5281_v53, %v5277_v21  ;;  %v5040_v51 = vpop.f32.mrb[232].mxu0 }
 0x86a   : > { %v5339_v18 = vpack.c.bf16 %v5282_v5, %v5278_v28  ;;  %v8292_v34 = vadd.f32 %v5040_v51, %v4575_v20  ;;  %v5042_v40 = vpop.f32.mrb[233].mxu0  ;;  %v8608_v51 = vld [vmem:[%s11102_s5 + $0x160] sm:$0xff]  }
 0x86b   : > { %v5340_v22 = vpack.c.bf16 %v5283_v24, %v5279_v46  ;;  %v5153_v63 = vpop.f32.mrb[232].mxu1  ;;  %v8293_v36 = vadd.f32 %v5042_v40, %v4575_v20  ;;  %v5044_v45 = vpop.f32.mrb[234].mxu0  ;;  %5504 = vmatprep.subr.bf16.mxu0 %v5338_v61  ;;  %v8604_v24 = vld [vmem:[%s11102_s5 + $0x140] sm:$0xff]   ;;  %v8607_v61 = vld [vmem:[%s11102_s5 + $0x158] sm:$0xff]  }
 0x86c   : > { %v8324_v47 = vadd.f32 %v5153_v63, %v4575_v20  ;;  %v5155_v12 = vpop.f32.mrb[233].mxu1  ;;  %v8294_v55 = vadd.f32 %v5044_v45, %v4580_v50  ;;  %v5046_v13 = vpop.f32.mrb[235].mxu0  ;;  %5505 = vmatpush1.bf16.msra.mxu0 %v5337_v27  ;;  %v5284_v8 = vmax.f32 %v8292_v34, 0.0  ;;  %v8610_v34 = vld [vmem:[%s11102_s5 + $0x170] sm:$0xff]   ;;  %v8611_v63 = vld [vmem:[%s11102_s5 + $0x178] sm:$0xff]  }
 0x86d   : > { %v8325_v1 = vadd.f32 %v5155_v12, %v4575_v20  ;;  %v5157_v44 = vpop.f32.mrb[234].mxu1  ;;  %5617 = vmatprep.subr.bf16.mxu1 %v5340_v22  ;;  %v8295_v42 = vadd.f32 %v5046_v13, %v4580_v50  ;;  %v5285_v37 = vmax.f32 %v8293_v36, 0.0  ;;  %v8609_v22 = vld [vmem:[%s11102_s5 + $0x168] sm:$0xff]   ;;  %v5369_v40 = vpop.permute.xlu0 %5368 }
 0x86e   : > { %v8326_v48 = vadd.f32 %v5157_v44, %v4580_v50  ;;  %v5159_v25 = vpop.f32.mrb[235].mxu1  ;;  %5618 = vmatpush1.bf16.msra.mxu1 %v5339_v18  ;;  %v5288_v6 = vmax.f32 %v8294_v55, 0.0  ;;  %v5286_v38 = vmax.f32 %v8324_v47, 0.0  ;;  %v8606_v18 = vld [vmem:[%s11102_s5 + $0x150] sm:$0xff]   ;;  %v5374_v47 = vpop.permute.xlu1 %5373 }
 0x86f   : > { %v8327_v49 = vadd.f32 %v5159_v25, %v4580_v50  ;;  %v5289_v59 = vmax.f32 %v8295_v42, 0.0  ;;  %v5287_v52 = vmax.f32 %v8325_v1, 0.0  ;;  %v8605_v50 = vld [vmem:[%s11102_s5 + $0x148] sm:$0xff]  }
 0x870   : > { %v5290_v56 = vmax.f32 %v8326_v48, 0.0  ;;  %v5341_v41 = vpack.c.bf16 %v5288_v6, %v5284_v8 }
 0x871   : > { %v5291_v39 = vmax.f32 %v8327_v49, 0.0  ;;  %v5342_v35 = vpack.c.bf16 %v5289_v59, %v5285_v37  ;;  %v5050_v57 = vpop.f32.mrb[236].mxu0 }
 0x872   : > { %v5343_v32 = vpack.c.bf16 %v5290_v56, %v5286_v38  ;;  %v8296_v23 = vadd.f32 %v5050_v57, %v4585_v62  ;;  %v5052_v19 = vpop.f32.mrb[237].mxu0 }
 0x873   : > { %v5344_v0 = vpack.c.bf16 %v5291_v39, %v5287_v52  ;;  %v5163_v16 = vpop.f32.mrb[236].mxu1  ;;  %v8297_v2 = vadd.f32 %v5052_v19, %v4585_v62  ;;  %v5054_v29 = vpop.f32.mrb[238].mxu0  ;;  %5506 = vmatprep.subr.bf16.mxu0 %v5342_v35 }
 0x874   : > { %v8328_v4 = vadd.f32 %v5163_v16, %v4585_v62  ;;  %v5165_v11 = vpop.f32.mrb[237].mxu1  ;;  %v8298_v31 = vadd.f32 %v5054_v29, %v4590_v7  ;;  %v5056_v33 = vpop.f32.mrb[239].mxu0  ;;  %5507 = vmatpush1.bf16.msra.mxu0 %v5341_v41  ;;  %v5292_v43 = vmax.f32 %v8296_v23, 0.0 }
 0x875   : > { %v8329_v15 = vadd.f32 %v5165_v11, %v4585_v62  ;;  %v5167_v26 = vpop.f32.mrb[238].mxu1  ;;  %5619 = vmatprep.subr.bf16.mxu1 %v5344_v0  ;;  %v8299_v30 = vadd.f32 %v5056_v33, %v4590_v7  ;;  %v5293_v10 = vmax.f32 %v8297_v2, 0.0  ;;  %v5384_v23 = vpop.permute.xlu1 %5383 }
 0x876   : > { %v8330_v60 = vadd.f32 %v5167_v26, %v4590_v7  ;;  %v5169_v54 = vpop.f32.mrb[239].mxu1  ;;  %5620 = vmatpush1.bf16.msra.mxu1 %v5343_v32  ;;  %v5296_v9 = vmax.f32 %v8298_v31, 0.0  ;;  %v5294_v17 = vmax.f32 %v8328_v4, 0.0  ;;  %v5379_v32 = vpop.permute.xlu0 %5378 }
 0x877   : > { %v8331_v3 = vadd.f32 %v5169_v54, %v4590_v7  ;;  %v5297_v28 = vmax.f32 %v8299_v30, 0.0  ;;  %v5295_v21 = vmax.f32 %v8329_v15, 0.0 }
 0x878   : > { %v5298_v58 = vmax.f32 %v8330_v60, 0.0  ;;  %v5345_v5 = vpack.c.bf16 %v5296_v9, %v5292_v43 }
 0x879   : > { %v5299_v53 = vmax.f32 %v8331_v3, 0.0  ;;  %v5346_v46 = vpack.c.bf16 %v5297_v28, %v5293_v10 }
 0x87a   : > { %v5347_v20 = vpack.c.bf16 %v5298_v58, %v5294_v17 }
 0x87b   : > { %v5348_v27 = vpack.c.bf16 %v5299_v53, %v5295_v21  ;;  %5508 = vmatprep.subr.bf16.mxu0 %v5346_v46 }
 0x87c   : > { %5509 = vmatpush1.bf16.msra.mxu0 %v5345_v5 }
 0x87d   : > { %5621 = vmatprep.subr.bf16.mxu1 %v5348_v27  ;;  %v5389_v27 = vpop.permute.xlu0 %5388 }
 0x87e   : > { %5622 = vmatpush1.bf16.msra.mxu1 %v5347_v20 }
 0x87f   : > { %5527 = vmatmul.mubr.bf16.vlgmr.msra.gmra.mrb[240].mxu0 %v8604_v24 }
 0x880   : > { %5536 = vmatprep.mubr.bf16.mxu0 %v11260_v14 }
 0x881   : > { %5640 = vmatmul.mubr.bf16.vlgmr.msra.gmra.mrb[240].mxu1 %v8604_v24 }
 0x882   : > { %5649 = vmatprep.mubr.bf16.mxu1 %v11260_v14 }
 0x887   : > { %5537 = vmatmul.mubr.bf16.gmra.mrb[244].mxu0 %v8605_v50 }
 0x888   : > { %5546 = vmatprep.mubr.bf16.mxu0 %v11260_v14 }
 0x889   : > { %5650 = vmatmul.mubr.bf16.gmra.mrb[244].mxu1 %v8605_v50 }
 0x88a   : > { %5659 = vmatprep.mubr.bf16.mxu1 %v11260_v14 }
 0x88f   : > { %5547 = vmatmul.mubr.bf16.gmra.mrb[248].mxu0 %v8606_v18 }
 0x890   : > { %5556 = vmatprep.mubr.bf16.mxu0 %v11260_v14 }
 0x891   : > { %5660 = vmatmul.mubr.bf16.gmra.mrb[248].mxu1 %v8606_v18 }
 0x892   : > { %5669 = vmatprep.mubr.bf16.mxu1 %v11260_v14 }
 0x897   : > { %5557 = vmatmul.mubr.bf16.gmra.mrb[252].mxu0 %v8607_v61 }
 0x898   : > { %5566 = vmatprep.mubr.bf16.mxu0 %v11260_v14 }
 0x899   : > { %5670 = vmatmul.mubr.bf16.gmra.mrb[252].mxu1 %v8607_v61  ;;  %v5394_v61 = vpop.permute.xlu1 %5393 }
 0x89a   : > { %5679 = vmatprep.mubr.bf16.mxu1 %v11260_v14 }
 0x89f   : > { %5567 = vmatmul.mubr.bf16.gmra.mrb[0].mxu0 %v8608_v51 }
 0x8a0   : > { %5576 = vmatprep.mubr.bf16.mxu0 %v11260_v14 }
 0x8a1   : > { %5680 = vmatmul.mubr.bf16.gmra.mrb[0].mxu1 %v8608_v51 }
 0x8a2   : > { %5689 = vmatprep.mubr.bf16.mxu1 %v11260_v14 }
 0x8a7   : > { %5577 = vmatmul.mubr.bf16.gmra.mrb[4].mxu0 %v8609_v22 }
 0x8a8   : > { %5586 = vmatprep.mubr.bf16.mxu0 %v11260_v14 }
 0x8a9   : > { %5690 = vmatmul.mubr.bf16.gmra.mrb[4].mxu1 %v8609_v22 }
 0x8aa   : > { %5699 = vmatprep.mubr.bf16.mxu1 %v11260_v14 }
 0x8af   : > { %5587 = vmatmul.mubr.bf16.gmra.mrb[8].mxu0 %v8610_v34 }
 0x8b0   : > { %5596 = vmatprep.mubr.bf16.mxu0 %v11260_v14 }
 0x8b1   : > { %5700 = vmatmul.mubr.bf16.gmra.mrb[8].mxu1 %v8610_v34 }
 0x8b2   : > { %5709 = vmatprep.mubr.bf16.mxu1 %v11260_v14 }
 0x8b7   : > { %5597 = vmatmul.mubr.bf16.gmra.mrb[12].mxu0 %v8611_v63 }
 0x8b8   : > { %6010 = vmatprep.mubr.bf16.mxu0 %v11260_v14 }
 0x8b9   : > { %5710 = vmatmul.mubr.bf16.gmra.mrb[12].mxu1 %v8611_v63 }
 0x8ba   : > { %6123 = vmatprep.mubr.bf16.mxu1 %v11260_v14 }
 0x952   : > { %v5528_v36 = vpop.f32.mrb[240].mxu0 }
 0x953   : > { %v5529_v12 = vadd.f32 %v5528_v36, %v5369_v40  ;;  %v5530_v1 = vpop.f32.mrb[241].mxu0 }
 0x954   : > { %v5641_v45 = vpop.f32.mrb[240].mxu1  ;;  %v5531_v44 = vadd.f32 %v5530_v1, %v5369_v40  ;;  %v5532_v48 = vpop.f32.mrb[242].mxu0 }
 0x955   : > { %v5642_v55 = vadd.f32 %v5641_v45, %v5369_v40  ;;  %v5643_v13 = vpop.f32.mrb[241].mxu1  ;;  %v5533_v25 = vadd.f32 %v5532_v48, %v5374_v47  ;;  %v5534_v6 = vpop.f32.mrb[243].mxu0  ;;  %v5720_v56 = vmax.f32 %v5529_v12, 0.0 }
 0x956   : > { %v5644_v42 = vadd.f32 %v5643_v13, %v5369_v40  ;;  %v5645_v8 = vpop.f32.mrb[242].mxu1  ;;  %v5535_v38 = vadd.f32 %v5534_v6, %v5374_v47  ;;  %v5721_v41 = vmax.f32 %v5531_v44, 0.0 }
 0x957   : > { %v5646_v49 = vadd.f32 %v5645_v8, %v5374_v47  ;;  %v5647_v37 = vpop.f32.mrb[243].mxu1  ;;  %v5724_v59 = vmax.f32 %v5533_v25, 0.0  ;;  %v5722_v52 = vmax.f32 %v5642_v55, 0.0 }
 0x958   : > { %v5648_v62 = vadd.f32 %v5647_v37, %v5374_v47  ;;  %v5725_v7 = vmax.f32 %v5535_v38, 0.0  ;;  %v5723_v35 = vmax.f32 %v5644_v42, 0.0 }
 0x959   : > { %v5726_v39 = vmax.f32 %v5646_v49, 0.0  ;;  %v5801_v57 = vpack.c.bf16 %v5724_v59, %v5720_v56 }
 0x95a   : > { %v5727_v0 = vmax.f32 %v5648_v62, 0.0  ;;  %v5802_v19 = vpack.c.bf16 %v5725_v7, %v5721_v41  ;;  %v5538_v4 = vpop.f32.mrb[244].mxu0  ;;  %v5399_v41 = vpop.permute.xlu0 %5398 }
 0x95b   : > { %v5803_v16 = vpack.c.bf16 %v5726_v39, %v5722_v52  ;;  %v5539_v11 = vadd.f32 %v5538_v4, %v5379_v32  ;;  %v5540_v15 = vpop.f32.mrb[245].mxu0 }
 0x95c   : > { %v5804_v2 = vpack.c.bf16 %v5727_v0, %v5723_v35  ;;  %v5651_v29 = vpop.f32.mrb[244].mxu1  ;;  %v5541_v26 = vadd.f32 %v5540_v15, %v5379_v32  ;;  %v5542_v60 = vpop.f32.mrb[246].mxu0  ;;  %5978 = vmatprep.subr.bf16.mxu0 %v5802_v19 }
 0x95d   : > { %v5652_v31 = vadd.f32 %v5651_v29, %v5379_v32  ;;  %v5653_v33 = vpop.f32.mrb[245].mxu1  ;;  %v5543_v54 = vadd.f32 %v5542_v60, %v5384_v23  ;;  %v5544_v9 = vpop.f32.mrb[247].mxu0  ;;  %5979 = vmatpush1.bf16.msra.mxu0 %v5801_v57  ;;  %v5728_v58 = vmax.f32 %v5539_v11, 0.0 }
 0x95e   : > { %v5654_v30 = vadd.f32 %v5653_v33, %v5379_v32  ;;  %v5655_v43 = vpop.f32.mrb[246].mxu1  ;;  %6091 = vmatprep.subr.bf16.mxu1 %v5804_v2  ;;  %v5545_v17 = vadd.f32 %v5544_v9, %v5384_v23  ;;  %v5729_v53 = vmax.f32 %v5541_v26, 0.0  ;;  %v5404_v35 = vpop.permute.xlu1 %5403 }
 0x95f   : > { %v5656_v3 = vadd.f32 %v5655_v43, %v5384_v23  ;;  %v5657_v10 = vpop.f32.mrb[247].mxu1  ;;  %6092 = vmatpush1.bf16.msra.mxu1 %v5803_v16  ;;  %v5732_v28 = vmax.f32 %v5543_v54, 0.0  ;;  %v5730_v5 = vmax.f32 %v5652_v31, 0.0 }
 0x960   : > { %v5658_v21 = vadd.f32 %v5657_v10, %v5384_v23  ;;  %v5733_v46 = vmax.f32 %v5545_v17, 0.0  ;;  %v5731_v24 = vmax.f32 %v5654_v30, 0.0 }
 0x961   : > { %v5734_v20 = vmax.f32 %v5656_v3, 0.0  ;;  %v5805_v50 = vpack.c.bf16 %v5732_v28, %v5728_v58 }
 0x962   : > { %v5735_v18 = vmax.f32 %v5658_v21, 0.0  ;;  %v5806_v22 = vpack.c.bf16 %v5733_v46, %v5729_v53  ;;  %v5548_v34 = vpop.f32.mrb[248].mxu0  ;;  %v5409_v53 = vpop.permute.xlu0 %5408 }
 0x963   : > { %v5807_v51 = vpack.c.bf16 %v5734_v20, %v5730_v5  ;;  %v5549_v40 = vadd.f32 %v5548_v34, %v5389_v27  ;;  %v5550_v36 = vpop.f32.mrb[249].mxu0 }
 0x964   : > { %v5808_v63 = vpack.c.bf16 %v5735_v18, %v5731_v24  ;;  %v5661_v47 = vpop.f32.mrb[248].mxu1  ;;  %v5551_v45 = vadd.f32 %v5550_v36, %v5389_v27  ;;  %v5552_v55 = vpop.f32.mrb[250].mxu0  ;;  %5980 = vmatprep.subr.bf16.mxu0 %v5806_v22 }
 0x965   : > { %v5662_v12 = vadd.f32 %v5661_v47, %v5389_v27  ;;  %v5663_v1 = vpop.f32.mrb[249].mxu1  ;;  %v5553_v13 = vadd.f32 %v5552_v55, %v5394_v61  ;;  %v5554_v42 = vpop.f32.mrb[251].mxu0  ;;  %5981 = vmatpush1.bf16.msra.mxu0 %v5805_v50  ;;  %v5736_v49 = vmax.f32 %v5549_v40, 0.0 }
 0x966   : > { %v5664_v44 = vadd.f32 %v5663_v1, %v5389_v27  ;;  %v5665_v48 = vpop.f32.mrb[250].mxu1  ;;  %6093 = vmatprep.subr.bf16.mxu1 %v5808_v63  ;;  %v5555_v8 = vadd.f32 %v5554_v42, %v5394_v61  ;;  %v5737_v59 = vmax.f32 %v5551_v45, 0.0  ;;  %v5414_v24 = vpop.permute.xlu1 %5413 }
 0x967   : > { %v5666_v25 = vadd.f32 %v5665_v48, %v5394_v61  ;;  %v5667_v6 = vpop.f32.mrb[251].mxu1  ;;  %6094 = vmatpush1.bf16.msra.mxu1 %v5807_v51  ;;  %v5740_v38 = vmax.f32 %v5553_v13, 0.0  ;;  %v5738_v56 = vmax.f32 %v5662_v12, 0.0 }
 0x968   : > { %v5668_v37 = vadd.f32 %v5667_v6, %v5394_v61  ;;  %v5741_v52 = vmax.f32 %v5555_v8, 0.0  ;;  %v5739_v39 = vmax.f32 %v5664_v44, 0.0 }
 0x969   : > { %v5742_v62 = vmax.f32 %v5666_v25, 0.0  ;;  %v5809_v7 = vpack.c.bf16 %v5740_v38, %v5736_v49 }
 0x96a   : > { %v5743_v32 = vmax.f32 %v5668_v37, 0.0  ;;  %v5810_v0 = vpack.c.bf16 %v5741_v52, %v5737_v59  ;;  %v5558_v23 = vpop.f32.mrb[252].mxu0  ;;  %v5419_v59 = vpop.permute.xlu0 %5418 }
 0x96b   : > { %v5811_v57 = vpack.c.bf16 %v5742_v62, %v5738_v56  ;;  %v5559_v19 = vadd.f32 %v5558_v23, %v5399_v41  ;;  %v5560_v2 = vpop.f32.mrb[253].mxu0 }
 0x96c   : > { %v5812_v16 = vpack.c.bf16 %v5743_v32, %v5739_v39  ;;  %v5671_v4 = vpop.f32.mrb[252].mxu1  ;;  %v5561_v29 = vadd.f32 %v5560_v2, %v5399_v41  ;;  %v5562_v31 = vpop.f32.mrb[254].mxu0  ;;  %5982 = vmatprep.subr.bf16.mxu0 %v5810_v0 }
 0x96d   : > { %v5672_v11 = vadd.f32 %v5671_v4, %v5399_v41  ;;  %v5673_v15 = vpop.f32.mrb[253].mxu1  ;;  %v5563_v33 = vadd.f32 %v5562_v31, %v5404_v35  ;;  %v5564_v30 = vpop.f32.mrb[255].mxu0  ;;  %5983 = vmatpush1.bf16.msra.mxu0 %v5809_v7  ;;  %v5744_v3 = vmax.f32 %v5559_v19, 0.0 }
 0x96e   : > { %v5674_v26 = vadd.f32 %v5673_v15, %v5399_v41  ;;  %v5675_v60 = vpop.f32.mrb[254].mxu1  ;;  %6095 = vmatprep.subr.bf16.mxu1 %v5812_v16  ;;  %v5565_v43 = vadd.f32 %v5564_v30, %v5404_v35  ;;  %v5745_v28 = vmax.f32 %v5561_v29, 0.0  ;;  %v5424_v39 = vpop.permute.xlu1 %5423 }
 0x96f   : > { %v5676_v54 = vadd.f32 %v5675_v60, %v5404_v35  ;;  %v5677_v9 = vpop.f32.mrb[255].mxu1  ;;  %6096 = vmatpush1.bf16.msra.mxu1 %v5811_v57  ;;  %v5748_v17 = vmax.f32 %v5563_v33, 0.0  ;;  %v5746_v58 = vmax.f32 %v5672_v11, 0.0 }
 0x970   : > { %v5678_v10 = vadd.f32 %v5677_v9, %v5404_v35  ;;  %v5749_v5 = vmax.f32 %v5565_v43, 0.0  ;;  %v5747_v20 = vmax.f32 %v5674_v26, 0.0 }
 0x971   : > { %v5750_v21 = vmax.f32 %v5676_v54, 0.0  ;;  %v5813_v46 = vpack.c.bf16 %v5748_v17, %v5744_v3 }
 0x972   : > { %v5751_v27 = vmax.f32 %v5678_v10, 0.0  ;;  %v5814_v18 = vpack.c.bf16 %v5749_v5, %v5745_v28  ;;  %v5568_v61 = vpop.f32.mrb[0].mxu0  ;;  %v5429_v28 = vpop.permute.xlu0 %5428 }
 0x973   : > { %v5815_v50 = vpack.c.bf16 %v5750_v21, %v5746_v58  ;;  %v5569_v22 = vadd.f32 %v5568_v61, %v5409_v53  ;;  %v5570_v63 = vpop.f32.mrb[1].mxu0 }
 0x974   : > { %v5816_v51 = vpack.c.bf16 %v5751_v27, %v5747_v20  ;;  %v5681_v34 = vpop.f32.mrb[0].mxu1  ;;  %v5571_v47 = vadd.f32 %v5570_v63, %v5409_v53  ;;  %v5572_v12 = vpop.f32.mrb[2].mxu0  ;;  %5984 = vmatprep.subr.bf16.mxu0 %v5814_v18 }
 0x975   : > { %v5682_v40 = vadd.f32 %v5681_v34, %v5409_v53  ;;  %v5683_v36 = vpop.f32.mrb[1].mxu1  ;;  %v5573_v1 = vadd.f32 %v5572_v12, %v5414_v24  ;;  %v5574_v44 = vpop.f32.mrb[3].mxu0  ;;  %5985 = vmatpush1.bf16.msra.mxu0 %v5813_v46  ;;  %v5752_v25 = vmax.f32 %v5569_v22, 0.0 }
 0x976   : > { %v5684_v45 = vadd.f32 %v5683_v36, %v5409_v53  ;;  %v5685_v55 = vpop.f32.mrb[2].mxu1  ;;  %6097 = vmatprep.subr.bf16.mxu1 %v5816_v51  ;;  %v5575_v48 = vadd.f32 %v5574_v44, %v5414_v24  ;;  %v5753_v38 = vmax.f32 %v5571_v47, 0.0  ;;  %v5434_v20 = vpop.permute.xlu1 %5433 }
 0x977   : > { %v5686_v13 = vadd.f32 %v5685_v55, %v5414_v24  ;;  %v5687_v42 = vpop.f32.mrb[3].mxu1  ;;  %6098 = vmatpush1.bf16.msra.mxu1 %v5815_v50  ;;  %v5756_v8 = vmax.f32 %v5573_v1, 0.0  ;;  %v5754_v49 = vmax.f32 %v5682_v40, 0.0 }
 0x978   : > { %v5688_v6 = vadd.f32 %v5687_v42, %v5414_v24  ;;  %v5757_v56 = vmax.f32 %v5575_v48, 0.0  ;;  %v5755_v62 = vmax.f32 %v5684_v45, 0.0 }
 0x979   : > { %v5758_v37 = vmax.f32 %v5686_v13, 0.0  ;;  %v5817_v52 = vpack.c.bf16 %v5756_v8, %v5752_v25 }
 0x97a   : > { %v5759_v41 = vmax.f32 %v5688_v6, 0.0  ;;  %v5818_v32 = vpack.c.bf16 %v5757_v56, %v5753_v38  ;;  %v5578_v35 = vpop.f32.mrb[4].mxu0  ;;  %v5439_v38 = vpop.permute.xlu0 %5438 }
 0x97b   : > { %v5819_v7 = vpack.c.bf16 %v5758_v37, %v5754_v49  ;;  %v5579_v0 = vadd.f32 %v5578_v35, %v5419_v59  ;;  %v5580_v16 = vpop.f32.mrb[5].mxu0 }
 0x97c   : > { %v5820_v57 = vpack.c.bf16 %v5759_v41, %v5755_v62  ;;  %v5691_v23 = vpop.f32.mrb[4].mxu1  ;;  %v5581_v4 = vadd.f32 %v5580_v16, %v5419_v59  ;;  %v5582_v11 = vpop.f32.mrb[6].mxu0  ;;  %5986 = vmatprep.subr.bf16.mxu0 %v5818_v32 }
 0x97d   : > { %v5692_v19 = vadd.f32 %v5691_v23, %v5419_v59  ;;  %v5693_v2 = vpop.f32.mrb[5].mxu1  ;;  %v5583_v15 = vadd.f32 %v5582_v11, %v5424_v39  ;;  %v5584_v26 = vpop.f32.mrb[7].mxu0  ;;  %5987 = vmatpush1.bf16.msra.mxu0 %v5817_v52  ;;  %v5760_v54 = vmax.f32 %v5579_v0, 0.0 }
 0x97e   : > { %v5694_v29 = vadd.f32 %v5693_v2, %v5419_v59  ;;  %v5695_v31 = vpop.f32.mrb[6].mxu1  ;;  %6099 = vmatprep.subr.bf16.mxu1 %v5820_v57  ;;  %v5585_v60 = vadd.f32 %v5584_v26, %v5424_v39  ;;  %v5761_v17 = vmax.f32 %v5581_v4, 0.0  ;;  %v5444_v62 = vpop.permute.xlu1 %5443 }
 0x97f   : > { %v5696_v33 = vadd.f32 %v5695_v31, %v5424_v39  ;;  %v5697_v30 = vpop.f32.mrb[7].mxu1  ;;  %6100 = vmatpush1.bf16.msra.mxu1 %v5819_v7  ;;  %v5764_v43 = vmax.f32 %v5583_v15, 0.0  ;;  %v5762_v3 = vmax.f32 %v5692_v19, 0.0 }
 0x980   : > { %v5698_v9 = vadd.f32 %v5697_v30, %v5424_v39  ;;  %v5765_v58 = vmax.f32 %v5585_v60, 0.0  ;;  %v5763_v21 = vmax.f32 %v5694_v29, 0.0 }
 0x981   : > { %v5766_v10 = vmax.f32 %v5696_v33, 0.0  ;;  %v5821_v5 = vpack.c.bf16 %v5764_v43, %v5760_v54 }
 0x982   : > { %v5767_v53 = vmax.f32 %v5698_v9, 0.0  ;;  %v5822_v27 = vpack.c.bf16 %v5765_v58, %v5761_v17  ;;  %v5588_v24 = vpop.f32.mrb[8].mxu0 }
 0x983   : > { %v5823_v46 = vpack.c.bf16 %v5766_v10, %v5762_v3  ;;  %v5589_v18 = vadd.f32 %v5588_v24, %v5429_v28  ;;  %v5590_v51 = vpop.f32.mrb[9].mxu0  ;;  %v8616_v24 = vld [vmem:[%s11102_s5 + $0x1a0] sm:$0xff]  }
 0x984   : > { %v5824_v50 = vpack.c.bf16 %v5767_v53, %v5763_v21  ;;  %v5701_v61 = vpop.f32.mrb[8].mxu1  ;;  %v5591_v34 = vadd.f32 %v5590_v51, %v5429_v28  ;;  %v5592_v40 = vpop.f32.mrb[10].mxu0  ;;  %5988 = vmatprep.subr.bf16.mxu0 %v5822_v27  ;;  %v8612_v53 = vld [vmem:[%s11102_s5 + $0x180] sm:$0xff]   ;;  %v8615_v27 = vld [vmem:[%s11102_s5 + $0x198] sm:$0xff]  }
 0x985   : > { %v5702_v22 = vadd.f32 %v5701_v61, %v5429_v28  ;;  %v5703_v63 = vpop.f32.mrb[9].mxu1  ;;  %v5593_v36 = vadd.f32 %v5592_v40, %v5434_v20  ;;  %v5594_v45 = vpop.f32.mrb[11].mxu0  ;;  %5989 = vmatpush1.bf16.msra.mxu0 %v5821_v5  ;;  %v5768_v13 = vmax.f32 %v5589_v18, 0.0  ;;  %v8618_v18 = vld [vmem:[%s11102_s5 + $0x1b0] sm:$0xff]   ;;  %v8619_v61 = vld [vmem:[%s11102_s5 + $0x1b8] sm:$0xff]  }
 0x986   : > { %v5704_v47 = vadd.f32 %v5703_v63, %v5429_v28  ;;  %v5705_v12 = vpop.f32.mrb[10].mxu1  ;;  %6101 = vmatprep.subr.bf16.mxu1 %v5824_v50  ;;  %v5595_v55 = vadd.f32 %v5594_v45, %v5434_v20  ;;  %v5769_v8 = vmax.f32 %v5591_v34, 0.0  ;;  %v8617_v50 = vld [vmem:[%s11102_s5 + $0x1a8] sm:$0xff]   ;;  %v5853_v51 = vpop.permute.xlu0 %5852 }
 0x987   : > { %v5706_v1 = vadd.f32 %v5705_v12, %v5434_v20  ;;  %v5707_v44 = vpop.f32.mrb[11].mxu1  ;;  %6102 = vmatpush1.bf16.msra.mxu1 %v5823_v46  ;;  %v5772_v48 = vmax.f32 %v5593_v36, 0.0  ;;  %v5770_v25 = vmax.f32 %v5702_v22, 0.0  ;;  %v8614_v46 = vld [vmem:[%s11102_s5 + $0x190] sm:$0xff]   ;;  %v5858_v22 = vpop.permute.xlu1 %5857 }
 0x988   : > { %v5708_v42 = vadd.f32 %v5707_v44, %v5434_v20  ;;  %v5773_v49 = vmax.f32 %v5595_v55, 0.0  ;;  %v5771_v37 = vmax.f32 %v5704_v47, 0.0  ;;  %v8613_v20 = vld [vmem:[%s11102_s5 + $0x188] sm:$0xff]  }
 0x989   : > { %v5774_v6 = vmax.f32 %v5706_v1, 0.0  ;;  %v5825_v56 = vpack.c.bf16 %v5772_v48, %v5768_v13 }
 0x98a   : > { %v5775_v59 = vmax.f32 %v5708_v42, 0.0  ;;  %v5826_v41 = vpack.c.bf16 %v5773_v49, %v5769_v8  ;;  %v5598_v39 = vpop.f32.mrb[12].mxu0 }
 0x98b   : > { %v5827_v52 = vpack.c.bf16 %v5774_v6, %v5770_v25  ;;  %v5599_v32 = vadd.f32 %v5598_v39, %v5439_v38  ;;  %v5600_v57 = vpop.f32.mrb[13].mxu0 }
 0x98c   : > { %v5828_v7 = vpack.c.bf16 %v5775_v59, %v5771_v37  ;;  %v5711_v35 = vpop.f32.mrb[12].mxu1  ;;  %v5601_v23 = vadd.f32 %v5600_v57, %v5439_v38  ;;  %v5602_v19 = vpop.f32.mrb[14].mxu0  ;;  %5990 = vmatprep.subr.bf16.mxu0 %v5826_v41 }
 0x98d   : > { %v5712_v0 = vadd.f32 %v5711_v35, %v5439_v38  ;;  %v5713_v16 = vpop.f32.mrb[13].mxu1  ;;  %v5603_v2 = vadd.f32 %v5602_v19, %v5444_v62  ;;  %v5604_v29 = vpop.f32.mrb[15].mxu0  ;;  %5991 = vmatpush1.bf16.msra.mxu0 %v5825_v56  ;;  %v5776_v33 = vmax.f32 %v5599_v32, 0.0 }
 0x98e   : > { %v5714_v4 = vadd.f32 %v5713_v16, %v5439_v38  ;;  %v5715_v11 = vpop.f32.mrb[14].mxu1  ;;  %6103 = vmatprep.subr.bf16.mxu1 %v5828_v7  ;;  %v5605_v31 = vadd.f32 %v5604_v29, %v5444_v62  ;;  %v5777_v43 = vmax.f32 %v5601_v23, 0.0  ;;  %v5868_v32 = vpop.permute.xlu1 %5867 }
 0x98f   : > { %v5716_v15 = vadd.f32 %v5715_v11, %v5444_v62  ;;  %v5717_v26 = vpop.f32.mrb[15].mxu1  ;;  %6104 = vmatpush1.bf16.msra.mxu1 %v5827_v52  ;;  %v5780_v60 = vmax.f32 %v5603_v2, 0.0  ;;  %v5778_v54 = vmax.f32 %v5712_v0, 0.0  ;;  %v5863_v52 = vpop.permute.xlu0 %5862 }
 0x990   : > { %v5718_v30 = vadd.f32 %v5717_v26, %v5444_v62  ;;  %v5781_v3 = vmax.f32 %v5605_v31, 0.0  ;;  %v5779_v17 = vmax.f32 %v5714_v4, 0.0 }
 0x991   : > { %v5782_v9 = vmax.f32 %v5716_v15, 0.0  ;;  %v5829_v10 = vpack.c.bf16 %v5780_v60, %v5776_v33 }
 0x992   : > { %v5783_v58 = vmax.f32 %v5718_v30, 0.0  ;;  %v5830_v21 = vpack.c.bf16 %v5781_v3, %v5777_v43 }
 0x993   : > { %v5831_v28 = vpack.c.bf16 %v5782_v9, %v5778_v54 }
 0x994   : > { %v5832_v5 = vpack.c.bf16 %v5783_v58, %v5779_v17  ;;  %5992 = vmatprep.subr.bf16.mxu0 %v5830_v21 }
 0x995   : > { %5993 = vmatpush1.bf16.msra.mxu0 %v5829_v10 }
 0x996   : > { %6105 = vmatprep.subr.bf16.mxu1 %v5832_v5  ;;  %v5873_v5 = vpop.permute.xlu0 %5872 }
 0x997   : > { %6106 = vmatpush1.bf16.msra.mxu1 %v5831_v28 }
 0x998   : > { %6011 = vmatmul.mubr.bf16.vlgmr.msra.gmra.mrb[16].mxu0 %v8612_v53 }
 0x999   : > { %6020 = vmatprep.mubr.bf16.mxu0 %v11260_v14 }
 0x99a   : > { %6124 = vmatmul.mubr.bf16.vlgmr.msra.gmra.mrb[16].mxu1 %v8612_v53 }
 0x99b   : > { %6133 = vmatprep.mubr.bf16.mxu1 %v11260_v14 }
 0x9a0   : > { %6021 = vmatmul.mubr.bf16.gmra.mrb[20].mxu0 %v8613_v20 }
 0x9a1   : > { %6030 = vmatprep.mubr.bf16.mxu0 %v11260_v14 }
 0x9a2   : > { %6134 = vmatmul.mubr.bf16.gmra.mrb[20].mxu1 %v8613_v20 }
 0x9a3   : > { %6143 = vmatprep.mubr.bf16.mxu1 %v11260_v14 }
 0x9a8   : > { %6031 = vmatmul.mubr.bf16.gmra.mrb[24].mxu0 %v8614_v46 }
 0x9a9   : > { %6040 = vmatprep.mubr.bf16.mxu0 %v11260_v14 }
 0x9aa   : > { %6144 = vmatmul.mubr.bf16.gmra.mrb[24].mxu1 %v8614_v46 }
 0x9ab   : > { %6153 = vmatprep.mubr.bf16.mxu1 %v11260_v14 }
 0x9b0   : > { %6041 = vmatmul.mubr.bf16.gmra.mrb[28].mxu0 %v8615_v27 }
 0x9b1   : > { %6050 = vmatprep.mubr.bf16.mxu0 %v11260_v14 }
 0x9b2   : > { %6154 = vmatmul.mubr.bf16.gmra.mrb[28].mxu1 %v8615_v27  ;;  %v5878_v27 = vpop.permute.xlu1 %5877 }
 0x9b3   : > { %6163 = vmatprep.mubr.bf16.mxu1 %v11260_v14 }
 0x9b8   : > { %6051 = vmatmul.mubr.bf16.gmra.mrb[32].mxu0 %v8616_v24 }
 0x9b9   : > { %6060 = vmatprep.mubr.bf16.mxu0 %v11260_v14 }
 0x9ba   : > { %6164 = vmatmul.mubr.bf16.gmra.mrb[32].mxu1 %v8616_v24 }
 0x9bb   : > { %6173 = vmatprep.mubr.bf16.mxu1 %v11260_v14 }
 0x9c0   : > { %6061 = vmatmul.mubr.bf16.gmra.mrb[36].mxu0 %v8617_v50 }
 0x9c1   : > { %6070 = vmatprep.mubr.bf16.mxu0 %v11260_v14 }
 0x9c2   : > { %6174 = vmatmul.mubr.bf16.gmra.mrb[36].mxu1 %v8617_v50 }
 0x9c3   : > { %6183 = vmatprep.mubr.bf16.mxu1 %v11260_v14 }
 0x9c8   : > { %6071 = vmatmul.mubr.bf16.gmra.mrb[40].mxu0 %v8618_v18 }
 0x9c9   : > { %6080 = vmatprep.mubr.bf16.mxu0 %v11260_v14 }
 0x9ca   : > { %6184 = vmatmul.mubr.bf16.gmra.mrb[40].mxu1 %v8618_v18 }
 0x9cb   : > { %6193 = vmatprep.mubr.bf16.mxu1 %v11260_v14 }
 0x9d0   : > { %6081 = vmatmul.mubr.bf16.gmra.mrb[44].mxu0 %v8619_v61 }
 0x9d1   : > { %6503 = vmatprep.mubr.bf16.mxu0 %v11260_v14 }
 0x9d2   : > { %6194 = vmatmul.mubr.bf16.gmra.mrb[44].mxu1 %v8619_v61 }
 0x9d3   : > { %6624 = vmatprep.mubr.bf16.mxu1 %v11260_v14 }
 0xa6b   : > { %v6012_v34 = vpop.f32.mrb[16].mxu0 }
 0xa6c   : > { %v6013_v63 = vadd.f32 %v6012_v34, %v5853_v51  ;;  %v6014_v47 = vpop.f32.mrb[17].mxu0 }
 0xa6d   : > { %v6125_v40 = vpop.f32.mrb[16].mxu1  ;;  %v6015_v12 = vadd.f32 %v6014_v47, %v5853_v51  ;;  %v6016_v1 = vpop.f32.mrb[18].mxu0 }
 0xa6e   : > { %v6126_v36 = vadd.f32 %v6125_v40, %v5853_v51  ;;  %v6127_v45 = vpop.f32.mrb[17].mxu1  ;;  %v6017_v44 = vadd.f32 %v6016_v1, %v5858_v22  ;;  %v6018_v48 = vpop.f32.mrb[19].mxu0  ;;  %v6204_v6 = vmax.f32 %v6013_v63, 0.0 }
 0xa6f   : > { %v6128_v55 = vadd.f32 %v6127_v45, %v5853_v51  ;;  %v6129_v13 = vpop.f32.mrb[18].mxu1  ;;  %v6019_v25 = vadd.f32 %v6018_v48, %v5858_v22  ;;  %v6205_v56 = vmax.f32 %v6015_v12, 0.0 }
 0xa70   : > { %v6130_v42 = vadd.f32 %v6129_v13, %v5858_v22  ;;  %v6131_v8 = vpop.f32.mrb[19].mxu1  ;;  %v6208_v49 = vmax.f32 %v6017_v44, 0.0  ;;  %v6206_v37 = vmax.f32 %v6126_v36, 0.0 }
 0xa71   : > { %v6132_v38 = vadd.f32 %v6131_v8, %v5858_v22  ;;  %v6209_v62 = vmax.f32 %v6019_v25, 0.0  ;;  %v6207_v41 = vmax.f32 %v6128_v55, 0.0 }
 0xa72   : > { %v6210_v59 = vmax.f32 %v6130_v42, 0.0  ;;  %v6285_v39 = vpack.c.bf16 %v6208_v49, %v6204_v6 }
 0xa73   : > { %v6211_v7 = vmax.f32 %v6132_v38, 0.0  ;;  %v6286_v57 = vpack.c.bf16 %v6209_v62, %v6205_v56  ;;  %v6022_v0 = vpop.f32.mrb[20].mxu0  ;;  %v5883_v56 = vpop.permute.xlu0 %5882 }
 0xa74   : > { %v6287_v35 = vpack.c.bf16 %v6210_v59, %v6206_v37  ;;  %v6023_v16 = vadd.f32 %v6022_v0, %v5863_v52  ;;  %v6024_v4 = vpop.f32.mrb[21].mxu0 }
 0xa75   : > { %v6288_v23 = vpack.c.bf16 %v6211_v7, %v6207_v41  ;;  %v6135_v19 = vpop.f32.mrb[20].mxu1  ;;  %v6025_v11 = vadd.f32 %v6024_v4, %v5863_v52  ;;  %v6026_v15 = vpop.f32.mrb[22].mxu0  ;;  %6471 = vmatprep.subr.bf16.mxu0 %v6286_v57 }
 0xa76   : > { %v6136_v2 = vadd.f32 %v6135_v19, %v5863_v52  ;;  %v6137_v29 = vpop.f32.mrb[21].mxu1  ;;  %v6027_v26 = vadd.f32 %v6026_v15, %v5868_v32  ;;  %v6028_v60 = vpop.f32.mrb[23].mxu0  ;;  %6472 = vmatpush1.bf16.msra.mxu0 %v6285_v39  ;;  %v6212_v9 = vmax.f32 %v6023_v16, 0.0 }
 0xa77   : > { %v6138_v31 = vadd.f32 %v6137_v29, %v5863_v52  ;;  %v6139_v33 = vpop.f32.mrb[22].mxu1  ;;  %6592 = vmatprep.subr.bf16.mxu1 %v6288_v23  ;;  %v6029_v54 = vadd.f32 %v6028_v60, %v5868_v32  ;;  %v6213_v58 = vmax.f32 %v6025_v11, 0.0  ;;  %v5888_v41 = vpop.permute.xlu1 %5887 }
 0xa78   : > { %v6140_v30 = vadd.f32 %v6139_v33, %v5868_v32  ;;  %v6141_v43 = vpop.f32.mrb[23].mxu1  ;;  %6593 = vmatpush1.bf16.msra.mxu1 %v6287_v35  ;;  %v6216_v3 = vmax.f32 %v6027_v26, 0.0  ;;  %v6214_v10 = vmax.f32 %v6136_v2, 0.0 }
 0xa79   : > { %v6142_v17 = vadd.f32 %v6141_v43, %v5868_v32  ;;  %v6217_v21 = vmax.f32 %v6029_v54, 0.0  ;;  %v6215_v53 = vmax.f32 %v6138_v31, 0.0 }
 0xa7a   : > { %v6218_v28 = vmax.f32 %v6140_v30, 0.0  ;;  %v6289_v20 = vpack.c.bf16 %v6216_v3, %v6212_v9 }
 0xa7b   : > { %v6219_v46 = vmax.f32 %v6142_v17, 0.0  ;;  %v6290_v50 = vpack.c.bf16 %v6217_v21, %v6213_v58  ;;  %v6032_v18 = vpop.f32.mrb[24].mxu0  ;;  %v5893_v58 = vpop.permute.xlu0 %5892 }
 0xa7c   : > { %v6291_v24 = vpack.c.bf16 %v6218_v28, %v6214_v10  ;;  %v6033_v51 = vadd.f32 %v6032_v18, %v5873_v5  ;;  %v6034_v34 = vpop.f32.mrb[25].mxu0 }
 0xa7d   : > { %v6292_v61 = vpack.c.bf16 %v6219_v46, %v6215_v53  ;;  %v6145_v22 = vpop.f32.mrb[24].mxu1  ;;  %v6035_v40 = vadd.f32 %v6034_v34, %v5873_v5  ;;  %v6036_v36 = vpop.f32.mrb[26].mxu0  ;;  %6473 = vmatprep.subr.bf16.mxu0 %v6290_v50 }
 0xa7e   : > { %v6146_v63 = vadd.f32 %v6145_v22, %v5873_v5  ;;  %v6147_v47 = vpop.f32.mrb[25].mxu1  ;;  %v6037_v45 = vadd.f32 %v6036_v36, %v5878_v27  ;;  %v6038_v55 = vpop.f32.mrb[27].mxu0  ;;  %6474 = vmatpush1.bf16.msra.mxu0 %v6289_v20  ;;  %v6220_v42 = vmax.f32 %v6033_v51, 0.0 }
 0xa7f   : > { %v6148_v12 = vadd.f32 %v6147_v47, %v5873_v5  ;;  %v6149_v1 = vpop.f32.mrb[26].mxu1  ;;  %6594 = vmatprep.subr.bf16.mxu1 %v6292_v61  ;;  %v6039_v13 = vadd.f32 %v6038_v55, %v5878_v27  ;;  %v6221_v49 = vmax.f32 %v6035_v40, 0.0  ;;  %v5898_v53 = vpop.permute.xlu1 %5897 }
 0xa80   : > { %v6150_v44 = vadd.f32 %v6149_v1, %v5878_v27  ;;  %v6151_v48 = vpop.f32.mrb[27].mxu1  ;;  %6595 = vmatpush1.bf16.msra.mxu1 %v6291_v24  ;;  %v6224_v25 = vmax.f32 %v6037_v45, 0.0  ;;  %v6222_v6 = vmax.f32 %v6146_v63, 0.0 }
 0xa81   : > { %v6152_v8 = vadd.f32 %v6151_v48, %v5878_v27  ;;  %v6225_v37 = vmax.f32 %v6039_v13, 0.0  ;;  %v6223_v59 = vmax.f32 %v6148_v12, 0.0 }
 0xa82   : > { %v6226_v38 = vmax.f32 %v6150_v44, 0.0  ;;  %v6293_v62 = vpack.c.bf16 %v6224_v25, %v6220_v42 }
 0xa83   : > { %v6227_v52 = vmax.f32 %v6152_v8, 0.0  ;;  %v6294_v7 = vpack.c.bf16 %v6225_v37, %v6221_v49  ;;  %v6042_v32 = vpop.f32.mrb[28].mxu0  ;;  %v5903_v49 = vpop.permute.xlu0 %5902 }
 0xa84   : > { %v6295_v39 = vpack.c.bf16 %v6226_v38, %v6222_v6  ;;  %v6043_v57 = vadd.f32 %v6042_v32, %v5883_v56  ;;  %v6044_v23 = vpop.f32.mrb[29].mxu0 }
 0xa85   : > { %v6296_v35 = vpack.c.bf16 %v6227_v52, %v6223_v59  ;;  %v6155_v0 = vpop.f32.mrb[28].mxu1  ;;  %v6045_v19 = vadd.f32 %v6044_v23, %v5883_v56  ;;  %v6046_v2 = vpop.f32.mrb[30].mxu0  ;;  %6475 = vmatprep.subr.bf16.mxu0 %v6294_v7 }
 0xa86   : > { %v6156_v16 = vadd.f32 %v6155_v0, %v5883_v56  ;;  %v6157_v4 = vpop.f32.mrb[29].mxu1  ;;  %v6047_v29 = vadd.f32 %v6046_v2, %v5888_v41  ;;  %v6048_v31 = vpop.f32.mrb[31].mxu0  ;;  %6476 = vmatpush1.bf16.msra.mxu0 %v6293_v62  ;;  %v6228_v30 = vmax.f32 %v6043_v57, 0.0 }
 0xa87   : > { %v6158_v11 = vadd.f32 %v6157_v4, %v5883_v56  ;;  %v6159_v15 = vpop.f32.mrb[30].mxu1  ;;  %6596 = vmatprep.subr.bf16.mxu1 %v6296_v35  ;;  %v6049_v33 = vadd.f32 %v6048_v31, %v5888_v41  ;;  %v6229_v3 = vmax.f32 %v6045_v19, 0.0  ;;  %v5908_v59 = vpop.permute.xlu1 %5907 }
 0xa88   : > { %v6160_v26 = vadd.f32 %v6159_v15, %v5888_v41  ;;  %v6161_v60 = vpop.f32.mrb[31].mxu1  ;;  %6597 = vmatpush1.bf16.msra.mxu1 %v6295_v39  ;;  %v6232_v54 = vmax.f32 %v6047_v29, 0.0  ;;  %v6230_v9 = vmax.f32 %v6156_v16, 0.0 }
 0xa89   : > { %v6162_v43 = vadd.f32 %v6161_v60, %v5888_v41  ;;  %v6233_v10 = vmax.f32 %v6049_v33, 0.0  ;;  %v6231_v28 = vmax.f32 %v6158_v11, 0.0 }
 0xa8a   : > { %v6234_v17 = vmax.f32 %v6160_v26, 0.0  ;;  %v6297_v21 = vpack.c.bf16 %v6232_v54, %v6228_v30 }
 0xa8b   : > { %v6235_v5 = vmax.f32 %v6162_v43, 0.0  ;;  %v6298_v46 = vpack.c.bf16 %v6233_v10, %v6229_v3  ;;  %v6052_v27 = vpop.f32.mrb[32].mxu0  ;;  %v5913_v3 = vpop.permute.xlu0 %5912 }
 0xa8c   : > { %v6299_v20 = vpack.c.bf16 %v6234_v17, %v6230_v9  ;;  %v6053_v50 = vadd.f32 %v6052_v27, %v5893_v58  ;;  %v6054_v61 = vpop.f32.mrb[33].mxu0 }
 0xa8d   : > { %v6300_v24 = vpack.c.bf16 %v6235_v5, %v6231_v28  ;;  %v6165_v18 = vpop.f32.mrb[32].mxu1  ;;  %v6055_v22 = vadd.f32 %v6054_v61, %v5893_v58  ;;  %v6056_v63 = vpop.f32.mrb[34].mxu0  ;;  %6477 = vmatprep.subr.bf16.mxu0 %v6298_v46 }
 0xa8e   : > { %v6166_v51 = vadd.f32 %v6165_v18, %v5893_v58  ;;  %v6167_v34 = vpop.f32.mrb[33].mxu1  ;;  %v6057_v47 = vadd.f32 %v6056_v63, %v5898_v53  ;;  %v6058_v12 = vpop.f32.mrb[35].mxu0  ;;  %6478 = vmatpush1.bf16.msra.mxu0 %v6297_v21  ;;  %v6236_v44 = vmax.f32 %v6053_v50, 0.0 }
 0xa8f   : > { %v6168_v40 = vadd.f32 %v6167_v34, %v5893_v58  ;;  %v6169_v36 = vpop.f32.mrb[34].mxu1  ;;  %6598 = vmatprep.subr.bf16.mxu1 %v6300_v24  ;;  %v6059_v1 = vadd.f32 %v6058_v12, %v5898_v53  ;;  %v6237_v25 = vmax.f32 %v6055_v22, 0.0  ;;  %v5918_v28 = vpop.permute.xlu1 %5917 }
 0xa90   : > { %v6170_v45 = vadd.f32 %v6169_v36, %v5898_v53  ;;  %v6171_v55 = vpop.f32.mrb[35].mxu1  ;;  %6599 = vmatpush1.bf16.msra.mxu1 %v6299_v20  ;;  %v6240_v13 = vmax.f32 %v6057_v47, 0.0  ;;  %v6238_v42 = vmax.f32 %v6166_v51, 0.0 }
 0xa91   : > { %v6172_v48 = vadd.f32 %v6171_v55, %v5898_v53  ;;  %v6241_v6 = vmax.f32 %v6059_v1, 0.0  ;;  %v6239_v38 = vmax.f32 %v6168_v40, 0.0  ;;  %v2026_v1 = vld [vmem:[%s8919_s22 + $0x28] sm:$0x1] }
 0xa92   : > { %v6242_v8 = vmax.f32 %v6170_v45, 0.0  ;;  %v6301_v37 = vpack.c.bf16 %v6240_v13, %v6236_v44  ;;  %v2022_v45 = vld [vmem:[%s8919_s22 + $0x8] sm:$0xc0] }
 0xa93   : > { %v6243_v56 = vmax.f32 %v6172_v48, 0.0  ;;  %v6302_v52 = vpack.c.bf16 %v6241_v6, %v6237_v25  ;;  %v6062_v41 = vpop.f32.mrb[36].mxu0  ;;  %v2024_v48 = vld [vmem:[%s8919_s22 + $0x18] sm:$0xc0] }
 0xa94   : > { %v6303_v62 = vpack.c.bf16 %v6242_v8, %v6238_v42  ;;  %v6063_v7 = vadd.f32 %v6062_v41, %v5903_v49  ;;  %v6064_v35 = vpop.f32.mrb[37].mxu0  ;;  %v2028_v42 = vld [vmem:[%s8919_s22 + $0x38] sm:$0x1] }
 0xa95   : > { %v6304_v39 = vpack.c.bf16 %v6243_v56, %v6239_v38  ;;  %v6175_v32 = vpop.f32.mrb[36].mxu1  ;;  %v6065_v0 = vadd.f32 %v6064_v35, %v5903_v49  ;;  %v6066_v16 = vpop.f32.mrb[38].mxu0  ;;  %6479 = vmatprep.subr.bf16.mxu0 %v6302_v52 }
 0xa96   : > { %v6176_v57 = vadd.f32 %v6175_v32, %v5903_v49  ;;  %v6177_v23 = vpop.f32.mrb[37].mxu1  ;;  %v6067_v4 = vadd.f32 %v6066_v16, %v5908_v59  ;;  %v6068_v11 = vpop.f32.mrb[39].mxu0  ;;  %6480 = vmatpush1.bf16.msra.mxu0 %v6301_v37  ;;  %v6244_v26 = vmax.f32 %v6063_v7, 0.0  ;;  %v8742_v32 = vmov 65535  }
 0xa97   : > { %v6178_v19 = vadd.f32 %v6177_v23, %v5903_v49  ;;  %v6179_v2 = vpop.f32.mrb[38].mxu1  ;;  %6600 = vmatprep.subr.bf16.mxu1 %v6304_v39  ;;  %v6069_v15 = vadd.f32 %v6068_v11, %v5908_v59  ;;  %v6245_v54 = vmax.f32 %v6065_v0, 0.0  ;;  %v5923_v38 = vpop.permute.xlu0 %5922  ;;  %v6850_v35 = vsel %vm1992_vm1, 4294967295, %v8742_v32 }
 0xa98   : > { %v6180_v29 = vadd.f32 %v6179_v2, %v5908_v59  ;;  %v6181_v31 = vpop.f32.mrb[39].mxu1  ;;  %6601 = vmatpush1.bf16.msra.mxu1 %v6303_v62  ;;  %v6248_v33 = vmax.f32 %v6067_v4, 0.0  ;;  %v6246_v30 = vmax.f32 %v6176_v57, 0.0  ;;  %v2030_v62 = vpack.c.bf16 %v2026_v1, %v2022_v45  ;;  %v5928_v52 = vpop.permute.xlu1 %5927  ;;  %v2021_v4 = vld [vmem:[%s8919_s22] sm:$0xc0] }
 0xa99   : > { %v6182_v60 = vadd.f32 %v6181_v31, %v5908_v59  ;;  %v6249_v9 = vmax.f32 %v6069_v15, 0.0  ;;  %v6247_v17 = vmax.f32 %v6178_v19, 0.0  ;;  %v2032_v57 = vpack.c.bf16 %v2028_v42, %v2024_v48  ;;  %v2025_v2 = vld [vmem:[%s8919_s22 + $0x20] sm:$0x1]  ;;  %v8622_v48 = vld [vmem:[%s11104_s7 + $0x10] sm:$0xff]   ;;  %v8623_v42 = vld [vmem:[%s11104_s7 + $0x18] sm:$0xff]  }
 0xa9a   : > { %v6250_v43 = vmax.f32 %v6180_v29, 0.0  ;;  %v6305_v10 = vpack.c.bf16 %v6248_v33, %v6244_v26  ;;  %v2023_v26 = vld [vmem:[%s8919_s22 + $0x10] sm:$0xc0]  ;;  %v2027_v33 = vld [vmem:[%s8919_s22 + $0x30] sm:$0x1]  ;;  %v8620_v1 = vld [vmem:[%s11104_s7] sm:$0xff]  }
 0xa9b   : > { %v6251_v58 = vmax.f32 %v6182_v60, 0.0  ;;  %v6306_v5 = vpack.c.bf16 %v6249_v9, %v6245_v54  ;;  %v6072_v53 = vpop.f32.mrb[40].mxu0  ;;  %v6822_v9 = vrot.slane %v2030_v62, 3  ;;  %v8632_v62 = vld [vmem:[%s11107_s10 + $0x18] sm:$0xff]   ;;  %v6337_v32 = vpop.permute.xlu0 %6336  ;;  %s8263_s22 = sshll.u32 %s11305_s24, 2 }
 0xa9c   : > { %v6307_v21 = vpack.c.bf16 %v6250_v43, %v6246_v30  ;;  %v6073_v46 = vadd.f32 %v6072_v53, %v5913_v3  ;;  %v6074_v24 = vpop.f32.mrb[41].mxu0  ;;  %s7748_s23 = sadd.s32 %s8264_s26, %s8263_s22  ;;  %s8645_s22 = scalar_lea.vmem %s11045_s0, 256 }
 0xa9d   : > { %v6308_v20 = vpack.c.bf16 %v6251_v58, %v6247_v17  ;;  %v6185_v27 = vpop.f32.mrb[40].mxu1  ;;  %v6075_v18 = vadd.f32 %v6074_v24, %v5913_v3  ;;  %v6076_v51 = vpop.f32.mrb[42].mxu0  ;;  %6481 = vmatprep.subr.bf16.mxu0 %v6306_v5  ;;  %s8265_s17 = sshll.u32 %s7748_s23, 6  ;;  %p8646_p2 = scmp.ne.s32.totalorder %s11045_s0, %s8645_s22 }
 0xa9e   : > { %v6186_v50 = vadd.f32 %v6185_v27, %v5913_v3  ;;  %v6187_v61 = vpop.f32.mrb[41].mxu1  ;;  %v6077_v34 = vadd.f32 %v6076_v51, %v5918_v28  ;;  %v6078_v40 = vpop.f32.mrb[43].mxu0  ;;  %6482 = vmatpush1.bf16.msra.mxu0 %v6305_v10  ;;  %v6252_v55 = vmax.f32 %v6073_v46, 0.0  ;;  %v2031_v46 = vpack.c.bf16 %v2027_v33, %v2023_v26  ;;  %s8743_s26 = smov [#allocation3]  }
 0xa9f   : > { %v6188_v22 = vadd.f32 %v6187_v61, %v5913_v3  ;;  %v6189_v63 = vpop.f32.mrb[42].mxu1  ;;  %6602 = vmatprep.subr.bf16.mxu1 %v6308_v20  ;;  %v6079_v36 = vadd.f32 %v6078_v40, %v5918_v28  ;;  %v6253_v8 = vmax.f32 %v6075_v18, 0.0  ;;  %v6851_v3 = vsel %vm1997_vm2, %v6850_v35, 0  ;;  %v6342_v35 = vpop.permute.xlu1 %6341  ;;  %p8647_p3 = pnand %p8646_p2, %p8879_p8  ;;  %s8649_s23 = sshll.u32 %s8743_s26, 4  ;;  %s8650_s23 = int_to_ptr.vmem [resolvable:$false] %s8649_s23 }
 0xaa0   : > { %v6190_v47 = vadd.f32 %v6189_v63, %v5918_v28  ;;  %v6191_v12 = vpop.f32.mrb[43].mxu1  ;;  %6603 = vmatpush1.bf16.msra.mxu1 %v6307_v21  ;;  %v6256_v44 = vmax.f32 %v6077_v34, 0.0  ;;  %v6254_v25 = vmax.f32 %v6186_v50, 0.0  ;;  %v2029_v21 = vpack.c.bf16 %v2025_v2, %v2021_v4  ;;  %s8651_s1 = scalar_lea.vmem %s8650_s23, 512  ;;  %p8652_p5 = scmp.lt.s32.totalorder %s11045_s0, %s8650_s23 }
 0xaa1   : > { %v6192_v13 = vadd.f32 %v6191_v12, %v5918_v28  ;;  %v6257_v49 = vmax.f32 %v6079_v36, 0.0  ;;  %v6255_v37 = vmax.f32 %v6188_v22, 0.0  ;;  %v6824_v28 = vrot.slane %v2032_v57, 3  ;;  %p8648_p4 = pneg %p8647_p3  ;;  %p8653_p6 = scmp.lt.s32.totalorder %s8651_s1, %s8645_s22 }
 0xaa2   : > { %v6258_v6 = vmax.f32 %v6190_v47, 0.0  ;;  %v6309_v56 = vpack.c.bf16 %v6256_v44, %v6252_v55  ;;  %v6856_v40 = vand.u32 %v6851_v3, %v6822_v9  ;;  %v6821_v47 = vrot.slane %v2029_v21, 3 }
 0xaa3   : > { %v6259_v59 = vmax.f32 %v6192_v13, 0.0  ;;  %v6310_v39 = vpack.c.bf16 %v6257_v49, %v6253_v8  ;;  %v6082_v7 = vpop.f32.mrb[44].mxu0  ;;  %v6862_v12 = vand.u32 %v6851_v3, %v6824_v28  ;;  %v6823_v45 = vrot.slane %v2031_v46, 3  ;;  %v8621_v13 = vld [vmem:[%s11104_s7 + $0x8] sm:$0xff]   ;;  %v8627_v49 = vld [vmem:[%s11104_s7 + $0x38] sm:$0xff]   ;;  %p8654_p7 = por %p8653_p6, %p8652_p5 }
 0xaa4   : > { %v6311_v41 = vpack.c.bf16 %v6258_v6, %v6254_v25  ;;  %v6083_v23 = vadd.f32 %v6082_v7, %v5923_v38  ;;  %v6084_v19 = vpop.f32.mrb[45].mxu0  ;;  %v6853_v55 = vand.u32 %v6851_v3, %v6821_v47  ;;  %v8624_v25 = vld [vmem:[%s11104_s7 + $0x20] sm:$0xff]   ;;  %v8625_v8 = vld [vmem:[%s11104_s7 + $0x28] sm:$0xff]   ;;  %v8626_v6 = vld [vmem:[%s11104_s7 + $0x30] sm:$0xff]  }
 0xaa5   : > { %v6312_v0 = vpack.c.bf16 %v6259_v59, %v6255_v37  ;;  %v6195_v16 = vpop.f32.mrb[44].mxu1  ;;  %v6085_v29 = vadd.f32 %v6084_v19, %v5923_v38  ;;  %v6086_v31 = vpop.f32.mrb[46].mxu0  ;;  %6483 = vmatprep.subr.bf16.mxu0 %v6310_v39  ;;  %v6859_v44 = vand.u32 %v6851_v3, %v6823_v45  ;;  %v8629_v37 = vld [vmem:[%s11107_s10] sm:$0xff]   ;;  %v8631_v59 = vld [vmem:[%s11107_s10 + $0x10] sm:$0xff]   ;;  %v8636_v7 = vld [vmem:[%s11107_s10 + $0x38] sm:$0xff]   ;;  %p8655_p10 = pnand %p8654_p7, %p8648_p4 }
 0xaa6   : > { %v6196_v11 = vadd.f32 %v6195_v16, %v5923_v38  ;;  %v6197_v15 = vpop.f32.mrb[45].mxu1  ;;  %v6087_v30 = vadd.f32 %v6086_v31, %v5928_v52  ;;  %v6088_v43 = vpop.f32.mrb[47].mxu0  ;;  %6484 = vmatpush1.bf16.msra.mxu0 %v6309_v56  ;;  %v6260_v5 = vmax.f32 %v6083_v23, 0.0  ;;  %v8630_v56 = vld [vmem:[%s11107_s10 + $0x8] sm:$0xff]   ;;  %v8635_v39 = vld [vmem:[%s11107_s10 + $0x30] sm:$0xff]  }
 0xaa7   : > { %v6198_v60 = vadd.f32 %v6197_v15, %v5923_v38  ;;  %v6199_v54 = vpop.f32.mrb[46].mxu1  ;;  %6604 = vmatprep.subr.bf16.mxu1 %v6312_v0  ;;  %v6089_v10 = vadd.f32 %v6088_v43, %v5928_v52  ;;  %v6261_v24 = vmax.f32 %v6085_v29, 0.0  ;;  %v8628_v38 = vld [vmem:[%s11104_s7 + $0x40] ss:$0 sps:$4 sm:$0x11]  }
 0xaa8   : > { %v6200_v17 = vadd.f32 %v6199_v54, %v5928_v52  ;;  %v6201_v58 = vpop.f32.mrb[47].mxu1  ;;  %6605 = vmatpush1.bf16.msra.mxu1 %v6311_v41  ;;  %v6264_v53 = vmax.f32 %v6087_v30, 0.0  ;;  %v6262_v27 = vmax.f32 %v6196_v11, 0.0  ;;  %v8634_v41 = vld [vmem:[%s11107_s10 + $0x28] sm:$0xff]  }
 0xaa9   : > { %v6202_v20 = vadd.f32 %v6201_v58, %v5928_v52  ;;  %v6265_v18 = vmax.f32 %v6089_v10, 0.0  ;;  %v6263_v61 = vmax.f32 %v6198_v60, 0.0  ;;  %v8633_v52 = vld [vmem:[%s11107_s10 + $0x20] sm:$0xff]   ;;  %v6352_v58 = vpop.permute.xlu1 %6351 }
 0xaaa   : > { %v6266_v50 = vmax.f32 %v6200_v17, 0.0  ;;  %v6313_v51 = vpack.c.bf16 %v6264_v53, %v6260_v5  ;;  %v6347_v17 = vpop.permute.xlu0 %6346 }
 0xaab   : > { %v6267_v22 = vmax.f32 %v6202_v20, 0.0  ;;  %v6314_v63 = vpack.c.bf16 %v6265_v18, %v6261_v24 }
 0xaac   : > { %v6315_v34 = vpack.c.bf16 %v6266_v50, %v6262_v27 }
 0xaad   : > { %v6316_v36 = vpack.c.bf16 %v6267_v22, %v6263_v61  ;;  %6485 = vmatprep.subr.bf16.mxu0 %v6314_v63 }
 0xaae   : > { %6486 = vmatpush1.bf16.msra.mxu0 %v6313_v51  ;;  %v6357_v45 = vpop.permute.xlu0 %6356 }
 0xaaf   : > { %6606 = vmatprep.subr.bf16.mxu1 %v6316_v36  ;;  %6864 = vmatprep.subr.bf16.mxu0 %v6856_v40 }
 0xab0   : > { %6607 = vmatpush1.bf16.msra.mxu1 %v6315_v34 }
 0xab1   : > { %6977 = vmatprep.subr.bf16.mxu1 %v6862_v12  ;;  %6504 = vmatmul.mubr.bf16.vlgmr.msra.gmra.mrb[48].mxu0 %v8620_v1 }
 0xab2   : > { %6513 = vmatprep.mubr.bf16.mxu0 %v11260_v14  ;;  %6865 = vmatpush1.bf16.msra.mxu0 %v6853_v55  ;;  %v6362_v55 = vpop.permute.xlu1 %6361 }
 0xab3   : > { %6625 = vmatmul.mubr.bf16.vlgmr.msra.gmra.mrb[48].mxu1 %v8620_v1 }
 0xab4   : > { %6634 = vmatprep.mubr.bf16.mxu1 %v11260_v14  ;;  %6978 = vmatpush1.bf16.msra.mxu1 %v6859_v44 }
 0xab9   : > { %6514 = vmatmul.mubr.bf16.gmra.mrb[52].mxu0 %v8621_v13 }
 0xaba   : > { %6523 = vmatprep.mubr.bf16.mxu0 %v11260_v14 }
 0xabb   : > { %6635 = vmatmul.mubr.bf16.gmra.mrb[52].mxu1 %v8621_v13 }
 0xabc   : > { %6644 = vmatprep.mubr.bf16.mxu1 %v11260_v14 }
 0xac1   : > { %6524 = vmatmul.mubr.bf16.gmra.mrb[56].mxu0 %v8622_v48 }
 0xac2   : > { %6533 = vmatprep.mubr.bf16.mxu0 %v11260_v14 }
 0xac3   : > { %6645 = vmatmul.mubr.bf16.gmra.mrb[56].mxu1 %v8622_v48 }
 0xac4   : > { %6654 = vmatprep.mubr.bf16.mxu1 %v11260_v14 }
 0xac9   : > { %6534 = vmatmul.mubr.bf16.gmra.mrb[60].mxu0 %v8623_v42 }
 0xaca   : > { %6543 = vmatprep.mubr.bf16.mxu0 %v11260_v14 }
 0xacb   : > { %6655 = vmatmul.mubr.bf16.gmra.mrb[60].mxu1 %v8623_v42 }
 0xacc   : > { %6664 = vmatprep.mubr.bf16.mxu1 %v11260_v14 }
 0xad1   : > { %6544 = vmatmul.mubr.bf16.gmra.mrb[64].mxu0 %v8624_v25 }
 0xad2   : > { %6553 = vmatprep.mubr.bf16.mxu0 %v11260_v14 }
 0xad3   : > { %6665 = vmatmul.mubr.bf16.gmra.mrb[64].mxu1 %v8624_v25 }
 0xad4   : > { %6674 = vmatprep.mubr.bf16.mxu1 %v11260_v14 }
 0xad9   : > { %6554 = vmatmul.mubr.bf16.gmra.mrb[68].mxu0 %v8625_v8 }
 0xada   : > { %6563 = vmatprep.mubr.bf16.mxu0 %v11260_v14 }
 0xadb   : > { %6675 = vmatmul.mubr.bf16.gmra.mrb[68].mxu1 %v8625_v8 }
 0xadc   : > { %6684 = vmatprep.mubr.bf16.mxu1 %v11260_v14 }
 0xae1   : > { %6564 = vmatmul.mubr.bf16.gmra.mrb[72].mxu0 %v8626_v6 }
 0xae2   : > { %6573 = vmatprep.mubr.bf16.mxu0 %v11260_v14 }
 0xae3   : > { %6685 = vmatmul.mubr.bf16.gmra.mrb[72].mxu1 %v8626_v6 }
 0xae4   : > { %6694 = vmatprep.mubr.bf16.mxu1 %v11260_v14 }
 0xae9   : > { %6574 = vmatmul.mubr.bf16.gmra.mrb[76].mxu0 %v8627_v49 }
 0xaea   : > { %6583 = vmatprep.mubr.bf16.mxu0 %v11260_v14 }
 0xaeb   : > { %6695 = vmatmul.mubr.bf16.gmra.mrb[76].mxu1 %v8627_v49 }
 0xaec   : > { %6704 = vmatprep.mubr.bf16.mxu1 %v11260_v14 }
 0xaf1   : > { %6584 = vmatmul.mubr.bf16.gmra.mrb[80].mxu0 %v8628_v38 }
 0xaf2   : > { %6896 = vmatprep.mubr.bf16.mxu0 %v11260_v14 }
 0xaf3   : > { %6705 = vmatmul.mubr.bf16.gmra.mrb[80].mxu1 %v8628_v38 }
 0xaf4   : > { %7009 = vmatprep.mubr.bf16.mxu1 %v11260_v14 }
 0xaf9   : > { %8238 = vmatmul.mubr.msk.bf16.vlgmr.msra.gmra.mrb[84].mxu0 %vm6825_vm7, %v8629_v37 }
 0xafa   : > { %6906 = vmatprep.mubr.bf16.mxu0 %v11260_v14 }
 0xafb   : > { %8246 = vmatmul.mubr.msk.bf16.vlgmr.msra.gmra.mrb[84].mxu1 %vm6825_vm7, %v8629_v37 }
 0xafc   : > { %7019 = vmatprep.mubr.bf16.mxu1 %v11260_v14 }
 0xb01   : > { %8239 = vmatmul.mubr.msk.bf16.gmra.mrb[88].mxu0 %vm6825_vm7, %v8630_v56 }
 0xb02   : > { %6916 = vmatprep.mubr.bf16.mxu0 %v11260_v14 }
 0xb03   : > { %8247 = vmatmul.mubr.msk.bf16.gmra.mrb[88].mxu1 %vm6825_vm7, %v8630_v56 }
 0xb04   : > { %7029 = vmatprep.mubr.bf16.mxu1 %v11260_v14 }
 0xb09   : > { %8240 = vmatmul.mubr.msk.bf16.gmra.mrb[92].mxu0 %vm6825_vm7, %v8631_v59 }
 0xb0a   : > { %6926 = vmatprep.mubr.bf16.mxu0 %v11260_v14 }
 0xb0b   : > { %8248 = vmatmul.mubr.msk.bf16.gmra.mrb[92].mxu1 %vm6825_vm7, %v8631_v59 }
 0xb0c   : > { %7039 = vmatprep.mubr.bf16.mxu1 %v11260_v14 }
 0xb11   : > { %8241 = vmatmul.mubr.msk.bf16.gmra.mrb[96].mxu0 %vm6825_vm7, %v8632_v62 }
 0xb12   : > { %6936 = vmatprep.mubr.bf16.mxu0 %v11260_v14 }
 0xb13   : > { %8249 = vmatmul.mubr.msk.bf16.gmra.mrb[96].mxu1 %vm6825_vm7, %v8632_v62 }
 0xb14   : > { %7049 = vmatprep.mubr.bf16.mxu1 %v11260_v14 }
 0xb19   : > { %8242 = vmatmul.mubr.msk.bf16.gmra.mrb[100].mxu0 %vm6825_vm7, %v8633_v52 }
 0xb1a   : > { %6946 = vmatprep.mubr.bf16.mxu0 %v11260_v14 }
 0xb1b   : > { %8250 = vmatmul.mubr.msk.bf16.gmra.mrb[100].mxu1 %vm6825_vm7, %v8633_v52 }
 0xb1c   : > { %7059 = vmatprep.mubr.bf16.mxu1 %v11260_v14 }
 0xb21   : > { %8243 = vmatmul.mubr.msk.bf16.gmra.mrb[104].mxu0 %vm6825_vm7, %v8634_v41 }
 0xb22   : > { %6956 = vmatprep.mubr.bf16.mxu0 %v11260_v14 }
 0xb23   : > { %8251 = vmatmul.mubr.msk.bf16.gmra.mrb[104].mxu1 %vm6825_vm7, %v8634_v41 }
 0xb24   : > { %7069 = vmatprep.mubr.bf16.mxu1 %v11260_v14 }
 0xb29   : > { %8244 = vmatmul.mubr.msk.bf16.gmra.mrb[108].mxu0 %vm6825_vm7, %v8635_v39 }
 0xb2a   : > { %6966 = vmatprep.mubr.bf16.mxu0 %v11260_v14 }
 0xb2b   : > { %8252 = vmatmul.mubr.msk.bf16.gmra.mrb[108].mxu1 %vm6825_vm7, %v8635_v39 }
 0xb2c   : > { %7079 = vmatprep.mubr.bf16.mxu1 %v11260_v14 }
 0xb31   : > { %8245 = vmatmul.mubr.msk.bf16.gmra.mrb[112].mxu0 %vm6825_vm7, %v8636_v7 }
 0xb32   : > { %7170 = vmatprep.mubr.bf16.mxu0 %v11260_v14 }
 0xb33   : > { %8253 = vmatmul.mubr.msk.bf16.gmra.mrb[112].mxu1 %vm6825_vm7, %v8636_v7 }
 0xb34   : > { %7283 = vmatprep.mubr.bf16.mxu1 %v11260_v14 }
 0xb84   : > { %v6505_v57 = vpop.f32.mrb[48].mxu0 }
 0xb85   : > { %v6507_v23 = vpop.f32.mrb[49].mxu0  ;;  %v6506_v4 = vadd.f32 %v6505_v57, %v6337_v32  ;;  %v6367_v57 = vpop.permute.xlu0 %6366 }
 0xb86   : > { %v6626_v0 = vpop.f32.mrb[48].mxu1  ;;  %v6509_v19 = vpop.f32.mrb[50].mxu0  ;;  %v6508_v31 = vadd.f32 %v6507_v23, %v6337_v32 }
 0xb87   : > { %v6628_v16 = vpop.f32.mrb[49].mxu1  ;;  %v6510_v2 = vadd.f32 %v6509_v19, %v6342_v35  ;;  %v6511_v29 = vpop.f32.mrb[51].mxu0  ;;  %v6627_v15 = vadd.f32 %v6626_v0, %v6337_v32 }
 0xb88   : > { %v6630_v11 = vpop.f32.mrb[50].mxu1  ;;  %v6512_v33 = vadd.f32 %v6511_v29, %v6342_v35  ;;  %v6629_v30 = vadd.f32 %v6628_v16, %v6337_v32  ;;  %v6372_v23 = vpop.permute.xlu1 %6371 }
 0xb89   : > { %v6631_v26 = vadd.f32 %v6630_v11, %v6342_v35  ;;  %v6632_v60 = vpop.f32.mrb[51].mxu1  ;;  %v6729_v54 = vpack.c.bf16 %v6510_v2, %v6506_v4 }
 0xb8a   : > { %v6633_v43 = vadd.f32 %v6632_v60, %v6342_v35  ;;  %v6730_v3 = vpack.c.bf16 %v6512_v33, %v6508_v31 }
 0xb8b   : > { %v6731_v9 = vpack.c.bf16 %v6631_v26, %v6627_v15 }
 0xb8c   : > { %v6732_v10 = vpack.c.bf16 %v6633_v43, %v6629_v30  ;;  %v6515_v28 = vpop.f32.mrb[52].mxu0  ;;  %7138 = vmatprep.subr.bf16.mxu0 %v6730_v3 }
 0xb8d   : > { %v6517_v5 = vpop.f32.mrb[53].mxu0  ;;  %7139 = vmatpush1.bf16.msra.mxu0 %v6729_v54  ;;  %v6516_v46 = vadd.f32 %v6515_v28, %v6347_v17  ;;  %v6377_v28 = vpop.permute.xlu0 %6376 }
 0xb8e   : > { %v6636_v21 = vpop.f32.mrb[52].mxu1  ;;  %7251 = vmatprep.subr.bf16.mxu1 %v6732_v10  ;;  %v6519_v20 = vpop.f32.mrb[54].mxu0  ;;  %v6518_v61 = vadd.f32 %v6517_v5, %v6347_v17 }
 0xb8f   : > { %v6638_v53 = vpop.f32.mrb[53].mxu1  ;;  %7252 = vmatpush1.bf16.msra.mxu1 %v6731_v9  ;;  %v6520_v27 = vadd.f32 %v6519_v20, %v6352_v58  ;;  %v6521_v50 = vpop.f32.mrb[55].mxu0  ;;  %v6637_v18 = vadd.f32 %v6636_v21, %v6347_v17 }
 0xb90   : > { %v6640_v24 = vpop.f32.mrb[54].mxu1  ;;  %v6522_v22 = vadd.f32 %v6521_v50, %v6352_v58  ;;  %v6639_v63 = vadd.f32 %v6638_v53, %v6347_v17  ;;  %v6382_v5 = vpop.permute.xlu1 %6381 }
 0xb91   : > { %v6641_v51 = vadd.f32 %v6640_v24, %v6352_v58  ;;  %v6642_v34 = vpop.f32.mrb[55].mxu1  ;;  %v6733_v40 = vpack.c.bf16 %v6520_v27, %v6516_v46 }
 0xb92   : > { %v6643_v47 = vadd.f32 %v6642_v34, %v6352_v58  ;;  %v6734_v12 = vpack.c.bf16 %v6522_v22, %v6518_v61 }
 0xb93   : > { %v6735_v36 = vpack.c.bf16 %v6641_v51, %v6637_v18 }
 0xb94   : > { %v6736_v1 = vpack.c.bf16 %v6643_v47, %v6639_v63  ;;  %v6525_v44 = vpop.f32.mrb[56].mxu0  ;;  %7140 = vmatprep.subr.bf16.mxu0 %v6734_v12 }
 0xb95   : > { %v6527_v48 = vpop.f32.mrb[57].mxu0  ;;  %7141 = vmatpush1.bf16.msra.mxu0 %v6733_v40  ;;  %v6526_v8 = vadd.f32 %v6525_v44, %v6357_v45  ;;  %v6387_v44 = vpop.permute.xlu0 %6386 }
 0xb96   : > { %v6646_v13 = vpop.f32.mrb[56].mxu1  ;;  %7253 = vmatprep.subr.bf16.mxu1 %v6736_v1  ;;  %v6529_v25 = vpop.f32.mrb[58].mxu0  ;;  %v6528_v56 = vadd.f32 %v6527_v48, %v6357_v45 }
 0xb97   : > { %v6648_v42 = vpop.f32.mrb[57].mxu1  ;;  %7254 = vmatpush1.bf16.msra.mxu1 %v6735_v36  ;;  %v6530_v6 = vadd.f32 %v6529_v25, %v6362_v55  ;;  %v6531_v38 = vpop.f32.mrb[59].mxu0  ;;  %v6647_v37 = vadd.f32 %v6646_v13, %v6357_v45 }
 0xb98   : > { %v6650_v49 = vpop.f32.mrb[58].mxu1  ;;  %v6532_v62 = vadd.f32 %v6531_v38, %v6362_v55  ;;  %v6649_v41 = vadd.f32 %v6648_v42, %v6357_v45  ;;  %v6392_v48 = vpop.permute.xlu1 %6391 }
 0xb99   : > { %v6651_v59 = vadd.f32 %v6650_v49, %v6362_v55  ;;  %v6652_v52 = vpop.f32.mrb[59].mxu1  ;;  %v6737_v39 = vpack.c.bf16 %v6530_v6, %v6526_v8 }
 0xb9a   : > { %v6653_v7 = vadd.f32 %v6652_v52, %v6362_v55  ;;  %v6738_v35 = vpack.c.bf16 %v6532_v62, %v6528_v56 }
 0xb9b   : > { %v6739_v32 = vpack.c.bf16 %v6651_v59, %v6647_v37 }
 0xb9c   : > { %v6740_v0 = vpack.c.bf16 %v6653_v7, %v6649_v41  ;;  %v6535_v16 = vpop.f32.mrb[60].mxu0  ;;  %7142 = vmatprep.subr.bf16.mxu0 %v6738_v35 }
 0xb9d   : > { %v6537_v4 = vpop.f32.mrb[61].mxu0  ;;  %7143 = vmatpush1.bf16.msra.mxu0 %v6737_v39  ;;  %v6536_v29 = vadd.f32 %v6535_v16, %v6367_v57  ;;  %v6397_v16 = vpop.permute.xlu0 %6396 }
 0xb9e   : > { %v6656_v19 = vpop.f32.mrb[60].mxu1  ;;  %7255 = vmatprep.subr.bf16.mxu1 %v6740_v0  ;;  %v6539_v11 = vpop.f32.mrb[62].mxu0  ;;  %v6538_v60 = vadd.f32 %v6537_v4, %v6367_v57 }
 0xb9f   : > { %v6658_v2 = vpop.f32.mrb[61].mxu1  ;;  %7256 = vmatpush1.bf16.msra.mxu1 %v6739_v32  ;;  %v6540_v15 = vadd.f32 %v6539_v11, %v6372_v23  ;;  %v6541_v26 = vpop.f32.mrb[63].mxu0  ;;  %v6657_v33 = vadd.f32 %v6656_v19, %v6367_v57 }
 0xba0   : > { %v6660_v31 = vpop.f32.mrb[62].mxu1  ;;  %v6542_v54 = vadd.f32 %v6541_v26, %v6372_v23  ;;  %v6659_v9 = vadd.f32 %v6658_v2, %v6367_v57  ;;  %v6402_v4 = vpop.permute.xlu1 %6401 }
 0xba1   : > { %v6661_v30 = vadd.f32 %v6660_v31, %v6372_v23  ;;  %v6662_v43 = vpop.f32.mrb[63].mxu1  ;;  %v6741_v3 = vpack.c.bf16 %v6540_v15, %v6536_v29 }
 0xba2   : > { %v6663_v17 = vadd.f32 %v6662_v43, %v6372_v23  ;;  %v6742_v58 = vpack.c.bf16 %v6542_v54, %v6538_v60 }
 0xba3   : > { %v6743_v10 = vpack.c.bf16 %v6661_v30, %v6657_v33 }
 0xba4   : > { %v6744_v21 = vpack.c.bf16 %v6663_v17, %v6659_v9  ;;  %v6545_v53 = vpop.f32.mrb[64].mxu0  ;;  %7144 = vmatprep.subr.bf16.mxu0 %v6742_v58 }
 0xba5   : > { %v6547_v46 = vpop.f32.mrb[65].mxu0  ;;  %7145 = vmatpush1.bf16.msra.mxu0 %v6741_v3  ;;  %v6546_v50 = vadd.f32 %v6545_v53, %v6377_v28  ;;  %v6407_v53 = vpop.permute.xlu0 %6406 }
 0xba6   : > { %v6666_v20 = vpop.f32.mrb[64].mxu1  ;;  %7257 = vmatprep.subr.bf16.mxu1 %v6744_v21  ;;  %v6549_v24 = vpop.f32.mrb[66].mxu0  ;;  %v6548_v34 = vadd.f32 %v6547_v46, %v6377_v28 }
 0xba7   : > { %v6668_v27 = vpop.f32.mrb[65].mxu1  ;;  %7258 = vmatpush1.bf16.msra.mxu1 %v6743_v10  ;;  %v6550_v18 = vadd.f32 %v6549_v24, %v6382_v5  ;;  %v6551_v51 = vpop.f32.mrb[67].mxu0  ;;  %v6667_v22 = vadd.f32 %v6666_v20, %v6377_v28 }
 0xba8   : > { %v6670_v61 = vpop.f32.mrb[66].mxu1  ;;  %v6552_v40 = vadd.f32 %v6551_v51, %v6382_v5  ;;  %v6669_v36 = vadd.f32 %v6668_v27, %v6377_v28  ;;  %v6412_v46 = vpop.permute.xlu1 %6411 }
 0xba9   : > { %v6671_v63 = vadd.f32 %v6670_v61, %v6382_v5  ;;  %v6672_v47 = vpop.f32.mrb[67].mxu1  ;;  %v6745_v12 = vpack.c.bf16 %v6550_v18, %v6546_v50 }
 0xbaa   : > { %v6673_v45 = vadd.f32 %v6672_v47, %v6382_v5  ;;  %v6746_v55 = vpack.c.bf16 %v6552_v40, %v6548_v34 }
 0xbab   : > { %v6747_v1 = vpack.c.bf16 %v6671_v63, %v6667_v22 }
 0xbac   : > { %v6748_v13 = vpack.c.bf16 %v6673_v45, %v6669_v36  ;;  %v6555_v42 = vpop.f32.mrb[68].mxu0  ;;  %7146 = vmatprep.subr.bf16.mxu0 %v6746_v55 }
 0xbad   : > { %v6557_v8 = vpop.f32.mrb[69].mxu0  ;;  %7147 = vmatpush1.bf16.msra.mxu0 %v6745_v12  ;;  %v6556_v38 = vadd.f32 %v6555_v42, %v6387_v44 }
 0xbae   : > { %v6676_v25 = vpop.f32.mrb[68].mxu1  ;;  %7259 = vmatprep.subr.bf16.mxu1 %v6748_v13  ;;  %v6559_v49 = vpop.f32.mrb[70].mxu0  ;;  %v6558_v52 = vadd.f32 %v6557_v8, %v6387_v44  ;;  %v8637_v8 = vld [vmem:[%s11106_s9] sm:$0xff]  }
 0xbaf   : > { %v6678_v6 = vpop.f32.mrb[69].mxu1  ;;  %7260 = vmatpush1.bf16.msra.mxu1 %v6747_v1  ;;  %v6560_v37 = vadd.f32 %v6559_v49, %v6392_v48  ;;  %v6561_v59 = vpop.f32.mrb[71].mxu0  ;;  %v6677_v62 = vadd.f32 %v6676_v25, %v6387_v44 }
 0xbb0   : > { %v6680_v56 = vpop.f32.mrb[70].mxu1  ;;  %v6562_v39 = vadd.f32 %v6561_v59, %v6392_v48  ;;  %v6679_v32 = vadd.f32 %v6678_v6, %v6387_v44 }
 0xbb1   : > { %v6681_v41 = vadd.f32 %v6680_v56, %v6392_v48  ;;  %v6682_v7 = vpop.f32.mrb[71].mxu1  ;;  %v6749_v35 = vpack.c.bf16 %v6560_v37, %v6556_v38 }
 0xbb2   : > { %v6683_v57 = vadd.f32 %v6682_v7, %v6392_v48  ;;  %v6750_v23 = vpack.c.bf16 %v6562_v39, %v6558_v52  ;;  %v8638_v52 = vld [vmem:[%s11106_s9 + $0x8] sm:$0xff]   ;;  %v8640_v39 = vld [vmem:[%s11106_s9 + $0x18] sm:$0xff]   ;;  %v8641_v7 = vld [vmem:[%s11106_s9 + $0x20] sm:$0xff]  }
 0xbb3   : > { %v6751_v0 = vpack.c.bf16 %v6681_v41, %v6677_v62  ;;  %v8639_v41 = vld [vmem:[%s11106_s9 + $0x10] sm:$0xff]  }
 0xbb4   : > { %v6752_v19 = vpack.c.bf16 %v6683_v57, %v6679_v32  ;;  %v6565_v2 = vpop.f32.mrb[72].mxu0  ;;  %7148 = vmatprep.subr.bf16.mxu0 %v6750_v23  ;;  %v8642_v32 = vld [vmem:[%s11106_s9 + $0x28] sm:$0xff]   ;;  %v8644_v57 = vld [vmem:[%s11106_s9 + $0x38] sm:$0xff]   ;;  %v7388_v23 = vpop.permute.xlu1 %7387 }
 0xbb5   : > { %v6567_v29 = vpop.f32.mrb[73].mxu0  ;;  %7149 = vmatpush1.bf16.msra.mxu0 %v6749_v35  ;;  %v6566_v26 = vadd.f32 %v6565_v2, %v6397_v16  ;;  %v8643_v35 = vld [vmem:[%s11106_s9 + $0x30] sm:$0xff]  }
 0xbb6   : > { %v6686_v11 = vpop.f32.mrb[72].mxu1  ;;  %7261 = vmatprep.subr.bf16.mxu1 %v6752_v19  ;;  %v6569_v31 = vpop.f32.mrb[74].mxu0  ;;  %v6568_v43 = vadd.f32 %v6567_v29, %v6397_v16 }
 0xbb7   : > { %v6688_v15 = vpop.f32.mrb[73].mxu1  ;;  %7262 = vmatpush1.bf16.msra.mxu1 %v6751_v0  ;;  %v6570_v33 = vadd.f32 %v6569_v31, %v6402_v4  ;;  %v6571_v30 = vpop.f32.mrb[75].mxu0  ;;  %v6687_v54 = vadd.f32 %v6686_v11, %v6397_v16 }
 0xbb8   : > { %v6690_v60 = vpop.f32.mrb[74].mxu1  ;;  %v6572_v3 = vadd.f32 %v6571_v30, %v6402_v4  ;;  %v6689_v10 = vadd.f32 %v6688_v15, %v6397_v16  ;;  %v7383_v0 = vpop.permute.xlu0 %7382 }
 0xbb9   : > { %v6691_v9 = vadd.f32 %v6690_v60, %v6402_v4  ;;  %v6692_v17 = vpop.f32.mrb[75].mxu1  ;;  %v6753_v58 = vpack.c.bf16 %v6570_v33, %v6566_v26 }
 0xbba   : > { %v6693_v28 = vadd.f32 %v6692_v17, %v6402_v4  ;;  %v6754_v5 = vpack.c.bf16 %v6572_v3, %v6568_v43 }
 0xbbb   : > { %v6755_v21 = vpack.c.bf16 %v6691_v9, %v6687_v54 }
 0xbbc   : > { %v6756_v20 = vpack.c.bf16 %v6693_v28, %v6689_v10  ;;  %v6575_v27 = vpop.f32.mrb[76].mxu0  ;;  %7150 = vmatprep.subr.bf16.mxu0 %v6754_v5  ;;  %v7393_v5 = vpop.permute.xlu0 %7392 }
 0xbbd   : > { %v6577_v50 = vpop.f32.mrb[77].mxu0  ;;  %7151 = vmatpush1.bf16.msra.mxu0 %v6753_v58  ;;  %v6576_v51 = vadd.f32 %v6575_v27, %v6407_v53  ;;  %v7398_v27 = vpop.permute.xlu1 %7397 }
 0xbbe   : > { %v6696_v24 = vpop.f32.mrb[76].mxu1  ;;  %7263 = vmatprep.subr.bf16.mxu1 %v6756_v20  ;;  %v6579_v61 = vpop.f32.mrb[78].mxu0  ;;  %v6578_v47 = vadd.f32 %v6577_v50, %v6407_v53 }
 0xbbf   : > { %v6698_v18 = vpop.f32.mrb[77].mxu1  ;;  %7264 = vmatpush1.bf16.msra.mxu1 %v6755_v21  ;;  %v6580_v22 = vadd.f32 %v6579_v61, %v6412_v46  ;;  %v6581_v63 = vpop.f32.mrb[79].mxu0  ;;  %v6697_v40 = vadd.f32 %v6696_v24, %v6407_v53 }
 0xbc0   : > { %v6700_v34 = vpop.f32.mrb[78].mxu1  ;;  %v6582_v12 = vadd.f32 %v6581_v63, %v6412_v46  ;;  %v6699_v1 = vadd.f32 %v6698_v18, %v6407_v53 }
 0xbc1   : > { %v6701_v36 = vadd.f32 %v6700_v34, %v6412_v46  ;;  %v6702_v45 = vpop.f32.mrb[79].mxu1  ;;  %v6757_v55 = vpack.c.bf16 %v6580_v22, %v6576_v51 }
 0xbc2   : > { %v6703_v44 = vadd.f32 %v6702_v45, %v6412_v46  ;;  %v6758_v48 = vpack.c.bf16 %v6582_v12, %v6578_v47 }
 0xbc3   : > { %v6759_v13 = vpack.c.bf16 %v6701_v36, %v6697_v40 }
 0xbc4   : > { %v6760_v42 = vpack.c.bf16 %v6703_v44, %v6699_v1  ;;  %v10978_v25 = vpop.f32.mrb[80].mxu0  ;;  %7152 = vmatprep.subr.bf16.mxu0 %v6758_v48 }
 0xbc5   : > { %v10985_v49 = vpop.f32.mrb[81].mxu0  ;;  %7153 = vmatpush1.bf16.msra.mxu0 %v6757_v55 }
 0xbc6   : > { %v10983_v6 = vpop.f32.mrb[80].mxu1  ;;  %7265 = vmatprep.subr.bf16.mxu1 %v6760_v42  ;;  %v6589_v37 = vpop.f32.mrb[82].mxu0 }
 0xbc7   : > { %v10987_v38 = vpop.f32.mrb[81].mxu1  ;;  %7266 = vmatpush1.bf16.msra.mxu1 %v6759_v13  ;;  %v6590_v59 = vpop.f32.mrb[83].mxu0 }
 0xbc8   : > { %v6710_v56 = vpop.f32.mrb[82].mxu1  ;;  %7171 = vmatmul.mubr.bf16.vlgmr.msra.gmra.mrb[84].mxu0 %v8637_v8 }
 0xbc9   : > { %v6711_v62 = vpop.f32.mrb[83].mxu1  ;;  %7180 = vmatprep.mubr.bf16.mxu0 %v11260_v14 }
 0xbca   : > { %7284 = vmatmul.mubr.bf16.vlgmr.msra.gmra.mrb[84].mxu1 %v8637_v8 }
 0xbcb   : > { %7293 = vmatprep.mubr.bf16.mxu1 %v11260_v14 }
 0xbd0   : > { %7181 = vmatmul.mubr.bf16.gmra.mrb[88].mxu0 %v8638_v52 }
 0xbd1   : > { %7190 = vmatprep.mubr.bf16.mxu0 %v11260_v14 }
 0xbd2   : > { %7294 = vmatmul.mubr.bf16.gmra.mrb[88].mxu1 %v8638_v52 }
 0xbd3   : > { %7303 = vmatprep.mubr.bf16.mxu1 %v11260_v14 }
 0xbd8   : > { %7191 = vmatmul.mubr.bf16.gmra.mrb[92].mxu0 %v8639_v41 }
 0xbd9   : > { %7200 = vmatprep.mubr.bf16.mxu0 %v11260_v14 }
 0xbda   : > { %7304 = vmatmul.mubr.bf16.gmra.mrb[92].mxu1 %v8639_v41  ;;  %v7403_v41 = vpop.permute.xlu0 %7402 }
 0xbdb   : > { %7313 = vmatprep.mubr.bf16.mxu1 %v11260_v14 }
 0xbe0   : > { %7201 = vmatmul.mubr.bf16.gmra.mrb[96].mxu0 %v8640_v39 }
 0xbe1   : > { %7210 = vmatprep.mubr.bf16.mxu0 %v11260_v14 }
 0xbe2   : > { %7314 = vmatmul.mubr.bf16.gmra.mrb[96].mxu1 %v8640_v39 }
 0xbe3   : > { %7323 = vmatprep.mubr.bf16.mxu1 %v11260_v14 }
 0xbe8   : > { %7211 = vmatmul.mubr.bf16.gmra.mrb[100].mxu0 %v8641_v7 }
 0xbe9   : > { %7220 = vmatprep.mubr.bf16.mxu0 %v11260_v14 }
 0xbea   : > { %7324 = vmatmul.mubr.bf16.gmra.mrb[100].mxu1 %v8641_v7 }
 0xbeb   : > { %7333 = vmatprep.mubr.bf16.mxu1 %v11260_v14 }
 0xbf0   : > { %7221 = vmatmul.mubr.bf16.gmra.mrb[104].mxu0 %v8642_v32 }
 0xbf1   : > { %7230 = vmatprep.mubr.bf16.mxu0 %v11260_v14 }
 0xbf2   : > { %7334 = vmatmul.mubr.bf16.gmra.mrb[104].mxu1 %v8642_v32 }
 0xbf3   : > { %7343 = vmatprep.mubr.bf16.mxu1 %v11260_v14 }
 0xbf8   : > { %7231 = vmatmul.mubr.bf16.gmra.mrb[108].mxu0 %v8643_v35 }
 0xbf9   : > { %7240 = vmatprep.mubr.bf16.mxu0 %v11260_v14 }
 0xbfa   : > { %7344 = vmatmul.mubr.bf16.gmra.mrb[108].mxu1 %v8643_v35  ;;  %v7408_v35 = vpop.permute.xlu1 %7407 }
 0xbfb   : > { %7353 = vmatprep.mubr.bf16.mxu1 %v11260_v14 }
 0xc00   : > { %7241 = vmatmul.mubr.bf16.gmra.mrb[112].mxu0 %v8644_v57 }
 0xc01   : > { %7659 = vmatprep.mubr.bf16.mxu0 %v11260_v14 }
 0xc02   : > { %7354 = vmatmul.mubr.bf16.gmra.mrb[112].mxu1 %v8644_v57 }
 0xc03   : > { %7700 = vmatprep.mubr.bf16.mxu1 %v11260_v14 }
 0xc9b   : > { %v7172_v16 = vpop.f32.mrb[84].mxu0 }
 0xc9c   : > { %v7460_v19 = vadd.f32 %v7383_v0, %v7172_v16  ;;  %v7174_v2 = vpop.f32.mrb[85].mxu0 }
 0xc9d   : > { %v7285_v4 = vpop.f32.mrb[84].mxu1  ;;  %v7461_v29 = vadd.f32 %v7383_v0, %v7174_v2  ;;  %v7176_v31 = vpop.f32.mrb[86].mxu0 }
 0xc9e   : > { %v7462_v11 = vadd.f32 %v7383_v0, %v7285_v4  ;;  %v7287_v15 = vpop.f32.mrb[85].mxu1  ;;  %v7464_v33 = vadd.f32 %v7388_v23, %v7176_v31  ;;  %v7178_v30 = vpop.f32.mrb[87].mxu0  ;;  %v7524_v3 = vmax.f32 %v7460_v19, 0.0 }
 0xc9f   : > { %v7463_v26 = vadd.f32 %v7383_v0, %v7287_v15  ;;  %v7289_v60 = vpop.f32.mrb[86].mxu1  ;;  %v7465_v43 = vadd.f32 %v7388_v23, %v7178_v30  ;;  %v7525_v58 = vmax.f32 %v7461_v29, 0.0 }
 0xca0   : > { %v7466_v54 = vadd.f32 %v7388_v23, %v7289_v60  ;;  %v7291_v9 = vpop.f32.mrb[87].mxu1  ;;  %v7528_v17 = vmax.f32 %v7464_v33, 0.0  ;;  %v7526_v10 = vmax.f32 %v7462_v11, 0.0 }
 0xca1   : > { %v7467_v14 = vadd.f32 %v7388_v23, %v7291_v9  ;;  %v7529_v21 = vmax.f32 %v7465_v43, 0.0  ;;  %v7527_v53 = vmax.f32 %v7463_v26, 0.0 }
 0xca2   : > { %v7530_v28 = vmax.f32 %v7466_v54, 0.0  ;;  %v7589_v20 = vpack.c.bf16 %v7528_v17, %v7524_v3 }
 0xca3   : > { %v7531_v46 = vmax.f32 %v7467_v14, 0.0  ;;  %v7590_v50 = vpack.c.bf16 %v7529_v21, %v7525_v58  ;;  %v7182_v18 = vpop.f32.mrb[88].mxu0 }
 0xca4   : > { %v7591_v24 = vpack.c.bf16 %v7530_v28, %v7526_v10  ;;  %v7468_v51 = vadd.f32 %v7393_v5, %v7182_v18  ;;  %v7184_v34 = vpop.f32.mrb[89].mxu0 }
 0xca5   : > { %v7592_v61 = vpack.c.bf16 %v7531_v46, %v7527_v53  ;;  %v7295_v22 = vpop.f32.mrb[88].mxu1  ;;  %v7469_v40 = vadd.f32 %v7393_v5, %v7184_v34  ;;  %v7186_v36 = vpop.f32.mrb[90].mxu0  ;;  %7627 = vmatprep.subr.bf16.mxu0 %v7590_v50 }
 0xca6   : > { %v7470_v63 = vadd.f32 %v7393_v5, %v7295_v22  ;;  %v7297_v47 = vpop.f32.mrb[89].mxu1  ;;  %v7472_v45 = vadd.f32 %v7398_v27, %v7186_v36  ;;  %v7188_v55 = vpop.f32.mrb[91].mxu0  ;;  %7628 = vmatpush1.bf16.msra.mxu0 %v7589_v20  ;;  %v7532_v42 = vmax.f32 %v7468_v51, 0.0 }
 0xca7   : > { %v7471_v12 = vadd.f32 %v7393_v5, %v7297_v47  ;;  %v7299_v1 = vpop.f32.mrb[90].mxu1  ;;  %7668 = vmatprep.subr.bf16.mxu1 %v7592_v61  ;;  %v7473_v13 = vadd.f32 %v7398_v27, %v7188_v55  ;;  %v7533_v59 = vmax.f32 %v7469_v40, 0.0  ;;  %v7413_v5 = vpop.permute.xlu0 %7412 }
 0xca8   : > { %v7474_v44 = vadd.f32 %v7398_v27, %v7299_v1  ;;  %v7301_v48 = vpop.f32.mrb[91].mxu1  ;;  %7669 = vmatpush1.bf16.msra.mxu1 %v7591_v24  ;;  %v7536_v8 = vmax.f32 %v7472_v45, 0.0  ;;  %v7534_v56 = vmax.f32 %v7470_v63, 0.0 }
 0xca9   : > { %v7475_v37 = vadd.f32 %v7398_v27, %v7301_v48  ;;  %v7537_v52 = vmax.f32 %v7473_v13, 0.0  ;;  %v7535_v39 = vmax.f32 %v7471_v12, 0.0  ;;  %v7418_v27 = vpop.permute.xlu1 %7417 }
 0xcaa   : > { %v7538_v62 = vmax.f32 %v7474_v44, 0.0  ;;  %v7593_v7 = vpack.c.bf16 %v7536_v8, %v7532_v42 }
 0xcab   : > { %v7539_v32 = vmax.f32 %v7475_v37, 0.0  ;;  %v7594_v0 = vpack.c.bf16 %v7537_v52, %v7533_v59  ;;  %v7192_v23 = vpop.f32.mrb[92].mxu0 }
 0xcac   : > { %v7595_v57 = vpack.c.bf16 %v7538_v62, %v7534_v56  ;;  %v7476_v19 = vadd.f32 %v7403_v41, %v7192_v23  ;;  %v7194_v2 = vpop.f32.mrb[93].mxu0 }
 0xcad   : > { %v7596_v16 = vpack.c.bf16 %v7539_v32, %v7535_v39  ;;  %v7305_v4 = vpop.f32.mrb[92].mxu1  ;;  %v7477_v29 = vadd.f32 %v7403_v41, %v7194_v2  ;;  %v7196_v31 = vpop.f32.mrb[94].mxu0  ;;  %7629 = vmatprep.subr.bf16.mxu0 %v7594_v0 }
 0xcae   : > { %v7478_v11 = vadd.f32 %v7403_v41, %v7305_v4  ;;  %v7307_v15 = vpop.f32.mrb[93].mxu1  ;;  %v7480_v33 = vadd.f32 %v7408_v35, %v7196_v31  ;;  %v7198_v30 = vpop.f32.mrb[95].mxu0  ;;  %7630 = vmatpush1.bf16.msra.mxu0 %v7593_v7  ;;  %v7540_v3 = vmax.f32 %v7476_v19, 0.0 }
 0xcaf   : > { %v7479_v26 = vadd.f32 %v7403_v41, %v7307_v15  ;;  %v7309_v60 = vpop.f32.mrb[94].mxu1  ;;  %7670 = vmatprep.subr.bf16.mxu1 %v7596_v16  ;;  %v7481_v43 = vadd.f32 %v7408_v35, %v7198_v30  ;;  %v7541_v58 = vmax.f32 %v7477_v29, 0.0  ;;  %v7423_v41 = vpop.permute.xlu0 %7422 }
 0xcb0   : > { %v7482_v54 = vadd.f32 %v7408_v35, %v7309_v60  ;;  %v7311_v9 = vpop.f32.mrb[95].mxu1  ;;  %7671 = vmatpush1.bf16.msra.mxu1 %v7595_v57  ;;  %v7544_v17 = vmax.f32 %v7480_v33, 0.0  ;;  %v7542_v10 = vmax.f32 %v7478_v11, 0.0 }
 0xcb1   : > { %v7483_v14 = vadd.f32 %v7408_v35, %v7311_v9  ;;  %v7545_v21 = vmax.f32 %v7481_v43, 0.0  ;;  %v7543_v53 = vmax.f32 %v7479_v26, 0.0  ;;  %v7428_v35 = vpop.permute.xlu1 %7427 }
 0xcb2   : > { %v7546_v28 = vmax.f32 %v7482_v54, 0.0  ;;  %v7597_v20 = vpack.c.bf16 %v7544_v17, %v7540_v3 }
 0xcb3   : > { %v7547_v46 = vmax.f32 %v7483_v14, 0.0  ;;  %v7598_v50 = vpack.c.bf16 %v7545_v21, %v7541_v58  ;;  %v7202_v18 = vpop.f32.mrb[96].mxu0 }
 0xcb4   : > { %v7599_v24 = vpack.c.bf16 %v7546_v28, %v7542_v10  ;;  %v7484_v51 = vadd.f32 %v7413_v5, %v7202_v18  ;;  %v7204_v34 = vpop.f32.mrb[97].mxu0 }
 0xcb5   : > { %v7600_v61 = vpack.c.bf16 %v7547_v46, %v7543_v53  ;;  %v7315_v22 = vpop.f32.mrb[96].mxu1  ;;  %v7485_v40 = vadd.f32 %v7413_v5, %v7204_v34  ;;  %v7206_v36 = vpop.f32.mrb[98].mxu0  ;;  %7631 = vmatprep.subr.bf16.mxu0 %v7598_v50 }
 0xcb6   : > { %v7486_v63 = vadd.f32 %v7413_v5, %v7315_v22  ;;  %v7317_v47 = vpop.f32.mrb[97].mxu1  ;;  %v7488_v45 = vadd.f32 %v7418_v27, %v7206_v36  ;;  %v7208_v55 = vpop.f32.mrb[99].mxu0  ;;  %7632 = vmatpush1.bf16.msra.mxu0 %v7597_v20  ;;  %v7548_v42 = vmax.f32 %v7484_v51, 0.0 }
 0xcb7   : > { %v7487_v12 = vadd.f32 %v7413_v5, %v7317_v47  ;;  %v7319_v1 = vpop.f32.mrb[98].mxu1  ;;  %7672 = vmatprep.subr.bf16.mxu1 %v7600_v61  ;;  %v7489_v13 = vadd.f32 %v7418_v27, %v7208_v55  ;;  %v7549_v59 = vmax.f32 %v7485_v40, 0.0  ;;  %v7433_v5 = vpop.permute.xlu0 %7432 }
 0xcb8   : > { %v7490_v44 = vadd.f32 %v7418_v27, %v7319_v1  ;;  %v7321_v48 = vpop.f32.mrb[99].mxu1  ;;  %7673 = vmatpush1.bf16.msra.mxu1 %v7599_v24  ;;  %v7552_v8 = vmax.f32 %v7488_v45, 0.0  ;;  %v7550_v56 = vmax.f32 %v7486_v63, 0.0 }
 0xcb9   : > { %v7491_v37 = vadd.f32 %v7418_v27, %v7321_v48  ;;  %v7553_v52 = vmax.f32 %v7489_v13, 0.0  ;;  %v7551_v39 = vmax.f32 %v7487_v12, 0.0  ;;  %v7438_v27 = vpop.permute.xlu1 %7437 }
 0xcba   : > { %v7554_v62 = vmax.f32 %v7490_v44, 0.0  ;;  %v7601_v7 = vpack.c.bf16 %v7552_v8, %v7548_v42 }
 0xcbb   : > { %v7555_v32 = vmax.f32 %v7491_v37, 0.0  ;;  %v7602_v0 = vpack.c.bf16 %v7553_v52, %v7549_v59  ;;  %v7212_v23 = vpop.f32.mrb[100].mxu0 }
 0xcbc   : > { %v7603_v57 = vpack.c.bf16 %v7554_v62, %v7550_v56  ;;  %v7492_v19 = vadd.f32 %v7423_v41, %v7212_v23  ;;  %v7214_v2 = vpop.f32.mrb[101].mxu0 }
 0xcbd   : > { %v7604_v16 = vpack.c.bf16 %v7555_v32, %v7551_v39  ;;  %v7325_v4 = vpop.f32.mrb[100].mxu1  ;;  %v7493_v29 = vadd.f32 %v7423_v41, %v7214_v2  ;;  %v7216_v31 = vpop.f32.mrb[102].mxu0  ;;  %7633 = vmatprep.subr.bf16.mxu0 %v7602_v0 }
 0xcbe   : > { %v7494_v11 = vadd.f32 %v7423_v41, %v7325_v4  ;;  %v7327_v15 = vpop.f32.mrb[101].mxu1  ;;  %v7496_v33 = vadd.f32 %v7428_v35, %v7216_v31  ;;  %v7218_v30 = vpop.f32.mrb[103].mxu0  ;;  %7634 = vmatpush1.bf16.msra.mxu0 %v7601_v7  ;;  %v7556_v3 = vmax.f32 %v7492_v19, 0.0 }
 0xcbf   : > { %v7495_v26 = vadd.f32 %v7423_v41, %v7327_v15  ;;  %v7329_v60 = vpop.f32.mrb[102].mxu1  ;;  %7674 = vmatprep.subr.bf16.mxu1 %v7604_v16  ;;  %v7497_v43 = vadd.f32 %v7428_v35, %v7218_v30  ;;  %v7557_v58 = vmax.f32 %v7493_v29, 0.0  ;;  %v7443_v41 = vpop.permute.xlu0 %7442 }
 0xcc0   : > { %v7498_v54 = vadd.f32 %v7428_v35, %v7329_v60  ;;  %v7331_v9 = vpop.f32.mrb[103].mxu1  ;;  %7675 = vmatpush1.bf16.msra.mxu1 %v7603_v57  ;;  %v7560_v17 = vmax.f32 %v7496_v33, 0.0  ;;  %v7558_v10 = vmax.f32 %v7494_v11, 0.0 }
 0xcc1   : > { %v7499_v14 = vadd.f32 %v7428_v35, %v7331_v9  ;;  %v7561_v21 = vmax.f32 %v7497_v43, 0.0  ;;  %v7559_v53 = vmax.f32 %v7495_v26, 0.0  ;;  %v7448_v35 = vpop.permute.xlu1 %7447 }
 0xcc2   : > { %v7562_v28 = vmax.f32 %v7498_v54, 0.0  ;;  %v7605_v20 = vpack.c.bf16 %v7560_v17, %v7556_v3 }
 0xcc3   : > { %v7563_v46 = vmax.f32 %v7499_v14, 0.0  ;;  %v7606_v50 = vpack.c.bf16 %v7561_v21, %v7557_v58  ;;  %v7222_v18 = vpop.f32.mrb[104].mxu0 }
 0xcc4   : > { %v7607_v24 = vpack.c.bf16 %v7562_v28, %v7558_v10  ;;  %v7500_v51 = vadd.f32 %v7433_v5, %v7222_v18  ;;  %v7224_v34 = vpop.f32.mrb[105].mxu0 }
 0xcc5   : > { %v7608_v61 = vpack.c.bf16 %v7563_v46, %v7559_v53  ;;  %v7335_v22 = vpop.f32.mrb[104].mxu1  ;;  %v7501_v40 = vadd.f32 %v7433_v5, %v7224_v34  ;;  %v7226_v36 = vpop.f32.mrb[106].mxu0  ;;  %7635 = vmatprep.subr.bf16.mxu0 %v7606_v50 }
 0xcc6   : > { %v7502_v63 = vadd.f32 %v7433_v5, %v7335_v22  ;;  %v7337_v47 = vpop.f32.mrb[105].mxu1  ;;  %v7504_v45 = vadd.f32 %v7438_v27, %v7226_v36  ;;  %v7228_v55 = vpop.f32.mrb[107].mxu0  ;;  %7636 = vmatpush1.bf16.msra.mxu0 %v7605_v20  ;;  %v7564_v42 = vmax.f32 %v7500_v51, 0.0 }
 0xcc7   : > { %v7503_v12 = vadd.f32 %v7433_v5, %v7337_v47  ;;  %v7339_v1 = vpop.f32.mrb[106].mxu1  ;;  %7676 = vmatprep.subr.bf16.mxu1 %v7608_v61  ;;  %v7505_v13 = vadd.f32 %v7438_v27, %v7228_v55  ;;  %v7565_v59 = vmax.f32 %v7501_v40, 0.0  ;;  %v7453_v5 = vpop.permute.xlu0 %7452 }
 0xcc8   : > { %v7506_v44 = vadd.f32 %v7438_v27, %v7339_v1  ;;  %v7341_v48 = vpop.f32.mrb[107].mxu1  ;;  %7677 = vmatpush1.bf16.msra.mxu1 %v7607_v24  ;;  %v7568_v8 = vmax.f32 %v7504_v45, 0.0  ;;  %v7566_v56 = vmax.f32 %v7502_v63, 0.0 }
 0xcc9   : > { %v7507_v37 = vadd.f32 %v7438_v27, %v7341_v48  ;;  %v7569_v52 = vmax.f32 %v7505_v13, 0.0  ;;  %v7567_v39 = vmax.f32 %v7503_v12, 0.0  ;;  %v7458_v27 = vpop.permute.xlu1 %7457 }
 0xcca   : > { %v7570_v62 = vmax.f32 %v7506_v44, 0.0  ;;  %v7609_v7 = vpack.c.bf16 %v7568_v8, %v7564_v42 }
 0xccb   : > { %v7571_v32 = vmax.f32 %v7507_v37, 0.0  ;;  %v7610_v0 = vpack.c.bf16 %v7569_v52, %v7565_v59  ;;  %v7232_v23 = vpop.f32.mrb[108].mxu0 }
 0xccc   : > { %v7611_v57 = vpack.c.bf16 %v7570_v62, %v7566_v56  ;;  %v7508_v19 = vadd.f32 %v7443_v41, %v7232_v23  ;;  %v7234_v2 = vpop.f32.mrb[109].mxu0  ;;  %v6417_v23 = vpop.permute.xlu0 %6416 }
 0xccd   : > { %v7612_v16 = vpack.c.bf16 %v7571_v32, %v7567_v39  ;;  %v7345_v4 = vpop.f32.mrb[108].mxu1  ;;  %v7509_v29 = vadd.f32 %v7443_v41, %v7234_v2  ;;  %v7236_v31 = vpop.f32.mrb[110].mxu0  ;;  %7637 = vmatprep.subr.bf16.mxu0 %v7610_v0  ;;  %v7588_v0 = vld [vmem:[%s11306_s12] sm:$0x3]  ;;  %v6709_v2 = vadd.f32 %v10987_v38, %v6417_v23  ;;  %s11043_s12 = scalar_lea.hbm %s11308_s25, %s8265_s17 }
 0xcce   : > { %v7510_v11 = vadd.f32 %v7443_v41, %v7345_v4  ;;  %v7347_v15 = vpop.f32.mrb[109].mxu1  ;;  %v7512_v33 = vadd.f32 %v7448_v35, %v7236_v31  ;;  %v7238_v30 = vpop.f32.mrb[111].mxu0  ;;  %7638 = vmatpush1.bf16.msra.mxu0 %v7609_v7  ;;  %v7572_v3 = vmax.f32 %v7508_v19, 0.0  ;;  %v6707_v19 = vadd.f32 %v10983_v6, %v6417_v23 }
 0xccf   : > { %v7511_v26 = vadd.f32 %v7443_v41, %v7347_v15  ;;  %v7349_v60 = vpop.f32.mrb[110].mxu1  ;;  %7678 = vmatprep.subr.bf16.mxu1 %v7612_v16  ;;  %v7513_v43 = vadd.f32 %v7448_v35, %v7238_v30  ;;  %v7573_v58 = vmax.f32 %v7509_v29, 0.0  ;;  %v6586_v16 = vadd.f32 %v10978_v25, %v6417_v23 }
 0xcd0   : > { %v7514_v54 = vadd.f32 %v7448_v35, %v7349_v60  ;;  %v7351_v9 = vpop.f32.mrb[111].mxu1  ;;  %7679 = vmatpush1.bf16.msra.mxu1 %v7611_v57  ;;  %v7576_v17 = vmax.f32 %v7512_v33, 0.0  ;;  %v7574_v10 = vmax.f32 %v7510_v11, 0.0  ;;  %v6588_v4 = vadd.f32 %v10985_v49, %v6417_v23  ;;  %v7625_v11 = vpop.permute.xlu1 %7624 }
 0xcd1   : > { %v7515_v14 = vadd.f32 %v7448_v35, %v7351_v9  ;;  %v7577_v21 = vmax.f32 %v7513_v43, 0.0  ;;  %v7575_v53 = vmax.f32 %v7511_v26, 0.0  ;;  %v7713_v15 = vrot.slane %v6586_v16, 5 }
 0xcd2   : > { %v7578_v28 = vmax.f32 %v7514_v54, 0.0  ;;  %v7613_v20 = vpack.c.bf16 %v7576_v17, %v7572_v3  ;;  %v7715_v60 = vrot.slane %v6707_v19, 5  ;;  %v7714_v30 = vrot.slane %v6588_v4, 5 }
 0xcd3   : > { %v7579_v46 = vmax.f32 %v7515_v14, 0.0  ;;  %v7614_v50 = vpack.c.bf16 %v7577_v21, %v7573_v58  ;;  %v7242_v18 = vpop.f32.mrb[112].mxu0  ;;  %v7716_v3 = vrot.slane %v6709_v2, 5 }
 0xcd4   : > { %v7615_v24 = vpack.c.bf16 %v7578_v28, %v7574_v10  ;;  %v7516_v51 = vadd.f32 %v7453_v5, %v7242_v18  ;;  %v7244_v34 = vpop.f32.mrb[113].mxu0 }
 0xcd5   : > { %v7616_v61 = vpack.c.bf16 %v7579_v46, %v7575_v53  ;;  %v7355_v22 = vpop.f32.mrb[112].mxu1  ;;  %v7517_v40 = vadd.f32 %v7453_v5, %v7244_v34  ;;  %v7246_v36 = vpop.f32.mrb[114].mxu0  ;;  %7639 = vmatprep.subr.bf16.mxu0 %v7614_v50 }
 0xcd6   : > { %v7518_v63 = vadd.f32 %v7453_v5, %v7355_v22  ;;  %v7357_v47 = vpop.f32.mrb[113].mxu1  ;;  %v7520_v45 = vadd.f32 %v7458_v27, %v7246_v36  ;;  %v7248_v55 = vpop.f32.mrb[115].mxu0  ;;  %7640 = vmatpush1.bf16.msra.mxu0 %v7613_v20  ;;  %v7580_v42 = vmax.f32 %v7516_v51, 0.0 }
 0xcd7   : > { %v7519_v12 = vadd.f32 %v7453_v5, %v7357_v47  ;;  %v7359_v1 = vpop.f32.mrb[114].mxu1  ;;  %7680 = vmatprep.subr.bf16.mxu1 %v7616_v61  ;;  %v7521_v13 = vadd.f32 %v7458_v27, %v7248_v55  ;;  %v7581_v59 = vmax.f32 %v7517_v40, 0.0 }
 0xcd8   : > { %v7522_v44 = vadd.f32 %v7458_v27, %v7359_v1  ;;  %v7361_v48 = vpop.f32.mrb[115].mxu1  ;;  %7681 = vmatpush1.bf16.msra.mxu1 %v7615_v24  ;;  %v7584_v8 = vmax.f32 %v7520_v45, 0.0  ;;  %v7582_v56 = vmax.f32 %v7518_v63, 0.0 }
 0xcd9   : > { %v7523_v37 = vadd.f32 %v7458_v27, %v7361_v48  ;;  %v7585_v52 = vmax.f32 %v7521_v13, 0.0  ;;  %v7583_v41 = vmax.f32 %v7519_v12, 0.0 }
 0xcda   : > { %v7586_v62 = vmax.f32 %v7522_v44, 0.0  ;;  %v7617_v39 = vpack.c.bf16 %v7584_v8, %v7580_v42 }
 0xcdb   : > { %v7587_v7 = vmax.f32 %v7523_v37, 0.0  ;;  %v7618_v35 = vpack.c.bf16 %v7585_v52, %v7581_v59 }
 0xcdc   : > { %v7619_v32 = vpack.c.bf16 %v7586_v62, %v7582_v56 }
 0xcdd   : > { %v7620_v57 = vpack.c.bf16 %v7587_v7, %v7583_v41  ;;  %7641 = vmatprep.subr.bf16.mxu0 %v7618_v35 }
 0xcde   : > { %7642 = vmatpush1.bf16.msra.mxu0 %v7617_v39 }
 0xcdf   : > { %7682 = vmatprep.subr.bf16.mxu1 %v7620_v57 }
 0xce0   : > { %7683 = vmatpush1.bf16.msra.mxu1 %v7619_v32 }
 0xce1   : > { %7660 = vmatmul.mubr.bf16.vlgmr.msra.gmra.mrb[116].mxu0 %v7588_v0 }
 0xce3   : > { %7701 = vmatmul.mubr.bf16.vlgmr.msra.gmra.mrb[116].mxu1 %v7588_v0 }
 0xdb4   : > { %v7661_v29 = vpop.f32.mrb[116].mxu0 }
 0xdb5   : > { %v7662_v31 = vadd.f32 %v7661_v29, %v7625_v11  ;;  %v7663_v33 = vpop.f32.mrb[117].mxu0 }
 0xdb6   : > { %v7702_v26 = vpop.f32.mrb[116].mxu1  ;;  %v7664_v43 = vadd.f32 %v7663_v33, %v7625_v11  ;;  %v7665_v9 = vpop.f32.mrb[118].mxu0 }
 0xdb7   : > { %v7703_v54 = vadd.f32 %v7702_v26, %v7625_v11  ;;  %v7704_v25 = vpop.f32.mrb[117].mxu1  ;;  %v7721_v6 = vsel %vm2002_vm3, %v7662_v31, %v7713_v15  ;;  %v7666_v38 = vpop.f32.mrb[119].mxu0 }
 0xdb8   : > { %v7705_v17 = vadd.f32 %v7704_v25, %v7625_v11  ;;  %v7706_v49 = vpop.f32.mrb[118].mxu1  ;;  %v7722_v10 = vsel %vm2002_vm3, %v7664_v43, %v7714_v30 }
 0xdb9   : > { %v7723_v14 = vsel %vm2002_vm3, %v7703_v54, %v7715_v60  ;;  %v7707_v58 = vpop.f32.mrb[119].mxu1  ;;  %v7729_v28 = vcombine.low %v7721_v6, %v7722_v10 }
 0xdba   : > { %v7724_v21 = vsel %vm2002_vm3, %v7705_v17, %v7716_v3 }
 0xdbb   : > { %v7730_v5 = vcombine.low %v7723_v14, %v7724_v21  ;;  %7733 = vst [vmem:[%s532_s21] sm:$0xff] %v7729_v28 }
 0xdbd   : > { %7734 = vst [vmem:[%s532_s21 + $0x8] sm:$0xff] %v7730_v5 }
 0xdbe   : > { %8658 = shalt.err (!%p8655_p10)
}
 0xdbf   : > { %s8659_s29 = scalar_lea.hbm %s11043_s12, 256  ;;  %s8663_s24 = scalar_lea.hbm %s11308_s25, 1024 }
 0xdc0   : > { %p8660_p11 = scmp.ne.s32.totalorder %s11043_s12, %s8659_s29  ;;  %p8664_p0 = scmp.lt.u32.totalorder %s11043_s12, %s11308_s25 }
 0xdc1   : > { %p8665_p1 = scmp.lt.u32.totalorder %s8663_s24, %s8659_s29  ;;  %p8667_p3 = scmp.lt.u32.totalorder %s8659_s29, %s11043_s12 }
 0xdc2   : > { %p8661_p12 = pnand %p8660_p11, %p8879_p8 }
 0xdc3   : > { %p8666_p2 = por %p8665_p1, %p8664_p0 }
 0xdc4   : > { %p8662_p13 = pneg %p8661_p12 }
 0xdc5   : > { %p8668_p4 = por %p8667_p3, %p8666_p2 }
 0xdc7   : > { %p8669_p5 = pnand %p8668_p4, %p8662_p13 }
 0xdc9   : > { %8672 = shalt.err (!%p8669_p5)
}
 0xdca   : > { %8461 = dma.vmem_to_hbm [thread:$0]  (%p8879_p8), %s11045_s0, 256, %s11043_s12, %s7736_s14  }
 0xdcb PF: > { %s11309_s1 = sld [smem:[#allocation6_spill]]  ;;  %p8467_p6 = scmp.ge.s32.totalorder %s8739_s20, 2 }
 0xdcd   : > { %p8464_p7 = pnand %p8467_p6, %p8883_p9 }
 0xdd1   : > { %s7764_s23 = sand.u32 1, %s11309_s1  }
 0xdd2   : > { %s7765_s17 = scalar_lea.sflag [#allocation4], %s7764_s23 }
 0xdd3   : > { %8706 = dma.done.wait (!%p8464_p7), %s7765_s17, 256  }
 0xdd4   : > { %8708 = vsyncadd (!%p8464_p7), %s7765_s17, 4294967040  ;;  %s27_s20 = sadd.s32 1, %s8739_s20   ;;  %s11311_s27 = sld [smem:[#allocation8_spill]] }
 0xdd5   : > { %p24_p10 = scmp.ge.s32.totalorder %s27_s20, 6   ;;  %s11312_s0 = sld [smem:[#allocation9_spill]] }
 0xdd6   : > { %s11313_s29 = smov %s8715_s30  ;;  %s11314_s30 = smov %s8719_s15 }
 0xdd7   : > { %s11315_s15 = smov %s8891_s16  ;;  %s11316_s16 = smov %s8731_s18 }
 0xdd8   : > { %s11317_s17 = smov %s8735_s19  ;;  %26 = sbr.rel (!%p24_p10) target bundleno = 10 (0xa), region = 161 }
 0xdda   : > { %s11318_s18 = smov %s11311_s27 }
 0xddb   : > { %s11319_s19 = smov %s11312_s0 }
 0xddf   :  { %7770 = vsyncpa [#allocation4], 1 }
 0xde0   :  { %7772 = vsyncpa [#allocation4 + $0x1], 1 }

</bundles_post_ra>
